<compile_context>
chip_gen: v6e
topology: v6e:2x2x1
jax: 0.10.0
libtpu: 0.0.40
codegen_flags: <defaults>
</compile_context>

<pallas_src>
import functools

import jax
import jax.numpy as jnp
from jax import lax
from jax.experimental import pallas as pl
from jax.experimental.pallas import tpu as pltpu

CIN = 64     # inplanes (fixed at 64 by out_layer = Conv2d(64, 3, 1))
CMID = 16    # planes
COUT = 3
EPS = 1e-5
# Fits v7x's 64 MiB physical VMEM with double-buffer headroom; well under
# v5e/v6e's 128 MiB.
VMEM_LIMIT = 48 * 1024 * 1024

_TAPS = tuple((sy, sx) for sy in (-1, 0, 1) for sx in (-1, 0, 1))


def _window(sy, sx, H, W):
    """Output rows/cols that tap (sy, sx) contributes to under zero padding."""
    r0, r1 = max(0, -sy), H - max(0, sy)
    c0, c1 = max(0, -sx), W - max(0, sx)
    return r0, r1, c0, c1


def _partial_stats(flat):
    """Single-pass per-image [sum; sum-of-squares] over pixels -> (2, C)."""
    return jnp.concatenate([jnp.sum(flat, axis=0, keepdims=True),
                            jnp.sum(flat * flat, axis=0, keepdims=True)], axis=0)


def _conv1_kernel(x_ref, w1_ref, h1_ref, st_ref, y_ref, *, H, W):
    """conv1 (3x3, 64->16) for one image + partial BN1 stats.

    x_ref : (H*W, 64)   bf16  flattened input pixels
    w1_ref: (64, 144)   bf16  tap-k weights live in columns [16k, 16k+16)
    h1_ref: (H, W, 16)  f32   raw conv1 output (pre-BN1)
    st_ref: (2, 16)     f32   per-image [sum, sumsq] of h1
    y_ref : (H, W, 144) f32   scratch: per-tap partial products
    """
    # One wide MXU matmul instead of 9 narrow (HW,64)x(64,16) matmuls.
    y = jnp.dot(x_ref[...], w1_ref[...], preferred_element_type=jnp.float32)
    y_ref[...] = y.reshape(H, W, 9 * CMID)

    # Zero init + bounded windows == zero 'SAME' padding (no roll, no masks).
    h1_ref[...] = jnp.zeros((H, W, CMID), jnp.float32)
    for k, (sy, sx) in enumerate(_TAPS):
        r0, r1, c0, c1 = _window(sy, sx, H, W)
        h1_ref[r0:r1, c0:c1, :] += y_ref[r0 + sy:r1 + sy, c0 + sx:c1 + sx,
                                         k * CMID:(k + 1) * CMID]

    st_ref[...] = _partial_stats(h1_ref[...].reshape(H * W, CMID))


def _conv2_kernel(h1_ref, sc_ref, sh_ref, w2_ref, h2_ref, st_ref, im_ref, *, H, W):
    """BN1(+ReLU) then conv2 (3x3, 16->64) for one image + partial BN2 stats.

    h1_ref       : (H, W, 16)  f32   raw conv1 output
    sc_ref/sh_ref: (1, 16)     f32   folded BN1 scale/shift (global batch stats)
    w2_ref       : (144, 64)   bf16  im2col weights, rows [16k,16k+16) = tap k
    h2_ref       : (H*W, 64)   f32   raw conv2 output (pre-BN2)
    st_ref       : (2, 64)     f32   per-image [sum, sumsq] of h2
    im_ref       : (H, W, 144) f32   scratch: im2col buffer (zero ring = padding)
    """
    # BN/ReLU math kept in f32; folded scale/shift = 2 VPU ops, one reduction.
    a1 = jnp.maximum(h1_ref[...] * sc_ref[...] + sh_ref[...], 0.0)

    im_ref[...] = jnp.zeros((H, W, 9 * CMID), jnp.float32)
    for k, (sy, sx) in enumerate(_TAPS):
        r0, r1, c0, c1 = _window(sy, sx, H, W)
        im_ref[r0:r1, c0:c1, k * CMID:(k + 1) * CMID] = \
            a1[r0 + sy:r1 + sy, c0 + sx:c1 + sx, :]

    im = im_ref[...].reshape(H * W, 9 * CMID).astype(jnp.bfloat16)
    h2 = jnp.dot(im, w2_ref[...], preferred_element_type=jnp.float32)   # (HW, 64)
    h2_ref[...] = h2
    st_ref[...] = _partial_stats(h2)


def _out_kernel(h2_ref, x_ref, sc_ref, sh_ref, w3_ref, b3_ref, o_ref):
    """BN2 + residual + ReLU + 1x1 conv (64->3) + tanh for one image.

    The output's last dim is 3 -> masked stores, but output bytes are ~1.5% of
    this call's input bytes, so the masked-store path is far off the critical
    path (loads + the earlier conv passes dominate).
    """
    x = x_ref[...].astype(jnp.float32)                    # residual (bf16 -> f32)
    h = jnp.maximum(h2_ref[...] * sc_ref[...] + sh_ref[...] + x, 0.0)
    y = jnp.dot(h.astype(jnp.bfloat16), w3_ref[...],
                preferred_element_type=jnp.float32) + b3_ref[...]
    o_ref[...] = jnp.tanh(y)


def _folded_bn(partial_stats, gamma, beta, count):
    """Finalise folded BN scale/shift from per-image [sum, sumsq] partials."""
    s = jnp.sum(partial_stats[:, 0, :], axis=0)
    ss = jnp.sum(partial_stats[:, 1, :], axis=0)
    mean = s / count
    var = ss / count - mean * mean            # biased variance (training-mode BN)
    scale = gamma * lax.rsqrt(var + EPS)
    shift = beta - mean * scale
    return scale[None, :], shift[None, :]


@jax.jit
def feature2texture(x_nchw, params):
    N, C, H, W = x_nchw.shape
    assert C == CIN, "out_layer fixes the feature channels at 64"
    assert W % 8 == 0, "TODO(synk): pad W to a multiple of 8 for general widths"
    HW = H * W

    # NCHW -> channels-last, pixel-flattened; bf16 halves the dominant HBM read.
    x_flat = (jnp.transpose(x_nchw, (0, 2, 3, 1))
              .reshape(N, HW, CIN).astype(jnp.bfloat16))

    # Conv taps repacked once (by XLA) for the batched-matmul formulations.
    w1_all = (params["w1"].transpose(2, 0, 1, 3)
              .reshape(CIN, 9 * CMID).astype(jnp.bfloat16))            # (64, 144)
    w2_all = params["w2"].reshape(9 * CMID, CIN).astype(jnp.bfloat16)  # (144, 64)
    w3 = params["w3"].astype(jnp.bfloat16)                             # (64, 3)
    b3 = params["b3"][None, :].astype(jnp.float32)                     # (1, 3)

    cparams = pltpu.CompilerParams(dimension_semantics=("parallel",),
                                   vmem_limit_bytes=VMEM_LIMIT)

    def batch(shape):      # one block per image along the batch grid axis
        return pl.BlockSpec((None,) + tuple(shape),
                            lambda n: (n,) + (0,) * len(shape))

    def full(shape):       # whole (small) array, same block every step
        return pl.BlockSpec(tuple(shape), lambda n: (0,) * len(shape))

    # ---- pass 1: conv1 + per-image BN1 partial stats ----------------------
    cost1 = pl.CostEstimate(
        flops=2 * N * HW * CIN * 9 * CMID,
        transcendentals=0,
        bytes_accessed=(N * HW * CIN * 2 + CIN * 9 * CMID * 2
                        + N * HW * CMID * 4 + N * 2 * CMID * 4))
    h1, st1 = pl.pallas_call(
        functools.partial(_conv1_kernel, H=H, W=W),
        grid=(N,),
        in_specs=[batch((HW, CIN)), full((CIN, 9 * CMID))],
        out_specs=[batch((H, W, CMID)), batch((2, CMID))],
        out_shape=[jax.ShapeDtypeStruct((N, H, W, CMID), jnp.float32),
                   jax.ShapeDtypeStruct((N, 2, CMID), jnp.float32)],
        scratch_shapes=[pltpu.VMEM((H, W, 9 * CMID), jnp.float32)],
        compiler_params=cparams,
        cost_estimate=cost1,
    )(x_flat, w1_all)

    scale1, shift1 = _folded_bn(st1, params["g1"], params["b1"], N * HW)

    # ---- pass 2: BN1 + ReLU + conv2 + per-image BN2 partial stats ---------
    cost2 = pl.CostEstimate(
        flops=2 * N * HW * 9 * CMID * CIN,
        transcendentals=0,
        bytes_accessed=(N * HW * CMID * 4 + 9 * CMID * CIN * 2
                        + N * HW * CIN * 4 + N * 2 * CIN * 4))
    h2, st2 = pl.pallas_call(
        functools.partial(_conv2_kernel, H=H, W=W),
        grid=(N,),
        in_specs=[batch((H, W, CMID)), full((1, CMID)), full((1, CMID)),
                  full((9 * CMID, CIN))],
        out_specs=[batch((HW, CIN)), batch((2, CIN))],
        out_shape=[jax.ShapeDtypeStruct((N, HW, CIN), jnp.float32),
                   jax.ShapeDtypeStruct((N, 2, CIN), jnp.float32)],
        scratch_shapes=[pltpu.VMEM((H, W, 9 * CMID), jnp.float32)],
        compiler_params=cparams,
        cost_estimate=cost2,
    )(h1, scale1, shift1, w2_all)

    scale2, shift2 = _folded_bn(st2, params["g2"], params["b2"], N * HW)

    # ---- pass 3: BN2 + residual + ReLU + 1x1 conv + tanh -------------------
    cost3 = pl.CostEstimate(
        flops=2 * N * HW * CIN * COUT + 6 * N * HW * CIN,
        transcendentals=N * HW * COUT,
        bytes_accessed=(N * HW * CIN * 4 + N * HW * CIN * 2
                        + N * HW * COUT * 4))
    tex = pl.pallas_call(
        _out_kernel,
        grid=(N,),
        in_specs=[batch((HW, CIN)), batch((HW, CIN)),
                  full((1, CIN)), full((1, CIN)),
                  full((CIN, COUT)), full((1, COUT))],
        out_specs=batch((HW, COUT)),
        out_shape=jax.ShapeDtypeStruct((N, HW, COUT), jnp.float32),
        compiler_params=cparams,
        cost_estimate=cost3,
    )(h2, x_flat, scale2, shift2, w3, b3)

    # Back to PyTorch's NCHW.
    return jnp.transpose(tex.reshape(N, H, W, COUT), (0, 3, 1, 2))


# ----------------------- pure-JAX reference (for checking) -----------------------
def reference(x_nchw, params, eps=EPS):
    x = jnp.transpose(x_nchw, (0, 2, 3, 1))

    def conv(a, w):
        return lax.conv_general_dilated(
            a, w, (1, 1), "SAME", dimension_numbers=("NHWC", "HWIO", "NHWC"))

    def bn(h, g, b):
        mean = jnp.mean(h, axis=(0, 1, 2), keepdims=True)
        var = jnp.mean(jnp.square(h - mean), axis=(0, 1, 2), keepdims=True)
        return (h - mean) * lax.rsqrt(var + eps) * g + b

    h1 = jax.nn.relu(bn(conv(x, params["w1"]), params["g1"], params["b1"]))
    h2 = bn(conv(h1, params["w2"]), params["g2"], params["b2"])
    h2 = jax.nn.relu(h2 + x)
    y = jnp.tanh(jnp.einsum("nhwc,cd->nhwd", h2, params["w3"]) + params["b3"])
    return jnp.transpose(y, (0, 3, 1, 2))


def make_params(key, inplanes=CIN, planes=CMID):
    ks = jax.random.split(key, 8)
    return {
        # Conv weights stored HWIO (3, 3, Cin, Cout); bias=False in the Bottleneck.
        "w1": 0.1 * jax.random.normal(ks[0], (3, 3, inplanes, planes), jnp.float32),
        "w2": 0.1 * jax.random.normal(ks[1], (3, 3, planes, inplanes), jnp.float32),
        "g1": 1.0 + 0.1 * jax.random.normal(ks[2], (planes,), jnp.float32),
        "b1": 0.1 * jax.random.normal(ks[3], (planes,), jnp.float32),
        "g2": 1.0 + 0.1 * jax.random.normal(ks[4], (inplanes,), jnp.float32),
        "b2": 0.1 * jax.random.normal(ks[5], (inplanes,), jnp.float32),
        # out_layer: 1x1 conv 64 -> 3, with bias.
        "w3": 0.1 * jax.random.normal(ks[6], (inplanes, COUT), jnp.float32),
        "b3": 0.1 * jax.random.normal(ks[7], (COUT,), jnp.float32),
    }


if __name__ == "__main__":
    key = jax.random.PRNGKey(0)
    k_x, k_p = jax.random.split(key)

    N, C, H, W = 2, CIN, 16, 16                 # out_layer fixes C = 64
    x = jax.random.normal(k_x, (N, C, H, W), jnp.float32)   # PyTorch-style NCHW
    params = make_params(k_p)

    tex = jax.block_until_ready(feature2texture(x, params))
    ref = reference(x, params)

    assert tex.shape == (N, COUT, H, W), tex.shape
    err = float(jnp.max(jnp.abs(tex - ref)))
    # bf16 matmul inputs with f32 accumulation (per the perf guidance) -> the
    # comparison against the pure-f32 reference needs a bf16-level tolerance.
    assert err < 3e-2, f"max abs err {err}"

    print("KERNEL_OK")
</pallas_src>

<mosaic_0001>
module attributes {stable_mosaic.version = 11 : i64} {
  func.func @_conv1_kernel(%arg0: i32, %arg1: memref<1x256x64xbf16, #tpu.memory_space<vmem>>, %arg2: memref<64x144xbf16, #tpu.memory_space<vmem>>, %arg3: memref<1x16x16x16xf32, #tpu.memory_space<vmem>>, %arg4: memref<1x2x16xf32, #tpu.memory_space<vmem>>, %arg5: memref<16x16x144xf32, #tpu.memory_space<vmem>>) attributes {dimension_semantics = [#tpu.dimension_semantics<parallel>], iteration_bounds = array<i64: 2>, scalar_prefetch = 0 : i64, scratch_operands = 1 : i64, tpu.core_type = #tpu.core_type<tc>, window_params = [{transform_indices = @transform_0, window_bounds = array<i64: 1, 256, 64>}, {pipeline_mode = #tpu.pipeline_mode<synchronous>, transform_indices = @transform_1, window_bounds = array<i64: 64, 144>}, {transform_indices = @transform_2, window_bounds = array<i64: 1, 16, 16, 16>}, {transform_indices = @transform_3, window_bounds = array<i64: 1, 2, 16>}]} {
    %c0 = arith.constant 0 : index
    %c0_0 = arith.constant 0 : index
    %c0_1 = arith.constant 0 : index
    %0 = vector.load %arg1[%c0, %c0_0, %c0_1] : memref<1x256x64xbf16, #tpu.memory_space<vmem>>, vector<1x256x64xbf16>
    %1 = vector.shape_cast %0 : vector<1x256x64xbf16> to vector<256x64xbf16>
    %c0_2 = arith.constant 0 : index
    %c0_3 = arith.constant 0 : index
    %2 = vector.load %arg2[%c0_2, %c0_3] : memref<64x144xbf16, #tpu.memory_space<vmem>>, vector<64x144xbf16>
    %cst = arith.constant dense<0.000000e+00> : vector<256x144xf32>
    %3 = tpu.matmul %1, %2, %cst {dimension_numbers = #tpu.dot_dimension_numbers<[1], [0], [0], [1], [0, 0, 1, 1], [], []>} : vector<256x64xbf16>, vector<64x144xbf16>, vector<256x144xf32> -> vector<256x144xf32>
    %4 = vector.shape_cast %3 : vector<256x144xf32> to vector<16x16x144xf32>
    %c0_4 = arith.constant 0 : index
    %c0_5 = arith.constant 0 : index
    %c0_6 = arith.constant 0 : index
    %5 = vector.load %arg5[%c0_4, %c0_5, %c0_6] : memref<16x16x144xf32, #tpu.memory_space<vmem>>, vector<16x16x144xf32>
    tpu.vector_store %arg5[%c0_4, %c0_5, %c0_6], %4 {strides = array<i32>} : memref<16x16x144xf32, #tpu.memory_space<vmem>>, vector<16x16x144xf32>,
    %cst_7 = arith.constant 0.000000e+00 : f32
    %6 = vector.broadcast %cst_7 : f32 to vector<16x16x16xf32>
    %c0_8 = arith.constant 0 : index
    %c0_9 = arith.constant 0 : index
    %c0_10 = arith.constant 0 : index
    %c0_11 = arith.constant 0 : index
    %7 = vector.load %arg3[%c0_8, %c0_9, %c0_10, %c0_11] : memref<1x16x16x16xf32, #tpu.memory_space<vmem>>, vector<1x16x16x16xf32>
    %8 = vector.shape_cast %7 : vector<1x16x16x16xf32> to vector<16x16x16xf32>
    %9 = vector.shape_cast %6 : vector<16x16x16xf32> to vector<1x16x16x16xf32>
    tpu.vector_store %arg3[%c0_8, %c0_9, %c0_10, %c0_11], %9 {strides = array<i32>} : memref<1x16x16x16xf32, #tpu.memory_space<vmem>>, vector<1x16x16x16xf32>,
    %c0_12 = arith.constant 0 : index
    %c1 = arith.constant 1 : index
    %c1_13 = arith.constant 1 : index
    %c0_14 = arith.constant 0 : index
    %10 = vector.load %arg3[%c0_12, %c1, %c1_13, %c0_14] : memref<1x16x16x16xf32, #tpu.memory_space<vmem>>, vector<1x15x15x16xf32>
    %11 = vector.shape_cast %10 : vector<1x15x15x16xf32> to vector<15x15x16xf32>
    %c0_15 = arith.constant 0 : index
    %c0_16 = arith.constant 0 : index
    %c0_17 = arith.constant 0 : index
    %12 = vector.load %arg5[%c0_15, %c0_16, %c0_17] : memref<16x16x144xf32, #tpu.memory_space<vmem>>, vector<15x15x16xf32>
    %13 = arith.addf %11, %12 : vector<15x15x16xf32>
    %c0_18 = arith.constant 0 : index
    %c1_19 = arith.constant 1 : index
    %c1_20 = arith.constant 1 : index
    %c0_21 = arith.constant 0 : index
    %14 = vector.load %arg3[%c0_18, %c1_19, %c1_20, %c0_21] : memref<1x16x16x16xf32, #tpu.memory_space<vmem>>, vector<1x15x15x16xf32>
    %15 = vector.shape_cast %14 : vector<1x15x15x16xf32> to vector<15x15x16xf32>
    %16 = vector.shape_cast %13 : vector<15x15x16xf32> to vector<1x15x15x16xf32>
    tpu.vector_store %arg3[%c0_18, %c1_19, %c1_20, %c0_21], %16 {strides = array<i32>} : memref<1x16x16x16xf32, #tpu.memory_space<vmem>>, vector<1x15x15x16xf32>,
    %c0_22 = arith.constant 0 : index
    %c1_23 = arith.constant 1 : index
    %c0_24 = arith.constant 0 : index
    %c0_25 = arith.constant 0 : index
    %17 = vector.load %arg3[%c0_22, %c1_23, %c0_24, %c0_25] : memref<1x16x16x16xf32, #tpu.memory_space<vmem>>, vector<1x15x16x16xf32>
    %18 = vector.shape_cast %17 : vector<1x15x16x16xf32> to vector<15x16x16xf32>
    %c0_26 = arith.constant 0 : index
    %c0_27 = arith.constant 0 : index
    %c16 = arith.constant 16 : index
    %19 = vector.load %arg5[%c0_26, %c0_27, %c16] : memref<16x16x144xf32, #tpu.memory_space<vmem>>, vector<15x16x16xf32>
    %20 = arith.addf %18, %19 : vector<15x16x16xf32>
    %c0_28 = arith.constant 0 : index
    %c1_29 = arith.constant 1 : index
    %c0_30 = arith.constant 0 : index
    %c0_31 = arith.constant 0 : index
    %21 = vector.load %arg3[%c0_28, %c1_29, %c0_30, %c0_31] : memref<1x16x16x16xf32, #tpu.memory_space<vmem>>, vector<1x15x16x16xf32>
    %22 = vector.shape_cast %21 : vector<1x15x16x16xf32> to vector<15x16x16xf32>
    %23 = vector.shape_cast %20 : vector<15x16x16xf32> to vector<1x15x16x16xf32>
    tpu.vector_store %arg3[%c0_28, %c1_29, %c0_30, %c0_31], %23 {strides = array<i32>} : memref<1x16x16x16xf32, #tpu.memory_space<vmem>>, vector<1x15x16x16xf32>,
    %c0_32 = arith.constant 0 : index
    %c1_33 = arith.constant 1 : index
    %c0_34 = arith.constant 0 : index
    %c0_35 = arith.constant 0 : index
    %24 = vector.load %arg3[%c0_32, %c1_33, %c0_34, %c0_35] : memref<1x16x16x16xf32, #tpu.memory_space<vmem>>, vector<1x15x15x16xf32>
    %25 = vector.shape_cast %24 : vector<1x15x15x16xf32> to vector<15x15x16xf32>
    %c0_36 = arith.constant 0 : index
    %c1_37 = arith.constant 1 : index
    %c32 = arith.constant 32 : index
    %26 = vector.load %arg5[%c0_36, %c1_37, %c32] : memref<16x16x144xf32, #tpu.memory_space<vmem>>, vector<15x15x16xf32>
    %27 = arith.addf %25, %26 : vector<15x15x16xf32>
    %c0_38 = arith.constant 0 : index
    %c1_39 = arith.constant 1 : index
    %c0_40 = arith.constant 0 : index
    %c0_41 = arith.constant 0 : index
    %28 = vector.load %arg3[%c0_38, %c1_39, %c0_40, %c0_41] : memref<1x16x16x16xf32, #tpu.memory_space<vmem>>, vector<1x15x15x16xf32>
    %29 = vector.shape_cast %28 : vector<1x15x15x16xf32> to vector<15x15x16xf32>
    %30 = vector.shape_cast %27 : vector<15x15x16xf32> to vector<1x15x15x16xf32>
    tpu.vector_store %arg3[%c0_38, %c1_39, %c0_40, %c0_41], %30 {strides = array<i32>} : memref<1x16x16x16xf32, #tpu.memory_space<vmem>>, vector<1x15x15x16xf32>,
    %c0_42 = arith.constant 0 : index
    %c0_43 = arith.constant 0 : index
    %c1_44 = arith.constant 1 : index
    %c0_45 = arith.constant 0 : index
    %31 = vector.load %arg3[%c0_42, %c0_43, %c1_44, %c0_45] : memref<1x16x16x16xf32, #tpu.memory_space<vmem>>, vector<1x16x15x16xf32>
    %32 = vector.shape_cast %31 : vector<1x16x15x16xf32> to vector<16x15x16xf32>
    %c0_46 = arith.constant 0 : index
    %c0_47 = arith.constant 0 : index
    %c48 = arith.constant 48 : index
    %33 = vector.load %arg5[%c0_46, %c0_47, %c48] : memref<16x16x144xf32, #tpu.memory_space<vmem>>, vector<16x15x16xf32>
    %34 = arith.addf %32, %33 : vector<16x15x16xf32>
    %c0_48 = arith.constant 0 : index
    %c0_49 = arith.constant 0 : index
    %c1_50 = arith.constant 1 : index
    %c0_51 = arith.constant 0 : index
    %35 = vector.load %arg3[%c0_48, %c0_49, %c1_50, %c0_51] : memref<1x16x16x16xf32, #tpu.memory_space<vmem>>, vector<1x16x15x16xf32>
    %36 = vector.shape_cast %35 : vector<1x16x15x16xf32> to vector<16x15x16xf32>
    %37 = vector.shape_cast %34 : vector<16x15x16xf32> to vector<1x16x15x16xf32>
    tpu.vector_store %arg3[%c0_48, %c0_49, %c1_50, %c0_51], %37 {strides = array<i32>} : memref<1x16x16x16xf32, #tpu.memory_space<vmem>>, vector<1x16x15x16xf32>,
    %c0_52 = arith.constant 0 : index
    %c0_53 = arith.constant 0 : index
    %c0_54 = arith.constant 0 : index
    %c0_55 = arith.constant 0 : index
    %38 = vector.load %arg3[%c0_52, %c0_53, %c0_54, %c0_55] : memref<1x16x16x16xf32, #tpu.memory_space<vmem>>, vector<1x16x16x16xf32>
    %39 = vector.shape_cast %38 : vector<1x16x16x16xf32> to vector<16x16x16xf32>
    %c0_56 = arith.constant 0 : index
    %c0_57 = arith.constant 0 : index
    %c64 = arith.constant 64 : index
    %40 = vector.load %arg5[%c0_56, %c0_57, %c64] : memref<16x16x144xf32, #tpu.memory_space<vmem>>, vector<16x16x16xf32>
    %41 = arith.addf %39, %40 : vector<16x16x16xf32>
    %c0_58 = arith.constant 0 : index
    %c0_59 = arith.constant 0 : index
    %c0_60 = arith.constant 0 : index
    %c0_61 = arith.constant 0 : index
    %42 = vector.load %arg3[%c0_58, %c0_59, %c0_60, %c0_61] : memref<1x16x16x16xf32, #tpu.memory_space<vmem>>, vector<1x16x16x16xf32>
    %43 = vector.shape_cast %42 : vector<1x16x16x16xf32> to vector<16x16x16xf32>
    %44 = vector.shape_cast %41 : vector<16x16x16xf32> to vector<1x16x16x16xf32>
    tpu.vector_store %arg3[%c0_58, %c0_59, %c0_60, %c0_61], %44 {strides = array<i32>} : memref<1x16x16x16xf32, #tpu.memory_space<vmem>>, vector<1x16x16x16xf32>,
    %c0_62 = arith.constant 0 : index
    %c0_63 = arith.constant 0 : index
    %c0_64 = arith.constant 0 : index
    %c0_65 = arith.constant 0 : index
    %45 = vector.load %arg3[%c0_62, %c0_63, %c0_64, %c0_65] : memref<1x16x16x16xf32, #tpu.memory_space<vmem>>, vector<1x16x15x16xf32>
    %46 = vector.shape_cast %45 : vector<1x16x15x16xf32> to vector<16x15x16xf32>
    %c0_66 = arith.constant 0 : index
    %c1_67 = arith.constant 1 : index
    %c80 = arith.constant 80 : index
    %47 = vector.load %arg5[%c0_66, %c1_67, %c80] : memref<16x16x144xf32, #tpu.memory_space<vmem>>, vector<16x15x16xf32>
    %48 = arith.addf %46, %47 : vector<16x15x16xf32>
    %c0_68 = arith.constant 0 : index
    %c0_69 = arith.constant 0 : index
    %c0_70 = arith.constant 0 : index
    %c0_71 = arith.constant 0 : index
    %49 = vector.load %arg3[%c0_68, %c0_69, %c0_70, %c0_71] : memref<1x16x16x16xf32, #tpu.memory_space<vmem>>, vector<1x16x15x16xf32>
    %50 = vector.shape_cast %49 : vector<1x16x15x16xf32> to vector<16x15x16xf32>
    %51 = vector.shape_cast %48 : vector<16x15x16xf32> to vector<1x16x15x16xf32>
    tpu.vector_store %arg3[%c0_68, %c0_69, %c0_70, %c0_71], %51 {strides = array<i32>} : memref<1x16x16x16xf32, #tpu.memory_space<vmem>>, vector<1x16x15x16xf32>,
    %c0_72 = arith.constant 0 : index
    %c0_73 = arith.constant 0 : index
    %c1_74 = arith.constant 1 : index
    %c0_75 = arith.constant 0 : index
    %52 = vector.load %arg3[%c0_72, %c0_73, %c1_74, %c0_75] : memref<1x16x16x16xf32, #tpu.memory_space<vmem>>, vector<1x15x15x16xf32>
    %53 = vector.shape_cast %52 : vector<1x15x15x16xf32> to vector<15x15x16xf32>
    %c1_76 = arith.constant 1 : index
    %c0_77 = arith.constant 0 : index
    %c96 = arith.constant 96 : index
    %54 = vector.load %arg5[%c1_76, %c0_77, %c96] : memref<16x16x144xf32, #tpu.memory_space<vmem>>, vector<15x15x16xf32>
    %55 = arith.addf %53, %54 : vector<15x15x16xf32>
    %c0_78 = arith.constant 0 : index
    %c0_79 = arith.constant 0 : index
    %c1_80 = arith.constant 1 : index
    %c0_81 = arith.constant 0 : index
    %56 = vector.load %arg3[%c0_78, %c0_79, %c1_80, %c0_81] : memref<1x16x16x16xf32, #tpu.memory_space<vmem>>, vector<1x15x15x16xf32>
    %57 = vector.shape_cast %56 : vector<1x15x15x16xf32> to vector<15x15x16xf32>
    %58 = vector.shape_cast %55 : vector<15x15x16xf32> to vector<1x15x15x16xf32>
    tpu.vector_store %arg3[%c0_78, %c0_79, %c1_80, %c0_81], %58 {strides = array<i32>} : memref<1x16x16x16xf32, #tpu.memory_space<vmem>>, vector<1x15x15x16xf32>,
    %c0_82 = arith.constant 0 : index
    %c0_83 = arith.constant 0 : index
    %c0_84 = arith.constant 0 : index
    %c0_85 = arith.constant 0 : index
    %59 = vector.load %arg3[%c0_82, %c0_83, %c0_84, %c0_85] : memref<1x16x16x16xf32, #tpu.memory_space<vmem>>, vector<1x15x16x16xf32>
    %60 = vector.shape_cast %59 : vector<1x15x16x16xf32> to vector<15x16x16xf32>
    %c1_86 = arith.constant 1 : index
    %c0_87 = arith.constant 0 : index
    %c112 = arith.constant 112 : index
    %61 = vector.load %arg5[%c1_86, %c0_87, %c112] : memref<16x16x144xf32, #tpu.memory_space<vmem>>, vector<15x16x16xf32>
    %62 = arith.addf %60, %61 : vector<15x16x16xf32>
    %c0_88 = arith.constant 0 : index
    %c0_89 = arith.constant 0 : index
    %c0_90 = arith.constant 0 : index
    %c0_91 = arith.constant 0 : index
    %63 = vector.load %arg3[%c0_88, %c0_89, %c0_90, %c0_91] : memref<1x16x16x16xf32, #tpu.memory_space<vmem>>, vector<1x15x16x16xf32>
    %64 = vector.shape_cast %63 : vector<1x15x16x16xf32> to vector<15x16x16xf32>
    %65 = vector.shape_cast %62 : vector<15x16x16xf32> to vector<1x15x16x16xf32>
    tpu.vector_store %arg3[%c0_88, %c0_89, %c0_90, %c0_91], %65 {strides = array<i32>} : memref<1x16x16x16xf32, #tpu.memory_space<vmem>>, vector<1x15x16x16xf32>,
    %c0_92 = arith.constant 0 : index
    %c0_93 = arith.constant 0 : index
    %c0_94 = arith.constant 0 : index
    %c0_95 = arith.constant 0 : index
    %66 = vector.load %arg3[%c0_92, %c0_93, %c0_94, %c0_95] : memref<1x16x16x16xf32, #tpu.memory_space<vmem>>, vector<1x15x15x16xf32>
    %67 = vector.shape_cast %66 : vector<1x15x15x16xf32> to vector<15x15x16xf32>
    %c1_96 = arith.constant 1 : index
    %c1_97 = arith.constant 1 : index
    %c128 = arith.constant 128 : index
    %68 = vector.load %arg5[%c1_96, %c1_97, %c128] : memref<16x16x144xf32, #tpu.memory_space<vmem>>, vector<15x15x16xf32>
    %69 = arith.addf %67, %68 : vector<15x15x16xf32>
    %c0_98 = arith.constant 0 : index
    %c0_99 = arith.constant 0 : index
    %c0_100 = arith.constant 0 : index
    %c0_101 = arith.constant 0 : index
    %70 = vector.load %arg3[%c0_98, %c0_99, %c0_100, %c0_101] : memref<1x16x16x16xf32, #tpu.memory_space<vmem>>, vector<1x15x15x16xf32>
    %71 = vector.shape_cast %70 : vector<1x15x15x16xf32> to vector<15x15x16xf32>
    %72 = vector.shape_cast %69 : vector<15x15x16xf32> to vector<1x15x15x16xf32>
    tpu.vector_store %arg3[%c0_98, %c0_99, %c0_100, %c0_101], %72 {strides = array<i32>} : memref<1x16x16x16xf32, #tpu.memory_space<vmem>>, vector<1x15x15x16xf32>,
    %c0_102 = arith.constant 0 : index
    %c0_103 = arith.constant 0 : index
    %c0_104 = arith.constant 0 : index
    %c0_105 = arith.constant 0 : index
    %73 = vector.load %arg3[%c0_102, %c0_103, %c0_104, %c0_105] : memref<1x16x16x16xf32, #tpu.memory_space<vmem>>, vector<1x16x16x16xf32>
    %74 = vector.shape_cast %73 : vector<1x16x16x16xf32> to vector<16x16x16xf32>
    %75 = vector.shape_cast %74 : vector<16x16x16xf32> to vector<256x16xf32>
    %cst_106 = arith.constant dense<0.000000e+00> : vector<16xf32>
    %76 = vector.multi_reduction <add>, %75, %cst_106 [0] : vector<256x16xf32> to vector<16xf32>
    %77 = vector.shape_cast %76 : vector<16xf32> to vector<1x16xf32>
    %78 = arith.mulf %75, %75 : vector<256x16xf32>
    %cst_107 = arith.constant dense<0.000000e+00> : vector<16xf32>
    %79 = vector.multi_reduction <add>, %78, %cst_107 [0] : vector<256x16xf32> to vector<16xf32>
    %80 = vector.shape_cast %79 : vector<16xf32> to vector<1x16xf32>
    %81 = tpu.concatenate %77, %80 in 0 : vector<1x16xf32>, vector<1x16xf32> -> vector<2x16xf32>
    %c0_108 = arith.constant 0 : index
    %c0_109 = arith.constant 0 : index
    %c0_110 = arith.constant 0 : index
    %82 = vector.load %arg4[%c0_108, %c0_109, %c0_110] : memref<1x2x16xf32, #tpu.memory_space<vmem>>, vector<1x2x16xf32>
    %83 = vector.shape_cast %82 : vector<1x2x16xf32> to vector<2x16xf32>
    %84 = vector.shape_cast %81 : vector<2x16xf32> to vector<1x2x16xf32>
    tpu.vector_store %arg4[%c0_108, %c0_109, %c0_110], %84 {strides = array<i32>} : memref<1x2x16xf32, #tpu.memory_space<vmem>>, vector<1x2x16xf32>,
    return
  }
  func.func @transform_0(%arg0: i32) -> (i32, i32, i32) {
    %c0_i32 = arith.constant 0 : i32
    %c0_i32_0 = arith.constant 0 : i32
    %c0_i32_1 = arith.constant 0 : i32
    return %arg0, %c0_i32, %c0_i32_0 : i32, i32, i32
  }
  func.func @transform_1(%arg0: i32) -> (i32, i32) {
    %c0_i32 = arith.constant 0 : i32
    %c0_i32_0 = arith.constant 0 : i32
    %c0_i32_1 = arith.constant 0 : i32
    return %c0_i32, %c0_i32_0 : i32, i32
  }
  func.func @transform_2(%arg0: i32) -> (i32, i32, i32, i32) {
    %c0_i32 = arith.constant 0 : i32
    %c0_i32_0 = arith.constant 0 : i32
    %c0_i32_1 = arith.constant 0 : i32
    %c0_i32_2 = arith.constant 0 : i32
    return %arg0, %c0_i32, %c0_i32_0, %c0_i32_1 : i32, i32, i32, i32
  }
  func.func @transform_3(%arg0: i32) -> (i32, i32, i32) {
    %c0_i32 = arith.constant 0 : i32
    %c0_i32_0 = arith.constant 0 : i32
    %c0_i32_1 = arith.constant 0 : i32
    return %arg0, %c0_i32, %c0_i32_0 : i32, i32, i32
  }
}

module attributes {stable_mosaic.version = 11 : i64} {
  func.func @_conv2_kernel(%arg0: i32, %arg1: memref<1x16x16x16xf32, #tpu.memory_space<vmem>>, %arg2: memref<1x16xf32, #tpu.memory_space<vmem>>, %arg3: memref<1x16xf32, #tpu.memory_space<vmem>>, %arg4: memref<144x64xbf16, #tpu.memory_space<vmem>>, %arg5: memref<1x256x64xf32, #tpu.memory_space<vmem>>, %arg6: memref<1x2x64xf32, #tpu.memory_space<vmem>>, %arg7: memref<16x16x144xf32, #tpu.memory_space<vmem>>) attributes {dimension_semantics = [#tpu.dimension_semantics<parallel>], iteration_bounds = array<i64: 2>, scalar_prefetch = 0 : i64, scratch_operands = 1 : i64, tpu.core_type = #tpu.core_type<tc>, window_params = [{transform_indices = @transform_0, window_bounds = array<i64: 1, 16, 16, 16>}, {pipeline_mode = #tpu.pipeline_mode<synchronous>, transform_indices = @transform_1, window_bounds = array<i64: 1, 16>}, {pipeline_mode = #tpu.pipeline_mode<synchronous>, transform_indices = @transform_2, window_bounds = array<i64: 1, 16>}, {pipeline_mode = #tpu.pipeline_mode<synchronous>, transform_indices = @transform_3, window_bounds = array<i64: 144, 64>}, {transform_indices = @transform_4, window_bounds = array<i64: 1, 256, 64>}, {transform_indices = @transform_5, window_bounds = array<i64: 1, 2, 64>}]} {
    %c0 = arith.constant 0 : index
    %c0_0 = arith.constant 0 : index
    %c0_1 = arith.constant 0 : index
    %c0_2 = arith.constant 0 : index
    %0 = vector.load %arg1[%c0, %c0_0, %c0_1, %c0_2] : memref<1x16x16x16xf32, #tpu.memory_space<vmem>>, vector<1x16x16x16xf32>
    %1 = vector.shape_cast %0 : vector<1x16x16x16xf32> to vector<16x16x16xf32>
    %c0_3 = arith.constant 0 : index
    %c0_4 = arith.constant 0 : index
    %2 = vector.load %arg2[%c0_3, %c0_4] : memref<1x16xf32, #tpu.memory_space<vmem>>, vector<1x16xf32>
    %3 = vector.shape_cast %2 : vector<1x16xf32> to vector<1x1x16xf32>
    %4 = vector.broadcast %3 : vector<1x1x16xf32> to vector<16x16x16xf32>
    %5 = arith.mulf %1, %4 : vector<16x16x16xf32>
    %c0_5 = arith.constant 0 : index
    %c0_6 = arith.constant 0 : index
    %6 = vector.load %arg3[%c0_5, %c0_6] : memref<1x16xf32, #tpu.memory_space<vmem>>, vector<1x16xf32>
    %7 = vector.shape_cast %6 : vector<1x16xf32> to vector<1x1x16xf32>
    %8 = vector.broadcast %7 : vector<1x1x16xf32> to vector<16x16x16xf32>
    %9 = arith.addf %5, %8 : vector<16x16x16xf32>
    %cst = arith.constant 0.000000e+00 : f32
    %10 = vector.broadcast %cst : f32 to vector<16x16x16xf32>
    %11 = arith.maximumf %9, %10 : vector<16x16x16xf32>
    %cst_7 = arith.constant 0.000000e+00 : f32
    %12 = vector.broadcast %cst_7 : f32 to vector<16x16x144xf32>
    %c0_8 = arith.constant 0 : index
    %c0_9 = arith.constant 0 : index
    %c0_10 = arith.constant 0 : index
    %13 = vector.load %arg7[%c0_8, %c0_9, %c0_10] : memref<16x16x144xf32, #tpu.memory_space<vmem>>, vector<16x16x144xf32>
    tpu.vector_store %arg7[%c0_8, %c0_9, %c0_10], %12 {strides = array<i32>} : memref<16x16x144xf32, #tpu.memory_space<vmem>>, vector<16x16x144xf32>,
    %14 = vector.extract_strided_slice %11 {offsets = [0, 0, 0], sizes = [15, 15, 16], strides = [1, 1, 1]} : vector<16x16x16xf32> to vector<15x15x16xf32>
    %c1 = arith.constant 1 : index
    %c1_11 = arith.constant 1 : index
    %c0_12 = arith.constant 0 : index
    %15 = vector.load %arg7[%c1, %c1_11, %c0_12] : memref<16x16x144xf32, #tpu.memory_space<vmem>>, vector<15x15x16xf32>
    tpu.vector_store %arg7[%c1, %c1_11, %c0_12], %14 {strides = array<i32>} : memref<16x16x144xf32, #tpu.memory_space<vmem>>, vector<15x15x16xf32>,
    %16 = vector.extract_strided_slice %11 {offsets = [0, 0, 0], sizes = [15, 16, 16], strides = [1, 1, 1]} : vector<16x16x16xf32> to vector<15x16x16xf32>
    %c1_13 = arith.constant 1 : index
    %c0_14 = arith.constant 0 : index
    %c16 = arith.constant 16 : index
    %17 = vector.load %arg7[%c1_13, %c0_14, %c16] : memref<16x16x144xf32, #tpu.memory_space<vmem>>, vector<15x16x16xf32>
    tpu.vector_store %arg7[%c1_13, %c0_14, %c16], %16 {strides = array<i32>} : memref<16x16x144xf32, #tpu.memory_space<vmem>>, vector<15x16x16xf32>,
    %18 = vector.extract_strided_slice %11 {offsets = [0, 1, 0], sizes = [15, 15, 16], strides = [1, 1, 1]} : vector<16x16x16xf32> to vector<15x15x16xf32>
    %c1_15 = arith.constant 1 : index
    %c0_16 = arith.constant 0 : index
    %c32 = arith.constant 32 : index
    %19 = vector.load %arg7[%c1_15, %c0_16, %c32] : memref<16x16x144xf32, #tpu.memory_space<vmem>>, vector<15x15x16xf32>
    tpu.vector_store %arg7[%c1_15, %c0_16, %c32], %18 {strides = array<i32>} : memref<16x16x144xf32, #tpu.memory_space<vmem>>, vector<15x15x16xf32>,
    %20 = vector.extract_strided_slice %11 {offsets = [0, 0, 0], sizes = [16, 15, 16], strides = [1, 1, 1]} : vector<16x16x16xf32> to vector<16x15x16xf32>
    %c0_17 = arith.constant 0 : index
    %c1_18 = arith.constant 1 : index
    %c48 = arith.constant 48 : index
    %21 = vector.load %arg7[%c0_17, %c1_18, %c48] : memref<16x16x144xf32, #tpu.memory_space<vmem>>, vector<16x15x16xf32>
    tpu.vector_store %arg7[%c0_17, %c1_18, %c48], %20 {strides = array<i32>} : memref<16x16x144xf32, #tpu.memory_space<vmem>>, vector<16x15x16xf32>,
    %c0_19 = arith.constant 0 : index
    %c0_20 = arith.constant 0 : index
    %c64 = arith.constant 64 : index
    %22 = vector.load %arg7[%c0_19, %c0_20, %c64] : memref<16x16x144xf32, #tpu.memory_space<vmem>>, vector<16x16x16xf32>
    tpu.vector_store %arg7[%c0_19, %c0_20, %c64], %11 {strides = array<i32>} : memref<16x16x144xf32, #tpu.memory_space<vmem>>, vector<16x16x16xf32>,
    %23 = vector.extract_strided_slice %11 {offsets = [0, 1, 0], sizes = [16, 15, 16], strides = [1, 1, 1]} : vector<16x16x16xf32> to vector<16x15x16xf32>
    %c0_21 = arith.constant 0 : index
    %c0_22 = arith.constant 0 : index
    %c80 = arith.constant 80 : index
    %24 = vector.load %arg7[%c0_21, %c0_22, %c80] : memref<16x16x144xf32, #tpu.memory_space<vmem>>, vector<16x15x16xf32>
    tpu.vector_store %arg7[%c0_21, %c0_22, %c80], %23 {strides = array<i32>} : memref<16x16x144xf32, #tpu.memory_space<vmem>>, vector<16x15x16xf32>,
    %25 = vector.extract_strided_slice %11 {offsets = [1, 0, 0], sizes = [15, 15, 16], strides = [1, 1, 1]} : vector<16x16x16xf32> to vector<15x15x16xf32>
    %c0_23 = arith.constant 0 : index
    %c1_24 = arith.constant 1 : index
    %c96 = arith.constant 96 : index
    %26 = vector.load %arg7[%c0_23, %c1_24, %c96] : memref<16x16x144xf32, #tpu.memory_space<vmem>>, vector<15x15x16xf32>
    tpu.vector_store %arg7[%c0_23, %c1_24, %c96], %25 {strides = array<i32>} : memref<16x16x144xf32, #tpu.memory_space<vmem>>, vector<15x15x16xf32>,
    %27 = vector.extract_strided_slice %11 {offsets = [1, 0, 0], sizes = [15, 16, 16], strides = [1, 1, 1]} : vector<16x16x16xf32> to vector<15x16x16xf32>
    %c0_25 = arith.constant 0 : index
    %c0_26 = arith.constant 0 : index
    %c112 = arith.constant 112 : index
    %28 = vector.load %arg7[%c0_25, %c0_26, %c112] : memref<16x16x144xf32, #tpu.memory_space<vmem>>, vector<15x16x16xf32>
    tpu.vector_store %arg7[%c0_25, %c0_26, %c112], %27 {strides = array<i32>} : memref<16x16x144xf32, #tpu.memory_space<vmem>>, vector<15x16x16xf32>,
    %29 = vector.extract_strided_slice %11 {offsets = [1, 1, 0], sizes = [15, 15, 16], strides = [1, 1, 1]} : vector<16x16x16xf32> to vector<15x15x16xf32>
    %c0_27 = arith.constant 0 : index
    %c0_28 = arith.constant 0 : index
    %c128 = arith.constant 128 : index
    %30 = vector.load %arg7[%c0_27, %c0_28, %c128] : memref<16x16x144xf32, #tpu.memory_space<vmem>>, vector<15x15x16xf32>
    tpu.vector_store %arg7[%c0_27, %c0_28, %c128], %29 {strides = array<i32>} : memref<16x16x144xf32, #tpu.memory_space<vmem>>, vector<15x15x16xf32>,
    %c0_29 = arith.constant 0 : index
    %c0_30 = arith.constant 0 : index
    %c0_31 = arith.constant 0 : index
    %31 = vector.load %arg7[%c0_29, %c0_30, %c0_31] : memref<16x16x144xf32, #tpu.memory_space<vmem>>, vector<16x16x144xf32>
    %32 = vector.shape_cast %31 : vector<16x16x144xf32> to vector<256x144xf32>
    %33 = arith.truncf %32 : vector<256x144xf32> to vector<256x144xbf16>
    %c0_32 = arith.constant 0 : index
    %c0_33 = arith.constant 0 : index
    %34 = vector.load %arg4[%c0_32, %c0_33] : memref<144x64xbf16, #tpu.memory_space<vmem>>, vector<144x64xbf16>
    %cst_34 = arith.constant dense<0.000000e+00> : vector<256x64xf32>
    %35 = tpu.matmul %33, %34, %cst_34 {dimension_numbers = #tpu.dot_dimension_numbers<[1], [0], [0], [1], [0, 0, 1, 1], [], []>} : vector<256x144xbf16>, vector<144x64xbf16>, vector<256x64xf32> -> vector<256x64xf32>
    %c0_35 = arith.constant 0 : index
    %c0_36 = arith.constant 0 : index
    %c0_37 = arith.constant 0 : index
    %36 = vector.load %arg5[%c0_35, %c0_36, %c0_37] : memref<1x256x64xf32, #tpu.memory_space<vmem>>, vector<1x256x64xf32>
    %37 = vector.shape_cast %36 : vector<1x256x64xf32> to vector<256x64xf32>
    %38 = vector.shape_cast %35 : vector<256x64xf32> to vector<1x256x64xf32>
    tpu.vector_store %arg5[%c0_35, %c0_36, %c0_37], %38 {strides = array<i32>} : memref<1x256x64xf32, #tpu.memory_space<vmem>>, vector<1x256x64xf32>,
    %cst_38 = arith.constant dense<0.000000e+00> : vector<64xf32>
    %39 = vector.multi_reduction <add>, %35, %cst_38 [0] : vector<256x64xf32> to vector<64xf32>
    %40 = vector.shape_cast %39 : vector<64xf32> to vector<1x64xf32>
    %41 = arith.mulf %35, %35 : vector<256x64xf32>
    %cst_39 = arith.constant dense<0.000000e+00> : vector<64xf32>
    %42 = vector.multi_reduction <add>, %41, %cst_39 [0] : vector<256x64xf32> to vector<64xf32>
    %43 = vector.shape_cast %42 : vector<64xf32> to vector<1x64xf32>
    %44 = tpu.concatenate %40, %43 in 0 : vector<1x64xf32>, vector<1x64xf32> -> vector<2x64xf32>
    %c0_40 = arith.constant 0 : index
    %c0_41 = arith.constant 0 : index
    %c0_42 = arith.constant 0 : index
    %45 = vector.load %arg6[%c0_40, %c0_41, %c0_42] : memref<1x2x64xf32, #tpu.memory_space<vmem>>, vector<1x2x64xf32>
    %46 = vector.shape_cast %45 : vector<1x2x64xf32> to vector<2x64xf32>
    %47 = vector.shape_cast %44 : vector<2x64xf32> to vector<1x2x64xf32>
    tpu.vector_store %arg6[%c0_40, %c0_41, %c0_42], %47 {strides = array<i32>} : memref<1x2x64xf32, #tpu.memory_space<vmem>>, vector<1x2x64xf32>,
    return
  }
  func.func @transform_0(%arg0: i32) -> (i32, i32, i32, i32) {
    %c0_i32 = arith.constant 0 : i32
    %c0_i32_0 = arith.constant 0 : i32
    %c0_i32_1 = arith.constant 0 : i32
    %c0_i32_2 = arith.constant 0 : i32
    return %arg0, %c0_i32, %c0_i32_0, %c0_i32_1 : i32, i32, i32, i32
  }
  func.func @transform_1(%arg0: i32) -> (i32, i32) {
    %c0_i32 = arith.constant 0 : i32
    %c0_i32_0 = arith.constant 0 : i32
    %c0_i32_1 = arith.constant 0 : i32
    return %c0_i32, %c0_i32_0 : i32, i32
  }
  func.func @transform_2(%arg0: i32) -> (i32, i32) {
    %c0_i32 = arith.constant 0 : i32
    %c0_i32_0 = arith.constant 0 : i32
    %c0_i32_1 = arith.constant 0 : i32
    return %c0_i32, %c0_i32_0 : i32, i32
  }
  func.func @transform_3(%arg0: i32) -> (i32, i32) {
    %c0_i32 = arith.constant 0 : i32
    %c0_i32_0 = arith.constant 0 : i32
    %c0_i32_1 = arith.constant 0 : i32
    return %c0_i32, %c0_i32_0 : i32, i32
  }
  func.func @transform_4(%arg0: i32) -> (i32, i32, i32) {
    %c0_i32 = arith.constant 0 : i32
    %c0_i32_0 = arith.constant 0 : i32
    %c0_i32_1 = arith.constant 0 : i32
    return %arg0, %c0_i32, %c0_i32_0 : i32, i32, i32
  }
  func.func @transform_5(%arg0: i32) -> (i32, i32, i32) {
    %c0_i32 = arith.constant 0 : i32
    %c0_i32_0 = arith.constant 0 : i32
    %c0_i32_1 = arith.constant 0 : i32
    return %arg0, %c0_i32, %c0_i32_0 : i32, i32, i32
  }
}

module attributes {stable_mosaic.version = 11 : i64} {
  func.func @_out_kernel(%arg0: i32, %arg1: memref<1x256x64xf32, #tpu.memory_space<vmem>>, %arg2: memref<1x256x64xbf16, #tpu.memory_space<vmem>>, %arg3: memref<1x64xf32, #tpu.memory_space<vmem>>, %arg4: memref<1x64xf32, #tpu.memory_space<vmem>>, %arg5: memref<64x3xbf16, #tpu.memory_space<vmem>>, %arg6: memref<1x3xf32, #tpu.memory_space<vmem>>, %arg7: memref<1x256x3xf32, #tpu.memory_space<vmem>>) attributes {dimension_semantics = [#tpu.dimension_semantics<parallel>], iteration_bounds = array<i64: 2>, scalar_prefetch = 0 : i64, scratch_operands = 0 : i64, tpu.core_type = #tpu.core_type<tc>, window_params = [{transform_indices = @transform_0, window_bounds = array<i64: 1, 256, 64>}, {transform_indices = @transform_1, window_bounds = array<i64: 1, 256, 64>}, {pipeline_mode = #tpu.pipeline_mode<synchronous>, transform_indices = @transform_2, window_bounds = array<i64: 1, 64>}, {pipeline_mode = #tpu.pipeline_mode<synchronous>, transform_indices = @transform_3, window_bounds = array<i64: 1, 64>}, {pipeline_mode = #tpu.pipeline_mode<synchronous>, transform_indices = @transform_4, window_bounds = array<i64: 64, 3>}, {pipeline_mode = #tpu.pipeline_mode<synchronous>, transform_indices = @transform_5, window_bounds = array<i64: 1, 3>}, {transform_indices = @transform_6, window_bounds = array<i64: 1, 256, 3>}]} {
    %c0 = arith.constant 0 : index
    %c0_0 = arith.constant 0 : index
    %c0_1 = arith.constant 0 : index
    %0 = vector.load %arg2[%c0, %c0_0, %c0_1] : memref<1x256x64xbf16, #tpu.memory_space<vmem>>, vector<1x256x64xbf16>
    %1 = vector.shape_cast %0 : vector<1x256x64xbf16> to vector<256x64xbf16>
    %2 = arith.extf %1 : vector<256x64xbf16> to vector<256x64xf32>
    %c0_2 = arith.constant 0 : index
    %c0_3 = arith.constant 0 : index
    %c0_4 = arith.constant 0 : index
    %3 = vector.load %arg1[%c0_2, %c0_3, %c0_4] : memref<1x256x64xf32, #tpu.memory_space<vmem>>, vector<1x256x64xf32>
    %4 = vector.shape_cast %3 : vector<1x256x64xf32> to vector<256x64xf32>
    %c0_5 = arith.constant 0 : index
    %c0_6 = arith.constant 0 : index
    %5 = vector.load %arg3[%c0_5, %c0_6] : memref<1x64xf32, #tpu.memory_space<vmem>>, vector<1x64xf32>
    %6 = vector.broadcast %5 : vector<1x64xf32> to vector<256x64xf32>
    %7 = arith.mulf %4, %6 : vector<256x64xf32>
    %c0_7 = arith.constant 0 : index
    %c0_8 = arith.constant 0 : index
    %8 = vector.load %arg4[%c0_7, %c0_8] : memref<1x64xf32, #tpu.memory_space<vmem>>, vector<1x64xf32>
    %9 = vector.broadcast %8 : vector<1x64xf32> to vector<256x64xf32>
    %10 = arith.addf %7, %9 : vector<256x64xf32>
    %11 = arith.addf %10, %2 : vector<256x64xf32>
    %cst = arith.constant 0.000000e+00 : f32
    %12 = vector.broadcast %cst : f32 to vector<256x64xf32>
    %13 = arith.maximumf %11, %12 : vector<256x64xf32>
    %14 = arith.truncf %13 : vector<256x64xf32> to vector<256x64xbf16>
    %c0_9 = arith.constant 0 : index
    %c0_10 = arith.constant 0 : index
    %15 = vector.load %arg5[%c0_9, %c0_10] : memref<64x3xbf16, #tpu.memory_space<vmem>>, vector<64x3xbf16>
    %cst_11 = arith.constant dense<0.000000e+00> : vector<256x3xf32>
    %16 = tpu.matmul %14, %15, %cst_11 {dimension_numbers = #tpu.dot_dimension_numbers<[1], [0], [0], [1], [0, 0, 1, 1], [], []>} : vector<256x64xbf16>, vector<64x3xbf16>, vector<256x3xf32> -> vector<256x3xf32>
    %c0_12 = arith.constant 0 : index
    %c0_13 = arith.constant 0 : index
    %17 = vector.load %arg6[%c0_12, %c0_13] : memref<1x3xf32, #tpu.memory_space<vmem>>, vector<1x3xf32>
    %18 = vector.broadcast %17 : vector<1x3xf32> to vector<256x3xf32>
    %19 = arith.addf %16, %18 : vector<256x3xf32>
    %20 = math.tanh %19 : vector<256x3xf32>
    %c0_14 = arith.constant 0 : index
    %c0_15 = arith.constant 0 : index
    %c0_16 = arith.constant 0 : index
    %21 = vector.load %arg7[%c0_14, %c0_15, %c0_16] : memref<1x256x3xf32, #tpu.memory_space<vmem>>, vector<1x256x3xf32>
    %22 = vector.shape_cast %21 : vector<1x256x3xf32> to vector<256x3xf32>
    %23 = vector.shape_cast %20 : vector<256x3xf32> to vector<1x256x3xf32>
    tpu.vector_store %arg7[%c0_14, %c0_15, %c0_16], %23 {strides = array<i32>} : memref<1x256x3xf32, #tpu.memory_space<vmem>>, vector<1x256x3xf32>,
    return
  }
  func.func @transform_0(%arg0: i32) -> (i32, i32, i32) {
    %c0_i32 = arith.constant 0 : i32
    %c0_i32_0 = arith.constant 0 : i32
    %c0_i32_1 = arith.constant 0 : i32
    return %arg0, %c0_i32, %c0_i32_0 : i32, i32, i32
  }
  func.func @transform_1(%arg0: i32) -> (i32, i32, i32) {
    %c0_i32 = arith.constant 0 : i32
    %c0_i32_0 = arith.constant 0 : i32
    %c0_i32_1 = arith.constant 0 : i32
    return %arg0, %c0_i32, %c0_i32_0 : i32, i32, i32
  }
  func.func @transform_2(%arg0: i32) -> (i32, i32) {
    %c0_i32 = arith.constant 0 : i32
    %c0_i32_0 = arith.constant 0 : i32
    %c0_i32_1 = arith.constant 0 : i32
    return %c0_i32, %c0_i32_0 : i32, i32
  }
  func.func @transform_3(%arg0: i32) -> (i32, i32) {
    %c0_i32 = arith.constant 0 : i32
    %c0_i32_0 = arith.constant 0 : i32
    %c0_i32_1 = arith.constant 0 : i32
    return %c0_i32, %c0_i32_0 : i32, i32
  }
  func.func @transform_4(%arg0: i32) -> (i32, i32) {
    %c0_i32 = arith.constant 0 : i32
    %c0_i32_0 = arith.constant 0 : i32
    %c0_i32_1 = arith.constant 0 : i32
    return %c0_i32, %c0_i32_0 : i32, i32
  }
  func.func @transform_5(%arg0: i32) -> (i32, i32) {
    %c0_i32 = arith.constant 0 : i32
    %c0_i32_0 = arith.constant 0 : i32
    %c0_i32_1 = arith.constant 0 : i32
    return %c0_i32, %c0_i32_0 : i32, i32
  }
  func.func @transform_6(%arg0: i32) -> (i32, i32, i32) {
    %c0_i32 = arith.constant 0 : i32
    %c0_i32_0 = arith.constant 0 : i32
    %c0_i32_1 = arith.constant 0 : i32
    return %arg0, %c0_i32, %c0_i32_0 : i32, i32, i32
  }
}

</mosaic_0001>

<bundles_post_ra>
// kernel: feature2texture.5
= control target key start
LH: loop header
LB: loop body
LE: loop exit
PB: predicated region body
PF: predicated region fallthrough
CT: control target
= control target key end

     0   :  { %s1213_s21 = smov 0   ;;  %s1498_s0 = inlined_call_operand.vmem [shape: f32[2,256,64], index: 0, kind: input, shape index: {}]   ;;  %s1499_s1 = inlined_call_operand.vmem [shape: bf16[2,256,64], index: 1, kind: input, shape index: {}]   ;;  %s1500_s2 = inlined_call_operand.vmem [shape: f32[1,64], index: 2, kind: input, shape index: {}]   ;;  %s1501_s3 = inlined_call_operand.vmem [shape: f32[1,64], index: 3, kind: input, shape index: {}]   ;;  %s1502_s4 = inlined_call_operand.vmem [shape: bf16[64,3], index: 4, kind: input, shape index: {}]   ;;  %s1503_s5 = inlined_call_operand.vmem [shape: f32[1,3], index: 5, kind: input, shape index: {}]   ;;  %s1504_s6 = inlined_call_operand.vmem [shape: f32[2,256,3], index: 6, kind: output, shape index: {}]  }
   0x1 LB: > { %s908_s22 = sadd.s32 4294967295, %s1176_s21   ;;  %p912_p0 = scmp.ge.s32.totalorder %s1176_s21, 1  ;;  %s1176_s21 = sphi %s1213_s21, %s16_s21  }
   0x2   : > { %p222_p1 = scmp.lt.s32.totalorder %s1176_s21, 3 }
   0x4   : > { %p223_p2 = pnand %p912_p0, %p222_p1 }
   0x5   : > { %p257_p3 = scmp.lt.s32.totalorder (!%p223_p2), %s908_s22, 1 }
   0x6   : > { %226 = sbr.rel (%p223_p2) target bundleno = 282 (0x11a), region = 44 }
   0xb   : > { %v1102_v0 = vld [vmem:[%s1502_s4 + $0x18] sm:$0xff]   ;;  %v1103_v1 = vld [vmem:[%s1502_s4 + $0x10] sm:$0xff]   ;;  %s1506_s22 = smov (!%p257_p3, %s908_s22), 1  ;;  %v1104_v2 = vld [vmem:[%s1502_s4 + $0x8] sm:$0xff]   ;;  %vm566_vm0 = vcmask 523264   ;;  %vm808_vm1 = vcmask 23552  }
   0xc   : > { %1046 = vmatprep.subr.bf16.mxu0 %v1102_v0  ;;  %1086 = vmatprep.subr.bf16.mxu1 %v1102_v0  ;;  %s944_s29 = sshll.u32 %s1506_s22, 8  ;;  %s945_s30 = sshll.u32 %s1506_s22, 7  ;;  %v1237_v3 = vld [vmem:[%s1500_s2] ss:$0 sm:$0xff] }
   0xd   : > { %1047 = vmatpush3.bf16.msra.mxu0 %v1102_v0  ;;  %1090 = vmatpush3.bf16.msra.mxu1 %v1102_v0  ;;  %s1244_s11 = scalar_lea.vmem %s1498_s0, %s944_s29  ;;  %s1249_s14 = scalar_lea.vmem %s1499_s1, %s945_s30  ;;  %v1254_v4 = vld [vmem:[%s1501_s3] ss:$0 sm:$0xff] }
   0xe   : > { %1048 = vmatprep.subr.bf16.mxu0 %v1103_v1  ;;  %1087 = vmatprep.subr.bf16.mxu1 %v1103_v1  ;;  %v1105_v5 = vld [vmem:[%s1502_s4] sm:$0xff]   ;;  %v338_v8 = vld [vmem:[%s1244_s11 + $0x8] sm:$0xff]  ;;  %v339_v21 = vld [vmem:[%s1244_s11 + $0x10] sm:$0xff]  ;;  %s1406_s25 = scalar_lea.vmem %s1504_s6, %s944_s29 }
   0xf   : > { %v948_v6 = vld [vmem:[%s1249_s14] sm:$0xff]   ;;  %v377_v12 = vmul.f32 %v1237_v3, %v338_v8  ;;  %v354_v15 = vld [vmem:[%s1244_s11 + $0x88] sm:$0xff]  ;;  %v340_v22 = vld [vmem:[%s1244_s11 + $0x18] sm:$0xff]  ;;  %v378_v30 = vmul.f32 %v1237_v3, %v339_v21 }
  0x10   : > { %v337_v7 = vld [vmem:[%s1244_s11] sm:$0xff]  ;;  %v949_v9 = vunpack.c.l.bf16 %v948_v6  ;;  %v950_v10 = vunpack.c.h.bf16 %v948_v6  ;;  %v393_v19 = vmul.f32 %v1237_v3, %v354_v15  ;;  %v1011_v20 = vld [vmem:[%s1249_s14 + $0x8] sm:$0xff]   ;;  %v379_v31 = vmul.f32 %v1237_v3, %v340_v22  ;;  %v355_v32 = vld [vmem:[%s1244_s11 + $0x90] sm:$0xff] }
  0x11   : > { %1049 = vmatpush3.bf16.msra.mxu0 %v1103_v1  ;;  %1091 = vmatpush3.bf16.msra.mxu1 %v1103_v1  ;;  %v376_v11 = vmul.f32 %v1237_v3, %v337_v7  ;;  %v1018_v13 = vld [vmem:[%s1249_s14 + $0x40] sm:$0xff]   ;;  %v416_v24 = vadd.f32 %v1254_v4, %v377_v12  ;;  %v953_v25 = vunpack.c.l.bf16 %v1011_v20  ;;  %v954_v26 = vunpack.c.h.bf16 %v1011_v20  ;;  %v1019_v27 = vld [vmem:[%s1249_s14 + $0x48] sm:$0xff]   ;;  %v1012_v33 = vld [vmem:[%s1249_s14 + $0x10] sm:$0xff]  }
  0x12   : > { %v353_v14 = vld [vmem:[%s1244_s11 + $0x80] sm:$0xff]  ;;  %1050 = vmatprep.subr.bf16.mxu0 %v1104_v2  ;;  %1088 = vmatprep.subr.bf16.mxu1 %v1104_v2  ;;  %v981_v16 = vunpack.c.l.bf16 %v1018_v13  ;;  %v982_v17 = vunpack.c.h.bf16 %v1018_v13  ;;  %v432_v29 = vadd.f32 %v1254_v4, %v393_v19  ;;  %v985_v36 = vunpack.c.l.bf16 %v1019_v27  ;;  %v356_v38 = vld [vmem:[%s1244_s11 + $0x98] sm:$0xff]  ;;  %v342_v52 = vld [vmem:[%s1244_s11 + $0x28] sm:$0xff] }
  0x13   : > { %v392_v18 = vmul.f32 %v1237_v3, %v353_v14  ;;  %v415_v23 = vadd.f32 %v1254_v4, %v376_v11  ;;  %v448_v35 = vadd.f32 %v950_v10, %v416_v24  ;;  %v986_v37 = vunpack.c.h.bf16 %v1019_v27  ;;  %v341_v47 = vld [vmem:[%s1244_s11 + $0x20] sm:$0xff]  ;;  %v1020_v53 = vld [vmem:[%s1249_s14 + $0x50] sm:$0xff]   ;;  %v358_v63 = vld [vmem:[%s1244_s11 + $0xa8] sm:$0xff] }
  0x14   : > { %v464_v40 = vadd.f32 %v982_v17, %v432_v29  ;;  %v417_v41 = vadd.f32 %v1254_v4, %v378_v30  ;;  %v957_v42 = vunpack.c.l.bf16 %v1012_v33  ;;  %v418_v45 = vadd.f32 %v1254_v4, %v379_v31  ;;  %v357_v58 = vld [vmem:[%s1244_s11 + $0xa0] sm:$0xff]  ;;  %v1013_v6 = vld [vmem:[%s1249_s14 + $0x18] sm:$0xff]   ;;  %v343_v11 = vld [vmem:[%s1244_s11 + $0x30] sm:$0xff] }
  0x15   : > { %v431_v28 = vadd.f32 %v1254_v4, %v392_v18  ;;  %1051 = vmatpush3.bf16.msra.mxu0 %v1104_v2  ;;  %1092 = vmatpush3.bf16.msra.mxu1 %v1104_v2  ;;  %v447_v34 = vadd.f32 %v949_v9, %v415_v23  ;;  %v480_v44 = vmax.f32 %v448_v35, 0.0  ;;  %v394_v46 = vmul.f32 %v1237_v3, %v355_v32  ;;  %v1021_v21 = vld [vmem:[%s1249_s14 + $0x58] sm:$0xff]  }
  0x16   : > { %1052 = vmatprep.subr.bf16.mxu0 %v1105_v5  ;;  %1089 = vmatprep.subr.bf16.mxu1 %v1105_v5  ;;  %v496_v49 = vmax.f32 %v464_v40, 0.0  ;;  %v449_v50 = vadd.f32 %v953_v25, %v417_v41  ;;  %v395_v51 = vmul.f32 %v1237_v3, %v356_v38  ;;  %v450_v55 = vadd.f32 %v954_v26, %v418_v45  ;;  %v359_v26 = vld [vmem:[%s1244_s11 + $0xb0] sm:$0xff]  ;;  %v360_v31 = vld [vmem:[%s1244_s11 + $0xb8] sm:$0xff]  ;;  %v345_v41 = vld [vmem:[%s1244_s11 + $0x40] sm:$0xff] }
  0x17   : > { %v463_v39 = vadd.f32 %v981_v16, %v431_v28  ;;  %v479_v43 = vmax.f32 %v447_v34, 0.0  ;;  %v433_v56 = vadd.f32 %v1254_v4, %v394_v46  ;;  %v958_v57 = vunpack.c.h.bf16 %v1012_v33  ;;  %v344_v16 = vld [vmem:[%s1244_s11 + $0x38] sm:$0xff]  ;;  %v346_v46 = vld [vmem:[%s1244_s11 + $0x48] sm:$0xff] }
  0x18   : > { %v481_v60 = vmax.f32 %v449_v50, 0.0  ;;  %v434_v61 = vadd.f32 %v1254_v4, %v395_v51  ;;  %v380_v62 = vmul.f32 %v1237_v3, %v341_v47  ;;  %v482_v0 = vmax.f32 %v450_v55, 0.0  ;;  %v1022_v47 = vld [vmem:[%s1249_s14 + $0x60] sm:$0xff]  }
  0x19   : > { %v495_v48 = vmax.f32 %v463_v39, 0.0  ;;  %1053 = vmatpush3.bf16.msra.mxu0 %v1105_v5  ;;  %1093 = vmatpush3.bf16.msra.mxu1 %v1105_v5  ;;  %v511_v54 = vpack.c.bf16 %v480_v44, %v479_v43  ;;  %v465_v1 = vadd.f32 %v985_v36, %v433_v56  ;;  %v381_v2 = vmul.f32 %v1237_v3, %v342_v52  ;;  %v1014_v36 = vld [vmem:[%s1249_s14 + $0x20] sm:$0xff]  }
  0x1a   : > { %v989_v5 = vunpack.c.l.bf16 %v1020_v53  ;;  %v466_v7 = vadd.f32 %v986_v37, %v434_v61  ;;  %v419_v8 = vadd.f32 %v1254_v4, %v380_v62  ;;  %v990_v9 = vunpack.c.h.bf16 %v1020_v53  ;;  %v361_v52 = vld [vmem:[%s1244_s11 + $0xc0] sm:$0xff]  ;;  %v1015_v62 = vld [vmem:[%s1249_s14 + $0x28] sm:$0xff]  }
  0x1b   : > { %v519_v59 = vpack.c.bf16 %v496_v49, %v495_v48  ;;  %1054 = vmatprep.mubr.msk.bf16.mxu0 %vm566_vm0, %v511_v54  ;;  %v396_v10 = vmul.f32 %v1237_v3, %v357_v58  ;;  %v512_v12 = vpack.c.bf16 %v482_v0, %v481_v60  ;;  %v497_v13 = vmax.f32 %v465_v1, 0.0 }
  0x1c   : > { %v420_v14 = vadd.f32 %v1254_v4, %v381_v2  ;;  %v397_v15 = vmul.f32 %v1237_v3, %v358_v63  ;;  %v498_v17 = vmax.f32 %v466_v7, 0.0  ;;  %v451_v18 = vadd.f32 %v957_v42, %v419_v8 }
  0x1d   : > { %1070 = vmatprep.mubr.msk.bf16.mxu1 %vm566_vm0, %v519_v59  ;;  %v435_v19 = vadd.f32 %v1254_v4, %v396_v10  ;;  %v961_v20 = vunpack.c.l.bf16 %v1013_v6  ;;  %1055 = vmatmul.mubr.msk.bf16.vlgmr.msra.gmra.mxu0 %vm566_vm0, %v512_v12  ;;  %v962_v24 = vunpack.c.h.bf16 %v1013_v6  ;;  %v382_v25 = vmul.f32 %v1237_v3, %v343_v11  ;;  %v348_v10 = vld [vmem:[%s1244_s11 + $0x58] sm:$0xff] }
  0x1e   : > { %v452_v22 = vadd.f32 %v958_v57, %v420_v14  ;;  %v436_v23 = vadd.f32 %v1254_v4, %v397_v15  ;;  %v520_v27 = vpack.c.bf16 %v498_v17, %v497_v13  ;;  %v483_v28 = vmax.f32 %v451_v18, 0.0  ;;  %v362_v57 = vld [vmem:[%s1244_s11 + $0xc8] sm:$0xff] }
  0x1f   : > { %v467_v29 = vadd.f32 %v989_v5, %v435_v19  ;;  %v383_v30 = vmul.f32 %v1237_v3, %v344_v16  ;;  %v421_v34 = vadd.f32 %v1254_v4, %v382_v25  ;;  %v993_v35 = vunpack.c.l.bf16 %v1021_v21  ;;  %v347_v5 = vld [vmem:[%s1244_s11 + $0x50] sm:$0xff]  ;;  %v1023_v15 = vld [vmem:[%s1249_s14 + $0x68] sm:$0xff]   ;;  %v364_v25 = vld [vmem:[%s1244_s11 + $0xd8] sm:$0xff] }
  0x20   : > { %v484_v32 = vmax.f32 %v452_v22, 0.0  ;;  %v468_v33 = vadd.f32 %v990_v9, %v436_v23  ;;  %1071 = vmatmul.mubr.msk.bf16.vlgmr.msra.gmra.mxu1 %vm566_vm0, %v520_v27  ;;  %v994_v39 = vunpack.c.h.bf16 %v1021_v21  ;;  %v398_v40 = vmul.f32 %v1237_v3, %v359_v26 }
  0x21   : > { %v499_v37 = vmax.f32 %v467_v29, 0.0  ;;  %v422_v38 = vadd.f32 %v1254_v4, %v383_v30  ;;  %v453_v44 = vadd.f32 %v961_v20, %v421_v34  ;;  %v399_v45 = vmul.f32 %v1237_v3, %v360_v31  ;;  %v363_v20 = vld [vmem:[%s1244_s11 + $0xd0] sm:$0xff] }
  0x22   : > { %v513_v42 = vpack.c.bf16 %v484_v32, %v483_v28  ;;  %v500_v43 = vmax.f32 %v468_v33, 0.0  ;;  %v437_v49 = vadd.f32 %v1254_v4, %v398_v40  ;;  %v965_v50 = vunpack.c.l.bf16 %v1014_v36  ;;  %v1016_v30 = vld [vmem:[%s1249_s14 + $0x30] sm:$0xff]   ;;  %v350_v40 = vld [vmem:[%s1244_s11 + $0x68] sm:$0xff] }
  0x23   : > { %v454_v48 = vadd.f32 %v962_v24, %v422_v38  ;;  %v966_v51 = vunpack.c.h.bf16 %v1014_v36  ;;  %v485_v54 = vmax.f32 %v453_v44, 0.0  ;;  %v438_v55 = vadd.f32 %v1254_v4, %v399_v45 }
  0x24   : > { %1058 = vmatprep.mubr.msk.bf16.mxu0 %vm566_vm0, %v513_v42  ;;  %v521_v53 = vpack.c.bf16 %v500_v43, %v499_v37  ;;  %v384_v56 = vmul.f32 %v1237_v3, %v345_v41  ;;  %v469_v59 = vadd.f32 %v993_v35, %v437_v49  ;;  %v385_v60 = vmul.f32 %v1237_v3, %v346_v46  ;;  %v349_v35 = vld [vmem:[%s1244_s11 + $0x60] sm:$0xff]  ;;  %v1024_v41 = vld [vmem:[%s1249_s14 + $0x70] sm:$0xff]  }
  0x25   : > { %v486_v58 = vmax.f32 %v454_v48, 0.0  ;;  %v997_v61 = vunpack.c.l.bf16 %v1022_v47  ;;  %v470_v63 = vadd.f32 %v994_v39, %v438_v55  ;;  %v998_v1 = vunpack.c.h.bf16 %v1022_v47  ;;  %v365_v46 = vld [vmem:[%s1244_s11 + $0xe0] sm:$0xff] }
  0x26   : > { %1074 = vmatprep.mubr.msk.bf16.mxu1 %vm566_vm0, %v521_v53  ;;  %v423_v0 = vadd.f32 %v1254_v4, %v384_v56  ;;  %v400_v2 = vmul.f32 %v1237_v3, %v361_v52  ;;  %v501_v7 = vmax.f32 %v469_v59, 0.0  ;;  %v424_v8 = vadd.f32 %v1254_v4, %v385_v60  ;;  %v1017_v56 = vld [vmem:[%s1249_s14 + $0x38] sm:$0xff]  }
  0x27   : > { %v514_v6 = vpack.c.bf16 %v486_v58, %v485_v54  ;;  %v401_v9 = vmul.f32 %v1237_v3, %v362_v57  ;;  %v502_v11 = vmax.f32 %v470_v63, 0.0  ;;  %v969_v14 = vunpack.c.l.bf16 %v1015_v62 }
  0x28   : > { %v455_v12 = vadd.f32 %v965_v50, %v423_v0  ;;  %v439_v13 = vadd.f32 %v1254_v4, %v400_v2  ;;  %v456_v16 = vadd.f32 %v966_v51, %v424_v8  ;;  %v970_v18 = vunpack.c.h.bf16 %v1015_v62  ;;  %v366_v51 = vld [vmem:[%s1244_s11 + $0xe8] sm:$0xff]  ;;  %v352_v2 = vld [vmem:[%s1244_s11 + $0x78] sm:$0xff] }
  0x29   : > { %1059 = vmatmul.mubr.msk.bf16.gmra.mxu0 %vm566_vm0, %v514_v6  ;;  %v440_v17 = vadd.f32 %v1254_v4, %v401_v9  ;;  %v386_v19 = vmul.f32 %v1237_v3, %v347_v5  ;;  %v522_v21 = vpack.c.bf16 %v502_v11, %v501_v7  ;;  %v387_v24 = vmul.f32 %v1237_v3, %v348_v10  ;;  %v1025_v9 = vld [vmem:[%s1249_s14 + $0x78] sm:$0xff]  }
  0x2a   : > { %v487_v22 = vmax.f32 %v455_v12, 0.0  ;;  %v471_v23 = vadd.f32 %v997_v61, %v439_v13  ;;  %v488_v26 = vmax.f32 %v456_v16, 0.0  ;;  %v1001_v29 = vunpack.c.l.bf16 %v1023_v15  ;;  %v351_v61 = vld [vmem:[%s1244_s11 + $0x70] sm:$0xff] }
  0x2b   : > { %v472_v27 = vadd.f32 %v998_v1, %v440_v17  ;;  %v425_v28 = vadd.f32 %v1254_v4, %v386_v19  ;;  %1075 = vmatmul.mubr.msk.bf16.gmra.mxu1 %vm566_vm0, %v522_v21  ;;  %v426_v32 = vadd.f32 %v1254_v4, %v387_v24  ;;  %v1002_v33 = vunpack.c.h.bf16 %v1023_v15  ;;  %v368_v19 = vld [vmem:[%s1244_s11 + $0xf8] sm:$0xff] }
  0x2c   : > { %v503_v31 = vmax.f32 %v471_v23, 0.0  ;;  %v402_v34 = vmul.f32 %v1237_v3, %v363_v20  ;;  %v515_v36 = vpack.c.bf16 %v488_v26, %v487_v22  ;;  %v403_v39 = vmul.f32 %v1237_v3, %v364_v25 }
  0x2d   : > { %v504_v37 = vmax.f32 %v472_v27, 0.0  ;;  %v457_v38 = vadd.f32 %v969_v14, %v425_v28  ;;  %v458_v42 = vadd.f32 %v970_v18, %v426_v32  ;;  %v973_v44 = vunpack.c.l.bf16 %v1016_v30  ;;  %v367_v14 = vld [vmem:[%s1244_s11 + $0xf0] sm:$0xff] }
  0x2e   : > { %v441_v43 = vadd.f32 %v1254_v4, %v402_v34  ;;  %v974_v45 = vunpack.c.h.bf16 %v1016_v30  ;;  %1062 = vmatprep.mubr.msk.bf16.mxu0 %vm566_vm0, %v515_v36  ;;  %v442_v49 = vadd.f32 %v1254_v4, %v403_v39  ;;  %v388_v50 = vmul.f32 %v1237_v3, %v349_v35 }
  0x2f   : > { %v523_v47 = vpack.c.bf16 %v504_v37, %v503_v31  ;;  %v489_v48 = vmax.f32 %v457_v38, 0.0  ;;  %v490_v52 = vmax.f32 %v458_v42, 0.0  ;;  %v389_v54 = vmul.f32 %v1237_v3, %v350_v40 }
  0x30   : > { %v473_v53 = vadd.f32 %v1001_v29, %v441_v43  ;;  %v1005_v55 = vunpack.c.l.bf16 %v1024_v41  ;;  %v474_v57 = vadd.f32 %v1002_v33, %v442_v49  ;;  %v427_v58 = vadd.f32 %v1254_v4, %v388_v50  ;;  %v1390_v43 = vld [vmem:[%s1503_s5] ss:$0 sm:$0xff] }
  0x31   : > { %1078 = vmatprep.mubr.msk.bf16.mxu1 %vm566_vm0, %v523_v47  ;;  %v1006_v59 = vunpack.c.h.bf16 %v1024_v41  ;;  %v404_v60 = vmul.f32 %v1237_v3, %v365_v46  ;;  %v516_v62 = vpack.c.bf16 %v490_v52, %v489_v48  ;;  %v428_v0 = vadd.f32 %v1254_v4, %v389_v54 }
  0x32   : > { %v505_v63 = vmax.f32 %v473_v53, 0.0  ;;  %v405_v1 = vmul.f32 %v1237_v3, %v366_v51  ;;  %v506_v5 = vmax.f32 %v474_v57, 0.0  ;;  %v459_v6 = vadd.f32 %v973_v44, %v427_v58 }
  0x33   : > { %v443_v7 = vadd.f32 %v1254_v4, %v404_v60  ;;  %v977_v8 = vunpack.c.l.bf16 %v1017_v56  ;;  %1063 = vmatmul.mubr.msk.bf16.gmra.mxu0 %vm566_vm0, %v516_v62  ;;  %v460_v10 = vadd.f32 %v974_v45, %v428_v0  ;;  %v978_v12 = vunpack.c.h.bf16 %v1017_v56 }
  0x34   : > { %v444_v11 = vadd.f32 %v1254_v4, %v405_v1  ;;  %v390_v13 = vmul.f32 %v1237_v3, %v351_v61  ;;  %v524_v15 = vpack.c.bf16 %v506_v5, %v505_v63  ;;  %v491_v16 = vmax.f32 %v459_v6, 0.0 }
  0x35   : > { %v475_v17 = vadd.f32 %v1005_v55, %v443_v7  ;;  %v391_v18 = vmul.f32 %v1237_v3, %v352_v2  ;;  %v492_v20 = vmax.f32 %v460_v10, 0.0  ;;  %v1009_v23 = vunpack.c.l.bf16 %v1025_v9 }
  0x36   : > { %v476_v21 = vadd.f32 %v1006_v59, %v444_v11  ;;  %v429_v22 = vadd.f32 %v1254_v4, %v390_v13  ;;  %1079 = vmatmul.mubr.msk.bf16.gmra.mxu1 %vm566_vm0, %v524_v15  ;;  %v1010_v26 = vunpack.c.h.bf16 %v1025_v9  ;;  %v406_v27 = vmul.f32 %v1237_v3, %v367_v14 }
  0x37   : > { %v507_v24 = vmax.f32 %v475_v17, 0.0  ;;  %v430_v25 = vadd.f32 %v1254_v4, %v391_v18  ;;  %v517_v28 = vpack.c.bf16 %v492_v20, %v491_v16  ;;  %v407_v31 = vmul.f32 %v1237_v3, %v368_v19 }
  0x38   : > { %v508_v29 = vmax.f32 %v476_v21, 0.0  ;;  %v461_v30 = vadd.f32 %v977_v8, %v429_v22  ;;  %v445_v33 = vadd.f32 %v1254_v4, %v406_v27 }
  0x39   : > { %v462_v32 = vadd.f32 %v978_v12, %v430_v25  ;;  %1066 = vmatprep.mubr.msk.bf16.mxu0 %vm566_vm0, %v517_v28  ;;  %v446_v36 = vadd.f32 %v1254_v4, %v407_v31 }
  0x3a   : > { %v525_v34 = vpack.c.bf16 %v508_v29, %v507_v24  ;;  %v493_v35 = vmax.f32 %v461_v30, 0.0  ;;  %v477_v38 = vadd.f32 %v1009_v23, %v445_v33 }
  0x3b   : > { %v494_v37 = vmax.f32 %v462_v32, 0.0  ;;  %v478_v39 = vadd.f32 %v1010_v26, %v446_v36 }
  0x3c   : > { %1082 = vmatprep.mubr.msk.bf16.mxu1 %vm566_vm0, %v525_v34  ;;  %v509_v41 = vmax.f32 %v477_v38, 0.0 }
  0x3d   : > { %v518_v40 = vpack.c.bf16 %v494_v37, %v493_v35  ;;  %v510_v42 = vmax.f32 %v478_v39, 0.0 }
  0x3f   : > { %1067 = vmatmul.mubr.msk.bf16.gmra.mxu0 %vm566_vm0, %v518_v40  ;;  %v526_v3 = vpack.c.bf16 %v510_v42, %v509_v41 }
  0x41   : > { %1083 = vmatmul.mubr.msk.bf16.gmra.mxu1 %vm566_vm0, %v526_v3 }
  0xdd   : > { %v1056_v44 = vpop.f32.mrf.mxu0 }
  0xde   : > { %v658_v4 = vadd.f32 %v1056_v44, %v1390_v43 }
  0xdf   : > { %v649_v45 = vpop.f32.mrf.mxu0 }
  0xe0   : > { %1106 = vtanh.f32 %v658_v4  ;;  %v1072_v46 = vpop.f32.mrf.mxu1  ;;  %v650_v47 = vadd.f32 %v1390_v43, %v649_v45 }
  0xe1   : > { %v722_v48 = vadd.f32 %v1072_v46, %v1390_v43  ;;  %v1057_v49 = vpop.f32.mrf.mxu0 }
  0xe2   : > { %1108 = vtanh.f32 %v650_v47  ;;  %v713_v50 = vpop.f32.mrf.mxu1  ;;  %v661_v51 = vadd.f32 %v1057_v49, %v1390_v43 }
  0xe3   : > { %1110 = vtanh.f32 %v722_v48  ;;  %v714_v52 = vadd.f32 %v1390_v43, %v713_v50  ;;  %v652_v53 = vpop.f32.mrf.mxu0 }
  0xe4   : > { %1112 = vtanh.f32 %v661_v51  ;;  %v1073_v54 = vpop.f32.mrf.mxu1  ;;  %v653_v55 = vadd.f32 %v1390_v43, %v652_v53 }
  0xe5   : > { %1114 = vtanh.f32 %v714_v52  ;;  %v725_v56 = vadd.f32 %v1073_v54, %v1390_v43 }
  0xe6   : > { %1116 = vtanh.f32 %v653_v55  ;;  %v716_v57 = vpop.f32.mrf.mxu1 }
  0xe7   : > { %1118 = vtanh.f32 %v725_v56  ;;  %v717_v58 = vadd.f32 %v1390_v43, %v716_v57 }
  0xe9   : > { %v1060_v59 = vpop.f32.mrf.mxu0  ;;  %1120 = vtanh.f32 %v717_v58 }
  0xea   : > { %v674_v60 = vadd.f32 %v1060_v59, %v1390_v43 }
  0xeb   : > { %v665_v61 = vpop.f32.mrf.mxu0  ;;  %v1076_v62 = vpop.f32.mrf.mxu1 }
  0xec   : > { %1122 = vtanh.f32 %v674_v60  ;;  %v666_v63 = vadd.f32 %v1390_v43, %v665_v61  ;;  %v738_v0 = vadd.f32 %v1076_v62, %v1390_v43 }
  0xed   : > { %v1061_v1 = vpop.f32.mrf.mxu0  ;;  %v1107_v2 = vpop.eup %1106 }
  0xee   : > { %1124 = vtanh.f32 %v666_v63  ;;  %v729_v5 = vpop.f32.mrf.mxu1  ;;  %v677_v6 = vadd.f32 %v1061_v1, %v1390_v43  ;;  %811 = vst.msk [vmem:[%s1406_s25 + $0x10] sm:$0xff] %vm808_vm1, %v1107_v2 }
  0xef   : > { %1126 = vtanh.f32 %v738_v0  ;;  %v730_v7 = vadd.f32 %v1390_v43, %v729_v5  ;;  %v668_v8 = vpop.f32.mrf.mxu0  ;;  %v1109_v9 = vpop.eup %1108 }
  0xf0   : > { %1128 = vtanh.f32 %v677_v6  ;;  %v1077_v10 = vpop.f32.mrf.mxu1  ;;  %v669_v11 = vadd.f32 %v1390_v43, %v668_v8  ;;  %v1111_v12 = vpop.eup %1110  ;;  %809 = vst.msk [vmem:[%s1406_s25] sm:$0xff] %vm808_vm1, %v1109_v9 }
  0xf1   : > { %1130 = vtanh.f32 %v730_v7  ;;  %v741_v13 = vadd.f32 %v1077_v10, %v1390_v43  ;;  %v1113_v14 = vpop.eup %1112  ;;  %827 = vst.msk [vmem:[%s1406_s25 + $0x90] sm:$0xff] %vm808_vm1, %v1111_v12 }
  0xf2   : > { %1132 = vtanh.f32 %v669_v11  ;;  %v732_v15 = vpop.f32.mrf.mxu1  ;;  %v1115_v16 = vpop.eup %1114  ;;  %812 = vst.msk [vmem:[%s1406_s25 + $0x18] sm:$0xff] %vm808_vm1, %v1113_v14 }
  0xf3   : > { %1134 = vtanh.f32 %v741_v13  ;;  %v733_v17 = vadd.f32 %v1390_v43, %v732_v15  ;;  %v1117_v18 = vpop.eup %1116  ;;  %825 = vst.msk [vmem:[%s1406_s25 + $0x80] sm:$0xff] %vm808_vm1, %v1115_v16  ;;  %v1064_v19 = vpop.f32.mrf.mxu0 }
  0xf4   : > { %v1119_v20 = vpop.eup %1118  ;;  %810 = vst.msk [vmem:[%s1406_s25 + $0x8] sm:$0xff] %vm808_vm1, %v1117_v18  ;;  %v690_v21 = vadd.f32 %v1064_v19, %v1390_v43 }
  0xf5   : > { %1136 = vtanh.f32 %v733_v17  ;;  %828 = vst.msk [vmem:[%s1406_s25 + $0x98] sm:$0xff] %vm808_vm1, %v1119_v20  ;;  %v681_v22 = vpop.f32.mrf.mxu0 }
  0xf6   : > { %v1121_v23 = vpop.eup %1120  ;;  %1138 = vtanh.f32 %v690_v21  ;;  %v1080_v24 = vpop.f32.mrf.mxu1  ;;  %v682_v25 = vadd.f32 %v1390_v43, %v681_v22 }
  0xf7   : > { %826 = vst.msk [vmem:[%s1406_s25 + $0x88] sm:$0xff] %vm808_vm1, %v1121_v23  ;;  %v754_v26 = vadd.f32 %v1080_v24, %v1390_v43  ;;  %v1065_v27 = vpop.f32.mrf.mxu0 }
  0xf8   : > { %1140 = vtanh.f32 %v682_v25  ;;  %v745_v29 = vpop.f32.mrf.mxu1  ;;  %v693_v30 = vadd.f32 %v1065_v27, %v1390_v43 }
  0xf9   : > { %v1123_v28 = vpop.eup %1122  ;;  %1142 = vtanh.f32 %v754_v26  ;;  %v746_v31 = vadd.f32 %v1390_v43, %v745_v29  ;;  %v684_v32 = vpop.f32.mrf.mxu0 }
  0xfa   : > { %815 = vst.msk [vmem:[%s1406_s25 + $0x30] sm:$0xff] %vm808_vm1, %v1123_v28  ;;  %1144 = vtanh.f32 %v693_v30  ;;  %v1081_v34 = vpop.f32.mrf.mxu1  ;;  %v685_v35 = vadd.f32 %v1390_v43, %v684_v32 }
  0xfb   : > { %v1125_v33 = vpop.eup %1124  ;;  %1146 = vtanh.f32 %v746_v31  ;;  %v757_v37 = vadd.f32 %v1081_v34, %v1390_v43 }
  0xfc   : > { %v1127_v36 = vpop.eup %1126  ;;  %813 = vst.msk [vmem:[%s1406_s25 + $0x20] sm:$0xff] %vm808_vm1, %v1125_v33  ;;  %1148 = vtanh.f32 %v685_v35  ;;  %v748_v39 = vpop.f32.mrf.mxu1 }
  0xfd   : > { %v1129_v38 = vpop.eup %1128  ;;  %831 = vst.msk [vmem:[%s1406_s25 + $0xb0] sm:$0xff] %vm808_vm1, %v1127_v36  ;;  %1150 = vtanh.f32 %v757_v37  ;;  %v749_v41 = vadd.f32 %v1390_v43, %v748_v39 }
  0xfe   : > { %v1131_v40 = vpop.eup %1130  ;;  %816 = vst.msk [vmem:[%s1406_s25 + $0x38] sm:$0xff] %vm808_vm1, %v1129_v38 }
  0xff   : > { %v1133_v42 = vpop.eup %1132  ;;  %829 = vst.msk [vmem:[%s1406_s25 + $0xa0] sm:$0xff] %vm808_vm1, %v1131_v40  ;;  %v1068_v3 = vpop.f32.mrf.mxu0  ;;  %1152 = vtanh.f32 %v749_v41 }
 0x100   : > { %v1135_v44 = vpop.eup %1134  ;;  %814 = vst.msk [vmem:[%s1406_s25 + $0x28] sm:$0xff] %vm808_vm1, %v1133_v42  ;;  %v706_v4 = vadd.f32 %v1068_v3, %v1390_v43 }
 0x101   : > { %832 = vst.msk [vmem:[%s1406_s25 + $0xb8] sm:$0xff] %vm808_vm1, %v1135_v44  ;;  %v697_v45 = vpop.f32.mrf.mxu0  ;;  %v1084_v47 = vpop.f32.mrf.mxu1 }
 0x102   : > { %v1137_v46 = vpop.eup %1136  ;;  %1154 = vtanh.f32 %v706_v4  ;;  %v698_v48 = vadd.f32 %v1390_v43, %v697_v45  ;;  %v770_v49 = vadd.f32 %v1084_v47, %v1390_v43 }
 0x103   : > { %830 = vst.msk [vmem:[%s1406_s25 + $0xa8] sm:$0xff] %vm808_vm1, %v1137_v46  ;;  %v1069_v50 = vpop.f32.mrf.mxu0  ;;  %v1139_v51 = vpop.eup %1138 }
 0x104   : > { %1156 = vtanh.f32 %v698_v48  ;;  %v761_v52 = vpop.f32.mrf.mxu1  ;;  %v709_v53 = vadd.f32 %v1069_v50, %v1390_v43  ;;  %819 = vst.msk [vmem:[%s1406_s25 + $0x50] sm:$0xff] %vm808_vm1, %v1139_v51 }
 0x105   : > { %1158 = vtanh.f32 %v770_v49  ;;  %v762_v54 = vadd.f32 %v1390_v43, %v761_v52  ;;  %v700_v55 = vpop.f32.mrf.mxu0  ;;  %v1141_v56 = vpop.eup %1140 }
 0x106   : > { %1160 = vtanh.f32 %v709_v53  ;;  %v1085_v57 = vpop.f32.mrf.mxu1  ;;  %v701_v58 = vadd.f32 %v1390_v43, %v700_v55  ;;  %v1143_v59 = vpop.eup %1142  ;;  %817 = vst.msk [vmem:[%s1406_s25 + $0x40] sm:$0xff] %vm808_vm1, %v1141_v56 }
 0x107   : > { %1162 = vtanh.f32 %v762_v54  ;;  %v773_v60 = vadd.f32 %v1085_v57, %v1390_v43  ;;  %v1145_v61 = vpop.eup %1144  ;;  %835 = vst.msk [vmem:[%s1406_s25 + $0xd0] sm:$0xff] %vm808_vm1, %v1143_v59 }
 0x108   : > { %1164 = vtanh.f32 %v701_v58  ;;  %v764_v62 = vpop.f32.mrf.mxu1  ;;  %v1147_v63 = vpop.eup %1146  ;;  %820 = vst.msk [vmem:[%s1406_s25 + $0x58] sm:$0xff] %vm808_vm1, %v1145_v61 }
 0x109   : > { %1166 = vtanh.f32 %v773_v60  ;;  %v765_v0 = vadd.f32 %v1390_v43, %v764_v62  ;;  %v1149_v1 = vpop.eup %1148  ;;  %833 = vst.msk [vmem:[%s1406_s25 + $0xc0] sm:$0xff] %vm808_vm1, %v1147_v63 }
 0x10a   : > { %v1151_v2 = vpop.eup %1150  ;;  %818 = vst.msk [vmem:[%s1406_s25 + $0x48] sm:$0xff] %vm808_vm1, %v1149_v1 }
 0x10b   : > { %1168 = vtanh.f32 %v765_v0  ;;  %836 = vst.msk [vmem:[%s1406_s25 + $0xd8] sm:$0xff] %vm808_vm1, %v1151_v2 }
 0x10c   : > { %v1153_v5 = vpop.eup %1152 }
 0x10d   : > { %834 = vst.msk [vmem:[%s1406_s25 + $0xc8] sm:$0xff] %vm808_vm1, %v1153_v5 }
 0x10f   : > { %v1155_v6 = vpop.eup %1154 }
 0x110   : > { %823 = vst.msk [vmem:[%s1406_s25 + $0x70] sm:$0xff] %vm808_vm1, %v1155_v6 }
 0x111   : > { %v1157_v43 = vpop.eup %1156 }
 0x112   : > { %v1159_v7 = vpop.eup %1158  ;;  %821 = vst.msk [vmem:[%s1406_s25 + $0x60] sm:$0xff] %vm808_vm1, %v1157_v43 }
 0x113   : > { %v1161_v8 = vpop.eup %1160  ;;  %839 = vst.msk [vmem:[%s1406_s25 + $0xf0] sm:$0xff] %vm808_vm1, %v1159_v7 }
 0x114   : > { %v1163_v9 = vpop.eup %1162  ;;  %824 = vst.msk [vmem:[%s1406_s25 + $0x78] sm:$0xff] %vm808_vm1, %v1161_v8 }
 0x115   : > { %v1165_v10 = vpop.eup %1164  ;;  %837 = vst.msk [vmem:[%s1406_s25 + $0xe0] sm:$0xff] %vm808_vm1, %v1163_v9 }
 0x116   : > { %v1167_v11 = vpop.eup %1166  ;;  %822 = vst.msk [vmem:[%s1406_s25 + $0x68] sm:$0xff] %vm808_vm1, %v1165_v10 }
 0x117   : > { %840 = vst.msk [vmem:[%s1406_s25 + $0xf8] sm:$0xff] %vm808_vm1, %v1167_v11 }
 0x118   : > { %v1169_v12 = vpop.eup %1168 }
 0x119   : > { %838 = vst.msk [vmem:[%s1406_s25 + $0xe8] sm:$0xff] %vm808_vm1, %v1169_v12 }
 0x11a PF: > { %s16_s21 = sadd.s32 1, %s1176_s21  }
 0x11b   : > { %p13_p4 = scmp.ge.s32.totalorder %s16_s21, 4  }
 0x11d   :  { %15 = sbr.rel (!%p13_p4) target bundleno = 1 (0x1), region = 77 }

// kernel: feature2texture.4
= control target key start
LH: loop header
LB: loop body
LE: loop exit
PB: predicated region body
PF: predicated region fallthrough
CT: control target
= control target key end

     0   :  { %s2375_s18 = smov 0   ;;  %s3909_s0 = inlined_call_operand.vmem [shape: f32[2,16,16,16], index: 0, kind: input, shape index: {}]   ;;  %s3910_s1 = inlined_call_operand.vmem [shape: f32[1,16], index: 1, kind: input, shape index: {}]   ;;  %s3911_s2 = inlined_call_operand.vmem [shape: f32[1,16], index: 2, kind: input, shape index: {}]   ;;  %s3912_s3 = inlined_call_operand.vmem [shape: bf16[144,64], index: 3, kind: input, shape index: {}]   ;;  %s3913_s4 = inlined_call_operand.vmem [shape: f32[2,256,64], index: 4, kind: output, shape index: {0}]   ;;  %s3914_s5 = inlined_call_operand.vmem [shape: f32[2,2,64], index: 5, kind: output, shape index: {1}]  }
   0x1 LB: > { %s2241_s19 = sadd.s32 4294967295, %s2334_s18   ;;  %p2245_p0 = scmp.ge.s32.totalorder %s2334_s18, 1  ;;  %s2334_s18 = sphi %s2375_s18, %s16_s18  }
   0x2   : > { %p190_p1 = scmp.lt.s32.totalorder %s2334_s18, 3 }
   0x4   : > { %p191_p2 = pnand %p2245_p0, %p190_p1 }
   0x6   : > { %194 = sbr.rel (%p191_p2) target bundleno = 794 (0x31a), region = 36 }
   0xb   : > { %p222_p3 = scmp.lt.s32.totalorder %s2241_s19, 1  ;;  %vm380_vm0 = vcmask 130048   ;;  %v2336_v0 = vmov 0.0   ;;  %v2484_v1 = vld [vmem:[%s3910_s1] ss:$0 sm:$0xff]  ;;  %s2337_s28 = smov 16  }
   0xc   : > { %381 = vst.msk [vmem:[#allocation2 + $0x8] sm:$0xff] %vm380_vm0, %v2336_v0  ;;  %383 = vst.msk [vmem:[#allocation2 + $0x18] sm:$0xff] %vm380_vm0, %v2336_v0  ;;  %v2497_v2 = vld [vmem:[%s3911_s2] ss:$0 sm:$0xff]  ;;  %vm551_vm1 = vcmask 130049   ;;  %vm474_vm2 = vcmask 1040384  }
   0xd   : > { %s3963_s19 = smov (!%p222_p3, %s2241_s19), 1  ;;  %379 = vst [vmem:[#allocation2] sm:$0xff] %v2336_v0  ;;  %382 = vst [vmem:[#allocation2 + $0x10] sm:$0xff] %v2336_v0  ;;  %vm1542_vm3 = vcmask 129024   ;;  %vm703_vm4 = vcmask 1046528   ;;  %s2339_s14 = smov 48  }
   0xe   : > { %384 = vst [vmem:[#allocation2 + $0x20] sm:$0xff] %v2336_v0  ;;  %385 = vst.msk [vmem:[#allocation2 + $0x28] sm:$0xff] %vm380_vm0, %v2336_v0  ;;  %s2280_s22 = sshll.u32 %s3963_s19, 8  ;;  %s2340_s17 = smov 64   ;;  %vm672_vm5 = vcmask 261248   ;;  %vm972_vm6 = vcmask 523649  }
   0xf   : > { %386 = vst [vmem:[#allocation2 + $0x30] sm:$0xff] %v2336_v0  ;;  %387 = vst.msk [vmem:[#allocation2 + $0x38] sm:$0xff] %vm380_vm0, %v2336_v0  ;;  %s2492_s25 = scalar_lea.vmem %s3909_s0, %s2280_s22  ;;  %s2341_s23 = smov 80   ;;  %vm1102_vm7 = vcmask 654848   ;;  %vm974_vm8 = vcmask 523648   ;;  %vm1234_vm9 = vcmask 786048  }
  0x10   : > { %388 = vst [vmem:[#allocation2 + $0x40] sm:$0xff] %v2336_v0  ;;  %389 = vst.msk [vmem:[#allocation2 + $0x48] sm:$0xff] %vm380_vm0, %v2336_v0  ;;  %v239_v3 = vld [vmem:[%s2492_s25 + $0x10] sm:$0xff]  ;;  %v237_v4 = vld [vmem:[%s2492_s25] sm:$0xff]  ;;  %s2342_s27 = smov 96   ;;  %s2343_s6 = smov 112  }
  0x11   : > { %390 = vst [vmem:[#allocation2 + $0x50] sm:$0xff] %v2336_v0  ;;  %391 = vst.msk [vmem:[#allocation2 + $0x58] sm:$0xff] %vm380_vm0, %v2336_v0  ;;  %v240_v5 = vld [vmem:[%s2492_s25 + $0x18] sm:$0xff]  ;;  %v278_v6 = vmul.f32 %v2484_v1, %v239_v3  ;;  %v276_v7 = vmul.f32 %v2484_v1, %v237_v4  ;;  %v238_v9 = vld [vmem:[%s2492_s25 + $0x8] sm:$0xff]  ;;  %s2344_s7 = smov 32   ;;  %vm1358_vm10 = vcmask 917249   ;;  %s3632_s13 = scalar_lea.vmem %s3913_s4, %s2280_s22 }
  0x12   : > { %392 = vst [vmem:[#allocation2 + $0x60] sm:$0xff] %v2336_v0  ;;  %393 = vst.msk [vmem:[#allocation2 + $0x68] sm:$0xff] %vm380_vm0, %v2336_v0  ;;  %v279_v8 = vmul.f32 %v2484_v1, %v240_v5  ;;  %v242_v10 = vld [vmem:[%s2492_s25 + $0x28] sm:$0xff]  ;;  %v241_v11 = vld [vmem:[%s2492_s25 + $0x20] sm:$0xff]  ;;  %v277_v12 = vmul.f32 %v2484_v1, %v238_v9  ;;  %vm1236_vm11 = vcmask 785024   ;;  %vm1480_vm12 = vcmask 1048448  }
  0x13   : > { %394 = vst [vmem:[#allocation2 + $0x70] sm:$0xff] %v2336_v0  ;;  %395 = vst.msk [vmem:[#allocation2 + $0x78] sm:$0xff] %vm380_vm0, %v2336_v0  ;;  %v281_v13 = vmul.f32 %v2484_v1, %v242_v10  ;;  %v280_v14 = vmul.f32 %v2484_v1, %v241_v11  ;;  %v244_v15 = vld [vmem:[%s2492_s25 + $0x38] sm:$0xff]  ;;  %v243_v16 = vld [vmem:[%s2492_s25 + $0x30] sm:$0xff]  ;;  %v317_v17 = vadd.f32 %v2497_v2, %v278_v6  ;;  %vm1360_vm13 = vcmask 917248   ;;  %s2250_s22 = sshll.u32 %s3963_s19, 1 }
  0x14   : > { %396 = vst [vmem:[#allocation2 + $0x80] sm:$0xff] %v2336_v0  ;;  %397 = vst.msk [vmem:[#allocation2 + $0x88] sm:$0xff] %vm380_vm0, %v2336_v0  ;;  %v315_v18 = vadd.f32 %v2497_v2, %v276_v7  ;;  %v318_v19 = vadd.f32 %v2497_v2, %v279_v8  ;;  %v283_v20 = vmul.f32 %v2484_v1, %v244_v15  ;;  %v246_v23 = vld [vmem:[%s2492_s25 + $0x48] sm:$0xff]  ;;  %v245_v27 = vld [vmem:[%s2492_s25 + $0x40] sm:$0xff]  ;;  %vm839_vm14 = vcmask 392448   ;;  %s235_s15 = scalar_lea.vmem %s3914_s5, %s2250_s22 }
  0x15   : > { %398 = vst [vmem:[#allocation2 + $0x90] sm:$0xff] %v2336_v0  ;;  %399 = vst.msk [vmem:[#allocation2 + $0x98] sm:$0xff] %vm380_vm0, %v2336_v0  ;;  %v316_v21 = vadd.f32 %v2497_v2, %v277_v12  ;;  %v282_v22 = vmul.f32 %v2484_v1, %v243_v16  ;;  %v2520_v24 = vmax.f32 %v317_v17, 0.0  ;;  %v320_v26 = vadd.f32 %v2497_v2, %v281_v13  ;;  %v248_v28 = vld [vmem:[%s2492_s25 + $0x58] sm:$0xff]  ;;  %v247_v30 = vld [vmem:[%s2492_s25 + $0x50] sm:$0xff] }
  0x16   : > { %400 = vst [vmem:[#allocation2 + $0xa0] sm:$0xff] %v2336_v0  ;;  %401 = vst.msk [vmem:[#allocation2 + $0xa8] sm:$0xff] %vm380_vm0, %v2336_v0  ;;  %v2522_v25 = vmax.f32 %v315_v18, 0.0  ;;  %v319_v29 = vadd.f32 %v2497_v2, %v280_v14  ;;  %v250_v31 = vld [vmem:[%s2492_s25 + $0x68] sm:$0xff]  ;;  %v2534_v32 = vmax.f32 %v318_v19, 0.0  ;;  %v322_v34 = vadd.f32 %v2497_v2, %v283_v20  ;;  %v249_v36 = vld [vmem:[%s2492_s25 + $0x60] sm:$0xff] }
  0x17   : > { %402 = vst [vmem:[#allocation2 + $0xb0] sm:$0xff] %v2336_v0  ;;  %403 = vst.msk [vmem:[#allocation2 + $0xb8] sm:$0xff] %vm380_vm0, %v2336_v0  ;;  %586 = vrot.lane.b32.xlu1 %v2520_v24, %s2337_s28  ;;  %v2536_v33 = vmax.f32 %v316_v21, 0.0  ;;  %v285_v35 = vmul.f32 %v2484_v1, %v246_v23  ;;  %v321_v37 = vadd.f32 %v2497_v2, %v282_v22  ;;  %v252_v40 = vld [vmem:[%s2492_s25 + $0x78] sm:$0xff]  ;;  %v251_v41 = vld [vmem:[%s2492_s25 + $0x70] sm:$0xff]  ;;  %v2547_v43 = vmax.f32 %v320_v26, 0.0 }
  0x18   : > { %404 = vst [vmem:[#allocation2 + $0xc0] sm:$0xff] %v2336_v0  ;;  %405 = vst.msk [vmem:[#allocation2 + $0xc8] sm:$0xff] %vm380_vm0, %v2336_v0  ;;  %582 = vrot.lane.b32.xlu0 %v2522_v25, %s2337_s28  ;;  %v284_v38 = vmul.f32 %v2484_v1, %v245_v27  ;;  %v287_v39 = vmul.f32 %v2484_v1, %v248_v28  ;;  %v254_v42 = vld [vmem:[%s2492_s25 + $0x88] sm:$0xff]  ;;  %v286_v44 = vmul.f32 %v2484_v1, %v247_v30  ;;  %v253_v46 = vld [vmem:[%s2492_s25 + $0x80] sm:$0xff]  ;;  %vm841_vm15 = vcmask 391424  }
  0x19   : > { %406 = vst [vmem:[#allocation2 + $0xd0] sm:$0xff] %v2336_v0  ;;  %407 = vst.msk [vmem:[#allocation2 + $0xd8] sm:$0xff] %vm380_vm0, %v2336_v0  ;;  %v289_v45 = vmul.f32 %v2484_v1, %v250_v31  ;;  %v256_v47 = vld [vmem:[%s2492_s25 + $0x98] sm:$0xff]  ;;  %v255_v48 = vld [vmem:[%s2492_s25 + $0x90] sm:$0xff]  ;;  %v2558_v49 = vmax.f32 %v319_v29, 0.0  ;;  %v2560_v50 = vmax.f32 %v322_v34, 0.0  ;;  %v324_v51 = vadd.f32 %v2497_v2, %v285_v35 }
  0x1a   : > { %408 = vst [vmem:[#allocation2 + $0xe0] sm:$0xff] %v2336_v0  ;;  %409 = vst.msk [vmem:[#allocation2 + $0xe8] sm:$0xff] %vm380_vm0, %v2336_v0  ;;  %v288_v52 = vmul.f32 %v2484_v1, %v249_v36  ;;  %v258_v53 = vld [vmem:[%s2492_s25 + $0xa8] sm:$0xff]  ;;  %v2565_v54 = vmax.f32 %v321_v37, 0.0  ;;  %v323_v55 = vadd.f32 %v2497_v2, %v284_v38  ;;  %v326_v56 = vadd.f32 %v2497_v2, %v287_v39  ;;  %v257_v58 = vld [vmem:[%s2492_s25 + $0xa0] sm:$0xff] }
  0x1b   : > { %410 = vst [vmem:[#allocation2 + $0xf0] sm:$0xff] %v2336_v0  ;;  %411 = vst.msk [vmem:[#allocation2 + $0xf8] sm:$0xff] %vm380_vm0, %v2336_v0  ;;  %588 = vrot.lane.b32.xlu1 %v2534_v32, %s2337_s28  ;;  %v291_v57 = vmul.f32 %v2484_v1, %v252_v40  ;;  %v325_v59 = vadd.f32 %v2497_v2, %v286_v44  ;;  %v328_v60 = vadd.f32 %v2497_v2, %v289_v45  ;;  %v260_v63 = vld [vmem:[%s2492_s25 + $0xb8] sm:$0xff]  ;;  %v259_v6 = vld [vmem:[%s2492_s25 + $0xb0] sm:$0xff] }
  0x1c   : > { %412 = vst [vmem:[#allocation2 + $0x100] sm:$0xff] %v2336_v0  ;;  %413 = vst.msk [vmem:[#allocation2 + $0x108] sm:$0xff] %vm380_vm0, %v2336_v0  ;;  %584 = vrot.lane.b32.xlu0 %v2536_v33, %s2337_s28  ;;  %v290_v61 = vmul.f32 %v2484_v1, %v251_v41  ;;  %v293_v62 = vmul.f32 %v2484_v1, %v254_v42  ;;  %v295_v3 = vmul.f32 %v2484_v1, %v256_v47  ;;  %v262_v19 = vld [vmem:[%s2492_s25 + $0xc8] sm:$0xff]  ;;  %v261_v26 = vld [vmem:[%s2492_s25 + $0xc0] sm:$0xff] }
  0x1d   : > { %414 = vst [vmem:[#allocation2 + $0x110] sm:$0xff] %v2336_v0  ;;  %415 = vst.msk [vmem:[#allocation2 + $0x118] sm:$0xff] %vm380_vm0, %v2336_v0  ;;  %v294_v4 = vmul.f32 %v2484_v1, %v255_v48  ;;  %v297_v5 = vmul.f32 %v2484_v1, %v258_v53  ;;  %v2585_v7 = vmax.f32 %v324_v51, 0.0  ;;  %v327_v8 = vadd.f32 %v2497_v2, %v288_v52  ;;  %v264_v37 = vld [vmem:[%s2492_s25 + $0xd8] sm:$0xff]  ;;  %v263_v41 = vld [vmem:[%s2492_s25 + $0xd0] sm:$0xff] }
  0x1e   : > { %416 = vst [vmem:[#allocation2 + $0x120] sm:$0xff] %v2336_v0  ;;  %417 = vst.msk [vmem:[#allocation2 + $0x128] sm:$0xff] %vm380_vm0, %v2336_v0  ;;  %v296_v9 = vmul.f32 %v2484_v1, %v257_v58  ;;  %v2590_v10 = vrot.slane %v2522_v25, 7  ;;  %v2592_v11 = vmax.f32 %v323_v55, 0.0  ;;  %v2594_v12 = vmax.f32 %v326_v56, 0.0 }
  0x1f   : > { %418 = vst [vmem:[#allocation2 + $0x130] sm:$0xff] %v2336_v0  ;;  %419 = vst.msk [vmem:[#allocation2 + $0x138] sm:$0xff] %vm380_vm0, %v2336_v0  ;;  %592 = vrot.lane.b32.xlu1 %v2547_v43, %s2337_s28  ;;  %v330_v13 = vadd.f32 %v2497_v2, %v291_v57  ;;  %v299_v14 = vmul.f32 %v2484_v1, %v260_v63  ;;  %v2598_v15 = vmax.f32 %v325_v59, 0.0  ;;  %v2615_v27 = vmax.f32 %v328_v60, 0.0 }
  0x20   : > { %420 = vst [vmem:[#allocation2 + $0x140] sm:$0xff] %v2336_v0  ;;  %421 = vst.msk [vmem:[#allocation2 + $0x148] sm:$0xff] %vm380_vm0, %v2336_v0  ;;  %590 = vrot.lane.b32.xlu0 %v2558_v49, %s2337_s28  ;;  %v329_v16 = vadd.f32 %v2497_v2, %v290_v61  ;;  %v332_v17 = vadd.f32 %v2497_v2, %v293_v62  ;;  %v298_v18 = vmul.f32 %v2484_v1, %v259_v6 }
  0x21   : > { %422 = vst [vmem:[#allocation2 + $0x150] sm:$0xff] %v2336_v0  ;;  %423 = vst.msk [vmem:[#allocation2 + $0x158] sm:$0xff] %vm380_vm0, %v2336_v0  ;;  %v334_v21 = vadd.f32 %v2497_v2, %v295_v3  ;;  %v333_v22 = vadd.f32 %v2497_v2, %v294_v4  ;;  %v336_v23 = vadd.f32 %v2497_v2, %v297_v5  ;;  %v476_v30 = vrot.slane %v2536_v33, 7 }
  0x22   : > { %424 = vst [vmem:[#allocation2 + $0x160] sm:$0xff] %v2336_v0  ;;  %425 = vst.msk [vmem:[#allocation2 + $0x168] sm:$0xff] %vm380_vm0, %v2336_v0  ;;  %v335_v28 = vadd.f32 %v2497_v2, %v296_v9  ;;  %v338_v29 = vadd.f32 %v2497_v2, %v299_v14  ;;  %v2620_v31 = vmax.f32 %v327_v8, 0.0  ;;  %v2622_v34 = vmax.f32 %v330_v13, 0.0 }
  0x23   : > { %426 = vst [vmem:[#allocation2 + $0x170] sm:$0xff] %v2336_v0  ;;  %427 = vst.msk [vmem:[#allocation2 + $0x178] sm:$0xff] %vm380_vm0, %v2336_v0  ;;  %596 = vrot.lane.b32.xlu1 %v2560_v50, %s2337_s28  ;;  %v337_v35 = vadd.f32 %v2497_v2, %v298_v18  ;;  %v301_v36 = vmul.f32 %v2484_v1, %v262_v19  ;;  %v2627_v38 = vmax.f32 %v329_v16, 0.0  ;;  %v2629_v39 = vmax.f32 %v332_v17, 0.0 }
  0x24   : > { %428 = vst [vmem:[#allocation2 + $0x180] sm:$0xff] %v2336_v0  ;;  %429 = vst.msk [vmem:[#allocation2 + $0x188] sm:$0xff] %vm380_vm0, %v2336_v0  ;;  %594 = vrot.lane.b32.xlu0 %v2565_v54, %s2337_s28  ;;  %v300_v40 = vmul.f32 %v2484_v1, %v261_v26  ;;  %v2635_v42 = vsel %vm474_vm2, %v2590_v10, %v476_v30  ;;  %v2639_v45 = vmax.f32 %v334_v21, 0.0  ;;  %v2643_v47 = vmax.f32 %v336_v23, 0.0 }
  0x25   : > { %430 = vst [vmem:[#allocation2 + $0x190] sm:$0xff] %v2336_v0  ;;  %431 = vst.msk [vmem:[#allocation2 + $0x198] sm:$0xff] %vm380_vm0, %v2336_v0  ;;  %v2651_v48 = vmax.f32 %v335_v28, 0.0  ;;  %v2653_v51 = vmax.f32 %v338_v29, 0.0  ;;  %v2656_v52 = vmul.f32 %v2484_v1, %v264_v37  ;;  %v2659_v53 = vrot.slane %v2520_v24, 7 }
  0x26   : > { %432 = vst [vmem:[#allocation2 + $0x1a0] sm:$0xff] %v2336_v0  ;;  %433 = vst.msk [vmem:[#allocation2 + $0x1a8] sm:$0xff] %vm380_vm0, %v2336_v0  ;;  %v2661_v55 = vmax.f32 %v337_v35, 0.0  ;;  %v2664_v56 = vadd.f32 %v2497_v2, %v301_v36  ;;  %v2667_v57 = vmul.f32 %v2484_v1, %v263_v41  ;;  %v479_v58 = vrot.slane %v2534_v32, 7 }
  0x27   : > { %434 = vst [vmem:[#allocation2 + $0x1b0] sm:$0xff] %v2336_v0  ;;  %435 = vst.msk [vmem:[#allocation2 + $0x1b8] sm:$0xff] %vm380_vm0, %v2336_v0  ;;  %600 = vrot.lane.b32.xlu1 %v2585_v7, %s2337_s28  ;;  %v2671_v59 = vadd.f32 %v2497_v2, %v300_v40  ;;  %v707_v60 = vrot.slane %v2520_v24, 1  ;;  %v2675_v61 = vrot.slane %v2534_v32, 1  ;;  %v2678_v62 = vrot.slane %v2558_v49, 7 }
  0x28   : > { %436 = vst [vmem:[#allocation2 + $0x1c0] sm:$0xff] %v2336_v0  ;;  %437 = vst.msk [vmem:[#allocation2 + $0x1c8] sm:$0xff] %vm380_vm0, %v2336_v0  ;;  %598 = vrot.lane.b32.xlu0 %v2592_v11, %s2337_s28  ;;  %v2684_v63 = vsel %vm474_vm2, %v2659_v53, %v479_v58  ;;  %v710_v3 = vrot.slane %v2558_v49, 1  ;;  %v2689_v4 = vrot.slane %v2547_v43, 1  ;;  %v2706_v6 = vrot.slane %v2565_v54, 7 }
  0x29   : > { %438 = vst [vmem:[#allocation2 + $0x1d0] sm:$0xff] %v2336_v0  ;;  %439 = vst.msk [vmem:[#allocation2 + $0x1d8] sm:$0xff] %vm380_vm0, %v2336_v0  ;;  %v2697_v5 = vsel %vm703_vm4, %v707_v60, %v2675_v61  ;;  %v485_v8 = vrot.slane %v2560_v50, 7  ;;  %v2710_v9 = vrot.slane %v2592_v11, 7  ;;  %v488_v16 = vrot.slane %v2585_v7, 7 }
  0x2a   : > { %440 = vst [vmem:[#allocation2 + $0x1e0] sm:$0xff] %v2336_v0  ;;  %441 = vst.msk [vmem:[#allocation2 + $0x1e8] sm:$0xff] %vm380_vm0, %v2336_v0  ;;  %v2720_v14 = vsel %vm703_vm4, %v710_v3, %v2689_v4  ;;  %v2726_v17 = vrot.slane %v2598_v15, 7  ;;  %v491_v19 = vrot.slane %v2594_v12, 7  ;;  %v2743_v21 = vrot.slane %v2560_v50, 1 }
  0x2b   : > { %442 = vst [vmem:[#allocation2 + $0x1f0] sm:$0xff] %v2336_v0  ;;  %443 = vst.msk [vmem:[#allocation2 + $0x1f8] sm:$0xff] %vm380_vm0, %v2336_v0  ;;  %v292_v0 = vmul.f32 %v2484_v1, %v253_v46  ;;  %v2641_v46 = vmax.f32 %v333_v22, 0.0  ;;  %604 = vrot.lane.b32.xlu1 %v2594_v12, %s2337_s28  ;;  %v2736_v18 = vsel %vm474_vm2, %v2706_v6, %v485_v8  ;;  %v2754_v23 = vrot.slane %v2620_v31, 7 }
  0x2c   : > { %552 = vst.msk [vmem:[#allocation2 + $0x20] sm:$0xfe] %vm551_vm1, %v2590_v10  ;;  %3939 = vst [vmem:[#allocation3_spill] sm:$0xff] %v2622_v34  ;;  %602 = vrot.lane.b32.xlu0 %v2598_v15, %s2337_s28  ;;  %v2749_v22 = vsel %vm474_vm2, %v2710_v9, %v488_v16  ;;  %v494_v26 = vrot.slane %v2615_v27, 7  ;;  %v2758_v28 = vrot.slane %v2627_v38, 7  ;;  %v2768_v29 = vsel %vm474_vm2, %v2726_v17, %v491_v19  ;;  %v265_v16 = vld [vmem:[%s2492_s25 + $0xe0] sm:$0xff] }
  0x2d   : > { %v331_v20 = vadd.f32 %v2497_v2, %v292_v0  ;;  %3940 = vst [vmem:[#allocation4_spill] sm:$0xff] %v2627_v38  ;;  %553 = vst.msk [vmem:[#allocation2 + $0x30] sm:$0xff] %vm380_vm0, %v2635_v42  ;;  %v482_v0 = vrot.slane %v2547_v43, 7  ;;  %v497_v35 = vrot.slane %v2622_v34, 7  ;;  %v500_v40 = vrot.slane %v2629_v39, 7 }
  0x2e   : > { %554 = vst.msk [vmem:[#allocation2 + $0x40] sm:$0xfe] %vm551_vm1, %v2659_v53  ;;  %556 = vst.msk [vmem:[#allocation2 + $0x60] sm:$0xfe] %vm551_vm1, %v2678_v62  ;;  %v2786_v37 = vsel %vm474_vm2, %v2754_v23, %v494_v26  ;;  %v2794_v41 = vrot.slane %v2641_v46, 7  ;;  %v503_v58 = vrot.slane %v2639_v45, 7 }
  0x2f   : > { %v2637_v44 = vmax.f32 %v331_v20, 0.0  ;;  %1543 = vst.msk [vmem:[#allocation2 + $0x18] sm:$0x7f] %vm1542_vm3, %v2675_v61  ;;  %v2716_v13 = vsel %vm474_vm2, %v2678_v62, %v482_v0  ;;  %1545 = vst.msk [vmem:[#allocation2 + $0x38] sm:$0x7f] %vm1542_vm3, %v2689_v4  ;;  %v713_v20 = vrot.slane %v2565_v54, 1  ;;  %608 = vrot.lane.b32.xlu1 %v2615_v27, %s2337_s28  ;;  %v2801_v60 = vsel %vm474_vm2, %v2758_v28, %v497_v35 }
  0x30   : > { %555 = vst.msk [vmem:[#allocation2 + $0x50] sm:$0xff] %vm380_vm0, %v2684_v63  ;;  %1541 = vst.msk [vmem:[#allocation2 + $0x8] sm:$0xff] %vm380_vm0, %v2697_v5  ;;  %606 = vrot.lane.b32.xlu0 %v2620_v31, %s2337_s28  ;;  %v725_v0 = vrot.slane %v2627_v38, 1  ;;  %v2807_v3 = vrot.slane %v2622_v34, 1  ;;  %v2810_v8 = vrot.slane %v2651_v48, 7  ;;  %v506_v26 = vrot.slane %v2643_v47, 7 }
  0x31   : > { %557 = vst.msk [vmem:[#allocation2 + $0x70] sm:$0xff] %vm380_vm0, %v2716_v13  ;;  %1544 = vst.msk [vmem:[#allocation2 + $0x28] sm:$0xff] %vm380_vm0, %v2720_v14  ;;  %v2772_v30 = vsel %vm703_vm4, %v713_v20, %v2743_v21  ;;  %v2778_v36 = vrot.slane %v2637_v44, 7  ;;  %v2821_v20 = vsel %vm474_vm2, %v2794_v41, %v503_v58  ;;  %v2827_v35 = vrot.slane %v2661_v55, 7 }
  0x32   : > { %558 = vst.msk [vmem:[#allocation2 + $0x80] sm:$0xfe] %vm551_vm1, %v2706_v6  ;;  %560 = vst.msk [vmem:[#allocation2 + $0xa0] sm:$0xfe] %vm551_vm1, %v2710_v9  ;;  %v2841_v58 = vsel %vm703_vm4, %v725_v0, %v2807_v3  ;;  %v2860_v0 = vsel %vm474_vm2, %v2810_v8, %v506_v26 }
  0x33   : > { %559 = vst.msk [vmem:[#allocation2 + $0x90] sm:$0xff] %vm380_vm0, %v2736_v18  ;;  %3941 = vst [vmem:[#allocation5_spill] sm:$0xff] %v2758_v28  ;;  %v2817_v19 = vsel %vm474_vm2, %v2778_v36, %v500_v40  ;;  %612 = vrot.lane.b32.xlu1 %v2622_v34, %s2337_s28  ;;  %v342_v40 = vadd.f32 %v2497_v2, %v2656_v52  ;;  %v509_v34 = vrot.slane %v2653_v51, 7  ;;  %v2849_v52 = vmax.f32 %v2664_v56, 0.0 }
  0x34   : > { %562 = vst.msk [vmem:[#allocation2 + $0xc0] sm:$0xfe] %vm551_vm1, %v2726_v17  ;;  %564 = vst.msk [vmem:[#allocation2 + $0xe0] sm:$0xfe] %vm551_vm1, %v2754_v23  ;;  %610 = vrot.lane.b32.xlu0 %v2627_v38, %s2337_s28  ;;  %v2852_v38 = vmax.f32 %v2671_v59, 0.0 }
  0x35   : > { %561 = vst.msk [vmem:[#allocation2 + $0xb0] sm:$0xff] %vm380_vm0, %v2749_v22  ;;  %563 = vst.msk [vmem:[#allocation2 + $0xd0] sm:$0xff] %vm380_vm0, %v2768_v29  ;;  %v2869_v56 = vsel %vm474_vm2, %v2827_v35, %v509_v34  ;;  %v512_v59 = vrot.slane %v2849_v52, 7 }
  0x36   : > { %1547 = vst.msk [vmem:[#allocation2 + $0x58] sm:$0x7f] %vm1542_vm3, %v2743_v21  ;;  %3942 = vst [vmem:[#allocation6_spill] sm:$0xff] %v2801_v60 }
  0x37   : > { %1546 = vst.msk [vmem:[#allocation2 + $0x48] sm:$0xff] %vm380_vm0, %v2772_v30  ;;  %565 = vst.msk [vmem:[#allocation2 + $0xf0] sm:$0xff] %vm380_vm0, %v2786_v37  ;;  %616 = vrot.lane.b32.xlu1 %v2629_v39, %s2337_s28 }
  0x38   : > { %566 = vst.msk [vmem:[#allocation2 + $0x100] sm:$0xfe] %vm551_vm1, %v2758_v28  ;;  %568 = vst.msk [vmem:[#allocation2 + $0x120] sm:$0xfe] %vm551_vm1, %v2778_v36  ;;  %v304_v28 = vmul.f32 %v2484_v1, %v265_v16  ;;  %614 = vrot.lane.b32.xlu0 %v2637_v44, %s2337_s28  ;;  %v2881_v1 = vmax.f32 %v342_v40, 0.0 }
  0x39   : > { %567 = vst.msk [vmem:[#allocation2 + $0x110] sm:$0xff] %vm380_vm0, %v2801_v60  ;;  %3943 = vst [vmem:[#allocation7_spill] sm:$0xff] %v2827_v35  ;;  %v341_v60 = vadd.f32 %v2497_v2, %v2667_v57  ;;  %v2874_v57 = vrot.slane %v2852_v38, 7 }
  0x3a   : > { %570 = vst.msk [vmem:[#allocation2 + $0x140] sm:$0xfe] %vm551_vm1, %v2794_v41  ;;  %572 = vst.msk [vmem:[#allocation2 + $0x160] sm:$0xfe] %vm551_vm1, %v2810_v8  ;;  %v343_v26 = vadd.f32 %v2497_v2, %v304_v28  ;;  %v515_v40 = vrot.slane %v2881_v1, 7 }
  0x3b   : > { %569 = vst.msk [vmem:[#allocation2 + $0x130] sm:$0xff] %vm380_vm0, %v2817_v19  ;;  %571 = vst.msk [vmem:[#allocation2 + $0x150] sm:$0xff] %vm380_vm0, %v2821_v20  ;;  %v2883_v16 = vmax.f32 %v341_v60, 0.0  ;;  %v2887_v34 = vsel %vm474_vm2, %v2874_v57, %v512_v59  ;;  %620 = vrot.lane.b32.xlu1 %v2639_v45, %s2337_s28  ;;  %v2317_v60 = vld [vmem:[%s3912_s3 + $0x38] sm:$0xff]   ;;  %v3927_v59 = vmov 0  }
  0x3c   : > { %1555 = vst.msk [vmem:[#allocation2 + $0xd8] sm:$0x7f] %vm1542_vm3, %v2807_v3  ;;  %3944 = vst [vmem:[#allocation8_spill] sm:$0xff] %v2869_v56  ;;  %618 = vrot.lane.b32.xlu0 %v2641_v46, %s2337_s28  ;;  %1788 = vmatprep.subr.bf16.mxu0 %v3927_v59  ;;  %v2913_v28 = vmax.f32 %v343_v26, 0.0  ;;  %v2318_v26 = vld [vmem:[%s3912_s3 + $0x30] sm:$0xff]  }
  0x3d   : > { %1554 = vst.msk [vmem:[#allocation2 + $0xc8] sm:$0xff] %vm380_vm0, %v2841_v58  ;;  %573 = vst.msk [vmem:[#allocation2 + $0x170] sm:$0xff] %vm380_vm0, %v2860_v0  ;;  %2282 = vmatprep.subr.bf16.mxu1 %v3927_v59  ;;  %1789 = vmatpush1.bf16.msra.mxu0 %v2317_v60 }
  0x3e   : > { %574 = vst.msk [vmem:[#allocation2 + $0x180] sm:$0xfe] %vm551_vm1, %v2827_v35  ;;  %3945 = vst [vmem:[#allocation9_spill] sm:$0xff] %v2874_v57  ;;  %2291 = vmatpush1.bf16.msra.mxu1 %v2317_v60  ;;  %1790 = vmatprep.subr.bf16.mxu0 %v3927_v59  ;;  %v2931_v60 = vrot.slane %v2585_v7, 1  ;;  %v704_v35 = vrot.slane %v2522_v25, 1 }
  0x3f   : > { %575 = vst.msk [vmem:[#allocation2 + $0x190] sm:$0xff] %vm380_vm0, %v2869_v56  ;;  %3946 = vst [vmem:[#allocation10_spill] sm:$0xff] %v2887_v34  ;;  %v2895_v56 = vrot.slane %v2883_v16, 7  ;;  %2283 = vmatprep.subr.bf16.mxu1 %v3927_v59  ;;  %624 = vrot.lane.b32.xlu1 %v2643_v47, %s2337_s28 }
  0x40   : > { %576 = vst.msk [vmem:[#allocation2 + $0x1a0] sm:$0xfe] %vm551_vm1, %v2874_v57  ;;  %622 = vrot.lane.b32.xlu0 %v2651_v48, %s2337_s28 }
  0x41   : > { %577 = vst.msk [vmem:[#allocation2 + $0x1b0] sm:$0xff] %vm380_vm0, %v2887_v34  ;;  %3947 = vst [vmem:[#allocation11_spill] sm:$0xff] %v2895_v56  ;;  %v2908_v2 = vsel %vm474_vm2, %v2895_v56, %v515_v40  ;;  %v2927_v40 = vrot.slane %v2913_v28, 7  ;;  %1791 = vmatpush1.bf16.msra.mxu0 %v2318_v26  ;;  %v2954_v34 = vrot.slane %v2629_v39, 1 }
  0x42   : > { %3948 = vst [vmem:[#allocation12_spill] sm:$0xff] %v2908_v2  ;;  %578 = vst.msk [vmem:[#allocation2 + $0x1c0] sm:$0xfe] %vm551_vm1, %v2895_v56  ;;  %2292 = vmatpush1.bf16.msra.mxu1 %v2318_v26  ;;  %v3950_v56 = vmov 0   ;;  %v728_v26 = vrot.slane %v2637_v44, 1 }
  0x43   : > { %579 = vst.msk [vmem:[#allocation2 + $0x1d0] sm:$0xff] %vm380_vm0, %v2908_v2  ;;  %3949 = vst [vmem:[#allocation13_spill] sm:$0xff] %v2927_v40  ;;  %v716_v2 = vrot.slane %v2592_v11, 1  ;;  %1792 = vmatprep.subr.bf16.mxu0 %v3950_v56  ;;  %2284 = vmatprep.subr.bf16.mxu1 %v3950_v56 }
  0x44   : > { %580 = vst.msk [vmem:[#allocation2 + $0x1e0] sm:$0xfe] %vm551_vm1, %v2927_v40  ;;  %628 = vrot.lane.b32.xlu1 %v2653_v51, %s2337_s28  ;;  %626 = vrot.lane.b32.xlu0 %v2661_v55, %s2337_s28  ;;  %v2958_v57 = vsel %vm703_vm4, %v728_v26, %v2954_v34  ;;  %v2321_v26 = vld [vmem:[%s3912_s3 + $0x18] sm:$0xff]   ;;  %v705_v40 = vrot.slane %v2536_v33, 1  ;;  %vm1949_vm1 = vcmask 523264  }
  0x45   : > { %v2937_v59 = vsel %vm703_vm4, %v716_v2, %v2931_v60  ;;  %1549 = vst.msk [vmem:[#allocation2 + $0x78] sm:$0x7f] %vm1542_vm3, %v2931_v60  ;;  %v2319_v2 = vld [vmem:[%s3912_s3 + $0x28] sm:$0xff]   ;;  %1557 = vst.msk [vmem:[#allocation2 + $0xf8] sm:$0x7f] %vm1542_vm3, %v2954_v34 }
  0x46   : > { %1548 = vst.msk [vmem:[#allocation2 + $0x68] sm:$0xff] %vm380_vm0, %v2937_v59  ;;  %1793 = vmatpush1.bf16.msra.mxu0 %v2319_v2  ;;  %2293 = vmatpush1.bf16.msra.mxu1 %v2319_v2  ;;  %1556 = vst.msk [vmem:[#allocation2 + $0xe8] sm:$0xff] %vm380_vm0, %v2958_v57  ;;  %v2320_v2 = vld [vmem:[%s3912_s3 + $0x20] sm:$0xff]  }
  0x47   : > { %1794 = vmatprep.subr.bf16.mxu0 %v3950_v56  ;;  %2285 = vmatprep.subr.bf16.mxu1 %v3950_v56 }
  0x48   : > { %632 = vrot.lane.b32.xlu1 %v2849_v52, %s2337_s28  ;;  %630 = vrot.lane.b32.xlu0 %v2852_v38, %s2337_s28 }
  0x4a   : > { %1795 = vmatpush1.bf16.msra.mxu0 %v2320_v2  ;;  %2294 = vmatpush1.bf16.msra.mxu1 %v2320_v2  ;;  %v2322_v2 = vld [vmem:[%s3912_s3 + $0x10] sm:$0xff]  }
  0x4b   : > { %1796 = vmatprep.subr.bf16.mxu0 %v3950_v56  ;;  %2286 = vmatprep.subr.bf16.mxu1 %v3950_v56 }
  0x4c   : > { %636 = vrot.lane.b32.xlu1 %v2881_v1, %s2337_s28  ;;  %634 = vrot.lane.b32.xlu0 %v2883_v16, %s2337_s28 }
  0x4e   : > { %1797 = vmatpush1.bf16.msra.mxu0 %v2321_v26  ;;  %2295 = vmatpush1.bf16.msra.mxu1 %v2321_v26  ;;  %v706_v26 = vsel %vm703_vm4, %v704_v35, %v705_v40  ;;  %v1575_v35 = vld [vmem:[#allocation2 + $0x18] sm:$0xff] }
  0x4f   : > { %1798 = vmatprep.subr.bf16.mxu0 %v3950_v56  ;;  %2287 = vmatprep.subr.bf16.mxu1 %v3950_v56 }
  0x50   : > { %638 = vrot.lane.b32.xlu0 %v2913_v28, %s2337_s28  ;;  %876 = vrot.lane.b32.xlu1 %v2590_v10, %s2339_s14  ;;  %v2323_v10 = vld [vmem:[%s3912_s3 + $0x8] sm:$0xff]  }
  0x52   : > { %1799 = vmatpush1.bf16.msra.mxu0 %v2322_v2  ;;  %2296 = vmatpush1.bf16.msra.mxu1 %v2322_v2 }
  0x53   : > { %1800 = vmatprep.subr.bf16.mxu0 %v3950_v56  ;;  %2288 = vmatprep.subr.bf16.mxu1 %v3950_v56 }
  0x54   : > { %1006 = vrot.lane.b32.xlu1 %v2522_v25, %s2340_s17  ;;  %878 = vrot.lane.b32.xlu0 %v2635_v42, %s2339_s14  ;;  %v2324_v25 = vld [vmem:[%s3912_s3] sm:$0xff]   ;;  %v1573_v42 = vld [vmem:[#allocation2 + $0x8] sm:$0xff] }
  0x55   : > { %v1637_v2 = vpack.c.bf16 %v1575_v35, %v1573_v42 }
  0x56   : > { %1801 = vmatpush1.bf16.msra.mxu0 %v2323_v10  ;;  %2297 = vmatpush1.bf16.msra.mxu1 %v2323_v10  ;;  %v3040_v10 = vrot.slane %v2594_v12, 1 }
  0x57   : > { %1802 = vmatprep.subr.bf16.mxu0 %v3950_v56  ;;  %2289 = vmatprep.subr.bf16.mxu1 %v3950_v56 }
  0x58   : > { %1138 = vrot.lane.b32.xlu1 %v706_v26, %s2341_s23  ;;  %1008 = vrot.lane.b32.xlu0 %v2536_v33, %s2340_s17  ;;  %v2325_v33 = vld [vmem:[%s3912_s3 + $0x40] sm:$0xff]   ;;  %1551 = vst.msk [vmem:[#allocation2 + $0x98] sm:$0x7f] %vm1542_vm3, %v3040_v10 }
  0x59   : > { %2262 = vmatprep.mubr.msk.bf16.mxu0 %vm380_vm0, %v1637_v2  ;;  %v3142_v2 = vrot.slane %v2643_v47, 1 }
  0x5a   : > { %1803 = vmatpush1.bf16.msra.mxu0 %v2324_v25  ;;  %2298 = vmatpush1.bf16.msra.mxu1 %v2324_v25 }
  0x5b   : > { %1818 = vmatprep.subr.bf16.mxu0 %v3950_v56  ;;  %2290 = vmatprep.subr.bf16.mxu1 %v3950_v56  ;;  %v719_v56 = vrot.slane %v2598_v15, 1  ;;  %1561 = vst.msk [vmem:[#allocation2 + $0x138] sm:$0x7f] %vm1542_vm3, %v3142_v2 }
  0x5c   : > { %1268 = vrot.lane.b32.xlu1 %v2659_v53, %s2342_s27  ;;  %1140 = vrot.lane.b32.xlu0 %v705_v40, %s2341_s23 }
  0x5e   : > { %1819 = vmatpush2.bf16.msra.mxu0 %v2325_v33  ;;  %2299 = vmatpush2.bf16.msra.mxu1 %v2325_v33 }
  0x60   : > { %1390 = vrot.lane.b32.xlu1 %v2520_v24, %s2343_s6  ;;  %1270 = vrot.lane.b32.xlu0 %v2684_v63, %s2342_s27 }
  0x64   : > { %749 = vrot.lane.b32.xlu1 %v706_v26, %s2344_s7  ;;  %1392 = vrot.lane.b32.xlu0 %v2534_v32, %s2343_s6 }
  0x68   : > { %880 = vrot.lane.b32.xlu1 %v2659_v53, %s2339_s14  ;;  %751 = vrot.lane.b32.xlu0 %v705_v40, %s2344_s7  ;;  %v3044_v53 = vsel %vm703_vm4, %v719_v56, %v3040_v10 }
  0x69   : > { %1550 = vst.msk [vmem:[#allocation2 + $0x88] sm:$0xff] %vm380_vm0, %v3044_v53 }
  0x6c   : > { %1010 = vrot.lane.b32.xlu1 %v2520_v24, %s2340_s17  ;;  %882 = vrot.lane.b32.xlu0 %v2684_v63, %s2339_s14  ;;  %v731_v24 = vrot.slane %v2641_v46, 1 }
  0x70   : > { %1142 = vrot.lane.b32.xlu1 %v2697_v5, %s2341_s23  ;;  %1012 = vrot.lane.b32.xlu0 %v2534_v32, %s2340_s17  ;;  %v3056_v32 = vrot.slane %v2639_v45, 1 }
  0x72   : > { %v3060_v63 = vsel %vm703_vm4, %v731_v24, %v3056_v32  ;;  %1559 = vst.msk [vmem:[#allocation2 + $0x118] sm:$0x7f] %vm1542_vm3, %v3056_v32 }
  0x73   : > { %1558 = vst.msk [vmem:[#allocation2 + $0x108] sm:$0xff] %vm380_vm0, %v3060_v63 }
  0x74   : > { %1272 = vrot.lane.b32.xlu1 %v2678_v62, %s2342_s27  ;;  %1144 = vrot.lane.b32.xlu0 %v2675_v61, %s2341_s23 }
  0x78   : > { %1394 = vrot.lane.b32.xlu1 %v2558_v49, %s2343_s6  ;;  %1274 = vrot.lane.b32.xlu0 %v2716_v13, %s2342_s27 }
  0x7c   : > { %753 = vrot.lane.b32.xlu1 %v2697_v5, %s2344_s7  ;;  %1396 = vrot.lane.b32.xlu0 %v2547_v43, %s2343_s6 }
  0x80   : > { %884 = vrot.lane.b32.xlu1 %v2678_v62, %s2339_s14  ;;  %755 = vrot.lane.b32.xlu0 %v2675_v61, %s2344_s7 }
  0x84   : > { %1014 = vrot.lane.b32.xlu1 %v2558_v49, %s2340_s17  ;;  %886 = vrot.lane.b32.xlu0 %v2716_v13, %s2339_s14 }
  0x88   : > { %1146 = vrot.lane.b32.xlu1 %v2720_v14, %s2341_s23  ;;  %1016 = vrot.lane.b32.xlu0 %v2547_v43, %s2340_s17 }
  0x89   : > { %v587_v5 = vpop.permute.xlu1 %586 }
  0x8a   : > { %v583_v40 = vpop.permute.xlu0 %582  ;;  %675 = vst.msk [vmem:[#allocation2 + $0x40] sm:$0xff] %vm672_vm5, %v587_v5 }
  0x8b   : > { %673 = vst.msk [vmem:[#allocation2 + $0x20] sm:$0xff] %vm672_vm5, %v583_v40 }
  0x8c   : > { %1276 = vrot.lane.b32.xlu1 %v2706_v6, %s2342_s27  ;;  %1148 = vrot.lane.b32.xlu0 %v2689_v4, %s2341_s23 }
  0x8d   : > { %v589_v49 = vpop.permute.xlu1 %588 }
  0x8e   : > { %v585_v61 = vpop.permute.xlu0 %584  ;;  %676 = vst.msk [vmem:[#allocation2 + $0x50] sm:$0xff] %vm672_vm5, %v589_v49 }
  0x8f   : > { %674 = vst.msk [vmem:[#allocation2 + $0x30] sm:$0xff] %vm672_vm5, %v585_v61 }
  0x90   : > { %1398 = vrot.lane.b32.xlu1 %v2565_v54, %s2343_s6  ;;  %1278 = vrot.lane.b32.xlu0 %v2736_v18, %s2342_s27 }
  0x91   : > { %v593_v43 = vpop.permute.xlu1 %592 }
  0x92   : > { %v591_v62 = vpop.permute.xlu0 %590  ;;  %678 = vst.msk [vmem:[#allocation2 + $0x70] sm:$0xff] %vm672_vm5, %v593_v43 }
  0x93   : > { %677 = vst.msk [vmem:[#allocation2 + $0x60] sm:$0xff] %vm672_vm5, %v591_v62 }
  0x94   : > { %757 = vrot.lane.b32.xlu1 %v2720_v14, %s2344_s7  ;;  %1400 = vrot.lane.b32.xlu0 %v2560_v50, %s2343_s6 }
  0x95   : > { %v597_v13 = vpop.permute.xlu1 %596 }
  0x96   : > { %v595_v26 = vpop.permute.xlu0 %594  ;;  %680 = vst.msk [vmem:[#allocation2 + $0x90] sm:$0xff] %vm672_vm5, %v597_v13 }
  0x97   : > { %679 = vst.msk [vmem:[#allocation2 + $0x80] sm:$0xff] %vm672_vm5, %v595_v26 }
  0x98   : > { %888 = vrot.lane.b32.xlu1 %v2706_v6, %s2339_s14  ;;  %759 = vrot.lane.b32.xlu0 %v2689_v4, %s2344_s7  ;;  %v722_v4 = vrot.slane %v2620_v31, 1  ;;  %v3124_v6 = vrot.slane %v2615_v27, 1 }
  0x99   : > { %v601_v25 = vpop.permute.xlu1 %600 }
  0x9a   : > { %v599_v33 = vpop.permute.xlu0 %598  ;;  %682 = vst.msk [vmem:[#allocation2 + $0xb0] sm:$0xff] %vm672_vm5, %v601_v25 }
  0x9b   : > { %681 = vst.msk [vmem:[#allocation2 + $0xa0] sm:$0xff] %vm672_vm5, %v599_v33 }
  0x9c   : > { %1018 = vrot.lane.b32.xlu1 %v2565_v54, %s2340_s17  ;;  %890 = vrot.lane.b32.xlu0 %v2736_v18, %s2339_s14  ;;  %v3130_v18 = vsel %vm703_vm4, %v722_v4, %v3124_v6  ;;  %1553 = vst.msk [vmem:[#allocation2 + $0xb8] sm:$0x7f] %vm1542_vm3, %v3124_v6 }
  0x9d   : > { %v605_v14 = vpop.permute.xlu1 %604  ;;  %1552 = vst.msk [vmem:[#allocation2 + $0xa8] sm:$0xff] %vm380_vm0, %v3130_v18 }
  0x9e   : > { %v603_v42 = vpop.permute.xlu0 %602  ;;  %684 = vst.msk [vmem:[#allocation2 + $0xd0] sm:$0xff] %vm672_vm5, %v605_v14 }
  0x9f   : > { %683 = vst.msk [vmem:[#allocation2 + $0xc0] sm:$0xff] %vm672_vm5, %v603_v42 }
  0xa0   : > { %1150 = vrot.lane.b32.xlu1 %v2772_v30, %s2341_s23  ;;  %1020 = vrot.lane.b32.xlu0 %v2560_v50, %s2340_s17  ;;  %v734_v50 = vrot.slane %v2651_v48, 1 }
  0xa1   : > { %v609_v54 = vpop.permute.xlu1 %608 }
  0xa2   : > { %v607_v35 = vpop.permute.xlu0 %606  ;;  %686 = vst.msk [vmem:[#allocation2 + $0xf0] sm:$0xff] %vm672_vm5, %v609_v54  ;;  %v3148_v5 = vsel %vm703_vm4, %v734_v50, %v3142_v2 }
  0xa3   : > { %685 = vst.msk [vmem:[#allocation2 + $0xe0] sm:$0xff] %vm672_vm5, %v607_v35 }
  0xa4   : > { %1280 = vrot.lane.b32.xlu1 %v2710_v9, %s2342_s27  ;;  %1152 = vrot.lane.b32.xlu0 %v2743_v21, %s2341_s23  ;;  %1560 = vst.msk [vmem:[#allocation2 + $0x128] sm:$0xff] %vm380_vm0, %v3148_v5 }
  0xa5   : > { %v613_v56 = vpop.permute.xlu1 %612 }
  0xa6   : > { %v611_v24 = vpop.permute.xlu0 %610  ;;  %688 = vst.msk [vmem:[#allocation2 + $0x110] sm:$0xff] %vm672_vm5, %v613_v56 }
  0xa7   : > { %687 = vst.msk [vmem:[#allocation2 + $0x100] sm:$0xff] %vm672_vm5, %v611_v24  ;;  %v1605_v24 = vld [vmem:[#allocation2 + $0x108] sm:$0xff] }
  0xa8   : > { %1402 = vrot.lane.b32.xlu1 %v2592_v11, %s2343_s6  ;;  %1282 = vrot.lane.b32.xlu0 %v2749_v22, %s2342_s27 }
  0xa9   : > { %v617_v40 = vpop.permute.xlu1 %616 }
  0xaa   : > { %v615_v49 = vpop.permute.xlu0 %614  ;;  %690 = vst.msk [vmem:[#allocation2 + $0x130] sm:$0xff] %vm672_vm5, %v617_v40  ;;  %v1607_v40 = vld [vmem:[#allocation2 + $0x118] sm:$0xff] }
  0xab   : > { %689 = vst.msk [vmem:[#allocation2 + $0x120] sm:$0xff] %vm672_vm5, %v615_v49  ;;  %v737_v49 = vrot.slane %v2661_v55, 1 }
  0xac   : > { %761 = vrot.lane.b32.xlu1 %v2772_v30, %s2344_s7  ;;  %1404 = vrot.lane.b32.xlu0 %v2585_v7, %s2343_s6 }
  0xad   : > { %v621_v61 = vpop.permute.xlu1 %620 }
  0xae   : > { %v619_v43 = vpop.permute.xlu0 %618  ;;  %692 = vst.msk [vmem:[#allocation2 + $0x150] sm:$0xff] %vm672_vm5, %v621_v61  ;;  %v3226_v61 = vrot.slane %v2653_v51, 1 }
  0xaf   : > { %691 = vst.msk [vmem:[#allocation2 + $0x140] sm:$0xff] %vm672_vm5, %v619_v43 }
  0xb0   : > { %777 = vrot.lane.b32.xlu1 %v2841_v58, %s2344_s7  ;;  %763 = vrot.lane.b32.xlu0 %v2743_v21, %s2344_s7  ;;  %1563 = vst.msk [vmem:[#allocation2 + $0x158] sm:$0x7f] %vm1542_vm3, %v3226_v61 }
  0xb1   : > { %v625_v62 = vpop.permute.xlu1 %624 }
  0xb2   : > { %v623_v13 = vpop.permute.xlu0 %622  ;;  %694 = vst.msk [vmem:[#allocation2 + $0x170] sm:$0xff] %vm672_vm5, %v625_v62 }
  0xb3   : > { %693 = vst.msk [vmem:[#allocation2 + $0x160] sm:$0xff] %vm672_vm5, %v623_v13  ;;  %v1653_v13 = vpack.c.bf16 %v1607_v40, %v1605_v24 }
  0xb4   : > { %892 = vrot.lane.b32.xlu1 %v2710_v9, %s2339_s14  ;;  %779 = vrot.lane.b32.xlu0 %v2807_v3, %s2344_s7 }
  0xb5   : > { %2270 = vmatprep.mubr.msk.bf16.mxu1 %vm380_vm0, %v1653_v13 }
  0xb6   : > { %v629_v30 = vpop.permute.xlu1 %628  ;;  %v627_v26 = vpop.permute.xlu0 %626 }
  0xb7   : > { %696 = vst.msk [vmem:[#allocation2 + $0x190] sm:$0xff] %vm672_vm5, %v629_v30  ;;  %695 = vst.msk [vmem:[#allocation2 + $0x180] sm:$0xff] %vm672_vm5, %v627_v26  ;;  %v3232_v30 = vsel %vm703_vm4, %v737_v49, %v3226_v61 }
  0xb8   : > { %908 = vrot.lane.b32.xlu1 %v2778_v36, %s2339_s14  ;;  %894 = vrot.lane.b32.xlu0 %v2749_v22, %s2339_s14  ;;  %1562 = vst.msk [vmem:[#allocation2 + $0x148] sm:$0xff] %vm380_vm0, %v3232_v30 }
  0xba   : > { %v633_v21 = vpop.permute.xlu1 %632  ;;  %v631_v25 = vpop.permute.xlu0 %630 }
  0xbb   : > { %698 = vst.msk [vmem:[#allocation2 + $0x1b0] sm:$0xff] %vm672_vm5, %v633_v21  ;;  %697 = vst.msk [vmem:[#allocation2 + $0x1a0] sm:$0xff] %vm672_vm5, %v631_v25  ;;  %v1577_v25 = vld [vmem:[#allocation2 + $0x28] sm:$0xff] }
  0xbc   : > { %1022 = vrot.lane.b32.xlu1 %v2592_v11, %s2340_s17  ;;  %910 = vrot.lane.b32.xlu0 %v2817_v19, %s2339_s14 }
  0xbe   : > { %v637_v9 = vpop.permute.xlu1 %636  ;;  %v635_v33 = vpop.permute.xlu0 %634 }
  0xbf   : > { %700 = vst.msk [vmem:[#allocation2 + $0x1d0] sm:$0xff] %vm672_vm5, %v637_v9  ;;  %699 = vst.msk [vmem:[#allocation2 + $0x1c0] sm:$0xff] %vm672_vm5, %v635_v33  ;;  %v1579_v9 = vld [vmem:[#allocation2 + $0x38] sm:$0xff] }
  0xc0   : > { %1038 = vrot.lane.b32.xlu1 %v2637_v44, %s2340_s17  ;;  %1024 = vrot.lane.b32.xlu0 %v2585_v7, %s2340_s17 }
  0xc2   : > { %v639_v22 = vpop.permute.xlu0 %638  ;;  %v877_v14 = vpop.permute.xlu1 %876 }
  0xc3   : > { %701 = vst.msk [vmem:[#allocation2 + $0x1e0] sm:$0xff] %vm672_vm5, %v639_v22 }
  0xc4   : > { %973 = vst.msk [vmem:[#allocation2] sm:$0xfe] %vm972_vm6, %v877_v14  ;;  %1154 = vrot.lane.b32.xlu1 %v2937_v59, %s2341_s23  ;;  %1040 = vrot.lane.b32.xlu0 %v2629_v39, %s2340_s17 }
  0xc6   : > { %v1007_v11 = vpop.permute.xlu1 %1006  ;;  %v879_v42 = vpop.permute.xlu0 %878 }
  0xc7   : > { %1103 = vst.msk [vmem:[#allocation2] sm:$0xff] %vm1102_vm7, %v1007_v11 }
  0xc8   : > { %975 = vst.msk [vmem:[#allocation2 + $0x10] sm:$0xff] %vm974_vm8, %v879_v42  ;;  %1170 = vrot.lane.b32.xlu1 %v2958_v57, %s2341_s23  ;;  %1156 = vrot.lane.b32.xlu0 %v2931_v60, %s2341_s23  ;;  %v1639_v42 = vpack.c.bf16 %v1579_v9, %v1577_v25 }
  0xca   : > { %v1139_v7 = vpop.permute.xlu1 %1138  ;;  %v1009_v4 = vpop.permute.xlu0 %1008 }
  0xcb   : > { %1235 = vst.msk [vmem:[#allocation2] sm:$0xff] %vm1234_vm9, %v1139_v7 }
  0xcc   : > { %1104 = vst.msk [vmem:[#allocation2 + $0x10] sm:$0xff] %vm1102_vm7, %v1009_v4  ;;  %1284 = vrot.lane.b32.xlu1 %v2726_v17, %s2342_s27  ;;  %1172 = vrot.lane.b32.xlu0 %v2954_v34, %s2341_s23 }
  0xce   : > { %v1269_v54 = vpop.permute.xlu1 %1268  ;;  %v1141_v35 = vpop.permute.xlu0 %1140 }
  0xcf   : > { %1359 = vst.msk [vmem:[#allocation2] sm:$0xfe] %vm1358_vm10, %v1269_v54 }
  0xd0   : > { %1237 = vst.msk [vmem:[#allocation2 + $0x10] sm:$0x7f] %vm1236_vm11, %v1141_v35  ;;  %1300 = vrot.lane.b32.xlu1 %v2794_v41, %s2342_s27  ;;  %1286 = vrot.lane.b32.xlu0 %v2768_v29, %s2342_s27 }
  0xd2   : > { %v1391_v50 = vpop.permute.xlu1 %1390  ;;  %v1271_v56 = vpop.permute.xlu0 %1270 }
  0xd3   : > { %1481 = vst.msk [vmem:[#allocation2] sm:$0xff] %vm1480_vm12, %v1391_v50  ;;  %v740_v50 = vrot.slane %v2852_v38, 1 }
  0xd4   : > { %1361 = vst.msk [vmem:[#allocation2 + $0x10] sm:$0xff] %vm1360_vm13, %v1271_v56  ;;  %1406 = vrot.lane.b32.xlu1 %v2598_v15, %s2343_s6  ;;  %1302 = vrot.lane.b32.xlu0 %v2821_v20, %s2342_s27 }
  0xd6   : > { %v750_v43 = vpop.permute.xlu1 %749  ;;  %v1393_v62 = vpop.permute.xlu0 %1392 }
  0xd7   : > { %840 = vst.msk [vmem:[#allocation2 + $0x20] sm:$0xff] %vm839_vm14, %v750_v43 }
  0xd8   : > { %1482 = vst.msk [vmem:[#allocation2 + $0x10] sm:$0xff] %vm1480_vm12, %v1393_v62  ;;  %1422 = vrot.lane.b32.xlu1 %v2641_v46, %s2343_s6  ;;  %1408 = vrot.lane.b32.xlu0 %v2594_v12, %s2343_s6 }
  0xda   : > { %v881_v26 = vpop.permute.xlu1 %880  ;;  %v752_v21 = vpop.permute.xlu0 %751  ;;  %v1572_v14 = vld [vmem:[#allocation2] sm:$0xff] }
  0xdb   : > { %976 = vst.msk [vmem:[#allocation2 + $0x20] sm:$0xfe] %vm972_vm6, %v881_v26 }
  0xdc   : > { %842 = vst.msk [vmem:[#allocation2 + $0x30] sm:$0x7f] %vm841_vm15, %v752_v21  ;;  %765 = vrot.lane.b32.xlu1 %v2937_v59, %s2344_s7  ;;  %1424 = vrot.lane.b32.xlu0 %v2639_v45, %s2343_s6 }
  0xde   : > { %v1011_v33 = vpop.permute.xlu1 %1010  ;;  %v883_v22 = vpop.permute.xlu0 %882 }
  0xdf   : > { %v1574_v11 = vld [vmem:[#allocation2 + $0x10] sm:$0xff]  ;;  %1105 = vst.msk [vmem:[#allocation2 + $0x20] sm:$0xff] %vm1102_vm7, %v1011_v33 }
  0xe0   : > { %977 = vst.msk [vmem:[#allocation2 + $0x30] sm:$0xff] %vm974_vm8, %v883_v22  ;;  %v1636_v7 = vpack.c.bf16 %v1574_v11, %v1572_v14  ;;  %781 = vrot.lane.b32.xlu1 %v2958_v57, %s2344_s7  ;;  %767 = vrot.lane.b32.xlu0 %v2931_v60, %s2344_s7 }
  0xe2   : > { %1821 = vmatmul.mubr.bf16.vlgmr.msra.gmra.mxu0 %v1636_v7  ;;  %v1143_v59 = vpop.permute.xlu1 %1142  ;;  %v1013_v4 = vpop.permute.xlu0 %1012  ;;  %v1587_v7 = vld [vmem:[#allocation2 + $0x78] sm:$0xff] }
  0xe3   : > { %2263 = vmatprep.mubr.msk.bf16.mxu0 %vm380_vm0, %v1639_v42  ;;  %1238 = vst.msk [vmem:[#allocation2 + $0x20] sm:$0xff] %vm1234_vm9, %v1143_v59  ;;  %v1585_v42 = vld [vmem:[#allocation2 + $0x68] sm:$0xff]  ;;  %v743_v59 = vrot.slane %v2883_v16, 1 }
  0xe4   : > { %1106 = vst.msk [vmem:[#allocation2 + $0x30] sm:$0xff] %vm1102_vm7, %v1013_v4  ;;  %896 = vrot.lane.b32.xlu1 %v2726_v17, %s2339_s14  ;;  %783 = vrot.lane.b32.xlu0 %v2954_v34, %s2344_s7  ;;  %v3337_v4 = vrot.slane %v2881_v1, 1 }
  0xe6   : > { %v1273_v54 = vpop.permute.xlu1 %1272  ;;  %v1145_v57 = vpop.permute.xlu0 %1144  ;;  %1567 = vst.msk [vmem:[#allocation2 + $0x198] sm:$0x7f] %vm1542_vm3, %v3337_v4 }
  0xe7   : > { %1362 = vst.msk [vmem:[#allocation2 + $0x20] sm:$0xfe] %vm1358_vm10, %v1273_v54 }
  0xe8   : > { %1239 = vst.msk [vmem:[#allocation2 + $0x30] sm:$0x7f] %vm1236_vm11, %v1145_v57  ;;  %912 = vrot.lane.b32.xlu1 %v2794_v41, %s2339_s14  ;;  %898 = vrot.lane.b32.xlu0 %v2768_v29, %s2339_s14 }
  0xea   : > { %v1395_v60 = vpop.permute.xlu1 %1394  ;;  %v1275_v35 = vpop.permute.xlu0 %1274 }
  0xeb   : > { %1483 = vst.msk [vmem:[#allocation2 + $0x20] sm:$0xff] %vm1480_vm12, %v1395_v60 }
  0xec   : > { %1363 = vst.msk [vmem:[#allocation2 + $0x30] sm:$0xff] %vm1360_vm13, %v1275_v35  ;;  %1026 = vrot.lane.b32.xlu1 %v2598_v15, %s2340_s17  ;;  %914 = vrot.lane.b32.xlu0 %v2821_v20, %s2339_s14  ;;  %v1581_v15 = vld [vmem:[#allocation2 + $0x48] sm:$0xff]  ;;  %v1583_v20 = vld [vmem:[#allocation2 + $0x58] sm:$0xff] }
  0xed   : > { %v1641_v49 = vpack.c.bf16 %v1583_v20, %v1581_v15  ;;  %v3363_v20 = vld [vmem:[%s3911_s2] ss:$0 sm:$0xff] }
  0xee   : > { %v754_v17 = vpop.permute.xlu1 %753  ;;  %v1397_v34 = vpop.permute.xlu0 %1396 }
  0xef   : > { %843 = vst.msk [vmem:[#allocation2 + $0x40] sm:$0xff] %vm839_vm14, %v754_v17  ;;  %v1643_v17 = vpack.c.bf16 %v1587_v7, %v1585_v42  ;;  %v3952_v42 = vld [vmem:[#allocation5_spill] sm:$0xff] }
  0xf0   : > { %1484 = vst.msk [vmem:[#allocation2 + $0x30] sm:$0xff] %vm1480_vm12, %v1397_v34  ;;  %1042 = vrot.lane.b32.xlu1 %v2641_v46, %s2340_s17  ;;  %1028 = vrot.lane.b32.xlu0 %v2594_v12, %s2340_s17  ;;  %v3288_v46 = vrot.slane %v2849_v52, 1  ;;  %v266_v34 = vld [vmem:[%s2492_s25 + $0xe8] sm:$0xff] }
  0xf2   : > { %v885_v29 = vpop.permute.xlu1 %884  ;;  %v756_v41 = vpop.permute.xlu0 %755  ;;  %v1576_v24 = vld [vmem:[#allocation2 + $0x20] sm:$0xff]  ;;  %v3294_v62 = vsel %vm703_vm4, %v740_v50, %v3288_v46  ;;  %1565 = vst.msk [vmem:[#allocation2 + $0x178] sm:$0x7f] %vm1542_vm3, %v3288_v46 }
  0xf3   : > { %978 = vst.msk [vmem:[#allocation2 + $0x40] sm:$0xfe] %vm972_vm6, %v885_v29 }
  0xf4   : > { %844 = vst.msk [vmem:[#allocation2 + $0x50] sm:$0x7f] %vm841_vm15, %v756_v41  ;;  %1158 = vrot.lane.b32.xlu1 %v3044_v53, %s2341_s23  ;;  %1044 = vrot.lane.b32.xlu0 %v2639_v45, %s2340_s17  ;;  %v3351_v41 = vld [vmem:[%s3910_s1] ss:$0 sm:$0xff] }
  0xf5   : > { %1564 = vst.msk [vmem:[#allocation2 + $0x168] sm:$0xff] %vm380_vm0, %v3294_v62  ;;  %v305_v15 = vmul.f32 %v3351_v41, %v266_v34  ;;  %v3956_v34 = vld [vmem:[#allocation8_spill] sm:$0xff] }
  0xf6   : > { %v1015_v12 = vpop.permute.xlu1 %1014  ;;  %v887_v56 = vpop.permute.xlu0 %886 }
  0xf7   : > { %v1578_v40 = vld [vmem:[#allocation2 + $0x30] sm:$0xff]  ;;  %1107 = vst.msk [vmem:[#allocation2 + $0x40] sm:$0xff] %vm1102_vm7, %v1015_v12  ;;  %v344_v50 = vadd.f32 %v3363_v20, %v305_v15  ;;  %v268_v15 = vld [vmem:[%s2492_s25 + $0xf8] sm:$0xff] }
  0xf8   : > { %979 = vst.msk [vmem:[#allocation2 + $0x50] sm:$0xff] %vm974_vm8, %v887_v56  ;;  %v1638_v43 = vpack.c.bf16 %v1578_v40, %v1576_v24  ;;  %1174 = vrot.lane.b32.xlu1 %v3060_v63, %s2341_s23  ;;  %1160 = vrot.lane.b32.xlu0 %v3040_v10, %s2341_s23 }
  0xfa   : > { %1829 = vmatmul.mubr.bf16.gmra.mxu0 %v1638_v43  ;;  %v1147_v45 = vpop.permute.xlu1 %1146  ;;  %v1017_v13 = vpop.permute.xlu0 %1016 }
  0xfb   : > { %2264 = vmatprep.mubr.msk.bf16.mxu0 %vm380_vm0, %v1641_v49  ;;  %1240 = vst.msk [vmem:[#allocation2 + $0x40] sm:$0xff] %vm1234_vm9, %v1147_v45  ;;  %v3951_v49 = vld [vmem:[#allocation13_spill] sm:$0xff] }
  0xfc   : > { %1108 = vst.msk [vmem:[#allocation2 + $0x50] sm:$0xff] %vm1102_vm7, %v1017_v13  ;;  %1288 = vrot.lane.b32.xlu1 %v2754_v23, %s2342_s27  ;;  %1176 = vrot.lane.b32.xlu0 %v3056_v32, %s2341_s23 }
  0xfe   : > { %v1277_v26 = vpop.permute.xlu1 %1276  ;;  %v1149_v21 = vpop.permute.xlu0 %1148 }
  0xff   : > { %1364 = vst.msk [vmem:[#allocation2 + $0x40] sm:$0xfe] %vm1358_vm10, %v1277_v26  ;;  %v746_v26 = vrot.slane %v2913_v28, 1 }
 0x100   : > { %1241 = vst.msk [vmem:[#allocation2 + $0x50] sm:$0x7f] %vm1236_vm11, %v1149_v21  ;;  %1304 = vrot.lane.b32.xlu1 %v2810_v8, %s2342_s27  ;;  %1290 = vrot.lane.b32.xlu0 %v2786_v37, %s2342_s27 }
 0x102   : > { %v1399_v25 = vpop.permute.xlu1 %1398  ;;  %v1279_v9 = vpop.permute.xlu0 %1278 }
 0x103   : > { %1485 = vst.msk [vmem:[#allocation2 + $0x40] sm:$0xff] %vm1480_vm12, %v1399_v25 }
 0x104   : > { %1365 = vst.msk [vmem:[#allocation2 + $0x50] sm:$0xff] %vm1360_vm13, %v1279_v9  ;;  %1410 = vrot.lane.b32.xlu1 %v2620_v31, %s2343_s6  ;;  %1306 = vrot.lane.b32.xlu0 %v2860_v0, %s2342_s27 }
 0x106   : > { %v758_v33 = vpop.permute.xlu1 %757  ;;  %v1401_v22 = vpop.permute.xlu0 %1400 }
 0x107   : > { %845 = vst.msk [vmem:[#allocation2 + $0x60] sm:$0xff] %vm839_vm14, %v758_v33 }
 0x108   : > { %1486 = vst.msk [vmem:[#allocation2 + $0x50] sm:$0xff] %vm1480_vm12, %v1401_v22  ;;  %1426 = vrot.lane.b32.xlu1 %v2651_v48, %s2343_s6  ;;  %1412 = vrot.lane.b32.xlu0 %v2615_v27, %s2343_s6 }
 0x10a   : > { %v889_v14 = vpop.permute.xlu1 %888  ;;  %v760_v11 = vpop.permute.xlu0 %759  ;;  %v1580_v60 = vld [vmem:[#allocation2 + $0x40] sm:$0xff] }
 0x10b   : > { %980 = vst.msk [vmem:[#allocation2 + $0x60] sm:$0xfe] %vm972_vm6, %v889_v14 }
 0x10c   : > { %846 = vst.msk [vmem:[#allocation2 + $0x70] sm:$0x7f] %vm841_vm15, %v760_v11  ;;  %769 = vrot.lane.b32.xlu1 %v3044_v53, %s2344_s7  ;;  %1428 = vrot.lane.b32.xlu0 %v2643_v47, %s2343_s6  ;;  %v3344_v53 = vsel %vm703_vm4, %v743_v59, %v3337_v4 }
 0x10d   : > { %1566 = vst.msk [vmem:[#allocation2 + $0x188] sm:$0xff] %vm380_vm0, %v3344_v53 }
 0x10e   : > { %v1019_v54 = vpop.permute.xlu1 %1018  ;;  %v891_v57 = vpop.permute.xlu0 %890 }
 0x10f   : > { %v1582_v35 = vld [vmem:[#allocation2 + $0x50] sm:$0xff]  ;;  %1109 = vst.msk [vmem:[#allocation2 + $0x60] sm:$0xff] %vm1102_vm7, %v1019_v54  ;;  %v3953_v54 = vld [vmem:[#allocation7_spill] sm:$0xff] }
 0x110   : > { %981 = vst.msk [vmem:[#allocation2 + $0x70] sm:$0xff] %vm974_vm8, %v891_v57  ;;  %v1640_v29 = vpack.c.bf16 %v1582_v35, %v1580_v60  ;;  %785 = vrot.lane.b32.xlu1 %v3060_v63, %s2344_s7  ;;  %771 = vrot.lane.b32.xlu0 %v3040_v10, %s2344_s7  ;;  %v3369_v10 = vmax.f32 %v344_v50, 0.0  ;;  %v3954_v57 = vld [vmem:[#allocation6_spill] sm:$0xff] }
 0x112   : > { %1837 = vmatmul.mubr.bf16.gmra.mxu0 %v1640_v29  ;;  %v1151_v12 = vpop.permute.xlu1 %1150  ;;  %v1021_v56 = vpop.permute.xlu0 %1020  ;;  %v518_v63 = vrot.slane %v3369_v10, 7  ;;  %v267_v29 = vld [vmem:[%s2492_s25 + $0xf0] sm:$0xff] }
 0x113   : > { %2265 = vmatprep.mubr.msk.bf16.mxu0 %vm380_vm0, %v1643_v17  ;;  %1242 = vst.msk [vmem:[#allocation2 + $0x60] sm:$0xff] %vm1234_vm9, %v1151_v12  ;;  %v3955_v17 = vld [vmem:[#allocation4_spill] sm:$0xff] }
 0x114   : > { %1110 = vst.msk [vmem:[#allocation2 + $0x70] sm:$0xff] %vm1102_vm7, %v1021_v56  ;;  %900 = vrot.lane.b32.xlu1 %v2754_v23, %s2339_s14  ;;  %787 = vrot.lane.b32.xlu0 %v3056_v32, %s2344_s7  ;;  %v3380_v43 = vsel %vm474_vm2, %v3951_v49, %v518_v63  ;;  %v306_v56 = vmul.f32 %v3351_v41, %v267_v29 }
 0x115   : > { %581 = vst.msk [vmem:[#allocation2 + $0x1f0] sm:$0xff] %vm380_vm0, %v3380_v43  ;;  %v307_v63 = vmul.f32 %v3351_v41, %v268_v15 }
 0x116   : > { %v1281_v24 = vpop.permute.xlu1 %1280  ;;  %v1153_v40 = vpop.permute.xlu0 %1152 }
 0x117   : > { %1366 = vst.msk [vmem:[#allocation2 + $0x60] sm:$0xfe] %vm1358_vm10, %v1281_v24  ;;  %v3957_v24 = vld [vmem:[#allocation3_spill] sm:$0xff] }
 0x118   : > { %1243 = vst.msk [vmem:[#allocation2 + $0x70] sm:$0x7f] %vm1236_vm11, %v1153_v40  ;;  %916 = vrot.lane.b32.xlu1 %v2810_v8, %s2339_s14  ;;  %902 = vrot.lane.b32.xlu0 %v2786_v37, %s2339_s14 }
 0x11a   : > { %v1403_v23 = vpop.permute.xlu1 %1402  ;;  %v1283_v32 = vpop.permute.xlu0 %1282 }
 0x11b   : > { %1487 = vst.msk [vmem:[#allocation2 + $0x60] sm:$0xff] %vm1480_vm12, %v1403_v23 }
 0x11c   : > { %1367 = vst.msk [vmem:[#allocation2 + $0x70] sm:$0xff] %vm1360_vm13, %v1283_v32  ;;  %1030 = vrot.lane.b32.xlu1 %v2620_v31, %s2340_s17  ;;  %918 = vrot.lane.b32.xlu0 %v2860_v0, %s2339_s14  ;;  %v1589_v31 = vld [vmem:[#allocation2 + $0x88] sm:$0xff]  ;;  %v1591_v0 = vld [vmem:[#allocation2 + $0x98] sm:$0xff]  ;;  %v345_v32 = vadd.f32 %v3363_v20, %v306_v56 }
 0x11d   : > { %v1645_v33 = vpack.c.bf16 %v1591_v0, %v1589_v31 }
 0x11e   : > { %v762_v45 = vpop.permute.xlu1 %761  ;;  %v1405_v8 = vpop.permute.xlu0 %1404 }
 0x11f   : > { %847 = vst.msk [vmem:[#allocation2 + $0x80] sm:$0xff] %vm839_vm14, %v762_v45  ;;  %v346_v45 = vadd.f32 %v3363_v20, %v307_v63 }
 0x120   : > { %1488 = vst.msk [vmem:[#allocation2 + $0x70] sm:$0xff] %vm1480_vm12, %v1405_v8  ;;  %1046 = vrot.lane.b32.xlu1 %v2651_v48, %s2340_s17  ;;  %1032 = vrot.lane.b32.xlu0 %v2615_v27, %s2340_s17  ;;  %v3408_v48 = vrot.slane %v3369_v10, 1 }
 0x122   : > { %v778_v37 = vpop.permute.xlu1 %777  ;;  %v764_v13 = vpop.permute.xlu0 %763  ;;  %v1584_v25 = vld [vmem:[#allocation2 + $0x60] sm:$0xff]  ;;  %v3414_v14 = vsel %vm703_vm4, %v746_v26, %v3408_v48  ;;  %1569 = vst.msk [vmem:[#allocation2 + $0x1b8] sm:$0x7f] %vm1542_vm3, %v3408_v48 }
 0x123   : > { %855 = vst.msk [vmem:[#allocation2 + $0x100] sm:$0xff] %vm839_vm14, %v778_v37  ;;  %v3463_v37 = vmax.f32 %v345_v32, 0.0 }
 0x124   : > { %848 = vst.msk [vmem:[#allocation2 + $0x90] sm:$0x7f] %vm841_vm15, %v764_v13  ;;  %1162 = vrot.lane.b32.xlu1 %v3130_v18, %s2341_s23  ;;  %1048 = vrot.lane.b32.xlu0 %v2643_v47, %s2340_s17  ;;  %v3465_v13 = vmax.f32 %v346_v45, 0.0 }
 0x125   : > { %1568 = vst.msk [vmem:[#allocation2 + $0x1a8] sm:$0xff] %vm380_vm0, %v3414_v14  ;;  %v1135_v20 = vrot.slane %v3463_v37, 1 }
 0x126   : > { %v893_v27 = vpop.permute.xlu1 %892  ;;  %v780_v21 = vpop.permute.xlu0 %779 }
 0x127   : > { %v1586_v9 = vld [vmem:[#allocation2 + $0x70] sm:$0xff]  ;;  %982 = vst.msk [vmem:[#allocation2 + $0x80] sm:$0xfe] %vm972_vm6, %v893_v27 }
 0x128   : > { %856 = vst.msk [vmem:[#allocation2 + $0x110] sm:$0x7f] %vm841_vm15, %v780_v21  ;;  %v1642_v22 = vpack.c.bf16 %v1586_v9, %v1584_v25  ;;  %1178 = vrot.lane.b32.xlu1 %v3148_v5, %s2341_s23  ;;  %1164 = vrot.lane.b32.xlu0 %v3124_v6, %s2341_s23  ;;  %v1593_v9 = vld [vmem:[#allocation2 + $0xa8] sm:$0xff] }
 0x12a   : > { %1845 = vmatmul.mubr.bf16.gmra.mxu0 %v1642_v22  ;;  %v909_v47 = vpop.permute.xlu1 %908  ;;  %v895_v11 = vpop.permute.xlu0 %894 }
 0x12b   : > { %2266 = vmatprep.mubr.msk.bf16.mxu0 %vm380_vm0, %v1645_v33  ;;  %990 = vst.msk [vmem:[#allocation2 + $0x100] sm:$0xfe] %vm972_vm6, %v909_v47  ;;  %v1595_v33 = vld [vmem:[#allocation2 + $0xb8] sm:$0xff] }
 0x12c   : > { %983 = vst.msk [vmem:[#allocation2 + $0x90] sm:$0xff] %vm974_vm8, %v895_v11  ;;  %1292 = vrot.lane.b32.xlu1 %v3952_v42, %s2342_s27  ;;  %1180 = vrot.lane.b32.xlu0 %v3142_v2, %s2341_s23 }
 0x12e   : > { %v1023_v7 = vpop.permute.xlu1 %1022  ;;  %v911_v59 = vpop.permute.xlu0 %910 }
 0x12f   : > { %1111 = vst.msk [vmem:[#allocation2 + $0x80] sm:$0xff] %vm1102_vm7, %v1023_v7  ;;  %v1647_v7 = vpack.c.bf16 %v1595_v33, %v1593_v9  ;;  %v1613_v9 = vld [vmem:[#allocation2 + $0x148] sm:$0xff]  ;;  %v1615_v33 = vld [vmem:[#allocation2 + $0x158] sm:$0xff] }
 0x130   : > { %991 = vst.msk [vmem:[#allocation2 + $0x110] sm:$0xff] %vm974_vm8, %v911_v59  ;;  %1308 = vrot.lane.b32.xlu1 %v3953_v54, %s2342_s27  ;;  %1294 = vrot.lane.b32.xlu0 %v3954_v57, %s2342_s27 }
 0x132   : > { %v1039_v60 = vpop.permute.xlu1 %1038  ;;  %v1025_v35 = vpop.permute.xlu0 %1024 }
 0x133   : > { %1119 = vst.msk [vmem:[#allocation2 + $0x100] sm:$0xff] %vm1102_vm7, %v1039_v60  ;;  %1112 = vst.msk [vmem:[#allocation2 + $0x90] sm:$0xff] %vm1102_vm7, %v1025_v35 }
 0x134   : > { %1414 = vrot.lane.b32.xlu1 %v3955_v17, %s2343_s6  ;;  %1310 = vrot.lane.b32.xlu0 %v3956_v34, %s2342_s27 }
 0x136   : > { %v1155_v50 = vpop.permute.xlu1 %1154  ;;  %v1041_v12 = vpop.permute.xlu0 %1040 }
 0x137   : > { %1244 = vst.msk [vmem:[#allocation2 + $0x80] sm:$0xff] %vm1234_vm9, %v1155_v50 }
 0x138   : > { %1120 = vst.msk [vmem:[#allocation2 + $0x110] sm:$0xff] %vm1102_vm7, %v1041_v12  ;;  %1430 = vrot.lane.b32.xlu1 %v2661_v55, %s2343_s6  ;;  %1416 = vrot.lane.b32.xlu0 %v3957_v24, %s2343_s6 }
 0x13a   : > { %v1171_v40 = vpop.permute.xlu1 %1170  ;;  %v1157_v23 = vpop.permute.xlu0 %1156 }
 0x13b   : > { %1252 = vst.msk [vmem:[#allocation2 + $0x100] sm:$0xff] %vm1234_vm9, %v1171_v40 }
 0x13c   : > { %1245 = vst.msk [vmem:[#allocation2 + $0x90] sm:$0x7f] %vm1236_vm11, %v1157_v23  ;;  %773 = vrot.lane.b32.xlu1 %v3130_v18, %s2344_s7  ;;  %1432 = vrot.lane.b32.xlu0 %v2653_v51, %s2343_s6  ;;  %v3472_v18 = vrot.slane %v3465_v13, 1 }
 0x13e   : > { %v1285_v41 = vpop.permute.xlu1 %1284  ;;  %v1173_v8 = vpop.permute.xlu0 %1172  ;;  %1571 = vst.msk [vmem:[#allocation2 + $0x1d8] sm:$0x7f] %vm1542_vm3, %v3472_v18 }
 0x13f   : > { %1368 = vst.msk [vmem:[#allocation2 + $0x80] sm:$0xfe] %vm1358_vm10, %v1285_v41 }
 0x140   : > { %1253 = vst.msk [vmem:[#allocation2 + $0x110] sm:$0x7f] %vm1236_vm11, %v1173_v8  ;;  %789 = vrot.lane.b32.xlu1 %v3148_v5, %s2344_s7  ;;  %775 = vrot.lane.b32.xlu0 %v3124_v6, %s2344_s7  ;;  %v3481_v5 = vsel %vm703_vm4, %v1135_v20, %v3472_v18 }
 0x141   : > { %1570 = vst.msk [vmem:[#allocation2 + $0x1c8] sm:$0xff] %vm380_vm0, %v3481_v5 }
 0x142   : > { %v1301_v31 = vpop.permute.xlu1 %1300  ;;  %v1287_v0 = vpop.permute.xlu0 %1286 }
 0x143   : > { %1376 = vst.msk [vmem:[#allocation2 + $0x100] sm:$0xfe] %vm1358_vm10, %v1301_v31  ;;  %v1597_v31 = vld [vmem:[#allocation2 + $0xc8] sm:$0xff] }
 0x144   : > { %1369 = vst.msk [vmem:[#allocation2 + $0x90] sm:$0xff] %vm1360_vm13, %v1287_v0  ;;  %904 = vrot.lane.b32.xlu1 %v3952_v42, %s2339_s14  ;;  %791 = vrot.lane.b32.xlu0 %v3142_v2, %s2344_s7  ;;  %v3961_v0 = vld [vmem:[#allocation12_spill] sm:$0xff] }
 0x146   : > { %v1407_v6 = vpop.permute.xlu1 %1406  ;;  %v1303_v26 = vpop.permute.xlu0 %1302 }
 0x147   : > { %1489 = vst.msk [vmem:[#allocation2 + $0x80] sm:$0xff] %vm1480_vm12, %v1407_v6 }
 0x148   : > { %1377 = vst.msk [vmem:[#allocation2 + $0x110] sm:$0xff] %vm1360_vm13, %v1303_v26  ;;  %920 = vrot.lane.b32.xlu1 %v3953_v54, %s2339_s14  ;;  %906 = vrot.lane.b32.xlu0 %v3954_v57, %s2339_s14  ;;  %v1609_v54 = vld [vmem:[#allocation2 + $0x128] sm:$0xff]  ;;  %v1611_v57 = vld [vmem:[#allocation2 + $0x138] sm:$0xff] }
 0x14a   : > { %v1423_v27 = vpop.permute.xlu1 %1422  ;;  %v1409_v21 = vpop.permute.xlu0 %1408 }
 0x14b   : > { %1497 = vst.msk [vmem:[#allocation2 + $0x100] sm:$0xff] %vm1480_vm12, %v1423_v27  ;;  %1490 = vst.msk [vmem:[#allocation2 + $0x90] sm:$0xff] %vm1480_vm12, %v1409_v21 }
 0x14c   : > { %1034 = vrot.lane.b32.xlu1 %v3955_v17, %s2340_s17  ;;  %922 = vrot.lane.b32.xlu0 %v3956_v34, %s2339_s14  ;;  %v1655_v34 = vpack.c.bf16 %v1611_v57, %v1609_v54 }
 0x14e   : > { %v766_v2 = vpop.permute.xlu1 %765  ;;  %v1425_v25 = vpop.permute.xlu0 %1424  ;;  %v1588_v11 = vld [vmem:[#allocation2 + $0x80] sm:$0xff] }
 0x14f   : > { %849 = vst.msk [vmem:[#allocation2 + $0xa0] sm:$0xff] %vm839_vm14, %v766_v2 }
 0x150   : > { %1498 = vst.msk [vmem:[#allocation2 + $0x110] sm:$0xff] %vm1480_vm12, %v1425_v25  ;;  %1050 = vrot.lane.b32.xlu1 %v2661_v55, %s2340_s17  ;;  %1036 = vrot.lane.b32.xlu0 %v3957_v24, %s2340_s17 }
 0x152   : > { %v782_v22 = vpop.permute.xlu1 %781  ;;  %v768_v47 = vpop.permute.xlu0 %767  ;;  %v1590_v42 = vld [vmem:[#allocation2 + $0x90] sm:$0xff]  ;;  %v1604_v35 = vld [vmem:[#allocation2 + $0x100] sm:$0xff] }
 0x153   : > { %857 = vst.msk [vmem:[#allocation2 + $0x120] sm:$0xff] %vm839_vm14, %v782_v22  ;;  %v1644_v59 = vpack.c.bf16 %v1590_v42, %v1588_v11 }
 0x154   : > { %850 = vst.msk [vmem:[#allocation2 + $0xb0] sm:$0x7f] %vm841_vm15, %v768_v47  ;;  %1166 = vrot.lane.b32.xlu1 %v2841_v58, %s2341_s23  ;;  %1052 = vrot.lane.b32.xlu0 %v2653_v51, %s2340_s17 }
 0x155   : > { %1853 = vmatmul.mubr.bf16.gmra.mxu0 %v1644_v59 }
 0x156   : > { %v897_v55 = vpop.permute.xlu1 %896  ;;  %v784_v60 = vpop.permute.xlu0 %783  ;;  %2267 = vmatprep.mubr.msk.bf16.mxu0 %vm380_vm0, %v1647_v7  ;;  %v1657_v7 = vpack.c.bf16 %v1615_v33, %v1613_v9 }
 0x157   : > { %v1606_v17 = vld [vmem:[#allocation2 + $0x110] sm:$0xff]  ;;  %984 = vst.msk [vmem:[#allocation2 + $0xa0] sm:$0xfe] %vm972_vm6, %v897_v55 }
 0x158   : > { %858 = vst.msk [vmem:[#allocation2 + $0x130] sm:$0x7f] %vm841_vm15, %v784_v60  ;;  %v1652_v29 = vpack.c.bf16 %v1606_v17, %v1604_v35  ;;  %1182 = vrot.lane.b32.xlu1 %v3232_v30, %s2341_s23  ;;  %1168 = vrot.lane.b32.xlu0 %v2807_v3, %s2341_s23  ;;  %v3958_v3 = vld [vmem:[#allocation9_spill] sm:$0xff] }
 0x15a   : > { %1885 = vmatmul.mubr.bf16.vlgmr.msra.gmra.mxu1 %v1652_v29  ;;  %v913_v51 = vpop.permute.xlu1 %912  ;;  %v899_v58 = vpop.permute.xlu0 %898 }
 0x15b   : > { %2271 = vmatprep.mubr.msk.bf16.mxu1 %vm380_vm0, %v1655_v34  ;;  %992 = vst.msk [vmem:[#allocation2 + $0x120] sm:$0xfe] %vm972_vm6, %v913_v51 }
 0x15c   : > { %985 = vst.msk [vmem:[#allocation2 + $0xb0] sm:$0xff] %vm974_vm8, %v899_v58  ;;  %1296 = vrot.lane.b32.xlu1 %v2778_v36, %s2342_s27  ;;  %1184 = vrot.lane.b32.xlu0 %v3226_v61, %s2341_s23  ;;  %v3959_v36 = vld [vmem:[#allocation10_spill] sm:$0xff] }
 0x15e   : > { %v1027_v15 = vpop.permute.xlu1 %1026  ;;  %v915_v50 = vpop.permute.xlu0 %914 }
 0x15f   : > { %1113 = vst.msk [vmem:[#allocation2 + $0xa0] sm:$0xff] %vm1102_vm7, %v1027_v15 }
 0x160   : > { %993 = vst.msk [vmem:[#allocation2 + $0x130] sm:$0xff] %vm974_vm8, %v915_v50  ;;  %1312 = vrot.lane.b32.xlu1 %v3958_v3, %s2342_s27  ;;  %1298 = vrot.lane.b32.xlu0 %v2817_v19, %s2342_s27 }
 0x162   : > { %v1043_v12 = vpop.permute.xlu1 %1042  ;;  %v1029_v56 = vpop.permute.xlu0 %1028 }
 0x163   : > { %1121 = vst.msk [vmem:[#allocation2 + $0x120] sm:$0xff] %vm1102_vm7, %v1043_v12  ;;  %1114 = vst.msk [vmem:[#allocation2 + $0xb0] sm:$0xff] %vm1102_vm7, %v1029_v56 }
 0x164   : > { %1418 = vrot.lane.b32.xlu1 %v2637_v44, %s2343_s6  ;;  %1314 = vrot.lane.b32.xlu0 %v3959_v36, %s2342_s27 }
 0x166   : > { %v1159_v63 = vpop.permute.xlu1 %1158  ;;  %v1045_v24 = vpop.permute.xlu0 %1044 }
 0x167   : > { %1246 = vst.msk [vmem:[#allocation2 + $0xa0] sm:$0xff] %vm1234_vm9, %v1159_v63 }
 0x168   : > { %1122 = vst.msk [vmem:[#allocation2 + $0x130] sm:$0xff] %vm1102_vm7, %v1045_v24  ;;  %1434 = vrot.lane.b32.xlu1 %v2852_v38, %s2343_s6  ;;  %1420 = vrot.lane.b32.xlu0 %v2629_v39, %s2343_s6 }
 0x16a   : > { %v1175_v19 = vpop.permute.xlu1 %1174  ;;  %v1161_v40 = vpop.permute.xlu0 %1160 }
 0x16b   : > { %1254 = vst.msk [vmem:[#allocation2 + $0x120] sm:$0xff] %vm1234_vm9, %v1175_v19  ;;  %v873_v19 = vrot.slane %v3463_v37, 7 }
 0x16c   : > { %1247 = vst.msk [vmem:[#allocation2 + $0xb0] sm:$0x7f] %vm1236_vm11, %v1161_v40  ;;  %793 = vrot.lane.b32.xlu1 %v3232_v30, %s2344_s7  ;;  %1436 = vrot.lane.b32.xlu0 %v2849_v52, %s2343_s6 }
 0x16e   : > { %v1289_v44 = vpop.permute.xlu1 %1288  ;;  %v1177_v23 = vpop.permute.xlu0 %1176 }
 0x16f   : > { %1370 = vst.msk [vmem:[#allocation2 + $0xa0] sm:$0xfe] %vm1358_vm10, %v1289_v44  ;;  %v874_v44 = vrot.slane %v3465_v13, 7 }
 0x170   : > { %1255 = vst.msk [vmem:[#allocation2 + $0x130] sm:$0x7f] %vm1236_vm11, %v1177_v23  ;;  %924 = vrot.lane.b32.xlu1 %v3958_v3, %s2339_s14  ;;  %795 = vrot.lane.b32.xlu0 %v3226_v61, %s2344_s7 }
 0x172   : > { %v1305_v39 = vpop.permute.xlu1 %1304  ;;  %v1291_v32 = vpop.permute.xlu0 %1290 }
 0x173   : > { %1378 = vst.msk [vmem:[#allocation2 + $0x120] sm:$0xfe] %vm1358_vm10, %v1305_v39 }
 0x174   : > { %1371 = vst.msk [vmem:[#allocation2 + $0xb0] sm:$0xff] %vm1360_vm13, %v1291_v32  ;;  %1054 = vrot.lane.b32.xlu1 %v2852_v38, %s2340_s17  ;;  %926 = vrot.lane.b32.xlu0 %v3959_v36, %s2339_s14  ;;  %v3960_v38 = vld [vmem:[#allocation11_spill] sm:$0xff]  ;;  %v875_v32 = vsel %vm474_vm2, %v873_v19, %v874_v44 }
 0x176   : > { %v1411_v30 = vpop.permute.xlu1 %1410  ;;  %v1307_v45 = vpop.permute.xlu0 %1306 }
 0x177   : > { %1491 = vst.msk [vmem:[#allocation2 + $0xa0] sm:$0xff] %vm1480_vm12, %v1411_v30 }
 0x178   : > { %1379 = vst.msk [vmem:[#allocation2 + $0x130] sm:$0xff] %vm1360_vm13, %v1307_v45  ;;  %1186 = vrot.lane.b32.xlu1 %v3294_v62, %s2341_s23  ;;  %1056 = vrot.lane.b32.xlu0 %v2849_v52, %s2340_s17  ;;  %v1599_v52 = vld [vmem:[#allocation2 + $0xd8] sm:$0xff] }
 0x179   : > { %v1649_v2 = vpack.c.bf16 %v1599_v52, %v1597_v31 }
 0x17a   : > { %v1427_v61 = vpop.permute.xlu1 %1426  ;;  %v1413_v41 = vpop.permute.xlu0 %1412 }
 0x17b   : > { %1499 = vst.msk [vmem:[#allocation2 + $0x120] sm:$0xff] %vm1480_vm12, %v1427_v61  ;;  %1492 = vst.msk [vmem:[#allocation2 + $0xb0] sm:$0xff] %vm1480_vm12, %v1413_v41  ;;  %v1601_v61 = vld [vmem:[#allocation2 + $0xe8] sm:$0xff]  ;;  %v1603_v41 = vld [vmem:[#allocation2 + $0xf8] sm:$0xff] }
 0x17c   : > { %1316 = vrot.lane.b32.xlu1 %v3960_v38, %s2342_s27  ;;  %1188 = vrot.lane.b32.xlu0 %v3288_v46, %s2341_s23  ;;  %v1651_v52 = vpack.c.bf16 %v1603_v41, %v1601_v61 }
 0x17e   : > { %v770_v8 = vpop.permute.xlu1 %769  ;;  %v1429_v20 = vpop.permute.xlu0 %1428  ;;  %v1592_v27 = vld [vmem:[#allocation2 + $0xa0] sm:$0xff] }
 0x17f   : > { %851 = vst.msk [vmem:[#allocation2 + $0xc0] sm:$0xff] %vm839_vm14, %v770_v8 }
 0x180   : > { %1500 = vst.msk [vmem:[#allocation2 + $0x130] sm:$0xff] %vm1480_vm12, %v1429_v20  ;;  %1438 = vrot.lane.b32.xlu1 %v2883_v16, %s2343_s6  ;;  %1318 = vrot.lane.b32.xlu0 %v3961_v0, %s2342_s27 }
 0x182   : > { %v786_v6 = vpop.permute.xlu1 %785  ;;  %v772_v26 = vpop.permute.xlu0 %771  ;;  %v1594_v21 = vld [vmem:[#allocation2 + $0xb0] sm:$0xff]  ;;  %v1608_v11 = vld [vmem:[#allocation2 + $0x120] sm:$0xff] }
 0x183   : > { %859 = vst.msk [vmem:[#allocation2 + $0x140] sm:$0xff] %vm839_vm14, %v786_v6  ;;  %v1646_v25 = vpack.c.bf16 %v1594_v21, %v1592_v27  ;;  %v1617_v6 = vld [vmem:[#allocation2 + $0x168] sm:$0xff] }
 0x184   : > { %852 = vst.msk [vmem:[#allocation2 + $0xd0] sm:$0x7f] %vm841_vm15, %v772_v26  ;;  %797 = vrot.lane.b32.xlu1 %v3294_v62, %s2344_s7  ;;  %1440 = vrot.lane.b32.xlu0 %v2881_v1, %s2343_s6  ;;  %v1619_v26 = vld [vmem:[#allocation2 + $0x178] sm:$0xff] }
 0x185   : > { %1861 = vmatmul.mubr.bf16.gmra.mxu0 %v1646_v25  ;;  %v1659_v9 = vpack.c.bf16 %v1619_v26, %v1617_v6 }
 0x186   : > { %v901_v22 = vpop.permute.xlu1 %900  ;;  %v788_v47 = vpop.permute.xlu0 %787  ;;  %2268 = vmatprep.mubr.msk.bf16.mxu0 %vm380_vm0, %v1649_v2 }
 0x187   : > { %v1610_v42 = vld [vmem:[#allocation2 + $0x130] sm:$0xff]  ;;  %986 = vst.msk [vmem:[#allocation2 + $0xc0] sm:$0xfe] %vm972_vm6, %v901_v22 }
 0x188   : > { %860 = vst.msk [vmem:[#allocation2 + $0x150] sm:$0x7f] %vm841_vm15, %v788_v47  ;;  %v1654_v59 = vpack.c.bf16 %v1610_v42, %v1608_v11  ;;  %928 = vrot.lane.b32.xlu1 %v3960_v38, %s2339_s14  ;;  %799 = vrot.lane.b32.xlu0 %v3288_v46, %s2344_s7 }
 0x18a   : > { %1893 = vmatmul.mubr.bf16.gmra.mxu1 %v1654_v59  ;;  %v917_v62 = vpop.permute.xlu1 %916  ;;  %v903_v54 = vpop.permute.xlu0 %902 }
 0x18b   : > { %2272 = vmatprep.mubr.msk.bf16.mxu1 %vm380_vm0, %v1657_v7  ;;  %994 = vst.msk [vmem:[#allocation2 + $0x140] sm:$0xfe] %vm972_vm6, %v917_v62 }
 0x18c   : > { %987 = vst.msk [vmem:[#allocation2 + $0xd0] sm:$0xff] %vm974_vm8, %v903_v54  ;;  %1058 = vrot.lane.b32.xlu1 %v2883_v16, %s2340_s17  ;;  %930 = vrot.lane.b32.xlu0 %v3961_v0, %s2339_s14 }
 0x18e   : > { %v1031_v57 = vpop.permute.xlu1 %1030  ;;  %v919_v55 = vpop.permute.xlu0 %918 }
 0x18f   : > { %1115 = vst.msk [vmem:[#allocation2 + $0xc0] sm:$0xff] %vm1102_vm7, %v1031_v57 }
 0x190   : > { %995 = vst.msk [vmem:[#allocation2 + $0x150] sm:$0xff] %vm974_vm8, %v919_v55  ;;  %1190 = vrot.lane.b32.xlu1 %v3344_v53, %s2341_s23  ;;  %1060 = vrot.lane.b32.xlu0 %v2881_v1, %s2340_s17 }
 0x192   : > { %v1047_v46 = vpop.permute.xlu1 %1046  ;;  %v1033_v60 = vpop.permute.xlu0 %1032 }
 0x193   : > { %1123 = vst.msk [vmem:[#allocation2 + $0x140] sm:$0xff] %vm1102_vm7, %v1047_v46  ;;  %1116 = vst.msk [vmem:[#allocation2 + $0xd0] sm:$0xff] %vm1102_vm7, %v1033_v60 }
 0x194   : > { %1320 = vrot.lane.b32.xlu1 %v3951_v49, %s2342_s27  ;;  %1192 = vrot.lane.b32.xlu0 %v3337_v4, %s2341_s23 }
 0x196   : > { %v1163_v16 = vpop.permute.xlu1 %1162  ;;  %v1049_v35 = vpop.permute.xlu0 %1048 }
 0x197   : > { %1248 = vst.msk [vmem:[#allocation2 + $0xc0] sm:$0xff] %vm1234_vm9, %v1163_v16 }
 0x198   : > { %1124 = vst.msk [vmem:[#allocation2 + $0x150] sm:$0xff] %vm1102_vm7, %v1049_v35  ;;  %1442 = vrot.lane.b32.xlu1 %v2913_v28, %s2343_s6  ;;  %1322 = vrot.lane.b32.xlu0 %v3380_v43, %s2342_s27 }
 0x19a   : > { %v1179_v1 = vpop.permute.xlu1 %1178  ;;  %v1165_v17 = vpop.permute.xlu0 %1164 }
 0x19b   : > { %1256 = vst.msk [vmem:[#allocation2 + $0x140] sm:$0xff] %vm1234_vm9, %v1179_v1 }
 0x19c   : > { %1249 = vst.msk [vmem:[#allocation2 + $0xd0] sm:$0x7f] %vm1236_vm11, %v1165_v17  ;;  %801 = vrot.lane.b32.xlu1 %v3344_v53, %s2344_s7  ;;  %1444 = vrot.lane.b32.xlu0 %v3369_v10, %s2343_s6 }
 0x19e   : > { %v1293_v34 = vpop.permute.xlu1 %1292  ;;  %v1181_v29 = vpop.permute.xlu0 %1180 }
 0x19f   : > { %1372 = vst.msk [vmem:[#allocation2 + $0xc0] sm:$0xfe] %vm1358_vm10, %v1293_v34 }
 0x1a0   : > { %1257 = vst.msk [vmem:[#allocation2 + $0x150] sm:$0x7f] %vm1236_vm11, %v1181_v29  ;;  %932 = vrot.lane.b32.xlu1 %v3951_v49, %s2339_s14  ;;  %803 = vrot.lane.b32.xlu0 %v3337_v4, %s2344_s7 }
 0x1a2   : > { %v1822_v53 = vpop.f32.mrf.mxu0  ;;  %v1309_v51 = vpop.permute.xlu1 %1308 }
 0x1a3   : > { %1950 = vst.msk [vmem:[%s3632_s13] sm:$0xff] %vm1949_vm1, %v1822_v53  ;;  %v1295_v58 = vpop.permute.xlu0 %1294  ;;  %v2051_v50 = vmul.f32 %v1822_v53, %v1822_v53  ;;  %v1982_v4 = vsel %vm1949_vm1, %v1822_v53, 0.0 }
 0x1a4   : > { %1380 = vst.msk [vmem:[#allocation2 + $0x140] sm:$0xfe] %vm1358_vm10, %v1309_v51  ;;  %v1824_v15 = vpop.f32.mrf.mxu0  ;;  %1062 = vrot.lane.b32.xlu1 %v2913_v28, %s2340_s17  ;;  %934 = vrot.lane.b32.xlu0 %v3380_v43, %s2339_s14 }
 0x1a5   : > { %1373 = vst.msk [vmem:[#allocation2 + $0xd0] sm:$0xff] %vm1360_vm13, %v1295_v58  ;;  %v2083_v28 = vsel %vm1949_vm1, %v2051_v50, 0.0 }
 0x1a6   : > { %v1825_v49 = vpop.f32.mrf.mxu0  ;;  %v1415_v56 = vpop.permute.xlu1 %1414 }
 0x1a7   : > { %1951 = vst.msk [vmem:[%s3632_s13 + $0x8] sm:$0xff] %vm1949_vm1, %v1825_v49  ;;  %v1983_v3 = vsel %vm1949_vm1, %v1825_v49, 0.0  ;;  %v2052_v12 = vmul.f32 %v1825_v49, %v1825_v49  ;;  %v1311_v36 = vpop.permute.xlu0 %1310 }
 0x1a8   : > { %v1984_v63 = vadd.f32 %v1983_v3, %v1982_v4  ;;  %1493 = vst.msk [vmem:[#allocation2 + $0xc0] sm:$0xff] %vm1480_vm12, %v1415_v56  ;;  %v1827_v24 = vpop.f32.mrf.mxu0  ;;  %1194 = vrot.lane.b32.xlu1 %v3414_v14, %s2341_s23  ;;  %1064 = vrot.lane.b32.xlu0 %v3369_v10, %s2340_s17 }
 0x1a9   : > { %1381 = vst.msk [vmem:[#allocation2 + $0x150] sm:$0xff] %vm1360_vm13, %v1311_v36  ;;  %v2084_v43 = vsel %vm1949_vm1, %v2052_v12, 0.0 }
 0x1aa   : > { %v2085_v40 = vadd.f32 %v2084_v43, %v2083_v28  ;;  %v1431_v23 = vpop.permute.xlu1 %1430 }
 0x1ab   : > { %v1417_v39 = vpop.permute.xlu0 %1416  ;;  %1501 = vst.msk [vmem:[#allocation2 + $0x140] sm:$0xff] %vm1480_vm12, %v1431_v23 }
 0x1ac   : > { %1494 = vst.msk [vmem:[#allocation2 + $0xd0] sm:$0xff] %vm1480_vm12, %v1417_v39  ;;  %1324 = vrot.lane.b32.xlu1 %v873_v19, %s2342_s27  ;;  %1196 = vrot.lane.b32.xlu0 %v3408_v48, %s2341_s23 }
 0x1ae   : > { %v774_v30 = vpop.permute.xlu1 %773 }
 0x1af   : > { %v1433_v45 = vpop.permute.xlu0 %1432  ;;  %853 = vst.msk [vmem:[#allocation2 + $0xe0] sm:$0xff] %vm839_vm14, %v774_v30  ;;  %v1596_v20 = vld [vmem:[#allocation2 + $0xc0] sm:$0xff] }
 0x1b0   : > { %1502 = vst.msk [vmem:[#allocation2 + $0x150] sm:$0xff] %vm1480_vm12, %v1433_v45  ;;  %1446 = vrot.lane.b32.xlu1 %v3463_v37, %s2343_s6  ;;  %1326 = vrot.lane.b32.xlu0 %v875_v32, %s2342_s27 }
 0x1b2   : > { %v790_v38 = vpop.permute.xlu1 %789  ;;  %v1612_v2 = vld [vmem:[#allocation2 + $0x140] sm:$0xff] }
 0x1b3   : > { %v776_v8 = vpop.permute.xlu0 %775  ;;  %v1598_v31 = vld [vmem:[#allocation2 + $0xd0] sm:$0xff]  ;;  %861 = vst.msk [vmem:[#allocation2 + $0x160] sm:$0xff] %vm839_vm14, %v790_v38 }
 0x1b4   : > { %854 = vst.msk [vmem:[#allocation2 + $0xf0] sm:$0x7f] %vm841_vm15, %v776_v8  ;;  %v1648_v0 = vpack.c.bf16 %v1598_v31, %v1596_v20  ;;  %640 = vrot.lane.b32.xlu1 %v3369_v10, %s2337_s28  ;;  %1448 = vrot.lane.b32.xlu0 %v3465_v13, %s2343_s6  ;;  %v1621_v31 = vld [vmem:[#allocation2 + $0x188] sm:$0xff] }
 0x1b6   : > { %1869 = vmatmul.mubr.bf16.gmra.mxu0 %v1648_v0  ;;  %v905_v27 = vpop.permute.xlu1 %904 }
 0x1b7   : > { %v792_v21 = vpop.permute.xlu0 %791  ;;  %v1614_v25 = vld [vmem:[#allocation2 + $0x150] sm:$0xff]  ;;  %2269 = vmatprep.mubr.msk.bf16.mxu0 %vm380_vm0, %v1651_v52  ;;  %988 = vst.msk [vmem:[#allocation2 + $0xe0] sm:$0xfe] %vm972_vm6, %v905_v27  ;;  %v1623_v52 = vld [vmem:[#allocation2 + $0x198] sm:$0xff] }
 0x1b8   : > { %862 = vst.msk [vmem:[#allocation2 + $0x170] sm:$0x7f] %vm841_vm15, %v792_v21  ;;  %v1656_v33 = vpack.c.bf16 %v1614_v25, %v1612_v2  ;;  %807 = vrot.lane.b32.xlu1 %v3408_v48, %s2344_s7  ;;  %805 = vrot.lane.b32.xlu0 %v3414_v14, %s2344_s7  ;;  %v1661_v21 = vpack.c.bf16 %v1623_v52, %v1621_v31 }
 0x1ba   : > { %v1830_v10 = vpop.f32.mrf.mxu0  ;;  %1901 = vmatmul.mubr.bf16.gmra.mxu1 %v1656_v33  ;;  %v921_v11 = vpop.permute.xlu1 %920 }
 0x1bb   : > { %1952 = vst.msk [vmem:[%s3632_s13 + $0x10] sm:$0xff] %vm1949_vm1, %v1830_v10  ;;  %v1985_v22 = vsel %vm1949_vm1, %v1830_v10, 0.0  ;;  %v2053_v47 = vmul.f32 %v1830_v10, %v1830_v10  ;;  %v907_v42 = vpop.permute.xlu0 %906  ;;  %2273 = vmatprep.mubr.msk.bf16.mxu1 %vm380_vm0, %v1659_v9 }
 0x1bc   : > { %v1986_v7 = vadd.f32 %v1985_v22, %v1984_v63  ;;  %996 = vst.msk [vmem:[#allocation2 + $0x160] sm:$0xfe] %vm972_vm6, %v921_v11  ;;  %v1832_v48 = vpop.f32.mrf.mxu0  ;;  %938 = vrot.lane.b32.xlu1 %v875_v32, %s2339_s14  ;;  %936 = vrot.lane.b32.xlu0 %v873_v19, %s2339_s14 }
 0x1bd   : > { %989 = vst.msk [vmem:[#allocation2 + $0xf0] sm:$0xff] %vm974_vm8, %v907_v42  ;;  %v2086_v14 = vsel %vm1949_vm1, %v2053_v47, 0.0 }
 0x1be   : > { %v2087_v59 = vadd.f32 %v2086_v14, %v2085_v40  ;;  %v1833_v62 = vpop.f32.mrf.mxu0  ;;  %v1035_v55 = vpop.permute.xlu1 %1034 }
 0x1bf   : > { %1953 = vst.msk [vmem:[%s3632_s13 + $0x18] sm:$0xff] %vm1949_vm1, %v1833_v62  ;;  %v1987_v54 = vsel %vm1949_vm1, %v1833_v62, 0.0  ;;  %v2054_v57 = vmul.f32 %v1833_v62, %v1833_v62  ;;  %v923_v46 = vpop.permute.xlu0 %922 }
 0x1c0   : > { %v1988_v60 = vadd.f32 %v1987_v54, %v1986_v7  ;;  %1117 = vst.msk [vmem:[#allocation2 + $0xe0] sm:$0xff] %vm1102_vm7, %v1035_v55  ;;  %v1835_v16 = vpop.f32.mrf.mxu0  ;;  %1068 = vrot.lane.b32.xlu1 %v3465_v13, %s2340_s17  ;;  %1066 = vrot.lane.b32.xlu0 %v3463_v37, %s2340_s17 }
 0x1c1   : > { %997 = vst.msk [vmem:[#allocation2 + $0x170] sm:$0xff] %vm974_vm8, %v923_v46  ;;  %v2088_v35 = vsel %vm1949_vm1, %v2054_v57, 0.0 }
 0x1c2   : > { %v2089_v1 = vadd.f32 %v2088_v35, %v2087_v59  ;;  %v1051_v17 = vpop.permute.xlu1 %1050 }
 0x1c3   : > { %v1037_v34 = vpop.permute.xlu0 %1036  ;;  %1125 = vst.msk [vmem:[#allocation2 + $0x160] sm:$0xff] %vm1102_vm7, %v1051_v17 }
 0x1c4   : > { %1118 = vst.msk [vmem:[#allocation2 + $0xf0] sm:$0xff] %vm1102_vm7, %v1037_v34  ;;  %1200 = vrot.lane.b32.xlu1 %v3472_v18, %s2341_s23  ;;  %1198 = vrot.lane.b32.xlu0 %v3481_v5, %s2341_s23 }
 0x1c6   : > { %v1167_v29 = vpop.permute.xlu1 %1166 }
 0x1c7   : > { %v1053_v53 = vpop.permute.xlu0 %1052  ;;  %1250 = vst.msk [vmem:[#allocation2 + $0xe0] sm:$0xff] %vm1234_vm9, %v1167_v29 }
 0x1c8   : > { %1126 = vst.msk [vmem:[#allocation2 + $0x170] sm:$0xff] %vm1102_vm7, %v1053_v53  ;;  %v1625_v53 = vld [vmem:[#allocation2 + $0x1a8] sm:$0xff] }
 0x1ca   : > { %v1183_v37 = vpop.permute.xlu1 %1182 }
 0x1cb   : > { %v1169_v13 = vpop.permute.xlu0 %1168  ;;  %1258 = vst.msk [vmem:[#allocation2 + $0x160] sm:$0xff] %vm1234_vm9, %v1183_v37  ;;  %v1627_v37 = vld [vmem:[#allocation2 + $0x1b8] sm:$0xff] }
 0x1cc   : > { %1251 = vst.msk [vmem:[#allocation2 + $0xf0] sm:$0x7f] %vm1236_vm11, %v1169_v13 }
 0x1ce   : > { %v1297_v51 = vpop.permute.xlu1 %1296 }
 0x1cf   : > { %v1185_v58 = vpop.permute.xlu0 %1184  ;;  %1374 = vst.msk [vmem:[#allocation2 + $0xe0] sm:$0xfe] %vm1358_vm10, %v1297_v51 }
 0x1d0   : > { %1259 = vst.msk [vmem:[#allocation2 + $0x170] sm:$0x7f] %vm1236_vm11, %v1185_v58 }
 0x1d2   : > { %v1838_v18 = vpop.f32.mrf.mxu0  ;;  %v1313_v50 = vpop.permute.xlu1 %1312 }
 0x1d3   : > { %1954 = vst.msk [vmem:[%s3632_s13 + $0x20] sm:$0xff] %vm1949_vm1, %v1838_v18  ;;  %v1989_v5 = vsel %vm1949_vm1, %v1838_v18, 0.0  ;;  %v2055_v15 = vmul.f32 %v1838_v18, %v1838_v18  ;;  %v1299_v49 = vpop.permute.xlu0 %1298 }
 0x1d4   : > { %v1990_v4 = vadd.f32 %v1989_v5, %v1988_v60  ;;  %1382 = vst.msk [vmem:[#allocation2 + $0x160] sm:$0xfe] %vm1358_vm10, %v1313_v50  ;;  %v1840_v3 = vpop.f32.mrf.mxu0  ;;  %v1663_v5 = vpack.c.bf16 %v1627_v37, %v1625_v53 }
 0x1d5   : > { %1375 = vst.msk [vmem:[#allocation2 + $0xf0] sm:$0xff] %vm1360_vm13, %v1299_v49  ;;  %v2090_v12 = vsel %vm1949_vm1, %v2055_v15, 0.0 }
 0x1d6   : > { %v2091_v56 = vadd.f32 %v2090_v12, %v2089_v1  ;;  %v1841_v36 = vpop.f32.mrf.mxu0  ;;  %v1419_v28 = vpop.permute.xlu1 %1418 }
 0x1d7   : > { %1955 = vst.msk [vmem:[%s3632_s13 + $0x28] sm:$0xff] %vm1949_vm1, %v1841_v36  ;;  %v1991_v63 = vsel %vm1949_vm1, %v1841_v36, 0.0  ;;  %v2056_v24 = vmul.f32 %v1841_v36, %v1841_v36  ;;  %v1315_v43 = vpop.permute.xlu0 %1314 }
 0x1d8   : > { %v1992_v19 = vadd.f32 %v1991_v63, %v1990_v4  ;;  %1495 = vst.msk [vmem:[#allocation2 + $0xe0] sm:$0xff] %vm1480_vm12, %v1419_v28  ;;  %v1843_v40 = vpop.f32.mrf.mxu0 }
 0x1d9   : > { %1383 = vst.msk [vmem:[#allocation2 + $0x170] sm:$0xff] %vm1360_vm13, %v1315_v43  ;;  %v2092_v44 = vsel %vm1949_vm1, %v2056_v24, 0.0  ;;  %v1629_v43 = vld [vmem:[#allocation2 + $0x1c8] sm:$0xff] }
 0x1da   : > { %v2093_v23 = vadd.f32 %v2092_v44, %v2091_v56  ;;  %v1435_v39 = vpop.permute.xlu1 %1434 }
 0x1db   : > { %v1421_v32 = vpop.permute.xlu0 %1420  ;;  %1503 = vst.msk [vmem:[#allocation2 + $0x160] sm:$0xff] %vm1480_vm12, %v1435_v39 }
 0x1dc   : > { %1496 = vst.msk [vmem:[#allocation2 + $0xf0] sm:$0xff] %vm1480_vm12, %v1421_v32 }
 0x1de   : > { %v794_v30 = vpop.permute.xlu1 %793 }
 0x1df   : > { %v1437_v45 = vpop.permute.xlu0 %1436  ;;  %863 = vst.msk [vmem:[#allocation2 + $0x180] sm:$0xff] %vm839_vm14, %v794_v30  ;;  %v1600_v38 = vld [vmem:[#allocation2 + $0xe0] sm:$0xff] }
 0x1e0   : > { %1504 = vst.msk [vmem:[#allocation2 + $0x170] sm:$0xff] %vm1480_vm12, %v1437_v45 }
 0x1e2   : > { %v925_v61 = vpop.permute.xlu1 %924  ;;  %v1616_v26 = vld [vmem:[#allocation2 + $0x160] sm:$0xff] }
 0x1e3   : > { %v796_v41 = vpop.permute.xlu0 %795  ;;  %v1602_v8 = vld [vmem:[#allocation2 + $0xf0] sm:$0xff]  ;;  %998 = vst.msk [vmem:[#allocation2 + $0x180] sm:$0xfe] %vm972_vm6, %v925_v61 }
 0x1e4   : > { %864 = vst.msk [vmem:[#allocation2 + $0x190] sm:$0x7f] %vm841_vm15, %v796_v41  ;;  %v1650_v20 = vpack.c.bf16 %v1602_v8, %v1600_v38 }
 0x1e6   : > { %1877 = vmatmul.mubr.bf16.gmra.mxu0 %v1650_v20  ;;  %v1055_v0 = vpop.permute.xlu1 %1054 }
 0x1e7   : > { %v927_v6 = vpop.permute.xlu0 %926  ;;  %v1618_v27 = vld [vmem:[#allocation2 + $0x170] sm:$0xff]  ;;  %1127 = vst.msk [vmem:[#allocation2 + $0x180] sm:$0xff] %vm1102_vm7, %v1055_v0 }
 0x1e8   : > { %999 = vst.msk [vmem:[#allocation2 + $0x190] sm:$0xff] %vm974_vm8, %v927_v6  ;;  %v1658_v2 = vpack.c.bf16 %v1618_v27, %v1616_v26 }
 0x1ea   : > { %v1846_v25 = vpop.f32.mrf.mxu0  ;;  %1909 = vmatmul.mubr.bf16.gmra.mxu1 %v1658_v2  ;;  %v1187_v10 = vpop.permute.xlu1 %1186 }
 0x1eb   : > { %1956 = vst.msk [vmem:[%s3632_s13 + $0x30] sm:$0xff] %vm1949_vm1, %v1846_v25  ;;  %v1993_v9 = vsel %vm1949_vm1, %v1846_v25, 0.0  ;;  %v2057_v33 = vmul.f32 %v1846_v25, %v1846_v25  ;;  %v1057_v22 = vpop.permute.xlu0 %1056  ;;  %2274 = vmatprep.mubr.msk.bf16.mxu1 %vm380_vm0, %v1661_v21 }
 0x1ec   : > { %v1994_v47 = vadd.f32 %v1993_v9, %v1992_v19  ;;  %1260 = vst.msk [vmem:[#allocation2 + $0x180] sm:$0xff] %vm1234_vm9, %v1187_v10  ;;  %v1848_v11 = vpop.f32.mrf.mxu0  ;;  %v1631_v19 = vld [vmem:[#allocation2 + $0x1d8] sm:$0xff] }
 0x1ed   : > { %1128 = vst.msk [vmem:[#allocation2 + $0x190] sm:$0xff] %vm1102_vm7, %v1057_v22  ;;  %v2094_v42 = vsel %vm1949_vm1, %v2057_v33, 0.0  ;;  %v1665_v61 = vpack.c.bf16 %v1631_v19, %v1629_v43 }
 0x1ee   : > { %v2095_v7 = vadd.f32 %v2094_v42, %v2093_v23  ;;  %v1849_v48 = vpop.f32.mrf.mxu0  ;;  %v1317_v62 = vpop.permute.xlu1 %1316 }
 0x1ef   : > { %1957 = vst.msk [vmem:[%s3632_s13 + $0x38] sm:$0xff] %vm1949_vm1, %v1849_v48  ;;  %v1995_v14 = vsel %vm1949_vm1, %v1849_v48, 0.0  ;;  %v2058_v59 = vmul.f32 %v1849_v48, %v1849_v48  ;;  %v1189_v54 = vpop.permute.xlu0 %1188 }
 0x1f0   : > { %v1996_v57 = vadd.f32 %v1995_v14, %v1994_v47  ;;  %1384 = vst.msk [vmem:[#allocation2 + $0x180] sm:$0xfe] %vm1358_vm10, %v1317_v62  ;;  %v1851_v55 = vpop.f32.mrf.mxu0 }
 0x1f1   : > { %1261 = vst.msk [vmem:[#allocation2 + $0x190] sm:$0x7f] %vm1236_vm11, %v1189_v54  ;;  %v2096_v46 = vsel %vm1949_vm1, %v2058_v59, 0.0  ;;  %v1635_v55 = vld [vmem:[#allocation2 + $0x1f8] sm:$0xff] }
 0x1f2   : > { %v2097_v60 = vadd.f32 %v2096_v46, %v2095_v7  ;;  %v1439_v16 = vpop.permute.xlu1 %1438 }
 0x1f3   : > { %v1319_v35 = vpop.permute.xlu0 %1318  ;;  %1505 = vst.msk [vmem:[#allocation2 + $0x180] sm:$0xff] %vm1480_vm12, %v1439_v16 }
 0x1f4   : > { %1385 = vst.msk [vmem:[#allocation2 + $0x190] sm:$0xff] %vm1360_vm13, %v1319_v35 }
 0x1f6   : > { %v798_v1 = vpop.permute.xlu1 %797 }
 0x1f7   : > { %v1441_v17 = vpop.permute.xlu0 %1440  ;;  %865 = vst.msk [vmem:[#allocation2 + $0x1a0] sm:$0xff] %vm839_vm14, %v798_v1 }
 0x1f8   : > { %1506 = vst.msk [vmem:[#allocation2 + $0x190] sm:$0xff] %vm1480_vm12, %v1441_v17 }
 0x1fa   : > { %v929_v34 = vpop.permute.xlu1 %928  ;;  %v1620_v58 = vld [vmem:[#allocation2 + $0x180] sm:$0xff] }
 0x1fb   : > { %v800_v29 = vpop.permute.xlu0 %799  ;;  %1000 = vst.msk [vmem:[#allocation2 + $0x1a0] sm:$0xfe] %vm972_vm6, %v929_v34 }
 0x1fc   : > { %866 = vst.msk [vmem:[#allocation2 + $0x1b0] sm:$0x7f] %vm841_vm15, %v800_v29 }
 0x1fe   : > { %v1059_v13 = vpop.permute.xlu1 %1058 }
 0x1ff   : > { %v931_v51 = vpop.permute.xlu0 %930  ;;  %v1622_v18 = vld [vmem:[#allocation2 + $0x190] sm:$0xff]  ;;  %1129 = vst.msk [vmem:[#allocation2 + $0x1a0] sm:$0xff] %vm1102_vm7, %v1059_v13 }
 0x200   : > { %1001 = vst.msk [vmem:[#allocation2 + $0x1b0] sm:$0xff] %vm974_vm8, %v931_v51  ;;  %v1660_v15 = vpack.c.bf16 %v1622_v18, %v1620_v58 }
 0x202   : > { %1917 = vmatmul.mubr.bf16.gmra.mxu1 %v1660_v15  ;;  %v1191_v50 = vpop.permute.xlu1 %1190 }
 0x203   : > { %v1061_v49 = vpop.permute.xlu0 %1060  ;;  %2275 = vmatprep.mubr.msk.bf16.mxu1 %vm380_vm0, %v1663_v5  ;;  %1262 = vst.msk [vmem:[#allocation2 + $0x1a0] sm:$0xff] %vm1234_vm9, %v1191_v50 }
 0x204   : > { %1130 = vst.msk [vmem:[#allocation2 + $0x1b0] sm:$0xff] %vm1102_vm7, %v1061_v49 }
 0x206   : > { %v1321_v4 = vpop.permute.xlu1 %1320 }
 0x207   : > { %v1193_v3 = vpop.permute.xlu0 %1192  ;;  %1386 = vst.msk [vmem:[#allocation2 + $0x1a0] sm:$0xfe] %vm1358_vm10, %v1321_v4 }
 0x208   : > { %1263 = vst.msk [vmem:[#allocation2 + $0x1b0] sm:$0x7f] %vm1236_vm11, %v1193_v3 }
 0x20a   : > { %v1443_v12 = vpop.permute.xlu1 %1442 }
 0x20b   : > { %v1323_v56 = vpop.permute.xlu0 %1322  ;;  %1507 = vst.msk [vmem:[#allocation2 + $0x1a0] sm:$0xff] %vm1480_vm12, %v1443_v12 }
 0x20c   : > { %1387 = vst.msk [vmem:[#allocation2 + $0x1b0] sm:$0xff] %vm1360_vm13, %v1323_v56 }
 0x20e   : > { %v802_v36 = vpop.permute.xlu1 %801 }
 0x20f   : > { %v1445_v63 = vpop.permute.xlu0 %1444  ;;  %867 = vst.msk [vmem:[#allocation2 + $0x1c0] sm:$0xff] %vm839_vm14, %v802_v36 }
 0x210   : > { %1508 = vst.msk [vmem:[#allocation2 + $0x1b0] sm:$0xff] %vm1480_vm12, %v1445_v63 }
 0x212   : > { %v933_v24 = vpop.permute.xlu1 %932  ;;  %v1624_v30 = vld [vmem:[#allocation2 + $0x1a0] sm:$0xff] }
 0x213   : > { %v804_v28 = vpop.permute.xlu0 %803  ;;  %1002 = vst.msk [vmem:[#allocation2 + $0x1c0] sm:$0xfe] %vm972_vm6, %v933_v24 }
 0x214   : > { %868 = vst.msk [vmem:[#allocation2 + $0x1d0] sm:$0x7f] %vm841_vm15, %v804_v28 }
 0x215   : > { %v1854_v40 = vpop.f32.mrf.mxu0 }
 0x216   : > { %1958 = vst.msk [vmem:[%s3632_s13 + $0x40] sm:$0xff] %vm1949_vm1, %v1854_v40  ;;  %v1997_v44 = vsel %vm1949_vm1, %v1854_v40, 0.0  ;;  %v2059_v23 = vmul.f32 %v1854_v40, %v1854_v40  ;;  %v1063_v39 = vpop.permute.xlu1 %1062 }
 0x217   : > { %v935_v32 = vpop.permute.xlu0 %934  ;;  %v1626_v45 = vld [vmem:[#allocation2 + $0x1b0] sm:$0xff]  ;;  %v1998_v41 = vadd.f32 %v1997_v44, %v1996_v57  ;;  %1131 = vst.msk [vmem:[#allocation2 + $0x1c0] sm:$0xff] %vm1102_vm7, %v1063_v39  ;;  %v1856_v38 = vpop.f32.mrf.mxu0  ;;  %v1633_v57 = vld [vmem:[#allocation2 + $0x1e8] sm:$0xff] }
 0x218   : > { %1003 = vst.msk [vmem:[#allocation2 + $0x1d0] sm:$0xff] %vm974_vm8, %v935_v32  ;;  %v1662_v8 = vpack.c.bf16 %v1626_v45, %v1624_v30  ;;  %v2098_v20 = vsel %vm1949_vm1, %v2059_v23, 0.0  ;;  %v1667_v1 = vpack.c.bf16 %v1635_v55, %v1633_v57 }
 0x219   : > { %v2099_v31 = vadd.f32 %v2098_v20, %v2097_v60  ;;  %v1857_v52 = vpop.f32.mrf.mxu0 }
 0x21a   : > { %v3773_v0 = vpop.f32.mrf.mxu1  ;;  %1925 = vmatmul.mubr.bf16.gmra.mxu1 %v1662_v8  ;;  %1959 = vst.msk [vmem:[%s3632_s13 + $0x48] sm:$0xff] %vm1949_vm1, %v1857_v52  ;;  %v1999_v6 = vsel %vm1949_vm1, %v1857_v52, 0.0  ;;  %v2060_v26 = vmul.f32 %v1857_v52, %v1857_v52  ;;  %v1195_v27 = vpop.permute.xlu1 %1194 }
 0x21b   : > { %1966 = vst.msk [vmem:[%s3632_s13 + $0x80] sm:$0xff] %vm1949_vm1, %v3773_v0  ;;  %v1065_v21 = vpop.permute.xlu0 %1064  ;;  %2276 = vmatprep.mubr.msk.bf16.mxu1 %vm380_vm0, %v1665_v61  ;;  %v2000_v2 = vadd.f32 %v1999_v6, %v1998_v41  ;;  %v1859_v25 = vpop.f32.mrf.mxu0 }
 0x21c   : > { %1264 = vst.msk [vmem:[#allocation2 + $0x1c0] sm:$0xff] %vm1234_vm9, %v1195_v27  ;;  %v1888_v9 = vpop.f32.mrf.mxu1  ;;  %v2100_v33 = vsel %vm1949_vm1, %v2060_v26, 0.0 }
 0x21d   : > { %1132 = vst.msk [vmem:[#allocation2 + $0x1d0] sm:$0xff] %vm1102_vm7, %v1065_v21  ;;  %v2101_v10 = vadd.f32 %v2100_v33, %v2099_v31 }
 0x21e   : > { %v3785_v22 = vpop.f32.mrf.mxu1  ;;  %v1325_v47 = vpop.permute.xlu1 %1324 }
 0x21f   : > { %1967 = vst.msk [vmem:[%s3632_s13 + $0x88] sm:$0xff] %vm1949_vm1, %v3785_v22  ;;  %v1197_v11 = vpop.permute.xlu0 %1196 }
 0x220   : > { %1388 = vst.msk [vmem:[#allocation2 + $0x1c0] sm:$0xfe] %vm1358_vm10, %v1325_v47  ;;  %v1891_v42 = vpop.f32.mrf.mxu1 }
 0x221   : > { %1265 = vst.msk [vmem:[#allocation2 + $0x1d0] sm:$0x7f] %vm1236_vm11, %v1197_v11 }
 0x222   : > { %v1447_v7 = vpop.permute.xlu1 %1446 }
 0x223   : > { %v1327_v48 = vpop.permute.xlu0 %1326  ;;  %1509 = vst.msk [vmem:[#allocation2 + $0x1c0] sm:$0xff] %vm1480_vm12, %v1447_v7 }
 0x224   : > { %1389 = vst.msk [vmem:[#allocation2 + $0x1d0] sm:$0xff] %vm1360_vm13, %v1327_v48 }
 0x226   : > { %v641_v14 = vpop.permute.xlu1 %640 }
 0x227   : > { %v1449_v59 = vpop.permute.xlu0 %1448  ;;  %702 = vst.msk [vmem:[#allocation2 + $0x1f0] sm:$0xff] %vm672_vm5, %v641_v14 }
 0x228   : > { %1510 = vst.msk [vmem:[#allocation2 + $0x1d0] sm:$0xff] %vm1480_vm12, %v1449_v59  ;;  %v2067_v59 = vmul.f32 %v3773_v0, %v3773_v0 }
 0x22a   : > { %v808_v62 = vpop.permute.xlu1 %807  ;;  %v1628_v16 = vld [vmem:[#allocation2 + $0x1c0] sm:$0xff] }
 0x22b   : > { %v806_v54 = vpop.permute.xlu0 %805  ;;  %870 = vst.msk [vmem:[#allocation2 + $0x1f0] sm:$0x7f] %vm841_vm15, %v808_v62 }
 0x22c   : > { %869 = vst.msk [vmem:[#allocation2 + $0x1e0] sm:$0xff] %vm839_vm14, %v806_v54 }
 0x22e   : > { %v939_v46 = vpop.permute.xlu1 %938 }
 0x22f   : > { %v937_v60 = vpop.permute.xlu0 %936  ;;  %v1630_v35 = vld [vmem:[#allocation2 + $0x1d0] sm:$0xff]  ;;  %1005 = vst.msk [vmem:[#allocation2 + $0x1f0] sm:$0xff] %vm974_vm8, %v939_v46 }
 0x230   : > { %1004 = vst.msk [vmem:[#allocation2 + $0x1e0] sm:$0xfe] %vm972_vm6, %v937_v60  ;;  %v1664_v17 = vpack.c.bf16 %v1630_v35, %v1628_v16  ;;  %v2013_v16 = vsel %vm1949_vm1, %v3773_v0, 0.0  ;;  %v2068_v35 = vmul.f32 %v3785_v22, %v3785_v22 }
 0x232   : > { %1933 = vmatmul.mubr.bf16.gmra.mxu1 %v1664_v17  ;;  %v1069_v34 = vpop.permute.xlu1 %1068 }
 0x233   : > { %v1067_v29 = vpop.permute.xlu0 %1066  ;;  %2277 = vmatprep.mubr.msk.bf16.mxu1 %vm380_vm0, %v1667_v1  ;;  %1134 = vst.msk [vmem:[#allocation2 + $0x1f0] sm:$0xff] %vm1102_vm7, %v1069_v34  ;;  %vm2153_vm0 = vcmask 517120  }
 0x234   : > { %1133 = vst.msk [vmem:[#allocation2 + $0x1e0] sm:$0xff] %vm1102_vm7, %v1067_v29 }
 0x236   : > { %v1201_v53 = vpop.permute.xlu1 %1200 }
 0x237   : > { %v1199_v37 = vpop.permute.xlu0 %1198  ;;  %1267 = vst.msk [vmem:[#allocation2 + $0x1f0] sm:$0x7f] %vm1236_vm11, %v1201_v53  ;;  %v2114_v53 = vsel %vm1949_vm1, %v2067_v59, 0.0 }
 0x238   : > { %1266 = vst.msk [vmem:[#allocation2 + $0x1e0] sm:$0xff] %vm1234_vm9, %v1199_v37  ;;  %v2015_v37 = vsel %vm1949_vm1, %v3785_v22, 0.0 }
 0x23e   : > { %v1634_v51 = vld [vmem:[#allocation2 + $0x1f0] sm:$0xff] }
 0x23f   : > { %v1632_v13 = vld [vmem:[#allocation2 + $0x1e0] sm:$0xff] }
 0x240   : > { %v1666_v58 = vpack.c.bf16 %v1634_v51, %v1632_v13 }
 0x242   : > { %1941 = vmatmul.mubr.bf16.gmra.mxu1 %v1666_v58 }
 0x245   : > { %v1862_v18 = vpop.f32.mrf.mxu0 }
 0x246   : > { %1960 = vst.msk [vmem:[%s3632_s13 + $0x50] sm:$0xff] %vm1949_vm1, %v1862_v18  ;;  %v2001_v5 = vsel %vm1949_vm1, %v1862_v18, 0.0  ;;  %v2061_v15 = vmul.f32 %v1862_v18, %v1862_v18  ;;  %v2116_v18 = vsel %vm1949_vm1, %v2068_v35, 0.0 }
 0x247   : > { %v2002_v50 = vadd.f32 %v2001_v5, %v2000_v2  ;;  %v1864_v49 = vpop.f32.mrf.mxu0 }
 0x248   : > { %v2102_v4 = vsel %vm1949_vm1, %v2061_v15, 0.0 }
 0x249   : > { %v2103_v3 = vadd.f32 %v2102_v4, %v2101_v10  ;;  %v1865_v12 = vpop.f32.mrf.mxu0 }
 0x24a   : > { %v3809_v56 = vpop.f32.mrf.mxu1  ;;  %1961 = vst.msk [vmem:[%s3632_s13 + $0x58] sm:$0xff] %vm1949_vm1, %v1865_v12  ;;  %v2003_v36 = vsel %vm1949_vm1, %v1865_v12, 0.0  ;;  %v2062_v63 = vmul.f32 %v1865_v12, %v1865_v12 }
 0x24b   : > { %1968 = vst.msk [vmem:[%s3632_s13 + $0x90] sm:$0xff] %vm1949_vm1, %v3809_v56  ;;  %v2004_v24 = vadd.f32 %v2003_v36, %v2002_v50  ;;  %v1867_v28 = vpop.f32.mrf.mxu0  ;;  %v2069_v13 = vmul.f32 %v3809_v56, %v3809_v56  ;;  %v2017_v5 = vsel %vm1949_vm1, %v3809_v56, 0.0 }
 0x24c   : > { %v1896_v43 = vpop.f32.mrf.mxu1  ;;  %v2104_v19 = vsel %vm1949_vm1, %v2062_v63, 0.0 }
 0x24d   : > { %v2105_v40 = vadd.f32 %v2104_v19, %v2103_v3  ;;  %v2118_v4 = vsel %vm1949_vm1, %v2069_v13, 0.0 }
 0x24e   : > { %v1897_v44 = vpop.f32.mrf.mxu1 }
 0x24f   : > { %1969 = vst.msk [vmem:[%s3632_s13 + $0x98] sm:$0xff] %vm1949_vm1, %v1897_v44  ;;  %v2070_v15 = vmul.f32 %v1897_v44, %v1897_v44  ;;  %v2019_v22 = vsel %vm1949_vm1, %v1897_v44, 0.0 }
 0x250   : > { %v1899_v23 = vpop.f32.mrf.mxu1 }
 0x251   : > { %v2120_v63 = vsel %vm1949_vm1, %v2070_v15, 0.0 }
 0x276   : > { %v1870_v39 = vpop.f32.mrf.mxu0 }
 0x277   : > { %1962 = vst.msk [vmem:[%s3632_s13 + $0x60] sm:$0xff] %vm1949_vm1, %v1870_v39  ;;  %v2005_v32 = vsel %vm1949_vm1, %v1870_v39, 0.0  ;;  %v2063_v30 = vmul.f32 %v1870_v39, %v1870_v39 }
 0x278   : > { %v2006_v45 = vadd.f32 %v2005_v32, %v2004_v24  ;;  %v1872_v61 = vpop.f32.mrf.mxu0 }
 0x279   : > { %v2106_v41 = vsel %vm1949_vm1, %v2063_v30, 0.0 }
 0x27a   : > { %v2107_v38 = vadd.f32 %v2106_v41, %v2105_v40  ;;  %v1873_v8 = vpop.f32.mrf.mxu0  ;;  %v1902_v20 = vpop.f32.mrf.mxu1 }
 0x27b   : > { %1963 = vst.msk [vmem:[%s3632_s13 + $0x68] sm:$0xff] %vm1949_vm1, %v1873_v8  ;;  %v2007_v31 = vsel %vm1949_vm1, %v1873_v8, 0.0  ;;  %v2064_v52 = vmul.f32 %v1873_v8, %v1873_v8  ;;  %1970 = vst.msk [vmem:[%s3632_s13 + $0xa0] sm:$0xff] %vm1949_vm1, %v1902_v20  ;;  %v2071_v3 = vmul.f32 %v1902_v20, %v1902_v20  ;;  %v2021_v24 = vsel %vm1949_vm1, %v1902_v20, 0.0 }
 0x27c   : > { %v2008_v6 = vadd.f32 %v2007_v31, %v2006_v45  ;;  %v1875_v26 = vpop.f32.mrf.mxu0  ;;  %v1904_v27 = vpop.f32.mrf.mxu1 }
 0x27d   : > { %v2108_v21 = vsel %vm1949_vm1, %v2064_v52, 0.0  ;;  %v2122_v40 = vsel %vm1949_vm1, %v2071_v3, 0.0 }
 0x27e   : > { %v2109_v2 = vadd.f32 %v2108_v21, %v2107_v38  ;;  %v1905_v25 = vpop.f32.mrf.mxu1 }
 0x27f   : > { %1971 = vst.msk [vmem:[%s3632_s13 + $0xa8] sm:$0xff] %vm1949_vm1, %v1905_v25  ;;  %v2072_v28 = vmul.f32 %v1905_v25, %v1905_v25  ;;  %v2023_v56 = vsel %vm1949_vm1, %v1905_v25, 0.0 }
 0x280   : > { %v1907_v9 = vpop.f32.mrf.mxu1 }
 0x281   : > { %v2124_v44 = vsel %vm1949_vm1, %v2072_v28, 0.0 }
 0x2a6   : > { %v1878_v33 = vpop.f32.mrf.mxu0 }
 0x2a7   : > { %1964 = vst.msk [vmem:[%s3632_s13 + $0x70] sm:$0xff] %vm1949_vm1, %v1878_v33  ;;  %v2009_v10 = vsel %vm1949_vm1, %v1878_v33, 0.0  ;;  %v2065_v47 = vmul.f32 %v1878_v33, %v1878_v33 }
 0x2a8   : > { %v2010_v11 = vadd.f32 %v2009_v10, %v2008_v6  ;;  %v1880_v42 = vpop.f32.mrf.mxu0 }
 0x2a9   : > { %v2110_v7 = vsel %vm1949_vm1, %v2065_v47, 0.0 }
 0x2aa   : > { %v1881_v48 = vpop.f32.mrf.mxu0  ;;  %v1910_v14 = vpop.f32.mrf.mxu1  ;;  %v2111_v57 = vadd.f32 %v2110_v7, %v2109_v2 }
 0x2ab   : > { %1965 = vst.msk [vmem:[%s3632_s13 + $0x78] sm:$0xff] %vm1949_vm1, %v1881_v48  ;;  %v2011_v62 = vsel %vm1949_vm1, %v1881_v48, 0.0  ;;  %v2066_v54 = vmul.f32 %v1881_v48, %v1881_v48  ;;  %1972 = vst.msk [vmem:[%s3632_s13 + $0xb0] sm:$0xff] %vm1949_vm1, %v1910_v14  ;;  %v2073_v23 = vmul.f32 %v1910_v14, %v1910_v14  ;;  %v2025_v30 = vsel %vm1949_vm1, %v1910_v14, 0.0 }
 0x2ac   : > { %v2012_v55 = vadd.f32 %v2011_v62, %v2010_v11  ;;  %v1883_v46 = vpop.f32.mrf.mxu0  ;;  %v1912_v60 = vpop.f32.mrf.mxu1 }
 0x2ad   : > { %v2112_v1 = vsel %vm1949_vm1, %v2066_v54, 0.0  ;;  %v2126_v38 = vsel %vm1949_vm1, %v2073_v23, 0.0 }
 0x2ae   : > { %v2014_v17 = vadd.f32 %v2013_v16, %v2012_v55  ;;  %v2113_v34 = vadd.f32 %v2112_v1, %v2111_v57  ;;  %v1913_v29 = vpop.f32.mrf.mxu1 }
 0x2af   : > { %1973 = vst.msk [vmem:[%s3632_s13 + $0xb8] sm:$0xff] %vm1949_vm1, %v1913_v29  ;;  %v2074_v45 = vmul.f32 %v1913_v29, %v1913_v29  ;;  %v2027_v8 = vsel %vm1949_vm1, %v1913_v29, 0.0 }
 0x2b0   : > { %v2016_v51 = vadd.f32 %v2015_v37, %v2014_v17  ;;  %v2115_v0 = vadd.f32 %v2114_v53, %v2113_v34  ;;  %v1915_v58 = vpop.f32.mrf.mxu1 }
 0x2b1   : > { %v2128_v52 = vsel %vm1949_vm1, %v2074_v45, 0.0 }
 0x2b2   : > { %v2018_v50 = vadd.f32 %v2017_v5, %v2016_v51  ;;  %v2117_v49 = vadd.f32 %v2116_v18, %v2115_v0 }
 0x2b4   : > { %v2119_v12 = vadd.f32 %v2118_v4, %v2117_v49  ;;  %v2020_v36 = vadd.f32 %v2019_v22, %v2018_v50 }
 0x2b6   : > { %v2022_v43 = vadd.f32 %v2021_v24, %v2020_v36  ;;  %v2121_v19 = vadd.f32 %v2120_v63, %v2119_v12 }
 0x2b8   : > { %v2024_v39 = vadd.f32 %v2023_v56, %v2022_v43  ;;  %v2123_v32 = vadd.f32 %v2122_v40, %v2121_v19 }
 0x2ba   : > { %v2026_v61 = vadd.f32 %v2025_v30, %v2024_v39  ;;  %v2125_v41 = vadd.f32 %v2124_v44, %v2123_v32 }
 0x2bc   : > { %v2127_v20 = vadd.f32 %v2126_v38, %v2125_v41  ;;  %v2028_v31 = vadd.f32 %v2027_v8, %v2026_v61 }
 0x2be   : > { %v2129_v6 = vadd.f32 %v2128_v52, %v2127_v20 }
 0x2c2   : > { %v1918_v26 = vpop.f32.mrf.mxu1 }
 0x2c3   : > { %1974 = vst.msk [vmem:[%s3632_s13 + $0xc0] sm:$0xff] %vm1949_vm1, %v1918_v26  ;;  %v2075_v42 = vmul.f32 %v1918_v26, %v1918_v26  ;;  %v2029_v48 = vsel %vm1949_vm1, %v1918_v26, 0.0 }
 0x2c4   : > { %v1920_v27 = vpop.f32.mrf.mxu1  ;;  %v2030_v55 = vadd.f32 %v2029_v48, %v2028_v31 }
 0x2c5   : > { %v2130_v62 = vsel %vm1949_vm1, %v2075_v42, 0.0 }
 0x2c6   : > { %v1921_v21 = vpop.f32.mrf.mxu1  ;;  %v2131_v35 = vadd.f32 %v2130_v62, %v2129_v6 }
 0x2c7   : > { %1975 = vst.msk [vmem:[%s3632_s13 + $0xc8] sm:$0xff] %vm1949_vm1, %v1921_v21  ;;  %v2076_v14 = vmul.f32 %v1921_v21, %v1921_v21  ;;  %v2031_v54 = vsel %vm1949_vm1, %v1921_v21, 0.0 }
 0x2c8   : > { %v1923_v2 = vpop.f32.mrf.mxu1  ;;  %v2032_v1 = vadd.f32 %v2031_v54, %v2030_v55 }
 0x2c9   : > { %v2132_v46 = vsel %vm1949_vm1, %v2076_v14, 0.0 }
 0x2ca   : > { %v2133_v53 = vadd.f32 %v2132_v46, %v2131_v35 }
 0x2da   : > { %v1926_v25 = vpop.f32.mrf.mxu1 }
 0x2db   : > { %1976 = vst.msk [vmem:[%s3632_s13 + $0xd0] sm:$0xff] %vm1949_vm1, %v1926_v25  ;;  %v2077_v57 = vmul.f32 %v1926_v25, %v1926_v25  ;;  %v2033_v60 = vsel %vm1949_vm1, %v1926_v25, 0.0 }
 0x2dc   : > { %v1928_v9 = vpop.f32.mrf.mxu1  ;;  %v2034_v37 = vadd.f32 %v2033_v60, %v2032_v1 }
 0x2dd   : > { %v2134_v17 = vsel %vm1949_vm1, %v2077_v57, 0.0 }
 0x2de   : > { %v1929_v33 = vpop.f32.mrf.mxu1  ;;  %v2135_v58 = vadd.f32 %v2134_v17, %v2133_v53 }
 0x2df   : > { %1977 = vst.msk [vmem:[%s3632_s13 + $0xd8] sm:$0xff] %vm1949_vm1, %v1929_v33  ;;  %v2078_v16 = vmul.f32 %v1929_v33, %v1929_v33  ;;  %v2035_v34 = vsel %vm1949_vm1, %v1929_v33, 0.0 }
 0x2e0   : > { %v1931_v10 = vpop.f32.mrf.mxu1  ;;  %v2036_v18 = vadd.f32 %v2035_v34, %v2034_v37 }
 0x2e1   : > { %v2136_v13 = vsel %vm1949_vm1, %v2078_v16, 0.0 }
 0x2e2   : > { %v2137_v50 = vadd.f32 %v2136_v13, %v2135_v58 }
 0x2f2   : > { %v1934_v47 = vpop.f32.mrf.mxu1 }
 0x2f3   : > { %1978 = vst.msk [vmem:[%s3632_s13 + $0xe0] sm:$0xff] %vm1949_vm1, %v1934_v47  ;;  %v2079_v29 = vmul.f32 %v1934_v47, %v1934_v47  ;;  %v2037_v51 = vsel %vm1949_vm1, %v1934_v47, 0.0 }
 0x2f4   : > { %v1936_v11 = vpop.f32.mrf.mxu1  ;;  %v2038_v49 = vadd.f32 %v2037_v51, %v2036_v18 }
 0x2f5   : > { %v2138_v5 = vsel %vm1949_vm1, %v2079_v29, 0.0 }
 0x2f6   : > { %v1937_v7 = vpop.f32.mrf.mxu1  ;;  %v2139_v36 = vadd.f32 %v2138_v5, %v2137_v50 }
 0x2f7   : > { %1979 = vst.msk [vmem:[%s3632_s13 + $0xe8] sm:$0xff] %vm1949_vm1, %v1937_v7  ;;  %v2080_v0 = vmul.f32 %v1937_v7, %v1937_v7  ;;  %v2039_v15 = vsel %vm1949_vm1, %v1937_v7, 0.0 }
 0x2f8   : > { %v1939_v59 = vpop.f32.mrf.mxu1  ;;  %v2040_v63 = vadd.f32 %v2039_v15, %v2038_v49 }
 0x2f9   : > { %v2140_v22 = vsel %vm1949_vm1, %v2080_v0, 0.0 }
 0x2fa   : > { %v2141_v43 = vadd.f32 %v2140_v22, %v2139_v36 }
 0x302   : > { %v1942_v4 = vpop.f32.mrf.mxu1 }
 0x303   : > { %1980 = vst.msk [vmem:[%s3632_s13 + $0xf0] sm:$0xff] %vm1949_vm1, %v1942_v4  ;;  %v2041_v3 = vsel %vm1949_vm1, %v1942_v4, 0.0  ;;  %v2081_v12 = vmul.f32 %v1942_v4, %v1942_v4 }
 0x304   : > { %v1944_v24 = vpop.f32.mrf.mxu1  ;;  %v2042_v19 = vadd.f32 %v2041_v3, %v2040_v63 }
 0x305   : > { %v2142_v28 = vsel %vm1949_vm1, %v2081_v12, 0.0 }
 0x306   : > { %v1945_v40 = vpop.f32.mrf.mxu1  ;;  %v2143_v39 = vadd.f32 %v2142_v28, %v2141_v43 }
 0x307   : > { %1981 = vst.msk [vmem:[%s3632_s13 + $0xf8] sm:$0xff] %vm1949_vm1, %v1945_v40  ;;  %v2043_v56 = vsel %vm1949_vm1, %v1945_v40, 0.0  ;;  %v2082_v23 = vmul.f32 %v1945_v40, %v1945_v40 }
 0x308   : > { %v2044_v32 = vadd.f32 %v2043_v56, %v2042_v19  ;;  %v1947_v44 = vpop.f32.mrf.mxu1 }
 0x309   : > { %v2144_v30 = vsel %vm1949_vm1, %v2082_v23, 0.0 }
 0x30a   : > { %v2045_v45 = vrot.slane %v2044_v32, 4  ;;  %v2145_v61 = vadd.f32 %v2144_v30, %v2143_v39 }
 0x30c   : > { %v2046_v41 = vadd.f32 %v2045_v45, %v2044_v32  ;;  %v2146_v38 = vrot.slane %v2145_v61, 4 }
 0x30e   : > { %v2047_v8 = vrot.slane %v2046_v41, 2  ;;  %v2147_v20 = vadd.f32 %v2146_v38, %v2145_v61 }
 0x310   : > { %v2048_v31 = vadd.f32 %v2047_v8, %v2046_v41  ;;  %v2148_v52 = vrot.slane %v2147_v20, 2 }
 0x312   : > { %v2049_v6 = vrot.slane %v2048_v31, 1  ;;  %v2149_v26 = vadd.f32 %v2148_v52, %v2147_v20 }
 0x314   : > { %v2150_v27 = vrot.slane %v2149_v26, 1  ;;  %v2050_v21 = vadd.f32 %v2049_v6, %v2048_v31 }
 0x316   : > { %v2151_v2 = vadd.f32 %v2150_v27, %v2149_v26 }
 0x318   : > { %v2152_v25 = vsel %vm474_vm2, %v2050_v21, %v2151_v2 }
 0x319   : > { %2154 = vst.msk [vmem:[%s235_s15] sm:$0x3] %vm2153_vm0, %v2152_v25 }
 0x31a PF: > { %s16_s18 = sadd.s32 1, %s2334_s18  }
 0x31b   : > { %p13_p4 = scmp.ge.s32.totalorder %s16_s18, 4  }
 0x31d   :  { %15 = sbr.rel (!%p13_p4) target bundleno = 1 (0x1), region = 79 }

// kernel: feature2texture.3
= control target key start
LH: loop header
LB: loop body
LE: loop exit
PB: predicated region body
PF: predicated region fallthrough
CT: control target
= control target key end

     0   :  { %s3473_s12 = smov 0   ;;  %s5194_s0 = inlined_call_operand.vmem [shape: bf16[2,256,64], index: 0, kind: input, shape index: {}]   ;;  %s5195_s1 = inlined_call_operand.vmem [shape: bf16[64,144], index: 1, kind: input, shape index: {}]   ;;  %s5196_s2 = inlined_call_operand.vmem [shape: f32[2,16,16,16], index: 2, kind: output, shape index: {0}]   ;;  %s5197_s3 = inlined_call_operand.vmem [shape: f32[2,2,16], index: 3, kind: output, shape index: {1}]  }
   0x1 LB: > { %s3144_s13 = sadd.s32 4294967295, %s3442_s12   ;;  %p3148_p0 = scmp.ge.s32.totalorder %s3442_s12, 1  ;;  %s3442_s12 = sphi %s3473_s12, %s14_s12  }
   0x2   : > { %p140_p1 = scmp.lt.s32.totalorder %s3442_s12, 3 }
   0x4   : > { %p141_p2 = pnand %p3148_p0, %p140_p1 }
   0x5   : > { %p168_p3 = scmp.lt.s32.totalorder (!%p141_p2), %s3144_s13, 1  ;;  %s3446_s11 = smov (!%p141_p2), 112  }
   0x6   : > { %144 = sbr.rel (%p141_p2) target bundleno = 814 (0x32e), region = 28  ;;  %s3447_s14 = smov (!%p141_p2), 80  }
   0x7   : > { %s3448_s15 = smov (!%p141_p2), 64   ;;  %s3449_s16 = smov (!%p141_p2), 96  }
   0x8   : > { %s3450_s17 = smov (!%p141_p2), 48   ;;  %s3451_s18 = smov (!%p141_p2), 32  }
   0x9   : > { %s3452_s19 = smov (!%p141_p2), 16  }
   0xb   : > { %v3403_v0 = vld [vmem:[%s5195_s1 + $0x34] ss:$8 sps:$4 sm:$0xff]   ;;  %v3405_v1 = vld [vmem:[%s5195_s1 + $0x30] ss:$8 sps:$4 sm:$0xff]   ;;  %v3444_v2 = vmov 0   ;;  %s5199_s13 = smov (!%p168_p3, %s3144_s13), 1 }
   0xc   : > { %424 = vmatprep.mubr.bf16.mxu0 %v3444_v2  ;;  %504 = vmatprep.mubr.bf16.mxu1 %v3444_v2  ;;  %v3406_v3 = vld [vmem:[%s5195_s1 + $0x24] ss:$8 sps:$4 sm:$0xff]   ;;  %v3408_v4 = vld [vmem:[%s5195_s1 + $0x20] ss:$8 sps:$4 sm:$0xff]   ;;  %v3409_v5 = vld [vmem:[%s5195_s1 + $0x14] ss:$8 sps:$4 sm:$0xff]  }
   0xd   : > { %400 = vmatprep.subr.bf16.mxu0 %v3403_v0  ;;  %3378 = vmatprep.subr.bf16.mxu1 %v3403_v0  ;;  %s3376_s24 = sshll.u32 %s5199_s13, 7  ;;  %v3411_v6 = vld [vmem:[%s5195_s1 + $0x10] ss:$8 sps:$4 sm:$0xff]   ;;  %v3412_v7 = vld [vmem:[%s5195_s1 + $0x4] ss:$8 sps:$4 sm:$0xff]   ;;  %vm343_vm0 = vcmask 523264  }
   0xe   : > { %401 = vmatpush1.bf16.msra.mxu0 %v3405_v1  ;;  %3382 = vmatpush1.bf16.msra.mxu1 %v3405_v1  ;;  %s3504_s27 = scalar_lea.vmem %s5194_s0, %s3376_s24  ;;  %v3414_v8 = vld [vmem:[%s5195_s1] ss:$8 sps:$4 sm:$0xff]   ;;  %s3377_s7 = sshll.u32 %s5199_s13, 8  ;;  %vm586_vm1 = vcmask 130048   ;;  %v3445_v21 = vmov 0.0   ;;  %vm774_vm2 = vcmask 129024  }
   0xf   : > { %402 = vmatprep.subr.bf16.mxu0 %v3406_v3  ;;  %3379 = vmatprep.subr.bf16.mxu1 %v3406_v3  ;;  %v3415_v9 = vld [vmem:[%s3504_s27] sm:$0xff]   ;;  %v3417_v11 = vld [vmem:[%s3504_s27 + $0x8] sm:$0xff]   ;;  %v3419_v13 = vld [vmem:[%s3504_s27 + $0x10] sm:$0xff]   ;;  %s3555_s10 = scalar_lea.vmem %s5196_s2, %s3377_s7  ;;  %vm1134_vm3 = vcmask 1046528   ;;  %s3153_s20 = sshll.u32 %s5199_s13, 1  ;;  %vm3054_vm4 = vcmask 1040384  }
  0x10   : > { %v3416_v10 = vld [vmem:[%s3504_s27 + $0x40] sm:$0xff]   ;;  %v3418_v12 = vld [vmem:[%s3504_s27 + $0x48] sm:$0xff]   ;;  %v3420_v14 = vld [vmem:[%s3504_s27 + $0x50] sm:$0xff]   ;;  %652 = vst.msk [vmem:[%s3555_s10 + $0x10] sm:$0xff] %vm586_vm1, %v3445_v21  ;;  %s181_s23 = scalar_lea.vmem %s5197_s3, %s3153_s20  ;;  %vm3056_vm5 = vcmask 123904  }
  0x11   : > { %v3421_v15 = vld [vmem:[%s3504_s27 + $0x18] sm:$0xff]   ;;  %v3423_v17 = vld [vmem:[%s3504_s27 + $0x20] sm:$0xff]   ;;  %v3425_v19 = vld [vmem:[%s3504_s27 + $0x28] sm:$0xff]   ;;  %653 = vst.msk [vmem:[%s3555_s10 + $0x18] sm:$0xff] %vm586_vm1, %v3445_v21 }
  0x12   : > { %403 = vmatpush1.bf16.msra.mxu0 %v3408_v4  ;;  %3383 = vmatpush1.bf16.msra.mxu1 %v3408_v4  ;;  %v3422_v16 = vld [vmem:[%s3504_s27 + $0x58] sm:$0xff]   ;;  %v3424_v18 = vld [vmem:[%s3504_s27 + $0x60] sm:$0xff]   ;;  %v3426_v20 = vld [vmem:[%s3504_s27 + $0x68] sm:$0xff]   ;;  %650 = vst.msk [vmem:[%s3555_s10] sm:$0xff] %vm586_vm1, %v3445_v21 }
  0x13   : > { %404 = vmatprep.subr.bf16.mxu0 %v3409_v5  ;;  %3380 = vmatprep.subr.bf16.mxu1 %v3409_v5  ;;  %651 = vst.msk [vmem:[%s3555_s10 + $0x8] sm:$0xff] %vm586_vm1, %v3445_v21  ;;  %654 = vst.msk [vmem:[%s3555_s10 + $0x20] sm:$0xff] %vm586_vm1, %v3445_v21  ;;  %v3427_v22 = vld [vmem:[%s3504_s27 + $0x30] sm:$0xff]   ;;  %v3429_v24 = vld [vmem:[%s3504_s27 + $0x38] sm:$0xff]  }
  0x14   : > { %655 = vst.msk [vmem:[%s3555_s10 + $0x28] sm:$0xff] %vm586_vm1, %v3445_v21  ;;  %656 = vst.msk [vmem:[%s3555_s10 + $0x30] sm:$0xff] %vm586_vm1, %v3445_v21  ;;  %v3428_v23 = vld [vmem:[%s3504_s27 + $0x70] sm:$0xff]   ;;  %v3430_v25 = vld [vmem:[%s3504_s27 + $0x78] sm:$0xff]  }
  0x15   : > { %657 = vst.msk [vmem:[%s3555_s10 + $0x38] sm:$0xff] %vm586_vm1, %v3445_v21  ;;  %658 = vst.msk [vmem:[%s3555_s10 + $0x40] sm:$0xff] %vm586_vm1, %v3445_v21 }
  0x16   : > { %405 = vmatpush1.bf16.msra.mxu0 %v3411_v6  ;;  %3384 = vmatpush1.bf16.msra.mxu1 %v3411_v6  ;;  %659 = vst.msk [vmem:[%s3555_s10 + $0x48] sm:$0xff] %vm586_vm1, %v3445_v21  ;;  %660 = vst.msk [vmem:[%s3555_s10 + $0x50] sm:$0xff] %vm586_vm1, %v3445_v21 }
  0x17   : > { %406 = vmatprep.subr.bf16.mxu0 %v3412_v7  ;;  %3381 = vmatprep.subr.bf16.mxu1 %v3412_v7  ;;  %661 = vst.msk [vmem:[%s3555_s10 + $0x58] sm:$0xff] %vm586_vm1, %v3445_v21  ;;  %662 = vst.msk [vmem:[%s3555_s10 + $0x60] sm:$0xff] %vm586_vm1, %v3445_v21 }
  0x18   : > { %663 = vst.msk [vmem:[%s3555_s10 + $0x68] sm:$0xff] %vm586_vm1, %v3445_v21  ;;  %664 = vst.msk [vmem:[%s3555_s10 + $0x70] sm:$0xff] %vm586_vm1, %v3445_v21  ;;  %v3194_v26 = vld [vmem:[%s3555_s10 + $0x11] sm:$0xff]  ;;  %v3195_v44 = vld [vmem:[%s3555_s10 + $0x19] sm:$0x7f] }
  0x19   : > { %665 = vst.msk [vmem:[%s3555_s10 + $0x78] sm:$0xff] %vm586_vm1, %v3445_v21  ;;  %666 = vst.msk [vmem:[%s3555_s10 + $0x80] sm:$0xff] %vm586_vm1, %v3445_v21 }
  0x1a   : > { %407 = vmatpush1.bf16.msra.mxu0 %v3414_v8  ;;  %3385 = vmatpush1.bf16.msra.mxu1 %v3414_v8  ;;  %667 = vst.msk [vmem:[%s3555_s10 + $0x88] sm:$0xff] %vm586_vm1, %v3445_v21  ;;  %668 = vst.msk [vmem:[%s3555_s10 + $0x90] sm:$0xff] %vm586_vm1, %v3445_v21 }
  0x1b   : > { %669 = vst.msk [vmem:[%s3555_s10 + $0x98] sm:$0xff] %vm586_vm1, %v3445_v21  ;;  %670 = vst.msk [vmem:[%s3555_s10 + $0xa0] sm:$0xff] %vm586_vm1, %v3445_v21  ;;  %v3196_v38 = vld [vmem:[%s3555_s10 + $0x21] sm:$0xff]  ;;  %v3197_v0 = vld [vmem:[%s3555_s10 + $0x29] sm:$0x7f] }
  0x1c   : > { %671 = vst.msk [vmem:[%s3555_s10 + $0xa8] sm:$0xff] %vm586_vm1, %v3445_v21  ;;  %672 = vst.msk [vmem:[%s3555_s10 + $0xb0] sm:$0xff] %vm586_vm1, %v3445_v21  ;;  %v3198_v57 = vld [vmem:[%s3555_s10 + $0x31] sm:$0xff] }
  0x1d   : > { %3178 = vmatmul.mubr.msk.bf16.vlgmr.msra.gmra.mxu0 %vm343_vm0, %v3415_v9  ;;  %3186 = vmatmul.mubr.msk.bf16.vlgmr.msra.gmra.mxu1 %vm343_vm0, %v3416_v10  ;;  %673 = vst.msk [vmem:[%s3555_s10 + $0xb8] sm:$0xff] %vm586_vm1, %v3445_v21  ;;  %674 = vst.msk [vmem:[%s3555_s10 + $0xc0] sm:$0xff] %vm586_vm1, %v3445_v21 }
  0x1e   : > { %434 = vmatprep.mubr.bf16.mxu0 %v3444_v2  ;;  %514 = vmatprep.mubr.bf16.mxu1 %v3444_v2  ;;  %675 = vst.msk [vmem:[%s3555_s10 + $0xc8] sm:$0xff] %vm586_vm1, %v3445_v21  ;;  %676 = vst.msk [vmem:[%s3555_s10 + $0xd0] sm:$0xff] %vm586_vm1, %v3445_v21 }
  0x1f   : > { %677 = vst.msk [vmem:[%s3555_s10 + $0xd8] sm:$0xff] %vm586_vm1, %v3445_v21  ;;  %678 = vst.msk [vmem:[%s3555_s10 + $0xe0] sm:$0xff] %vm586_vm1, %v3445_v21 }
  0x20   : > { %679 = vst.msk [vmem:[%s3555_s10 + $0xe8] sm:$0xff] %vm586_vm1, %v3445_v21  ;;  %680 = vst.msk [vmem:[%s3555_s10 + $0xf0] sm:$0xff] %vm586_vm1, %v3445_v21 }
  0x21   : > { %681 = vst.msk [vmem:[%s3555_s10 + $0xf8] sm:$0xff] %vm586_vm1, %v3445_v21 }
  0x22   : > { %v3210_v27 = vld [vmem:[%s3555_s10 + $0x91] sm:$0xff]  ;;  %v3211_v45 = vld [vmem:[%s3555_s10 + $0x99] sm:$0x7f] }
  0x23   : > { %v3212_v39 = vld [vmem:[%s3555_s10 + $0xa1] sm:$0xff]  ;;  %v3213_v1 = vld [vmem:[%s3555_s10 + $0xa9] sm:$0x7f] }
  0x24   : > { %v3214_v58 = vld [vmem:[%s3555_s10 + $0xb1] sm:$0xff] }
  0x25   : > { %3179 = vmatmul.mubr.msk.bf16.gmra.mxu0 %vm343_vm0, %v3417_v11  ;;  %3187 = vmatmul.mubr.msk.bf16.gmra.mxu1 %vm343_vm0, %v3418_v12 }
  0x26   : > { %444 = vmatprep.mubr.bf16.mxu0 %v3444_v2  ;;  %524 = vmatprep.mubr.bf16.mxu1 %v3444_v2 }
  0x2d   : > { %3180 = vmatmul.mubr.msk.bf16.gmra.mxu0 %vm343_vm0, %v3419_v13  ;;  %3188 = vmatmul.mubr.msk.bf16.gmra.mxu1 %vm343_vm0, %v3420_v14  ;;  %v3200_v13 = vld [vmem:[%s3555_s10 + $0x41] sm:$0xff] }
  0x2e   : > { %454 = vmatprep.mubr.bf16.mxu0 %v3444_v2  ;;  %534 = vmatprep.mubr.bf16.mxu1 %v3444_v2  ;;  %v3216_v14 = vld [vmem:[%s3555_s10 + $0xc1] sm:$0xff] }
  0x35   : > { %3181 = vmatmul.mubr.msk.bf16.gmra.mxu0 %vm343_vm0, %v3421_v15  ;;  %3189 = vmatmul.mubr.msk.bf16.gmra.mxu1 %vm343_vm0, %v3422_v16 }
  0x36   : > { %464 = vmatprep.mubr.bf16.mxu0 %v3444_v2  ;;  %544 = vmatprep.mubr.bf16.mxu1 %v3444_v2 }
  0x3d   : > { %3182 = vmatmul.mubr.msk.bf16.gmra.mxu0 %vm343_vm0, %v3423_v17  ;;  %3190 = vmatmul.mubr.msk.bf16.gmra.mxu1 %vm343_vm0, %v3424_v18 }
  0x3e   : > { %474 = vmatprep.mubr.bf16.mxu0 %v3444_v2  ;;  %554 = vmatprep.mubr.bf16.mxu1 %v3444_v2 }
  0x45   : > { %3183 = vmatmul.mubr.msk.bf16.gmra.mxu0 %vm343_vm0, %v3425_v19  ;;  %3191 = vmatmul.mubr.msk.bf16.gmra.mxu1 %vm343_vm0, %v3426_v20 }
  0x46   : > { %484 = vmatprep.mubr.bf16.mxu0 %v3444_v2  ;;  %564 = vmatprep.mubr.bf16.mxu1 %v3444_v2 }
  0x4d   : > { %3184 = vmatmul.mubr.msk.bf16.gmra.mxu0 %vm343_vm0, %v3427_v22  ;;  %3192 = vmatmul.mubr.msk.bf16.gmra.mxu1 %vm343_vm0, %v3428_v23  ;;  %v3199_v22 = vld [vmem:[%s3555_s10 + $0x39] sm:$0x7f] }
  0x4e   : > { %494 = vmatprep.mubr.bf16.mxu0 %v3444_v2  ;;  %574 = vmatprep.mubr.bf16.mxu1 %v3444_v2  ;;  %v3215_v23 = vld [vmem:[%s3555_s10 + $0xb9] sm:$0x7f] }
  0x55   : > { %3185 = vmatmul.mubr.msk.bf16.gmra.mxu0 %vm343_vm0, %v3429_v24  ;;  %3193 = vmatmul.mubr.msk.bf16.gmra.mxu1 %vm343_vm0, %v3430_v25 }
  0xdd   : > { %v3633_v28 = vpop.f32.mrf.mxu0  ;;  %v3635_v29 = vpop.f32.mrf.mxu1 }
  0xde   : > { %585 = vst [vmem:[#allocation2] sm:$0xff] %v3633_v28  ;;  %v743_v30 = vadd.f32 %v3194_v26, %v3633_v28  ;;  %618 = vst [vmem:[#allocation2 + $0x100] sm:$0xff] %v3635_v29  ;;  %v759_v31 = vadd.f32 %v3210_v27, %v3635_v29  ;;  %894 = vrot.lane.b32.xlu0 %v3633_v28, %s3446_s11 }
  0xdf   : > { %v428_v32 = vpop.f32.mrf.mxu0  ;;  %v508_v33 = vpop.f32.mrf.mxu1 }
  0xe0   : > { %3224 = vst.msk [vmem:[%s3555_s10 + $0x11] sm:$0xff] %vm586_vm1, %v743_v30  ;;  %3240 = vst.msk [vmem:[%s3555_s10 + $0x91] sm:$0xff] %vm586_vm1, %v759_v31 }
  0xe1   : > { %619 = vst.msk [vmem:[#allocation2 + $0x108] sm:$0xff] %vm586_vm1, %v508_v33  ;;  %v3648_v34 = vpop.f32.mrf.mxu0  ;;  %v3650_v35 = vpop.f32.mrf.mxu1 }
  0xe2   : > { %588 = vst [vmem:[#allocation2 + $0x10] sm:$0xff] %v3648_v34  ;;  %620 = vst [vmem:[#allocation2 + $0x110] sm:$0xff] %v3650_v35  ;;  %928 = vrot.lane.b32.xlu1 %v3650_v35, %s3446_s11  ;;  %926 = vrot.lane.b32.xlu0 %v3635_v29, %s3446_s11  ;;  %v1136_v21 = vrot.slane %v3648_v34, 1 }
  0xe3   : > { %v432_v36 = vpop.f32.mrf.mxu0  ;;  %v512_v37 = vpop.f32.mrf.mxu1 }
  0xe4   : > { %621 = vst.msk [vmem:[#allocation2 + $0x118] sm:$0xff] %vm586_vm1, %v512_v37  ;;  %v1160_v36 = vrot.slane %v3650_v35, 1 }
  0xe5   : > { %v3661_v40 = vpop.f32.mrf.mxu0  ;;  %v3663_v41 = vpop.f32.mrf.mxu1  ;;  %v1074_v9 = vld [vmem:[#allocation2] sm:$0xfe] }
  0xe6   : > { %1426 = vrot.lane.b32.xlu0 %v3633_v28, %s3447_s14  ;;  %590 = vst [vmem:[#allocation2 + $0x20] sm:$0xff] %v3661_v40  ;;  %v745_v42 = vadd.f32 %v3196_v38, %v3661_v40  ;;  %622 = vst [vmem:[#allocation2 + $0x120] sm:$0xff] %v3663_v41  ;;  %v761_v43 = vadd.f32 %v3212_v39, %v3663_v41  ;;  %v1135_v15 = vrot.slane %v1074_v9, 1  ;;  %v1090_v18 = vld [vmem:[#allocation2 + $0x100] sm:$0xfe]  ;;  %v3202_v39 = vld [vmem:[%s3555_s10 + $0x51] sm:$0xff] }
  0xe7   : > { %v438_v46 = vpop.f32.mrf.mxu0  ;;  %v518_v47 = vpop.f32.mrf.mxu1  ;;  %v1159_v27 = vrot.slane %v1090_v18, 1  ;;  %v1874_v32 = vld [vmem:[#allocation2] sm:$0xfe] }
  0xe8   : > { %3226 = vst.msk [vmem:[%s3555_s10 + $0x21] sm:$0xff] %vm586_vm1, %v745_v42  ;;  %591 = vst.msk [vmem:[#allocation2 + $0x28] sm:$0xff] %vm586_vm1, %v438_v46  ;;  %v1137_v26 = vsel %vm1134_vm3, %v1135_v15, %v1136_v21  ;;  %v3218_v42 = vld [vmem:[%s3555_s10 + $0xd1] sm:$0xff] }
  0xe9   : > { %3242 = vst.msk [vmem:[%s3555_s10 + $0xa1] sm:$0xff] %vm586_vm1, %v761_v43  ;;  %623 = vst.msk [vmem:[#allocation2 + $0x128] sm:$0xff] %vm586_vm1, %v518_v47  ;;  %v714_v48 = vld [vmem:[#allocation2 + $0x10] sm:$0x7f]  ;;  %v3679_v51 = vpop.f32.mrf.mxu0  ;;  %v3681_v52 = vpop.f32.mrf.mxu1  ;;  %v1161_v43 = vsel %vm1134_vm3, %v1159_v27, %v1160_v36 }
  0xea   : > { %v730_v49 = vld [vmem:[#allocation2 + $0x110] sm:$0x7f]  ;;  %v744_v53 = vadd.f32 %v3195_v44, %v714_v48  ;;  %1458 = vrot.lane.b32.xlu0 %v3635_v29, %s3447_s14  ;;  %592 = vst [vmem:[#allocation2 + $0x30] sm:$0xff] %v3679_v51  ;;  %624 = vst [vmem:[#allocation2 + $0x130] sm:$0xff] %v3681_v52  ;;  %v1938_v44 = vrot.slane %v1874_v32, 1 }
  0xeb   : > { %v1363_v50 = vld [vmem:[#allocation2 + $0x10] sm:$0x7f]  ;;  %v760_v54 = vadd.f32 %v3211_v45, %v730_v49  ;;  %v442_v55 = vpop.f32.mrf.mxu0  ;;  %v522_v56 = vpop.f32.mrf.mxu1  ;;  %v3201_v48 = vld [vmem:[%s3555_s10 + $0x49] sm:$0x7f] }
  0xec   : > { %1428 = vrot.lane.b32.xlu1 %v1363_v50, %s3447_s14  ;;  %593 = vst.msk [vmem:[#allocation2 + $0x38] sm:$0xff] %vm586_vm1, %v442_v55  ;;  %625 = vst.msk [vmem:[#allocation2 + $0x138] sm:$0xff] %vm586_vm1, %v522_v56  ;;  %v1379_v59 = vld [vmem:[#allocation2 + $0x110] sm:$0x7f]  ;;  %v3217_v49 = vld [vmem:[%s3555_s10 + $0xc9] sm:$0x7f] }
  0xed   : > { %3241 = vst.msk [vmem:[%s3555_s10 + $0x99] sm:$0x7f] %vm774_vm2, %v760_v54  ;;  %3225 = vst.msk [vmem:[%s3555_s10 + $0x19] sm:$0x7f] %vm774_vm2, %v744_v53  ;;  %v3696_v60 = vpop.f32.mrf.mxu0  ;;  %v3698_v61 = vpop.f32.mrf.mxu1  ;;  %v1940_v54 = vsel %vm1134_vm3, %v1938_v44, %v1136_v21  ;;  %v1876_v32 = vld [vmem:[#allocation2 + $0x20] sm:$0xfe] }
  0xee   : > { %1682 = vrot.lane.b32.xlu0 %v3633_v28, %s3448_s15  ;;  %594 = vst [vmem:[#allocation2 + $0x40] sm:$0xff] %v3696_v60  ;;  %v747_v62 = vadd.f32 %v3198_v57, %v3696_v60  ;;  %626 = vst [vmem:[#allocation2 + $0x140] sm:$0xff] %v3698_v61  ;;  %v763_v63 = vadd.f32 %v3214_v58, %v3698_v61 }
  0xef   : > { %v448_v2 = vpop.f32.mrf.mxu0  ;;  %v528_v3 = vpop.f32.mrf.mxu1 }
  0xf0   : > { %1460 = vrot.lane.b32.xlu1 %v1379_v59, %s3447_s14  ;;  %3228 = vst.msk [vmem:[%s3555_s10 + $0x31] sm:$0xff] %vm586_vm1, %v747_v62  ;;  %595 = vst.msk [vmem:[#allocation2 + $0x48] sm:$0xff] %vm586_vm1, %v448_v2  ;;  %v3219_v2 = vld [vmem:[%s3555_s10 + $0xd9] sm:$0x7f] }
  0xf1   : > { %3244 = vst.msk [vmem:[%s3555_s10 + $0xb1] sm:$0xff] %vm586_vm1, %v763_v63  ;;  %627 = vst.msk [vmem:[#allocation2 + $0x148] sm:$0xff] %vm586_vm1, %v528_v3  ;;  %v716_v4 = vld [vmem:[#allocation2 + $0x30] sm:$0x7f]  ;;  %v3715_v6 = vpop.f32.mrf.mxu0  ;;  %v3717_v7 = vpop.f32.mrf.mxu1 }
  0xf2   : > { %v732_v5 = vld [vmem:[#allocation2 + $0x130] sm:$0x7f]  ;;  %1714 = vrot.lane.b32.xlu0 %v3635_v29, %s3448_s15  ;;  %v746_v8 = vadd.f32 %v3197_v0, %v716_v4  ;;  %596 = vst [vmem:[#allocation2 + $0x50] sm:$0xff] %v3715_v6  ;;  %628 = vst [vmem:[#allocation2 + $0x150] sm:$0xff] %v3717_v7 }
  0xf3   : > { %v762_v10 = vadd.f32 %v3213_v1, %v732_v5  ;;  %v452_v11 = vpop.f32.mrf.mxu0  ;;  %v532_v12 = vpop.f32.mrf.mxu1  ;;  %v3203_v1 = vld [vmem:[%s3555_s10 + $0x59] sm:$0x7f]  ;;  %v1365_v9 = vld [vmem:[#allocation2 + $0x30] sm:$0x7f] }
  0xf4   : > { %1684 = vrot.lane.b32.xlu1 %v3648_v34, %s3448_s15  ;;  %597 = vst.msk [vmem:[#allocation2 + $0x58] sm:$0xff] %vm586_vm1, %v452_v11  ;;  %629 = vst.msk [vmem:[#allocation2 + $0x158] sm:$0xff] %vm586_vm1, %v532_v12  ;;  %v3204_v11 = vld [vmem:[%s3555_s10 + $0x61] sm:$0xff]  ;;  %v1381_v15 = vld [vmem:[#allocation2 + $0x130] sm:$0x7f] }
  0xf5   : > { %3227 = vst.msk [vmem:[%s3555_s10 + $0x29] sm:$0x7f] %vm774_vm2, %v746_v8  ;;  %3243 = vst.msk [vmem:[%s3555_s10 + $0xa9] sm:$0x7f] %vm774_vm2, %v762_v10  ;;  %v3733_v16 = vpop.f32.mrf.mxu0  ;;  %v3735_v17 = vpop.f32.mrf.mxu1  ;;  %v1076_v12 = vld [vmem:[#allocation2 + $0x20] sm:$0xfe] }
  0xf6   : > { %896 = vrot.lane.b32.xlu0 %v3648_v34, %s3446_s11  ;;  %598 = vst [vmem:[#allocation2 + $0x60] sm:$0xff] %v3733_v16  ;;  %v749_v19 = vadd.f32 %v3200_v13, %v3733_v16  ;;  %630 = vst [vmem:[#allocation2 + $0x160] sm:$0xff] %v3735_v17  ;;  %v765_v20 = vadd.f32 %v3216_v14, %v3735_v17  ;;  %v1139_v14 = vrot.slane %v3679_v51, 1  ;;  %v2178_v18 = vld [vmem:[#allocation2 + $0x30] sm:$0x7f] }
  0xf7   : > { %v458_v24 = vpop.f32.mrf.mxu0  ;;  %v538_v25 = vpop.f32.mrf.mxu1 }
  0xf8   : > { %1716 = vrot.lane.b32.xlu1 %v3650_v35, %s3448_s15  ;;  %3230 = vst.msk [vmem:[%s3555_s10 + $0x41] sm:$0xff] %vm586_vm1, %v749_v19  ;;  %599 = vst.msk [vmem:[#allocation2 + $0x68] sm:$0xff] %vm586_vm1, %v458_v24  ;;  %v1138_v19 = vrot.slane %v1076_v12, 1 }
  0xf9   : > { %3246 = vst.msk [vmem:[%s3555_s10 + $0xc1] sm:$0xff] %vm586_vm1, %v765_v20  ;;  %631 = vst.msk [vmem:[#allocation2 + $0x168] sm:$0xff] %vm586_vm1, %v538_v25  ;;  %v718_v28 = vld [vmem:[#allocation2 + $0x50] sm:$0x7f]  ;;  %v3755_v30 = vpop.f32.mrf.mxu0  ;;  %v3757_v31 = vpop.f32.mrf.mxu1 }
  0xfa   : > { %v734_v29 = vld [vmem:[#allocation2 + $0x150] sm:$0x7f]  ;;  %1180 = vrot.lane.b32.xlu0 %v1137_v26, %s3449_s16  ;;  %v748_v33 = vadd.f32 %v3199_v22, %v718_v28  ;;  %600 = vst [vmem:[#allocation2 + $0x70] sm:$0xff] %v3755_v30  ;;  %632 = vst [vmem:[#allocation2 + $0x170] sm:$0xff] %v3757_v31  ;;  %v1140_v26 = vsel %vm1134_vm3, %v1138_v19, %v1139_v14  ;;  %v1163_v28 = vrot.slane %v3681_v52, 1 }
  0xfb   : > { %v764_v34 = vadd.f32 %v3215_v23, %v734_v29  ;;  %v462_v37 = vpop.f32.mrf.mxu0  ;;  %v542_v38 = vpop.f32.mrf.mxu1  ;;  %v2180_v19 = vld [vmem:[#allocation2 + $0x50] sm:$0x7f] }
  0xfc   : > { %1182 = vrot.lane.b32.xlu1 %v1136_v21, %s3449_s16  ;;  %601 = vst.msk [vmem:[#allocation2 + $0x78] sm:$0xff] %vm586_vm1, %v462_v37  ;;  %633 = vst.msk [vmem:[#allocation2 + $0x178] sm:$0xff] %vm586_vm1, %v542_v38  ;;  %v1941_v37 = vrot.slane %v1876_v32, 1  ;;  %v1330_v32 = vld [vmem:[%s3555_s10 + $0x1] sm:$0xff] }
  0xfd   : > { %3229 = vst.msk [vmem:[%s3555_s10 + $0x39] sm:$0x7f] %vm774_vm2, %v748_v33  ;;  %3245 = vst.msk [vmem:[%s3555_s10 + $0xb9] sm:$0x7f] %vm774_vm2, %v764_v34  ;;  %v3773_v35 = vpop.f32.mrf.mxu0  ;;  %v3775_v45 = vpop.f32.mrf.mxu1  ;;  %v3205_v34 = vld [vmem:[%s3555_s10 + $0x69] sm:$0x7f] }
  0xfe   : > { %1212 = vrot.lane.b32.xlu0 %v1161_v43, %s3449_s16  ;;  %602 = vst [vmem:[#allocation2 + $0x80] sm:$0xff] %v3773_v35  ;;  %v751_v46 = vadd.f32 %v3202_v39, %v3773_v35  ;;  %634 = vst [vmem:[#allocation2 + $0x180] sm:$0xff] %v3775_v45  ;;  %v767_v47 = vadd.f32 %v3218_v42, %v3775_v45  ;;  %v3221_v39 = vld [vmem:[%s3555_s10 + $0xe9] sm:$0x7f]  ;;  %v1943_v42 = vsel %vm1134_vm3, %v1941_v37, %v1139_v14 }
  0xff   : > { %v468_v50 = vpop.f32.mrf.mxu0  ;;  %v548_v53 = vpop.f32.mrf.mxu1 }
 0x100   : > { %1214 = vrot.lane.b32.xlu1 %v1160_v36, %s3449_s16  ;;  %3232 = vst.msk [vmem:[%s3555_s10 + $0x51] sm:$0xff] %vm586_vm1, %v751_v46  ;;  %603 = vst.msk [vmem:[#allocation2 + $0x88] sm:$0xff] %vm586_vm1, %v468_v50  ;;  %v1367_v50 = vld [vmem:[#allocation2 + $0x50] sm:$0x7f] }
 0x101   : > { %3248 = vst.msk [vmem:[%s3555_s10 + $0xd1] sm:$0xff] %vm586_vm1, %v767_v47  ;;  %635 = vst.msk [vmem:[#allocation2 + $0x188] sm:$0xff] %vm586_vm1, %v548_v53  ;;  %v720_v55 = vld [vmem:[#allocation2 + $0x70] sm:$0x7f]  ;;  %v3792_v57 = vpop.f32.mrf.mxu0  ;;  %v3794_v58 = vpop.f32.mrf.mxu1 }
 0x102   : > { %v736_v56 = vld [vmem:[#allocation2 + $0x170] sm:$0x7f]  ;;  %1986 = vrot.lane.b32.xlu0 %v1940_v54, %s3450_s17  ;;  %v750_v59 = vadd.f32 %v3201_v48, %v720_v55  ;;  %604 = vst [vmem:[#allocation2 + $0x90] sm:$0xff] %v3792_v57  ;;  %636 = vst [vmem:[#allocation2 + $0x190] sm:$0xff] %v3794_v58  ;;  %v1078_v48 = vld [vmem:[#allocation2 + $0x40] sm:$0xfe] }
 0x103   : > { %v766_v62 = vadd.f32 %v3217_v49, %v736_v56  ;;  %v472_v63 = vpop.f32.mrf.mxu0  ;;  %v552_v0 = vpop.f32.mrf.mxu1  ;;  %v1141_v53 = vrot.slane %v1078_v48, 1  ;;  %v3902_v54 = vrot.slane %v3715_v6, 1  ;;  %v1094_v56 = vld [vmem:[#allocation2 + $0x140] sm:$0xfe]  ;;  %v3209_v48 = vld [vmem:[%s3555_s10 + $0x89] sm:$0x7f] }
 0x104   : > { %1988 = vrot.lane.b32.xlu1 %v1136_v21, %s3450_s17  ;;  %3231 = vst.msk [vmem:[%s3555_s10 + $0x49] sm:$0x7f] %vm774_vm2, %v750_v59  ;;  %v3220_v21 = vld [vmem:[%s3555_s10 + $0xe1] sm:$0xff] }
 0x105   : > { %3247 = vst.msk [vmem:[%s3555_s10 + $0xc9] sm:$0x7f] %vm774_vm2, %v766_v62  ;;  %v3828_v10 = vpop.f32.mrf.mxu0  ;;  %v3840_v20 = vpop.f32.mrf.mxu1  ;;  %v1383_v62 = vld [vmem:[#allocation2 + $0x150] sm:$0x7f] }
 0x106   : > { %605 = vst.msk [vmem:[#allocation2 + $0x98] sm:$0xff] %vm586_vm1, %v472_v63  ;;  %637 = vst.msk [vmem:[#allocation2 + $0x198] sm:$0xff] %vm586_vm1, %v552_v0  ;;  %930 = vrot.lane.b32.xlu0 %v3663_v41, %s3446_s11  ;;  %v753_v13 = vadd.f32 %v3204_v11, %v3828_v10  ;;  %v769_v23 = vadd.f32 %v3220_v21, %v3840_v20  ;;  %v1143_v63 = vsel %vm1134_vm3, %v1141_v53, %v3902_v54  ;;  %v3254_v21 = vld [vmem:[%s3555_s10 + $0x10] sm:$0xff]  ;;  %v1080_v53 = vld [vmem:[#allocation2 + $0x60] sm:$0xfe] }
 0x107   : > { %606 = vst [vmem:[#allocation2 + $0xa0] sm:$0xff] %v3828_v10  ;;  %638 = vst [vmem:[#allocation2 + $0x1a0] sm:$0xff] %v3840_v20  ;;  %v558_v24 = vpop.f32.mrf.mxu1  ;;  %v1165_v0 = vrot.slane %v1094_v56, 1 }
 0x108   : > { %898 = vrot.lane.b32.xlu1 %v3661_v40, %s3446_s11  ;;  %3234 = vst.msk [vmem:[%s3555_s10 + $0x61] sm:$0xff] %vm586_vm1, %v753_v13  ;;  %3250 = vst.msk [vmem:[%s3555_s10 + $0xe1] sm:$0xff] %vm586_vm1, %v769_v23  ;;  %v3223_v13 = vld [vmem:[%s3555_s10 + $0xf9] sm:$0x7f] }
 0x109   : > { %v722_v3 = vld [vmem:[#allocation2 + $0x90] sm:$0x7f]  ;;  %639 = vst.msk [vmem:[#allocation2 + $0x1a8] sm:$0xff] %vm586_vm1, %v558_v24  ;;  %v3856_v29 = vpop.f32.mrf.mxu1  ;;  %v3271_v24 = vld [vmem:[%s3555_s10 + $0x98] sm:$0xff] }
 0x10a   : > { %v738_v4 = vld [vmem:[#allocation2 + $0x190] sm:$0x7f]  ;;  %1430 = vrot.lane.b32.xlu0 %v3661_v40, %s3447_s14  ;;  %v752_v5 = vadd.f32 %v3203_v1, %v722_v3  ;;  %640 = vst [vmem:[#allocation2 + $0x1b0] sm:$0xff] %v3856_v29  ;;  %v1166_v1 = vrot.slane %v3717_v7, 1 }
 0x10b   : > { %v768_v8 = vadd.f32 %v3219_v2, %v738_v4  ;;  %v562_v33 = vpop.f32.mrf.mxu1  ;;  %v3207_v4 = vld [vmem:[%s3555_s10 + $0x79] sm:$0x7f] }
 0x10c   : > { %2237 = vrot.lane.b32.xlu1 %v3661_v40, %s3451_s18  ;;  %3233 = vst.msk [vmem:[%s3555_s10 + $0x59] sm:$0x7f] %vm774_vm2, %v752_v5 }
 0x10d   : > { %3249 = vst.msk [vmem:[%s3555_s10 + $0xd9] sm:$0x7f] %vm774_vm2, %v768_v8  ;;  %v3905_v55 = vpop.f32.mrf.mxu1  ;;  %v1167_v8 = vsel %vm1134_vm3, %v1165_v0, %v1166_v1 }
 0x10e   : > { %1462 = vrot.lane.b32.xlu0 %v3663_v41, %s3447_s14  ;;  %641 = vst.msk [vmem:[#allocation2 + $0x1b8] sm:$0xff] %vm586_vm1, %v562_v33  ;;  %642 = vst [vmem:[#allocation2 + $0x1c0] sm:$0xff] %v3905_v55 }
 0x10f   : > { %v568_v59 = vpop.f32.mrf.mxu1 }
 0x110   : > { %900 = vrot.lane.b32.xlu1 %v3679_v51, %s3446_s11  ;;  %643 = vst.msk [vmem:[#allocation2 + $0x1c8] sm:$0xff] %vm586_vm1, %v568_v59 }
 0x111   : > { %v740_v43 = vld [vmem:[#allocation2 + $0x1b0] sm:$0x7f]  ;;  %v3921_v3 = vpop.f32.mrf.mxu1 }
 0x112   : > { %1686 = vrot.lane.b32.xlu0 %v3661_v40, %s3448_s15  ;;  %v478_v40 = vpop.f32.mrf.mxu0  ;;  %v770_v44 = vadd.f32 %v3221_v39, %v740_v43  ;;  %644 = vst [vmem:[#allocation2 + $0x1d0] sm:$0xff] %v3921_v3 }
 0x113   : > { %607 = vst.msk [vmem:[#allocation2 + $0xa8] sm:$0xff] %vm586_vm1, %v478_v40  ;;  %v572_v5 = vpop.f32.mrf.mxu1 }
 0x114   : > { %932 = vrot.lane.b32.xlu1 %v3681_v52, %s3446_s11  ;;  %v3845_v22 = vpop.f32.mrf.mxu0  ;;  %3251 = vst.msk [vmem:[%s3555_s10 + $0xe9] sm:$0x7f] %vm774_vm2, %v770_v44 }
 0x115   : > { %608 = vst [vmem:[#allocation2 + $0xb0] sm:$0xff] %v3845_v22  ;;  %645 = vst.msk [vmem:[#allocation2 + $0x1d8] sm:$0xff] %vm586_vm1, %v572_v5 }
 0x116   : > { %1718 = vrot.lane.b32.xlu0 %v3663_v41, %s3448_s15  ;;  %v1092_v41 = vld [vmem:[#allocation2 + $0x120] sm:$0xfe]  ;;  %v482_v25 = vpop.f32.mrf.mxu0 }
 0x117   : > { %v1162_v27 = vrot.slane %v1092_v41, 1  ;;  %609 = vst.msk [vmem:[#allocation2 + $0xb8] sm:$0xff] %vm586_vm1, %v482_v25  ;;  %v3270_v25 = vld [vmem:[%s3555_s10 + $0x90] sm:$0xff] }
 0x118   : > { %1432 = vrot.lane.b32.xlu1 %v1365_v9, %s3447_s14  ;;  %v3891_v46 = vpop.f32.mrf.mxu0 }
 0x119   : > { %v1164_v36 = vsel %vm1134_vm3, %v1162_v27, %v1163_v28  ;;  %610 = vst [vmem:[#allocation2 + $0xc0] sm:$0xff] %v3891_v46  ;;  %v742_v40 = vld [vmem:[#allocation2 + $0x1d0] sm:$0x7f] }
 0x11a   : > { %2239 = vrot.lane.b32.xlu0 %v2178_v18, %s3451_s18  ;;  %v488_v49 = vpop.f32.mrf.mxu0 }
 0x11b   : > { %611 = vst.msk [vmem:[#allocation2 + $0xc8] sm:$0xff] %vm586_vm1, %v488_v49  ;;  %v3990_v49 = vpop.f32.mrf.mxu1 }
 0x11c   : > { %1464 = vrot.lane.b32.xlu1 %v1381_v15, %s3447_s14  ;;  %v724_v38 = vld [vmem:[#allocation2 + $0xb0] sm:$0x7f]  ;;  %646 = vst [vmem:[#allocation2 + $0x1e0] sm:$0xff] %v3990_v49 }
 0x11d   : > { %v3222_v15 = vld [vmem:[%s3555_s10 + $0xf1] sm:$0xff] }
 0x11e   : > { %1184 = vrot.lane.b32.xlu0 %v1140_v26, %s3449_s16  ;;  %v771_v18 = vadd.f32 %v3222_v15, %v3905_v55 }
 0x120   : > { %1688 = vrot.lane.b32.xlu1 %v3679_v51, %s3448_s15  ;;  %v754_v51 = vadd.f32 %v3205_v34, %v724_v38  ;;  %3252 = vst.msk [vmem:[%s3555_s10 + $0xf1] sm:$0xff] %vm586_vm1, %v771_v18  ;;  %v1331_v38 = vld [vmem:[%s3555_s10 + $0x9] sm:$0x7f] }
 0x122   : > { %1216 = vrot.lane.b32.xlu0 %v1164_v36, %s3449_s16  ;;  %3235 = vst.msk [vmem:[%s3555_s10 + $0x69] sm:$0x7f] %vm774_vm2, %v754_v51 }
 0x124   : > { %1720 = vrot.lane.b32.xlu1 %v3681_v52, %s3448_s15  ;;  %v3206_v52 = vld [vmem:[%s3555_s10 + $0x71] sm:$0xff] }
 0x125   : > { %v755_v47 = vadd.f32 %v3206_v52, %v3891_v46 }
 0x126   : > { %1990 = vrot.lane.b32.xlu0 %v1943_v42, %s3450_s17 }
 0x127   : > { %3236 = vst.msk [vmem:[%s3555_s10 + $0x71] sm:$0xff] %vm586_vm1, %v755_v47 }
 0x128   : > { %1186 = vrot.lane.b32.xlu1 %v1139_v14, %s3449_s16 }
 0x12a   : > { %902 = vrot.lane.b32.xlu0 %v3696_v60, %s3446_s11 }
 0x12c   : > { %1218 = vrot.lane.b32.xlu1 %v1163_v28, %s3449_s16 }
 0x12e   : > { %934 = vrot.lane.b32.xlu0 %v3698_v61, %s3446_s11 }
 0x130   : > { %1992 = vrot.lane.b32.xlu1 %v1139_v14, %s3450_s17 }
 0x132   : > { %1434 = vrot.lane.b32.xlu0 %v3696_v60, %s3447_s14 }
 0x134   : > { %2241 = vrot.lane.b32.xlu1 %v3696_v60, %s3451_s18 }
 0x136   : > { %1466 = vrot.lane.b32.xlu0 %v3698_v61, %s3447_s14 }
 0x138   : > { %904 = vrot.lane.b32.xlu1 %v3715_v6, %s3446_s11 }
 0x13a   : > { %1690 = vrot.lane.b32.xlu0 %v3696_v60, %s3448_s15  ;;  %v3910_v60 = vpop.f32.mrf.mxu0 }
 0x13b   : > { %612 = vst [vmem:[#allocation2 + $0xd0] sm:$0xff] %v3910_v60 }
 0x13c   : > { %936 = vrot.lane.b32.xlu1 %v3717_v7, %s3446_s11  ;;  %v492_v2 = vpop.f32.mrf.mxu0 }
 0x13d   : > { %613 = vst.msk [vmem:[#allocation2 + $0xd8] sm:$0xff] %vm586_vm1, %v492_v2 }
 0x13e   : > { %1722 = vrot.lane.b32.xlu0 %v3698_v61, %s3448_s15  ;;  %v1878_v61 = vld [vmem:[#allocation2 + $0x40] sm:$0xfe]  ;;  %v3960_v33 = vpop.f32.mrf.mxu0 }
 0x13f   : > { %v1944_v9 = vrot.slane %v1878_v61, 1  ;;  %614 = vst [vmem:[#allocation2 + $0xe0] sm:$0xff] %v3960_v33  ;;  %v1144_v61 = vrot.slane %v1080_v53, 1 }
 0x140   : > { %1436 = vrot.lane.b32.xlu1 %v1367_v50, %s3447_s14  ;;  %v498_v36 = vpop.f32.mrf.mxu0 }
 0x141   : > { %v1946_v14 = vsel %vm1134_vm3, %v1944_v9, %v3902_v54  ;;  %615 = vst.msk [vmem:[#allocation2 + $0xe8] sm:$0xff] %vm586_vm1, %v498_v36  ;;  %v1096_v9 = vld [vmem:[#allocation2 + $0x160] sm:$0xfe] }
 0x142   : > { %1188 = vrot.lane.b32.xlu0 %v1143_v63, %s3449_s16  ;;  %v726_v11 = vld [vmem:[#allocation2 + $0xd0] sm:$0x7f]  ;;  %v3973_v51 = vpop.f32.mrf.mxu0  ;;  %v3208_v63 = vld [vmem:[%s3555_s10 + $0x81] sm:$0xff]  ;;  %v1168_v18 = vrot.slane %v1096_v9, 1 }
 0x143   : > { %v756_v12 = vadd.f32 %v3207_v4, %v726_v11  ;;  %616 = vst [vmem:[#allocation2 + $0xf0] sm:$0xff] %v3973_v51  ;;  %v757_v2 = vadd.f32 %v3208_v63, %v3960_v33  ;;  %v4006_v4 = vrot.slane %v3755_v30, 1 }
 0x144   : > { %1468 = vrot.lane.b32.xlu1 %v1383_v62, %s3447_s14  ;;  %v502_v44 = vpop.f32.mrf.mxu0  ;;  %v578_v62 = vpop.f32.mrf.mxu1 }
 0x145   : > { %3237 = vst.msk [vmem:[%s3555_s10 + $0x79] sm:$0x7f] %vm774_vm2, %v756_v12 }
 0x146   : > { %1220 = vrot.lane.b32.xlu0 %v1167_v8, %s3449_s16  ;;  %617 = vst.msk [vmem:[#allocation2 + $0xf8] sm:$0xff] %vm586_vm1, %v502_v44  ;;  %647 = vst.msk [vmem:[#allocation2 + $0x1e8] sm:$0xff] %vm586_vm1, %v578_v62  ;;  %v4010_v5 = vpop.f32.mrf.mxu1 }
 0x147   : > { %648 = vst [vmem:[#allocation2 + $0x1f0] sm:$0xff] %v4010_v5  ;;  %3238 = vst.msk [vmem:[%s3555_s10 + $0x81] sm:$0xff] %vm586_vm1, %v757_v2 }
 0x148   : > { %1692 = vrot.lane.b32.xlu1 %v3715_v6, %s3448_s15  ;;  %v772_v6 = vadd.f32 %v3223_v13, %v742_v40  ;;  %v582_v12 = vpop.f32.mrf.mxu1  ;;  %v3255_v40 = vld [vmem:[%s3555_s10 + $0x18] sm:$0xff] }
 0x149   : > { %649 = vst.msk [vmem:[#allocation2 + $0x1f8] sm:$0xff] %vm586_vm1, %v582_v12 }
 0x14a   : > { %1994 = vrot.lane.b32.xlu0 %v1946_v14, %s3450_s17  ;;  %3253 = vst.msk [vmem:[%s3555_s10 + $0xf9] sm:$0x7f] %vm774_vm2, %v772_v6  ;;  %v1385_v6 = vld [vmem:[#allocation2 + $0x170] sm:$0x7f] }
 0x14c   : > { %1724 = vrot.lane.b32.xlu1 %v3717_v7, %s3448_s15 }
 0x14e   : > { %906 = vrot.lane.b32.xlu0 %v3733_v16, %s3446_s11 }
 0x150   : > { %2243 = vrot.lane.b32.xlu1 %v2180_v19, %s3451_s18  ;;  %v895_v7 = vpop.permute.xlu0 %894  ;;  %v1169_v19 = vrot.slane %v3757_v31, 1 }
 0x151   : > { %v984_v41 = vadd.f32 %v3254_v21, %v895_v7  ;;  %v1880_v7 = vld [vmem:[#allocation2 + $0x60] sm:$0xfe] }
 0x152   : > { %938 = vrot.lane.b32.xlu0 %v3735_v17, %s3446_s11 }
 0x153   : > { %3284 = vst.msk [vmem:[%s3555_s10 + $0x10] sm:$0xff] %vm586_vm1, %v984_v41 }
 0x154   : > { %1190 = vrot.lane.b32.xlu1 %v3902_v54, %s3449_s16  ;;  %v929_v23 = vpop.permute.xlu1 %928  ;;  %v927_v26 = vpop.permute.xlu0 %926 }
 0x155   : > { %v1001_v27 = vadd.f32 %v3271_v24, %v929_v23  ;;  %v1000_v28 = vadd.f32 %v3270_v25, %v927_v26  ;;  %v1170_v25 = vsel %vm1134_vm3, %v1168_v18, %v1169_v19  ;;  %v1947_v26 = vrot.slane %v1880_v7, 1  ;;  %v3273_v18 = vld [vmem:[%s3555_s10 + $0xa8] sm:$0xff] }
 0x156   : > { %1438 = vrot.lane.b32.xlu0 %v3733_v16, %s3447_s14 }
 0x157   : > { %3301 = vst.msk [vmem:[%s3555_s10 + $0x98] sm:$0xff] %vm586_vm1, %v1001_v27  ;;  %3300 = vst.msk [vmem:[%s3555_s10 + $0x90] sm:$0xff] %vm586_vm1, %v1000_v28 }
 0x158   : > { %1222 = vrot.lane.b32.xlu1 %v1166_v1, %s3449_s16  ;;  %v1427_v34 = vpop.permute.xlu0 %1426 }
 0x159   : > { %v1522_v37 = vadd.f32 %v1427_v34, %v1330_v32 }
 0x15a   : > { %1470 = vrot.lane.b32.xlu0 %v3735_v17, %s3447_s14  ;;  %v3314_v41 = vld [vmem:[%s3555_s10 + $0x10] sm:$0xff] }
 0x15b   : > { %1554 = vst.msk [vmem:[%s3555_s10 + $0x1] sm:$0xff] %vm586_vm1, %v1522_v37 }
 0x15c   : > { %1996 = vrot.lane.b32.xlu1 %v3902_v54, %s3450_s17  ;;  %v3978_v42 = vpop.permute.xlu0 %1458  ;;  %v728_v54 = vld [vmem:[#allocation2 + $0xf0] sm:$0x7f] }
 0x15d   : > { %v758_v59 = vadd.f32 %v3209_v48, %v728_v54 }
 0x15e   : > { %v1429_v39 = vpop.permute.xlu1 %1428  ;;  %1694 = vrot.lane.b32.xlu0 %v3733_v16, %s3448_s15  ;;  %v3331_v27 = vld [vmem:[%s3555_s10 + $0x98] sm:$0x7f]  ;;  %v3330_v32 = vld [vmem:[%s3555_s10 + $0x90] sm:$0xff] }
 0x15f   : > { %v1523_v43 = vadd.f32 %v1429_v39, %v1331_v38  ;;  %3239 = vst.msk [vmem:[%s3555_s10 + $0x89] sm:$0x7f] %vm774_vm2, %v758_v59  ;;  %v1949_v38 = vsel %vm1134_vm3, %v1947_v26, %v4006_v4  ;;  %v3272_v59 = vld [vmem:[%s3555_s10 + $0xa0] sm:$0xff] }
 0x160   : > { %908 = vrot.lane.b32.xlu1 %v3755_v30, %s3446_s11  ;;  %v1683_v47 = vpop.permute.xlu0 %1682 }
 0x161   : > { %1555 = vst.msk [vmem:[%s3555_s10 + $0x9] sm:$0x7f] %vm774_vm2, %v1523_v43 }
 0x162   : > { %v3986_v52 = vpop.permute.xlu1 %1460  ;;  %v1586_v50 = vld [vmem:[%s3555_s10] sm:$0xff]  ;;  %1726 = vrot.lane.b32.xlu0 %v3735_v17, %s3448_s15  ;;  %v1369_v17 = vld [vmem:[#allocation2 + $0x70] sm:$0x7f] }
 0x163   : > { %v1778_v56 = vadd.f32 %v1683_v47, %v1586_v50 }
 0x164   : > { %940 = vrot.lane.b32.xlu1 %v3757_v31, %s3446_s11  ;;  %v3999_v1 = vpop.permute.xlu0 %1714 }
 0x165   : > { %1810 = vst.msk [vmem:[%s3555_s10] sm:$0xff] %vm586_vm1, %v1778_v56  ;;  %v3256_v56 = vld [vmem:[%s3555_s10 + $0x20] sm:$0xff] }
 0x166   : > { %v1685_v0 = vpop.permute.xlu1 %1684  ;;  %2245 = vrot.lane.b32.xlu0 %v3733_v16, %s3451_s18  ;;  %v1146_v16 = vsel %vm1134_vm3, %v1144_v61, %v4006_v4 }
 0x168   : > { %v1587_v8 = vld [vmem:[%s3555_s10 + $0x8] sm:$0xff]  ;;  %1440 = vrot.lane.b32.xlu1 %v1369_v17, %s3447_s14  ;;  %v897_v14 = vpop.permute.xlu0 %896 }
 0x169   : > { %v1779_v11 = vadd.f32 %v1685_v0, %v1587_v8  ;;  %v985_v15 = vadd.f32 %v3255_v40, %v897_v14  ;;  %v3257_v14 = vld [vmem:[%s3555_s10 + $0x28] sm:$0xff] }
 0x16a   : > { %v4019_v13 = vpop.permute.xlu1 %1716  ;;  %1192 = vrot.lane.b32.xlu0 %v1146_v16, %s3449_s16 }
 0x16b   : > { %1811 = vst.msk [vmem:[%s3555_s10 + $0x8] sm:$0xff] %vm586_vm1, %v1779_v11  ;;  %3285 = vst.msk [vmem:[%s3555_s10 + $0x18] sm:$0xff] %vm586_vm1, %v985_v15 }
 0x16c   : > { %1472 = vrot.lane.b32.xlu1 %v1385_v6, %s3447_s14  ;;  %v1181_v23 = vpop.permute.xlu0 %1180  ;;  %v1842_v47 = vld [vmem:[%s3555_s10] sm:$0xff] }
 0x16d   : > { %v1270_v24 = vadd.f32 %v3314_v41, %v1181_v23 }
 0x16e   : > { %v1183_v21 = vpop.permute.xlu1 %1182  ;;  %1224 = vrot.lane.b32.xlu0 %v1170_v25, %s3449_s16 }
 0x16f   : > { %3344 = vst.msk [vmem:[%s3555_s10 + $0x10] sm:$0xff] %vm586_vm1, %v1270_v24 }
 0x170   : > { %1696 = vrot.lane.b32.xlu1 %v3755_v30, %s3448_s15  ;;  %v1213_v34 = vpop.permute.xlu0 %1212 }
 0x171   : > { %v1286_v37 = vadd.f32 %v3330_v32, %v1213_v34 }
 0x172   : > { %v1215_v28 = vpop.permute.xlu1 %1214  ;;  %v3315_v39 = vld [vmem:[%s3555_s10 + $0x18] sm:$0x7f]  ;;  %1998 = vrot.lane.b32.xlu0 %v1949_v38, %s3450_s17  ;;  %v1843_v43 = vld [vmem:[%s3555_s10 + $0x8] sm:$0x7f]  ;;  %v1951_v38 = vrot.slane %v3792_v57, 1 }
 0x173   : > { %v1287_v36 = vadd.f32 %v3331_v27, %v1215_v28  ;;  %v1271_v30 = vadd.f32 %v3315_v39, %v1183_v21  ;;  %3360 = vst.msk [vmem:[%s3555_s10 + $0x90] sm:$0xff] %vm586_vm1, %v1286_v37  ;;  %v1082_v28 = vld [vmem:[#allocation2 + $0x80] sm:$0xfe] }
 0x174   : > { %1728 = vrot.lane.b32.xlu1 %v3757_v31, %s3448_s15  ;;  %v1987_v48 = vpop.permute.xlu0 %1986  ;;  %v2182_v31 = vld [vmem:[#allocation2 + $0x70] sm:$0x7f] }
 0x175   : > { %3361 = vst.msk [vmem:[%s3555_s10 + $0x98] sm:$0x7f] %vm774_vm2, %v1287_v36  ;;  %3345 = vst.msk [vmem:[%s3555_s10 + $0x18] sm:$0x7f] %vm774_vm2, %v1271_v30  ;;  %v2082_v53 = vadd.f32 %v1987_v48, %v1842_v47  ;;  %v1371_v30 = vld [vmem:[#allocation2 + $0x90] sm:$0x7f] }
 0x176   : > { %v1989_v44 = vpop.permute.xlu1 %1988  ;;  %910 = vrot.lane.b32.xlu0 %v3773_v35, %s3446_s11 }
 0x177   : > { %v2083_v50 = vadd.f32 %v1989_v44, %v1843_v43  ;;  %2114 = vst.msk [vmem:[%s3555_s10] sm:$0xff] %vm586_vm1, %v2082_v53  ;;  %v1098_v44 = vld [vmem:[#allocation2 + $0x180] sm:$0xfe] }
 0x178   : > { %2247 = vrot.lane.b32.xlu1 %v2182_v31, %s3451_s18  ;;  %v931_v62 = vpop.permute.xlu0 %930  ;;  %v1387_v31 = vld [vmem:[#allocation2 + $0x190] sm:$0x7f] }
 0x179   : > { %2115 = vst.msk [vmem:[%s3555_s10 + $0x8] sm:$0x7f] %vm774_vm2, %v2083_v50  ;;  %v1002_v0 = vadd.f32 %v3272_v59, %v931_v62  ;;  %v1172_v59 = vrot.slane %v3794_v58, 1 }
 0x17a   : > { %v899_v54 = vpop.permute.xlu1 %898  ;;  %942 = vrot.lane.b32.xlu0 %v3775_v45, %s3446_s11 }
 0x17b   : > { %v986_v63 = vadd.f32 %v3256_v56, %v899_v54  ;;  %3302 = vst.msk [vmem:[%s3555_s10 + $0xa0] sm:$0xff] %vm586_vm1, %v1002_v0  ;;  %v1171_v56 = vrot.slane %v1098_v44, 1 }
 0x17c   : > { %1194 = vrot.lane.b32.xlu1 %v4006_v4, %s3449_s16  ;;  %v1332_v17 = vld [vmem:[%s3555_s10 + $0x11] sm:$0xff]  ;;  %v1431_v61 = vpop.permute.xlu0 %1430  ;;  %v1333_v23 = vld [vmem:[%s3555_s10 + $0x19] sm:$0x7f] }
 0x17d   : > { %3286 = vst.msk [vmem:[%s3555_s10 + $0x20] sm:$0xff] %vm586_vm1, %v986_v63  ;;  %v1524_v8 = vadd.f32 %v1431_v61, %v1332_v17  ;;  %v1348_v40 = vld [vmem:[%s3555_s10 + $0x91] sm:$0xff]  ;;  %v1349_v32 = vld [vmem:[%s3555_s10 + $0x99] sm:$0x7f]  ;;  %v1882_v63 = vld [vmem:[#allocation2 + $0x80] sm:$0xfe] }
 0x17e   : > { %v2238_v2 = vpop.permute.xlu1 %2237  ;;  %1442 = vrot.lane.b32.xlu0 %v3773_v35, %s3447_s14 }
 0x17f   : > { %1556 = vst.msk [vmem:[%s3555_s10 + $0x11] sm:$0xff] %vm586_vm1, %v1524_v8 }
 0x180   : > { %v2146_v9 = vld [vmem:[%s3555_s10 + $0x1] sm:$0xff]  ;;  %1226 = vrot.lane.b32.xlu1 %v1169_v19, %s3449_s16  ;;  %v1463_v6 = vpop.permute.xlu0 %1462  ;;  %v2147_v36 = vld [vmem:[%s3555_s10 + $0x9] sm:$0x7f] }
 0x181   : > { %v2327_v11 = vadd.f32 %v2238_v2, %v2146_v9  ;;  %v1540_v16 = vadd.f32 %v1463_v6, %v1348_v40  ;;  %v1173_v9 = vsel %vm1134_vm3, %v1171_v56, %v1172_v59  ;;  %v1373_v56 = vld [vmem:[#allocation2 + $0xb0] sm:$0x7f] }
 0x182   : > { %v901_v12 = vpop.permute.xlu1 %900  ;;  %1474 = vrot.lane.b32.xlu0 %v3775_v45, %s3447_s14  ;;  %v3332_v17 = vld [vmem:[%s3555_s10 + $0xa0] sm:$0xff] }
 0x183   : > { %2357 = vst.msk [vmem:[%s3555_s10 + $0x1] sm:$0xff] %vm586_vm1, %v2327_v11  ;;  %v987_v15 = vadd.f32 %v3257_v14, %v901_v12  ;;  %1572 = vst.msk [vmem:[%s3555_s10 + $0x91] sm:$0xff] %vm586_vm1, %v1540_v16  ;;  %v1950_v11 = vrot.slane %v1882_v63, 1 }
 0x184   : > { %2000 = vrot.lane.b32.xlu1 %v4006_v4, %s3450_s17  ;;  %v1687_v7 = vpop.permute.xlu0 %1686  ;;  %v3316_v48 = vld [vmem:[%s3555_s10 + $0x20] sm:$0xff] }
 0x185   : > { %3287 = vst.msk [vmem:[%s3555_s10 + $0x28] sm:$0xff] %vm586_vm1, %v987_v15 }
 0x186   : > { %v933_v19 = vpop.permute.xlu1 %932  ;;  %v1588_v41 = vld [vmem:[%s3555_s10 + $0x10] sm:$0xff]  ;;  %1698 = vrot.lane.b32.xlu0 %v3773_v35, %s3448_s15 }
 0x187   : > { %v1003_v21 = vadd.f32 %v3273_v18, %v933_v19  ;;  %v1780_v4 = vadd.f32 %v1687_v7, %v1588_v41 }
 0x188   : > { %912 = vrot.lane.b32.xlu1 %v3792_v57, %s3446_s11  ;;  %v1719_v25 = vpop.permute.xlu0 %1718 }
 0x189   : > { %3303 = vst.msk [vmem:[%s3555_s10 + $0xa8] sm:$0xff] %vm586_vm1, %v1003_v21  ;;  %1812 = vst.msk [vmem:[%s3555_s10 + $0x10] sm:$0xff] %vm586_vm1, %v1780_v4  ;;  %v3258_v4 = vld [vmem:[%s3555_s10 + $0x30] sm:$0xff] }
 0x18a   : > { %v1433_v24 = vpop.permute.xlu1 %1432  ;;  %v1604_v27 = vld [vmem:[%s3555_s10 + $0x90] sm:$0xff]  ;;  %1730 = vrot.lane.b32.xlu0 %v3775_v45, %s3448_s15  ;;  %v1147_v45 = vrot.slane %v1082_v28, 1 }
 0x18b   : > { %v1525_v26 = vadd.f32 %v1433_v24, %v1333_v23  ;;  %v1796_v35 = vadd.f32 %v1719_v25, %v1604_v27 }
 0x18c   : > { %944 = vrot.lane.b32.xlu1 %v3794_v58, %s3446_s11  ;;  %v2240_v37 = vpop.permute.xlu0 %2239  ;;  %v1149_v54 = vsel %vm1134_vm3, %v1147_v45, %v1951_v38  ;;  %v3317_v6 = vld [vmem:[%s3555_s10 + $0x28] sm:$0x7f] }
 0x18d   : > { %1557 = vst.msk [vmem:[%s3555_s10 + $0x19] sm:$0x7f] %vm774_vm2, %v1525_v26  ;;  %v2328_v43 = vadd.f32 %v2240_v37, %v2147_v36  ;;  %v3274_v26 = vld [vmem:[%s3555_s10 + $0xb0] sm:$0xff] }
 0x18e   : > { %v1465_v34 = vpop.permute.xlu1 %1464  ;;  %1828 = vst.msk [vmem:[%s3555_s10 + $0x90] sm:$0xff] %vm586_vm1, %v1796_v35  ;;  %2004 = vrot.lane.b32.xlu0 %v1951_v38, %s3450_s17 }
 0x18f   : > { %v1541_v39 = vadd.f32 %v1465_v34, %v1349_v32  ;;  %2358 = vst.msk [vmem:[%s3555_s10 + $0x9] sm:$0x7f] %vm774_vm2, %v2328_v43 }
 0x190   : > { %1444 = vrot.lane.b32.xlu1 %v1371_v30, %s3447_s14  ;;  %v1185_v50 = vpop.permute.xlu0 %1184  ;;  %v1844_v15 = vld [vmem:[%s3555_s10 + $0x10] sm:$0xff]  ;;  %v3333_v7 = vld [vmem:[%s3555_s10 + $0xa8] sm:$0x7f] }
 0x191   : > { %1573 = vst.msk [vmem:[%s3555_s10 + $0x99] sm:$0x7f] %vm774_vm2, %v1541_v39  ;;  %v1272_v53 = vadd.f32 %v3316_v48, %v1185_v50  ;;  %v3259_v39 = vld [vmem:[%s3555_s10 + $0x38] sm:$0xff] }
 0x192   : > { %v1689_v47 = vpop.permute.xlu1 %1688  ;;  %1196 = vrot.lane.b32.xlu0 %v1149_v54, %s3449_s16  ;;  %v3275_v50 = vld [vmem:[%s3555_s10 + $0xb8] sm:$0xff] }
 0x193   : > { %3346 = vst.msk [vmem:[%s3555_s10 + $0x20] sm:$0xff] %vm586_vm1, %v1272_v53 }
 0x194   : > { %v1589_v62 = vld [vmem:[%s3555_s10 + $0x18] sm:$0xff]  ;;  %1476 = vrot.lane.b32.xlu1 %v1387_v31, %s3447_s14  ;;  %v1217_v61 = vpop.permute.xlu0 %1216 }
 0x195   : > { %v1781_v0 = vadd.f32 %v1689_v47, %v1589_v62  ;;  %v1288_v8 = vadd.f32 %v3332_v17, %v1217_v61  ;;  %v1389_v61 = vld [vmem:[#allocation2 + $0x1b0] sm:$0x7f] }
 0x196   : > { %v1721_v2 = vpop.permute.xlu1 %1720  ;;  %1228 = vrot.lane.b32.xlu0 %v1173_v9, %s3449_s16 }
 0x197   : > { %1813 = vst.msk [vmem:[%s3555_s10 + $0x18] sm:$0xff] %vm586_vm1, %v1781_v0  ;;  %3362 = vst.msk [vmem:[%s3555_s10 + $0xa0] sm:$0xff] %vm586_vm1, %v1288_v8 }
 0x198   : > { %v1605_v12 = vld [vmem:[%s3555_s10 + $0x98] sm:$0xff]  ;;  %1700 = vrot.lane.b32.xlu1 %v3792_v57, %s3448_s15  ;;  %v1991_v16 = vpop.permute.xlu0 %1990  ;;  %v1952_v57 = vsel %vm1134_vm3, %v1950_v11, %v1951_v38 }
 0x199   : > { %v1797_v14 = vadd.f32 %v1721_v2, %v1605_v12  ;;  %v2084_v19 = vadd.f32 %v1991_v16, %v1844_v15 }
 0x19a   : > { %v1187_v40 = vpop.permute.xlu1 %1186  ;;  %2002 = vrot.lane.b32.xlu0 %v1952_v57, %s3450_s17 }
 0x19b   : > { %1829 = vst.msk [vmem:[%s3555_s10 + $0x98] sm:$0xff] %vm586_vm1, %v1797_v14  ;;  %v1273_v18 = vadd.f32 %v3317_v6, %v1187_v40  ;;  %2116 = vst.msk [vmem:[%s3555_s10 + $0x10] sm:$0xff] %vm586_vm1, %v2084_v19  ;;  %v1954_v6 = vrot.slane %v3845_v22, 1 }
 0x19c   : > { %1732 = vrot.lane.b32.xlu1 %v3794_v58, %s3448_s15  ;;  %v903_v41 = vpop.permute.xlu0 %902 }
 0x19d   : > { %3347 = vst.msk [vmem:[%s3555_s10 + $0x28] sm:$0x7f] %vm774_vm2, %v1273_v18  ;;  %v988_v24 = vadd.f32 %v3258_v4, %v903_v41 }
 0x19e   : > { %v1219_v21 = vpop.permute.xlu1 %1218  ;;  %914 = vrot.lane.b32.xlu0 %v3828_v10, %s3446_s11  ;;  %v1845_v58 = vld [vmem:[%s3555_s10 + $0x18] sm:$0x7f] }
 0x19f   : > { %v1289_v23 = vadd.f32 %v3333_v7, %v1219_v21  ;;  %3288 = vst.msk [vmem:[%s3555_s10 + $0x30] sm:$0xff] %vm586_vm1, %v988_v24 }
 0x1a0   : > { %1198 = vrot.lane.b32.xlu1 %v1951_v38, %s3449_s16  ;;  %v935_v27 = vpop.permute.xlu0 %934 }
 0x1a1   : > { %3363 = vst.msk [vmem:[%s3555_s10 + $0xa8] sm:$0x7f] %vm774_vm2, %v1289_v23  ;;  %v1004_v35 = vadd.f32 %v3274_v26, %v935_v27 }
 0x1a2   : > { %v1993_v25 = vpop.permute.xlu1 %1992  ;;  %946 = vrot.lane.b32.xlu0 %v3840_v20, %s3446_s11 }
 0x1a3   : > { %v2085_v28 = vadd.f32 %v1993_v25, %v1845_v58  ;;  %3304 = vst.msk [vmem:[%s3555_s10 + $0xb0] sm:$0xff] %vm586_vm1, %v1004_v35 }
 0x1a4   : > { %1230 = vrot.lane.b32.xlu1 %v1172_v59, %s3449_s16  ;;  %v1334_v34 = vld [vmem:[%s3555_s10 + $0x21] sm:$0xff]  ;;  %v1435_v36 = vpop.permute.xlu0 %1434  ;;  %v1335_v63 = vld [vmem:[%s3555_s10 + $0x29] sm:$0x7f] }
 0x1a5   : > { %2117 = vst.msk [vmem:[%s3555_s10 + $0x18] sm:$0x7f] %vm774_vm2, %v2085_v28  ;;  %v1526_v37 = vadd.f32 %v1435_v36, %v1334_v34 }
 0x1a6   : > { %v2242_v32 = vpop.permute.xlu1 %2241  ;;  %1446 = vrot.lane.b32.xlu0 %v3828_v10, %s3447_s14  ;;  %v3318_v14 = vld [vmem:[%s3555_s10 + $0x30] sm:$0xff] }
 0x1a7   : > { %1558 = vst.msk [vmem:[%s3555_s10 + $0x21] sm:$0xff] %vm586_vm1, %v1526_v37 }
 0x1a8   : > { %916 = vrot.lane.b32.xlu1 %v3845_v22, %s3446_s11  ;;  %v1350_v30 = vld [vmem:[%s3555_s10 + $0xa1] sm:$0xff]  ;;  %v1467_v43 = vpop.permute.xlu0 %1466  ;;  %v1351_v11 = vld [vmem:[%s3555_s10 + $0xa9] sm:$0x7f] }
 0x1a9   : > { %v1542_v44 = vadd.f32 %v1467_v43, %v1350_v30 }
 0x1aa   : > { %v905_v38 = vpop.permute.xlu1 %904  ;;  %1478 = vrot.lane.b32.xlu0 %v3840_v20, %s3447_s14  ;;  %v3334_v57 = vld [vmem:[%s3555_s10 + $0xb0] sm:$0xff] }
 0x1ab   : > { %v989_v45 = vadd.f32 %v3259_v39, %v905_v38  ;;  %1574 = vst.msk [vmem:[%s3555_s10 + $0xa1] sm:$0xff] %vm586_vm1, %v1542_v44  ;;  %v3260_v38 = vld [vmem:[%s3555_s10 + $0x40] sm:$0xff] }
 0x1ac   : > { %v2148_v47 = vld [vmem:[%s3555_s10 + $0x11] sm:$0xff]  ;;  %948 = vrot.lane.b32.xlu1 %v3856_v29, %s3446_s11  ;;  %v1691_v53 = vpop.permute.xlu0 %1690  ;;  %v2149_v34 = vld [vmem:[%s3555_s10 + $0x19] sm:$0x7f] }
 0x1ad   : > { %v2329_v48 = vadd.f32 %v2242_v32, %v2148_v47  ;;  %3289 = vst.msk [vmem:[%s3555_s10 + $0x38] sm:$0xff] %vm586_vm1, %v989_v45  ;;  %v3276_v47 = vld [vmem:[%s3555_s10 + $0xc0] sm:$0xff] }
 0x1ae   : > { %v937_v31 = vpop.permute.xlu1 %936  ;;  %v1590_v59 = vld [vmem:[%s3555_s10 + $0x20] sm:$0xff]  ;;  %1702 = vrot.lane.b32.xlu0 %v3828_v10, %s3448_s15 }
 0x1af   : > { %2359 = vst.msk [vmem:[%s3555_s10 + $0x11] sm:$0xff] %vm586_vm1, %v2329_v48  ;;  %v1005_v54 = vadd.f32 %v3275_v50, %v937_v31  ;;  %v1782_v62 = vadd.f32 %v1691_v53, %v1590_v59  ;;  %v1084_v10 = vld [vmem:[#allocation2 + $0xa0] sm:$0xfe] }
 0x1b0   : > { %1448 = vrot.lane.b32.xlu1 %v1373_v56, %s3447_s14  ;;  %v1723_v2 = vpop.permute.xlu0 %1722  ;;  %v1150_v18 = vrot.slane %v1084_v10, 1 }
 0x1b1   : > { %3305 = vst.msk [vmem:[%s3555_s10 + $0xb8] sm:$0xff] %vm586_vm1, %v1005_v54  ;;  %1814 = vst.msk [vmem:[%s3555_s10 + $0x20] sm:$0xff] %vm586_vm1, %v1782_v62 }
 0x1b2   : > { %v1437_v0 = vpop.permute.xlu1 %1436  ;;  %v1606_v8 = vld [vmem:[%s3555_s10 + $0xa0] sm:$0xff]  ;;  %1734 = vrot.lane.b32.xlu0 %v3840_v20, %s3448_s15  ;;  %v1152_v41 = vsel %vm1134_vm3, %v1150_v18, %v1954_v6 }
 0x1b3   : > { %v1527_v17 = vadd.f32 %v1437_v0, %v1335_v63  ;;  %v1798_v9 = vadd.f32 %v1723_v2, %v1606_v8  ;;  %v1100_v20 = vld [vmem:[#allocation2 + $0x1a0] sm:$0xfe] }
 0x1b4   : > { %1480 = vrot.lane.b32.xlu1 %v1389_v61, %s3447_s14  ;;  %v1189_v40 = vpop.permute.xlu0 %1188  ;;  %v1174_v4 = vrot.slane %v1100_v20, 1  ;;  %v3319_v44 = vld [vmem:[%s3555_s10 + $0x38] sm:$0x7f] }
 0x1b5   : > { %1559 = vst.msk [vmem:[%s3555_s10 + $0x29] sm:$0x7f] %vm774_vm2, %v1527_v17  ;;  %v1274_v16 = vadd.f32 %v3318_v14, %v1189_v40  ;;  %v1375_v14 = vld [vmem:[#allocation2 + $0xd0] sm:$0x7f]  ;;  %v1086_v40 = vld [vmem:[#allocation2 + $0xc0] sm:$0xfe] }
 0x1b6   : > { %v1469_v12 = vpop.permute.xlu1 %1468  ;;  %1830 = vst.msk [vmem:[%s3555_s10 + $0xa0] sm:$0xff] %vm586_vm1, %v1798_v9  ;;  %2008 = vrot.lane.b32.xlu0 %v1954_v6, %s3450_s17  ;;  %v3261_v9 = vld [vmem:[%s3555_s10 + $0x48] sm:$0xff] }
 0x1b7   : > { %v1543_v15 = vadd.f32 %v1469_v12, %v1351_v11  ;;  %3348 = vst.msk [vmem:[%s3555_s10 + $0x30] sm:$0xff] %vm586_vm1, %v1274_v16  ;;  %v3277_v16 = vld [vmem:[%s3555_s10 + $0xc8] sm:$0xff] }
 0x1b8   : > { %1704 = vrot.lane.b32.xlu1 %v3845_v22, %s3448_s15  ;;  %v1221_v7 = vpop.permute.xlu0 %1220  ;;  %v1175_v22 = vrot.slane %v3856_v29, 1  ;;  %v1846_v25 = vld [vmem:[%s3555_s10 + $0x20] sm:$0xff]  ;;  %v3335_v54 = vld [vmem:[%s3555_s10 + $0xb8] sm:$0x7f] }
 0x1b9   : > { %1575 = vst.msk [vmem:[%s3555_s10 + $0xa9] sm:$0x7f] %vm774_vm2, %v1543_v15  ;;  %v1290_v21 = vadd.f32 %v3334_v57, %v1221_v7  ;;  %v4281_v57 = vrot.slane %v3910_v60, 1 }
 0x1ba   : > { %v1693_v19 = vpop.permute.xlu1 %1692  ;;  %1200 = vrot.lane.b32.xlu0 %v1152_v41, %s3449_s16  ;;  %v1176_v28 = vsel %vm1134_vm3, %v1174_v4, %v1175_v22  ;;  %v1102_v41 = vld [vmem:[#allocation2 + $0x1c0] sm:$0xfe] }
 0x1bb   : > { %3364 = vst.msk [vmem:[%s3555_s10 + $0xb0] sm:$0xff] %vm586_vm1, %v1290_v21  ;;  %v1391_v21 = vld [vmem:[#allocation2 + $0x1d0] sm:$0x7f] }
 0x1bc   : > { %v1591_v23 = vld [vmem:[%s3555_s10 + $0x28] sm:$0xff]  ;;  %1736 = vrot.lane.b32.xlu1 %v3856_v29, %s3448_s15  ;;  %v1995_v26 = vpop.permute.xlu0 %1994  ;;  %v1884_v29 = vld [vmem:[#allocation2 + $0xa0] sm:$0xfe] }
 0x1bd   : > { %v1783_v24 = vadd.f32 %v1693_v19, %v1591_v23  ;;  %v2086_v27 = vadd.f32 %v1995_v26, %v1846_v25  ;;  %v1953_v43 = vrot.slane %v1884_v29, 1  ;;  %v1153_v19 = vrot.slane %v1086_v40, 1  ;;  %v1088_v40 = vld [vmem:[#allocation2 + $0xe0] sm:$0xfe] }
 0x1be   : > { %v1725_v58 = vpop.permute.xlu1 %1724  ;;  %1232 = vrot.lane.b32.xlu0 %v1176_v28, %s3449_s16  ;;  %v1177_v25 = vrot.slane %v1102_v41, 1 }
 0x1bf   : > { %1815 = vst.msk [vmem:[%s3555_s10 + $0x28] sm:$0xff] %vm586_vm1, %v1783_v24  ;;  %2118 = vst.msk [vmem:[%s3555_s10 + $0x20] sm:$0xff] %vm586_vm1, %v2086_v27  ;;  %v1955_v31 = vsel %vm1134_vm3, %v1953_v43, %v1954_v6 }
 0x1c0   : > { %v1607_v35 = vld [vmem:[%s3555_s10 + $0xa8] sm:$0xff]  ;;  %1202 = vrot.lane.b32.xlu1 %v1954_v6, %s3449_s16  ;;  %v907_v37 = vpop.permute.xlu0 %906 }
 0x1c1   : > { %v1799_v32 = vadd.f32 %v1725_v58, %v1607_v35  ;;  %v990_v30 = vadd.f32 %v3260_v38, %v907_v37  ;;  %v1155_v58 = vsel %vm1134_vm3, %v1153_v19, %v4281_v57  ;;  %v1156_v19 = vrot.slane %v1088_v40, 1 }
 0x1c2   : > { %v2244_v36 = vpop.permute.xlu1 %2243  ;;  %918 = vrot.lane.b32.xlu0 %v3891_v46, %s3446_s11 }
 0x1c3   : > { %1831 = vst.msk [vmem:[%s3555_s10 + $0xa8] sm:$0xff] %vm586_vm1, %v1799_v32  ;;  %v2330_v39 = vadd.f32 %v2244_v36, %v2149_v34  ;;  %3290 = vst.msk [vmem:[%s3555_s10 + $0x40] sm:$0xff] %vm586_vm1, %v990_v30 }
 0x1c4   : > { %1234 = vrot.lane.b32.xlu1 %v1175_v22, %s3449_s16  ;;  %v939_v48 = vpop.permute.xlu0 %938 }
 0x1c5   : > { %2360 = vst.msk [vmem:[%s3555_s10 + $0x19] sm:$0x7f] %vm774_vm2, %v2330_v39  ;;  %v1006_v53 = vadd.f32 %v3276_v47, %v939_v48 }
 0x1c6   : > { %v1191_v45 = vpop.permute.xlu1 %1190  ;;  %950 = vrot.lane.b32.xlu0 %v3905_v55, %s3446_s11  ;;  %v1847_v63 = vld [vmem:[%s3555_s10 + $0x28] sm:$0x7f] }
 0x1c7   : > { %v1275_v50 = vadd.f32 %v3319_v44, %v1191_v45  ;;  %3306 = vst.msk [vmem:[%s3555_s10 + $0xc0] sm:$0xff] %vm586_vm1, %v1006_v53 }
 0x1c8   : > { %2006 = vrot.lane.b32.xlu1 %v1955_v31, %s3450_s17  ;;  %v1439_v59 = vpop.permute.xlu0 %1438 }
 0x1c9   : > { %3349 = vst.msk [vmem:[%s3555_s10 + $0x38] sm:$0x7f] %vm774_vm2, %v1275_v50 }
 0x1ca   : > { %v1223_v56 = vpop.permute.xlu1 %1222  ;;  %1450 = vrot.lane.b32.xlu0 %v3891_v46, %s3447_s14  ;;  %v3320_v34 = vld [vmem:[%s3555_s10 + $0x40] sm:$0xff] }
 0x1cb   : > { %v1291_v62 = vadd.f32 %v3335_v54, %v1223_v56 }
 0x1cc   : > { %920 = vrot.lane.b32.xlu1 %v3910_v60, %s3446_s11  ;;  %v1471_v2 = vpop.permute.xlu0 %1470 }
 0x1cd   : > { %3365 = vst.msk [vmem:[%s3555_s10 + $0xb8] sm:$0x7f] %vm774_vm2, %v1291_v62 }
 0x1ce   : > { %v1997_v0 = vpop.permute.xlu1 %1996  ;;  %1482 = vrot.lane.b32.xlu0 %v3905_v55, %s3447_s14  ;;  %v3336_v43 = vld [vmem:[%s3555_s10 + $0xc0] sm:$0xff] }
 0x1cf   : > { %v2087_v17 = vadd.f32 %v1997_v0, %v1847_v63  ;;  %v3262_v0 = vld [vmem:[%s3555_s10 + $0x50] sm:$0xff] }
 0x1d0   : > { %v1336_v61 = vld [vmem:[%s3555_s10 + $0x31] sm:$0xff]  ;;  %952 = vrot.lane.b32.xlu1 %v3921_v3, %s3446_s11  ;;  %v1695_v11 = vpop.permute.xlu0 %1694  ;;  %v1337_v4 = vld [vmem:[%s3555_s10 + $0x39] sm:$0x7f] }
 0x1d1   : > { %2119 = vst.msk [vmem:[%s3555_s10 + $0x28] sm:$0x7f] %vm774_vm2, %v2087_v17  ;;  %v1528_v8 = vadd.f32 %v1439_v59, %v1336_v61 }
 0x1d2   : > { %v909_v10 = vpop.permute.xlu1 %908  ;;  %1706 = vrot.lane.b32.xlu0 %v3891_v46, %s3448_s15 }
 0x1d3   : > { %1560 = vst.msk [vmem:[%s3555_s10 + $0x31] sm:$0xff] %vm586_vm1, %v1528_v8  ;;  %v991_v12 = vadd.f32 %v3261_v9, %v909_v10  ;;  %v3278_v10 = vld [vmem:[%s3555_s10 + $0xd0] sm:$0xff] }
 0x1d4   : > { %v1352_v6 = vld [vmem:[%s3555_s10 + $0xb1] sm:$0xff]  ;;  %1452 = vrot.lane.b32.xlu1 %v1375_v14, %s3447_s14  ;;  %v1727_v20 = vpop.permute.xlu0 %1726  ;;  %v1353_v29 = vld [vmem:[%s3555_s10 + $0xb9] sm:$0x7f] }
 0x1d5   : > { %v1544_v15 = vadd.f32 %v1471_v2, %v1352_v6  ;;  %3291 = vst.msk [vmem:[%s3555_s10 + $0x48] sm:$0xff] %vm586_vm1, %v991_v12  ;;  %v1377_v12 = vld [vmem:[#allocation2 + $0xf0] sm:$0x7f] }
 0x1d6   : > { %v941_v18 = vpop.permute.xlu1 %940  ;;  %1738 = vrot.lane.b32.xlu0 %v3905_v55, %s3448_s15  ;;  %v1178_v55 = vrot.slane %v3921_v3, 1 }
 0x1d7   : > { %1576 = vst.msk [vmem:[%s3555_s10 + $0xb1] sm:$0xff] %vm586_vm1, %v1544_v15  ;;  %v1007_v7 = vadd.f32 %v3277_v16, %v941_v18 }
 0x1d8   : > { %1484 = vrot.lane.b32.xlu1 %v1391_v21, %s3447_s14  ;;  %v2150_v23 = vld [vmem:[%s3555_s10 + $0x21] sm:$0xff]  ;;  %v2246_v24 = vpop.permute.xlu0 %2245  ;;  %v1179_v39 = vsel %vm1134_vm3, %v1177_v25, %v1178_v55  ;;  %v2151_v59 = vld [vmem:[%s3555_s10 + $0x29] sm:$0x7f] }
 0x1d9   : > { %3307 = vst.msk [vmem:[%s3555_s10 + $0xc8] sm:$0xff] %vm586_vm1, %v1007_v7  ;;  %v2331_v28 = vadd.f32 %v2246_v24, %v2150_v23  ;;  %v4358_v7 = vrot.slane %v3973_v51, 1  ;;  %v3263_v24 = vld [vmem:[%s3555_s10 + $0x58] sm:$0xff] }
 0x1da   : > { %v1592_v46 = vld [vmem:[%s3555_s10 + $0x30] sm:$0xff]  ;;  %v1441_v22 = vpop.permute.xlu1 %1440  ;;  %1204 = vrot.lane.b32.xlu0 %v1155_v58, %s3449_s16 }
 0x1db   : > { %v1784_v26 = vadd.f32 %v1695_v11, %v1592_v46  ;;  %v1529_v27 = vadd.f32 %v1441_v22, %v1337_v4  ;;  %2361 = vst.msk [vmem:[%s3555_s10 + $0x21] sm:$0xff] %vm586_vm1, %v2331_v28  ;;  %v1158_v4 = vsel %vm1134_vm3, %v1156_v19, %v4358_v7  ;;  %v3279_v28 = vld [vmem:[%s3555_s10 + $0xd8] sm:$0xff]  ;;  %v3264_v19 = vld [vmem:[%s3555_s10 + $0x60] sm:$0xff] }
 0x1dc   : > { %1708 = vrot.lane.b32.xlu1 %v3910_v60, %s3448_s15  ;;  %v1193_v36 = vpop.permute.xlu0 %1192  ;;  %v3321_v8 = vld [vmem:[%s3555_s10 + $0x48] sm:$0x7f] }
 0x1dd   : > { %1816 = vst.msk [vmem:[%s3555_s10 + $0x30] sm:$0xff] %vm586_vm1, %v1784_v26  ;;  %v1276_v38 = vadd.f32 %v3320_v34, %v1193_v36  ;;  %v4377_v26 = vld [vmem:[#allocation2 + $0x80] sm:$0xff] }
 0x1de   : > { %1561 = vst.msk [vmem:[%s3555_s10 + $0x39] sm:$0x7f] %vm774_vm2, %v1529_v27  ;;  %v1608_v35 = vld [vmem:[%s3555_s10 + $0xb0] sm:$0xff]  ;;  %v1473_v32 = vpop.permute.xlu1 %1472  ;;  %1236 = vrot.lane.b32.xlu0 %v1179_v39, %s3449_s16 }
 0x1df   : > { %v1800_v37 = vadd.f32 %v1727_v20, %v1608_v35  ;;  %v1545_v60 = vadd.f32 %v1473_v32, %v1353_v29  ;;  %3350 = vst.msk [vmem:[%s3555_s10 + $0x40] sm:$0xff] %vm586_vm1, %v1276_v38  ;;  %v1393_v20 = vld [vmem:[#allocation2 + $0x1f0] sm:$0x7f] }
 0x1e0   : > { %1740 = vrot.lane.b32.xlu1 %v3921_v3, %s3448_s15  ;;  %v1225_v45 = vpop.permute.xlu0 %1224  ;;  %v3337_v6 = vld [vmem:[%s3555_s10 + $0xc8] sm:$0x7f]  ;;  %v2418_v32 = vld [vmem:[#allocation2 + $0x30] sm:$0xff] }
 0x1e1   : > { %1832 = vst.msk [vmem:[%s3555_s10 + $0xb0] sm:$0xff] %vm586_vm1, %v1800_v37  ;;  %v1292_v44 = vadd.f32 %v3336_v43, %v1225_v45 }
 0x1e2   : > { %1577 = vst.msk [vmem:[%s3555_s10 + $0xb9] sm:$0x7f] %vm774_vm2, %v1545_v60  ;;  %v1697_v30 = vpop.permute.xlu1 %1696  ;;  %922 = vrot.lane.b32.xlu0 %v3960_v33, %s3446_s11 }
 0x1e3   : > { %3366 = vst.msk [vmem:[%s3555_s10 + $0xc0] sm:$0xff] %vm586_vm1, %v1292_v44 }
 0x1e4   : > { %1206 = vrot.lane.b32.xlu1 %v4281_v57, %s3449_s16  ;;  %v1848_v50 = vld [vmem:[%s3555_s10 + $0x30] sm:$0xff]  ;;  %v1999_v31 = vpop.permute.xlu0 %1998 }
 0x1e5   : > { %v1593_v47 = vld [vmem:[%s3555_s10 + $0x38] sm:$0xff]  ;;  %v2088_v53 = vadd.f32 %v1999_v31, %v1848_v50 }
 0x1e6   : > { %v1785_v3 = vadd.f32 %v1697_v30, %v1593_v47  ;;  %v1729_v48 = vpop.permute.xlu1 %1728  ;;  %1454 = vrot.lane.b32.xlu0 %v3960_v33, %s3447_s14  ;;  %v2417_v30 = vld [vmem:[#allocation2 + $0x20] sm:$0xff] }
 0x1e7   : > { %2120 = vst.msk [vmem:[%s3555_s10 + $0x30] sm:$0xff] %vm586_vm1, %v2088_v53 }
 0x1e8   : > { %1817 = vst.msk [vmem:[%s3555_s10 + $0x38] sm:$0xff] %vm586_vm1, %v1785_v3  ;;  %1238 = vrot.lane.b32.xlu1 %v1178_v55, %s3449_s16  ;;  %v911_v63 = vpop.permute.xlu0 %910 }
 0x1e9   : > { %v1609_v54 = vld [vmem:[%s3555_s10 + $0xb8] sm:$0xff]  ;;  %v992_v17 = vadd.f32 %v3262_v0, %v911_v63 }
 0x1ea   : > { %v1801_v56 = vadd.f32 %v1729_v48, %v1609_v54  ;;  %v2248_v62 = vpop.permute.xlu1 %2247  ;;  %1486 = vrot.lane.b32.xlu0 %v3990_v49, %s3447_s14 }
 0x1eb   : > { %v2332_v2 = vadd.f32 %v2248_v62, %v2151_v59  ;;  %3292 = vst.msk [vmem:[%s3555_s10 + $0x50] sm:$0xff] %vm586_vm1, %v992_v17 }
 0x1ec   : > { %1833 = vst.msk [vmem:[%s3555_s10 + $0xb8] sm:$0xff] %vm586_vm1, %v1801_v56  ;;  %924 = vrot.lane.b32.xlu1 %v3973_v51, %s3446_s11  ;;  %v943_v9 = vpop.permute.xlu0 %942  ;;  %v2419_v56 = vld [vmem:[#allocation2 + $0x40] sm:$0xff] }
 0x1ed   : > { %2362 = vst.msk [vmem:[%s3555_s10 + $0x29] sm:$0x7f] %vm774_vm2, %v2332_v2  ;;  %v1008_v14 = vadd.f32 %v3278_v10, %v943_v9  ;;  %v2420_v2 = vld [vmem:[#allocation2 + $0x50] sm:$0xff] }
 0x1ee   : > { %v1195_v61 = vpop.permute.xlu1 %1194  ;;  %1710 = vrot.lane.b32.xlu0 %v3960_v33, %s3448_s15 }
 0x1ef   : > { %v1277_v11 = vadd.f32 %v3321_v8, %v1195_v61  ;;  %3308 = vst.msk [vmem:[%s3555_s10 + $0xd0] sm:$0xff] %vm586_vm1, %v1008_v14  ;;  %v1849_v33 = vld [vmem:[%s3555_s10 + $0x38] sm:$0x7f]  ;;  %v1888_v61 = vld [vmem:[#allocation2 + $0xe0] sm:$0xfe] }
 0x1f0   : > { %1456 = vrot.lane.b32.xlu1 %v1377_v12, %s3447_s14  ;;  %v1443_v16 = vpop.permute.xlu0 %1442  ;;  %v1959_v14 = vrot.slane %v1888_v61, 1 }
 0x1f1   : > { %3351 = vst.msk [vmem:[%s3555_s10 + $0x48] sm:$0x7f] %vm774_vm2, %v1277_v11 }
 0x1f2   : > { %v1227_v15 = vpop.permute.xlu1 %1226  ;;  %1742 = vrot.lane.b32.xlu0 %v3990_v49, %s3448_s15  ;;  %v3322_v3 = vld [vmem:[%s3555_s10 + $0x50] sm:$0xff] }
 0x1f3   : > { %v1293_v18 = vadd.f32 %v3337_v6, %v1227_v15  ;;  %v3431_v6 = vld [vmem:[#allocation2 + $0xa0] sm:$0xff] }
 0x1f4   : > { %1488 = vrot.lane.b32.xlu1 %v1393_v20, %s3447_s14  ;;  %v1475_v41 = vpop.permute.xlu0 %1474 }
 0x1f5   : > { %3367 = vst.msk [vmem:[%s3555_s10 + $0xc8] sm:$0x7f] %vm774_vm2, %v1293_v18 }
 0x1f6   : > { %v2001_v21 = vpop.permute.xlu1 %2000  ;;  %1208 = vrot.lane.b32.xlu0 %v1158_v4, %s3449_s16  ;;  %v3338_v62 = vld [vmem:[%s3555_s10 + $0xd0] sm:$0xff] }
 0x1f7   : > { %v2089_v46 = vadd.f32 %v2001_v21, %v1849_v33  ;;  %v1961_v21 = vsel %vm1134_vm3, %v1959_v14, %v4358_v7 }
 0x1f8   : > { %v1338_v22 = vld [vmem:[%s3555_s10 + $0x41] sm:$0xff]  ;;  %1712 = vrot.lane.b32.xlu1 %v3973_v51, %s3448_s15  ;;  %v1699_v58 = vpop.permute.xlu0 %1698  ;;  %v1339_v36 = vld [vmem:[%s3555_s10 + $0x49] sm:$0x7f] }
 0x1f9   : > { %2121 = vst.msk [vmem:[%s3555_s10 + $0x38] sm:$0x7f] %vm774_vm2, %v2089_v46  ;;  %v1530_v49 = vadd.f32 %v1443_v16, %v1338_v22  ;;  %v2421_v46 = vld [vmem:[#allocation2 + $0x60] sm:$0xff] }
 0x1fa   : > { %v913_v23 = vpop.permute.xlu1 %912  ;;  %2249 = vrot.lane.b32.xlu0 %v4377_v26, %s3451_s18 }
 0x1fb   : > { %1562 = vst.msk [vmem:[%s3555_s10 + $0x41] sm:$0xff] %vm586_vm1, %v1530_v49  ;;  %v993_v25 = vadd.f32 %v3263_v24, %v913_v23  ;;  %v3280_v49 = vld [vmem:[%s3555_s10 + $0xe0] sm:$0xff] }
 0x1fc   : > { %v1354_v27 = vld [vmem:[%s3555_s10 + $0xc1] sm:$0xff]  ;;  %1744 = vrot.lane.b32.xlu1 %v4010_v5, %s3448_s15  ;;  %v1731_v35 = vpop.permute.xlu0 %1730  ;;  %v1355_v44 = vld [vmem:[%s3555_s10 + $0xc9] sm:$0x7f] }
 0x1fd   : > { %v1546_v51 = vadd.f32 %v1475_v41, %v1354_v27  ;;  %3293 = vst.msk [vmem:[%s3555_s10 + $0x58] sm:$0xff] %vm586_vm1, %v993_v25  ;;  %v1886_v5 = vld [vmem:[#allocation2 + $0xc0] sm:$0xfe]  ;;  %v2422_v27 = vld [vmem:[#allocation2 + $0x70] sm:$0xff] }
 0x1fe   : > { %v945_v55 = vpop.permute.xlu1 %944  ;;  %2479 = vrot.lane.b32.xlu0 %v2418_v32, %s3452_s19  ;;  %v1956_v43 = vrot.slane %v1886_v5, 1 }
 0x1ff   : > { %1578 = vst.msk [vmem:[%s3555_s10 + $0xc1] sm:$0xff] %vm586_vm1, %v1546_v51  ;;  %v1009_v29 = vadd.f32 %v3279_v28, %v945_v55  ;;  %v4448_v51 = vld [vmem:[#allocation2 + $0x110] sm:$0xff]  ;;  %v1890_v55 = vld [vmem:[#allocation2 + $0x100] sm:$0xfe] }
 0x200   : > { %1210 = vrot.lane.b32.xlu1 %v4358_v7, %s3449_s16  ;;  %v4396_v60 = vpop.permute.xlu0 %2004  ;;  %v1958_v53 = vsel %vm1134_vm3, %v1956_v43, %v4281_v57  ;;  %v1963_v5 = vrot.slane %v4448_v51, 1 }
 0x201   : > { %3309 = vst.msk [vmem:[%s3555_s10 + $0xd8] sm:$0xff] %vm586_vm1, %v1009_v29  ;;  %v3265_v29 = vld [vmem:[%s3555_s10 + $0x68] sm:$0xff] }
 0x202   : > { %v1594_v34 = vld [vmem:[%s3555_s10 + $0x40] sm:$0xff]  ;;  %v1445_v37 = vpop.permute.xlu1 %1444  ;;  %2012 = vrot.lane.b32.xlu0 %v4281_v57, %s3450_s17  ;;  %v2184_v57 = vld [vmem:[#allocation2 + $0x90] sm:$0x7f] }
 0x203   : > { %v1786_v38 = vadd.f32 %v1699_v58, %v1594_v34  ;;  %v1531_v39 = vadd.f32 %v1445_v37, %v1339_v36  ;;  %v2186_v58 = vld [vmem:[#allocation2 + $0xb0] sm:$0x7f]  ;;  %v1962_v36 = vrot.slane %v1890_v55, 1  ;;  %v4461_v37 = vld [vmem:[#allocation2 + $0xc0] sm:$0xff] }
 0x204   : > { %2477 = vrot.lane.b32.xlu1 %v2417_v30, %s3452_s19  ;;  %v1197_v48 = vpop.permute.xlu0 %1196  ;;  %v3323_v18 = vld [vmem:[%s3555_s10 + $0x58] sm:$0x7f] }
 0x205   : > { %1818 = vst.msk [vmem:[%s3555_s10 + $0x40] sm:$0xff] %vm586_vm1, %v1786_v38  ;;  %v1278_v54 = vadd.f32 %v3322_v3, %v1197_v48 }
 0x206   : > { %1563 = vst.msk [vmem:[%s3555_s10 + $0x49] sm:$0x7f] %vm774_vm2, %v1531_v39  ;;  %v1610_v45 = vld [vmem:[%s3555_s10 + $0xc0] sm:$0xff]  ;;  %v1477_v47 = vpop.permute.xlu1 %1476  ;;  %2481 = vrot.lane.b32.xlu0 %v2419_v56, %s3452_s19  ;;  %v3281_v39 = vld [vmem:[%s3555_s10 + $0xe8] sm:$0xff]  ;;  %v2424_v56 = vld [vmem:[#allocation2 + $0x90] sm:$0xff] }
 0x207   : > { %v1802_v50 = vadd.f32 %v1731_v35, %v1610_v45  ;;  %v1547_v31 = vadd.f32 %v1477_v47, %v1355_v44  ;;  %3352 = vst.msk [vmem:[%s3555_s10 + $0x50] sm:$0xff] %vm586_vm1, %v1278_v54  ;;  %v1964_v44 = vsel %vm1134_vm3, %v1962_v36, %v1963_v5  ;;  %v2188_v54 = vld [vmem:[#allocation2 + $0xd0] sm:$0x7f] }
 0x208   : > { %2010 = vrot.lane.b32.xlu1 %v1958_v53, %s3450_s17  ;;  %v1229_v63 = vpop.permute.xlu0 %1228  ;;  %v3339_v4 = vld [vmem:[%s3555_s10 + $0xd8] sm:$0x7f]  ;;  %v3266_v36 = vld [vmem:[%s3555_s10 + $0x70] sm:$0xff] }
 0x209   : > { %1834 = vst.msk [vmem:[%s3555_s10 + $0xc0] sm:$0xff] %vm586_vm1, %v1802_v50  ;;  %v1294_v0 = vadd.f32 %v3338_v62, %v1229_v63 }
 0x20a   : > { %1579 = vst.msk [vmem:[%s3555_s10 + $0xc9] sm:$0x7f] %vm774_vm2, %v1547_v31  ;;  %v1701_v59 = vpop.permute.xlu1 %1700  ;;  %2483 = vrot.lane.b32.xlu0 %v2420_v2, %s3452_s19 }
 0x20b   : > { %3368 = vst.msk [vmem:[%s3555_s10 + $0xd0] sm:$0xff] %vm586_vm1, %v1294_v0 }
 0x20c   : > { %2251 = vrot.lane.b32.xlu1 %v2184_v57, %s3451_s18  ;;  %v1850_v9 = vld [vmem:[%s3555_s10 + $0x40] sm:$0xff]  ;;  %v2003_v11 = vpop.permute.xlu0 %2002 }
 0x20d   : > { %v1595_v17 = vld [vmem:[%s3555_s10 + $0x48] sm:$0xff]  ;;  %v2090_v12 = vadd.f32 %v2003_v11, %v1850_v9 }
 0x20e   : > { %v1787_v8 = vadd.f32 %v1701_v59, %v1595_v17  ;;  %v1733_v10 = vpop.permute.xlu1 %1732  ;;  %2016 = vrot.lane.b32.xlu0 %v4358_v7, %s3450_s17  ;;  %v4482_v59 = vld [vmem:[#allocation2 + $0x130] sm:$0xff] }
 0x20f   : > { %2122 = vst.msk [vmem:[%s3555_s10 + $0x40] sm:$0xff] %vm586_vm1, %v2090_v12  ;;  %v1966_v2 = vrot.slane %v4482_v59, 1 }
 0x210   : > { %1819 = vst.msk [vmem:[%s3555_s10 + $0x48] sm:$0xff] %vm586_vm1, %v1787_v8  ;;  %2253 = vrot.lane.b32.xlu1 %v3431_v6, %s3451_s18  ;;  %v915_v20 = vpop.permute.xlu0 %914  ;;  %v2425_v6 = vld [vmem:[#allocation2 + $0xa0] sm:$0xff] }
 0x211   : > { %v1611_v40 = vld [vmem:[%s3555_s10 + $0xc8] sm:$0xff]  ;;  %v994_v41 = vadd.f32 %v3264_v19, %v915_v20 }
 0x212   : > { %v1803_v15 = vadd.f32 %v1733_v10, %v1611_v40  ;;  %v1199_v16 = vpop.permute.xlu1 %1198  ;;  %2485 = vrot.lane.b32.xlu0 %v2421_v46, %s3452_s19  ;;  %v4491_v10 = vld [vmem:[#allocation2 + $0xe0] sm:$0xff]  ;;  %v4510_v46 = vld [vmem:[#allocation2 + $0x150] sm:$0xff] }
 0x213   : > { %v1279_v33 = vadd.f32 %v3323_v18, %v1199_v16  ;;  %3294 = vst.msk [vmem:[%s3555_s10 + $0x60] sm:$0xff] %vm586_vm1, %v994_v41  ;;  %v2426_v41 = vld [vmem:[#allocation2 + $0xb0] sm:$0xff] }
 0x214   : > { %1835 = vst.msk [vmem:[%s3555_s10 + $0xc8] sm:$0xff] %vm586_vm1, %v1803_v15  ;;  %2014 = vrot.lane.b32.xlu1 %v1961_v21, %s3450_s17  ;;  %v947_v23 = vpop.permute.xlu0 %946 }
 0x215   : > { %3353 = vst.msk [vmem:[%s3555_s10 + $0x58] sm:$0x7f] %vm774_vm2, %v1279_v33  ;;  %v1010_v25 = vadd.f32 %v3280_v49, %v947_v23  ;;  %v2190_v33 = vld [vmem:[#allocation2 + $0xf0] sm:$0x7f] }
 0x216   : > { %v1231_v22 = vpop.permute.xlu1 %1230  ;;  %2487 = vrot.lane.b32.xlu0 %v2422_v27, %s3452_s19 }
 0x217   : > { %v1851_v24 = vld [vmem:[%s3555_s10 + $0x48] sm:$0x7f]  ;;  %v1295_v7 = vadd.f32 %v3339_v4, %v1231_v22  ;;  %3310 = vst.msk [vmem:[%s3555_s10 + $0xe0] sm:$0xff] %vm586_vm1, %v1010_v25  ;;  %v1894_v22 = vld [vmem:[#allocation2 + $0x140] sm:$0xfe]  ;;  %v1969_v25 = vrot.slane %v4510_v46, 1 }
 0x218   : > { %v2091_v28 = vadd.f32 %v4396_v60, %v1851_v24  ;;  %2255 = vrot.lane.b32.xlu1 %v2186_v58, %s3451_s18  ;;  %v1447_v32 = vpop.permute.xlu0 %1446 }
 0x219   : > { %3369 = vst.msk [vmem:[%s3555_s10 + $0xd8] sm:$0x7f] %vm774_vm2, %v1295_v7 }
 0x21a   : > { %2123 = vst.msk [vmem:[%s3555_s10 + $0x48] sm:$0x7f] %vm774_vm2, %v2091_v28  ;;  %v917_v35 = vpop.permute.xlu1 %916  ;;  %2020 = vrot.lane.b32.xlu0 %v1963_v5, %s3450_s17  ;;  %v3324_v20 = vld [vmem:[%s3555_s10 + $0x60] sm:$0xff] }
 0x21b   : > { %v995_v34 = vadd.f32 %v3265_v29, %v917_v35  ;;  %v4522_v28 = vld [vmem:[#allocation2 + $0x100] sm:$0xff]  ;;  %v1968_v35 = vrot.slane %v1894_v22, 1 }
 0x21c   : > { %2257 = vrot.lane.b32.xlu1 %v4461_v37, %s3451_s18  ;;  %v1340_v60 = vld [vmem:[%s3555_s10 + $0x51] sm:$0xff]  ;;  %v1479_v43 = vpop.permute.xlu0 %1478  ;;  %v1341_v48 = vld [vmem:[%s3555_s10 + $0x59] sm:$0x7f] }
 0x21d   : > { %3295 = vst.msk [vmem:[%s3555_s10 + $0x68] sm:$0xff] %vm586_vm1, %v995_v34  ;;  %v1532_v38 = vadd.f32 %v1447_v32, %v1340_v60 }
 0x21e   : > { %v949_v30 = vpop.permute.xlu1 %948  ;;  %2489 = vrot.lane.b32.xlu0 %v4377_v26, %s3452_s19  ;;  %v1892_v26 = vld [vmem:[#allocation2 + $0x120] sm:$0xfe] }
 0x21f   : > { %1564 = vst.msk [vmem:[%s3555_s10 + $0x51] sm:$0xff] %vm586_vm1, %v1532_v38  ;;  %v1011_v45 = vadd.f32 %v3281_v39, %v949_v30  ;;  %v1965_v8 = vrot.slane %v1892_v26, 1  ;;  %v3340_v7 = vld [vmem:[%s3555_s10 + $0xe0] sm:$0xff]  ;;  %v1970_v39 = vsel %vm1134_vm3, %v1968_v35, %v1969_v25 }
 0x220   : > { %2018 = vrot.lane.b32.xlu1 %v1964_v44, %s3450_s17  ;;  %v1356_v47 = vld [vmem:[%s3555_s10 + $0xd1] sm:$0xff]  ;;  %v1703_v31 = vpop.permute.xlu0 %1702  ;;  %v1357_v63 = vld [vmem:[%s3555_s10 + $0xd9] sm:$0x7f] }
 0x221   : > { %3311 = vst.msk [vmem:[%s3555_s10 + $0xe8] sm:$0xff] %vm586_vm1, %v1011_v45  ;;  %v1548_v3 = vadd.f32 %v1479_v43, %v1356_v47  ;;  %v1967_v40 = vsel %vm1134_vm3, %v1965_v8, %v1966_v2  ;;  %v3282_v44 = vld [vmem:[%s3555_s10 + $0xf0] sm:$0xff] }
 0x222   : > { %v1449_v50 = vpop.permute.xlu1 %1448  ;;  %2491 = vrot.lane.b32.xlu0 %v2424_v56, %s3452_s19  ;;  %v3267_v56 = vld [vmem:[%s3555_s10 + $0x78] sm:$0xff] }
 0x223   : > { %1580 = vst.msk [vmem:[%s3555_s10 + $0xd1] sm:$0xff] %vm586_vm1, %v1548_v3  ;;  %v1533_v53 = vadd.f32 %v1449_v50, %v1341_v48  ;;  %v2192_v48 = vld [vmem:[#allocation2 + $0x110] sm:$0x7f] }
 0x224   : > { %2259 = vrot.lane.b32.xlu1 %v2188_v54, %s3451_s18  ;;  %v1735_v0 = vpop.permute.xlu0 %1734  ;;  %v3325_v24 = vld [vmem:[%s3555_s10 + $0x68] sm:$0x7f] }
 0x225   : > { %1565 = vst.msk [vmem:[%s3555_s10 + $0x59] sm:$0x7f] %vm774_vm2, %v1533_v53  ;;  %v1896_v53 = vld [vmem:[#allocation2 + $0x160] sm:$0xfe] }
 0x226   : > { %v1596_v62 = vld [vmem:[%s3555_s10 + $0x50] sm:$0xff]  ;;  %v1481_v57 = vpop.permute.xlu1 %1480  ;;  %2024 = vrot.lane.b32.xlu0 %v1966_v2, %s3450_s17 }
 0x227   : > { %v1788_v17 = vadd.f32 %v1703_v31, %v1596_v62  ;;  %v1549_v61 = vadd.f32 %v1481_v57, %v1357_v63  ;;  %v4546_v31 = vld [vmem:[#allocation2 + $0x170] sm:$0xff] }
 0x228   : > { %2261 = vrot.lane.b32.xlu1 %v4491_v10, %s3451_s18  ;;  %v2009_v12 = vpop.permute.xlu0 %2008  ;;  %v3341_v32 = vld [vmem:[%s3555_s10 + $0xe8] sm:$0x7f]  ;;  %v1972_v63 = vrot.slane %v4546_v31, 1 }
 0x229   : > { %1820 = vst.msk [vmem:[%s3555_s10 + $0x50] sm:$0xff] %vm586_vm1, %v1788_v17  ;;  %v1971_v17 = vrot.slane %v1896_v53, 1 }
 0x22a   : > { %1581 = vst.msk [vmem:[%s3555_s10 + $0xd9] sm:$0x7f] %vm774_vm2, %v1549_v61  ;;  %v1612_v9 = vld [vmem:[%s3555_s10 + $0xd0] sm:$0xff]  ;;  %v1705_v11 = vpop.permute.xlu1 %1704  ;;  %2493 = vrot.lane.b32.xlu0 %v2425_v6, %s3452_s19  ;;  %v3283_v61 = vld [vmem:[%s3555_s10 + $0xf8] sm:$0xff] }
 0x22b   : > { %v1804_v14 = vadd.f32 %v1735_v0, %v1612_v9  ;;  %v4557_v0 = vld [vmem:[#allocation2 + $0x120] sm:$0xff] }
 0x22c   : > { %v1597_v15 = vld [vmem:[%s3555_s10 + $0x58] sm:$0xff]  ;;  %2022 = vrot.lane.b32.xlu1 %v1967_v40, %s3450_s17  ;;  %v1201_v19 = vpop.permute.xlu0 %1200 }
 0x22d   : > { %1836 = vst.msk [vmem:[%s3555_s10 + $0xd0] sm:$0xff] %vm586_vm1, %v1804_v14  ;;  %v1789_v16 = vadd.f32 %v1705_v11, %v1597_v15  ;;  %v1280_v21 = vadd.f32 %v3324_v20, %v1201_v19  ;;  %v1973_v14 = vsel %vm1134_vm3, %v1971_v17, %v1972_v63  ;;  %v2194_v20 = vld [vmem:[#allocation2 + $0x130] sm:$0x7f] }
 0x22e   : > { %v1737_v18 = vpop.permute.xlu1 %1736  ;;  %2495 = vrot.lane.b32.xlu0 %v2426_v41, %s3452_s19  ;;  %v4577_v19 = vld [vmem:[#allocation2 + $0x190] sm:$0xff] }
 0x22f   : > { %1821 = vst.msk [vmem:[%s3555_s10 + $0x58] sm:$0xff] %vm586_vm1, %v1789_v16  ;;  %3354 = vst.msk [vmem:[%s3555_s10 + $0x60] sm:$0xff] %vm586_vm1, %v1280_v21  ;;  %v3435_v21 = vld [vmem:[#allocation2 + $0xf0] sm:$0xff] }
 0x230   : > { %2263 = vrot.lane.b32.xlu1 %v2190_v33, %s3451_s18  ;;  %v1233_v58 = vpop.permute.xlu0 %1232  ;;  %v1852_v43 = vld [vmem:[%s3555_s10 + $0x50] sm:$0xff] }
 0x231   : > { %v1613_v4 = vld [vmem:[%s3555_s10 + $0xd8] sm:$0xff]  ;;  %v1296_v55 = vadd.f32 %v3340_v7, %v1233_v58  ;;  %v4588_v7 = vld [vmem:[#allocation2 + $0x140] sm:$0xff] }
 0x232   : > { %v1805_v49 = vadd.f32 %v1737_v18, %v1613_v4  ;;  %v1203_v23 = vpop.permute.xlu1 %1202  ;;  %2028 = vrot.lane.b32.xlu0 %v1969_v25, %s3450_s17 }
 0x233   : > { %v1281_v27 = vadd.f32 %v3325_v24, %v1203_v23  ;;  %3370 = vst.msk [vmem:[%s3555_s10 + $0xe0] sm:$0xff] %vm586_vm1, %v1296_v55  ;;  %v1975_v23 = vrot.slane %v4577_v19, 1 }
 0x234   : > { %1837 = vst.msk [vmem:[%s3555_s10 + $0xd8] sm:$0xff] %vm586_vm1, %v1805_v49  ;;  %2265 = vrot.lane.b32.xlu1 %v4522_v28, %s3451_s18  ;;  %v919_v34 = vpop.permute.xlu0 %918 }
 0x235   : > { %3355 = vst.msk [vmem:[%s3555_s10 + $0x68] sm:$0x7f] %vm774_vm2, %v1281_v27  ;;  %v996_v30 = vadd.f32 %v3266_v36, %v919_v34 }
 0x236   : > { %v1853_v29 = vld [vmem:[%s3555_s10 + $0x58] sm:$0x7f]  ;;  %v1235_v5 = vpop.permute.xlu1 %1234  ;;  %2497 = vrot.lane.b32.xlu0 %v4461_v37, %s3452_s19  ;;  %v3434_v37 = vld [vmem:[#allocation2 + $0xd0] sm:$0xff] }
 0x237   : > { %v2093_v60 = vadd.f32 %v2009_v12, %v1853_v29  ;;  %v1297_v38 = vadd.f32 %v3341_v32, %v1235_v5  ;;  %3296 = vst.msk [vmem:[%s3555_s10 + $0x70] sm:$0xff] %vm586_vm1, %v996_v30  ;;  %v2196_v30 = vld [vmem:[#allocation2 + $0x150] sm:$0x7f] }
 0x238   : > { %2026 = vrot.lane.b32.xlu1 %v1970_v39, %s3450_s17  ;;  %v951_v47 = vpop.permute.xlu0 %950 }
 0x239   : > { %2125 = vst.msk [vmem:[%s3555_s10 + $0x58] sm:$0x7f] %vm774_vm2, %v2093_v60  ;;  %3371 = vst.msk [vmem:[%s3555_s10 + $0xe8] sm:$0x7f] %vm774_vm2, %v1297_v38  ;;  %v1012_v50 = vadd.f32 %v3282_v44, %v951_v47 }
 0x23a   : > { %v2007_v45 = vpop.permute.xlu1 %2006  ;;  %2499 = vrot.lane.b32.xlu0 %v3434_v37, %s3452_s19  ;;  %v3268_v37 = vld [vmem:[%s3555_s10 + $0x80] sm:$0xff] }
 0x23b   : > { %v2092_v3 = vadd.f32 %v2007_v45, %v1852_v43  ;;  %3312 = vst.msk [vmem:[%s3555_s10 + $0xf0] sm:$0xff] %vm586_vm1, %v1012_v50  ;;  %v4609_v45 = vld [vmem:[#allocation2 + $0x1b0] sm:$0xff] }
 0x23c   : > { %2267 = vrot.lane.b32.xlu1 %v2192_v48, %s3451_s18  ;;  %v1342_v26 = vld [vmem:[%s3555_s10 + $0x61] sm:$0xff]  ;;  %v1451_v62 = vpop.permute.xlu0 %1450  ;;  %v1343_v6 = vld [vmem:[%s3555_s10 + $0x69] sm:$0x7f]  ;;  %v1978_v53 = vrot.slane %v4609_v45, 1 }
 0x23d   : > { %2124 = vst.msk [vmem:[%s3555_s10 + $0x50] sm:$0xff] %vm586_vm1, %v2092_v3  ;;  %v1534_v2 = vadd.f32 %v1451_v62, %v1342_v26 }
 0x23e   : > { %v921_v54 = vpop.permute.xlu1 %920  ;;  %2032 = vrot.lane.b32.xlu0 %v1972_v63, %s3450_s17  ;;  %v3326_v35 = vld [vmem:[%s3555_s10 + $0x70] sm:$0xff] }
 0x23f   : > { %v997_v57 = vadd.f32 %v3267_v56, %v921_v54  ;;  %1566 = vst.msk [vmem:[%s3555_s10 + $0x61] sm:$0xff] %vm586_vm1, %v1534_v2  ;;  %v4622_v56 = vld [vmem:[#allocation2 + $0x160] sm:$0xff] }
 0x240   : > { %2269 = vrot.lane.b32.xlu1 %v4557_v0, %s3451_s18  ;;  %v1358_v9 = vld [vmem:[%s3555_s10 + $0xe1] sm:$0xff]  ;;  %v1483_v11 = vpop.permute.xlu0 %1482  ;;  %v1359_v4 = vld [vmem:[%s3555_s10 + $0xe9] sm:$0x7f] }
 0x241   : > { %3297 = vst.msk [vmem:[%s3555_s10 + $0x78] sm:$0xff] %vm586_vm1, %v997_v57  ;;  %v1550_v40 = vadd.f32 %v1483_v11, %v1358_v9 }
 0x242   : > { %v953_v8 = vpop.permute.xlu1 %952  ;;  %2501 = vrot.lane.b32.xlu0 %v4491_v10, %s3452_s19  ;;  %v1898_v10 = vld [vmem:[#allocation2 + $0x180] sm:$0xfe]  ;;  %v3342_v38 = vld [vmem:[%s3555_s10 + $0xf0] sm:$0xff] }
 0x243   : > { %v1013_v12 = vadd.f32 %v3283_v61, %v953_v8  ;;  %1582 = vst.msk [vmem:[%s3555_s10 + $0xe1] sm:$0xff] %vm586_vm1, %v1550_v40  ;;  %v1974_v58 = vrot.slane %v1898_v10, 1  ;;  %v3269_v8 = vld [vmem:[%s3555_s10 + $0x88] sm:$0xff] }
 0x244   : > { %2030 = vrot.lane.b32.xlu1 %v1973_v14, %s3450_s17  ;;  %v1707_v16 = vpop.permute.xlu0 %1706  ;;  %v4639_v14 = vld [vmem:[#allocation2 + $0x1d0] sm:$0xff] }
 0x245   : > { %3313 = vst.msk [vmem:[%s3555_s10 + $0xf8] sm:$0xff] %vm586_vm1, %v1013_v12  ;;  %v1976_v32 = vsel %vm1134_vm3, %v1974_v58, %v1975_v23  ;;  %v2198_v12 = vld [vmem:[#allocation2 + $0x170] sm:$0x7f] }
 0x246   : > { %v1453_v15 = vpop.permute.xlu1 %1452  ;;  %v1598_v33 = vld [vmem:[%s3555_s10 + $0x60] sm:$0xff]  ;;  %2503 = vrot.lane.b32.xlu0 %v3435_v21, %s3452_s19 }
 0x247   : > { %v1535_v18 = vadd.f32 %v1453_v15, %v1343_v6  ;;  %v1790_v41 = vadd.f32 %v1707_v16, %v1598_v33  ;;  %v1902_v6 = vld [vmem:[#allocation2 + $0x1c0] sm:$0xfe] }
 0x248   : > { %2271 = vrot.lane.b32.xlu1 %v2194_v20, %s3451_s18  ;;  %v1739_v49 = vpop.permute.xlu0 %1738  ;;  %v3327_v48 = vld [vmem:[%s3555_s10 + $0x78] sm:$0x7f]  ;;  %v1981_v20 = vrot.slane %v4639_v14, 1  ;;  %v4651_v21 = vld [vmem:[#allocation2 + $0x180] sm:$0xff] }
 0x249   : > { %1567 = vst.msk [vmem:[%s3555_s10 + $0x69] sm:$0x7f] %vm774_vm2, %v1535_v18 }
 0x24a   : > { %v1485_v22 = vpop.permute.xlu1 %1484  ;;  %1822 = vst.msk [vmem:[%s3555_s10 + $0x60] sm:$0xff] %vm586_vm1, %v1790_v41  ;;  %v1614_v25 = vld [vmem:[%s3555_s10 + $0xe0] sm:$0xff]  ;;  %2036 = vrot.lane.b32.xlu0 %v1975_v23, %s3450_s17 }
 0x24b   : > { %v1551_v24 = vadd.f32 %v1485_v22, %v1359_v4  ;;  %v1806_v27 = vadd.f32 %v1739_v49, %v1614_v25 }
 0x24c   : > { %2273 = vrot.lane.b32.xlu1 %v4588_v7, %s3451_s18  ;;  %v1205_v29 = vpop.permute.xlu0 %1204  ;;  %v3343_v62 = vld [vmem:[%s3555_s10 + $0xf8] sm:$0x7f] }
 0x24d   : > { %1583 = vst.msk [vmem:[%s3555_s10 + $0xe9] sm:$0x7f] %vm774_vm2, %v1551_v24  ;;  %v1282_v5 = vadd.f32 %v3326_v35, %v1205_v29  ;;  %v2200_v29 = vld [vmem:[#allocation2 + $0x190] sm:$0x7f] }
 0x24e   : > { %v1709_v55 = vpop.permute.xlu1 %1708  ;;  %1838 = vst.msk [vmem:[%s3555_s10 + $0xe0] sm:$0xff] %vm586_vm1, %v1806_v27  ;;  %2505 = vrot.lane.b32.xlu0 %v4522_v28, %s3452_s19  ;;  %v1900_v28 = vld [vmem:[#allocation2 + $0x1a0] sm:$0xfe] }
 0x24f   : > { %3356 = vst.msk [vmem:[%s3555_s10 + $0x70] sm:$0xff] %vm586_vm1, %v1282_v5  ;;  %v1977_v26 = vrot.slane %v1900_v28, 1 }
 0x250   : > { %v1599_v34 = vld [vmem:[%s3555_s10 + $0x68] sm:$0xff]  ;;  %2034 = vrot.lane.b32.xlu1 %v1976_v32, %s3450_s17  ;;  %v1237_v39 = vpop.permute.xlu0 %1236 }
 0x251   : > { %v1791_v36 = vadd.f32 %v1709_v55, %v1599_v34  ;;  %v1298_v43 = vadd.f32 %v3342_v38, %v1237_v39  ;;  %v1979_v17 = vsel %vm1134_vm3, %v1977_v26, %v1978_v53 }
 0x252   : > { %v1741_v60 = vpop.permute.xlu1 %1740  ;;  %2507 = vrot.lane.b32.xlu0 %v4448_v51, %s3452_s19 }
 0x253   : > { %1823 = vst.msk [vmem:[%s3555_s10 + $0x68] sm:$0xff] %vm586_vm1, %v1791_v36  ;;  %3372 = vst.msk [vmem:[%s3555_s10 + $0xf0] sm:$0xff] %vm586_vm1, %v1298_v43 }
 0x254   : > { %v1615_v44 = vld [vmem:[%s3555_s10 + $0xe8] sm:$0xff]  ;;  %2275 = vrot.lane.b32.xlu1 %v2196_v30, %s3451_s18  ;;  %v923_v50 = vpop.permute.xlu0 %922  ;;  %v4682_v30 = vld [vmem:[#allocation2 + $0x1a0] sm:$0xff] }
 0x255   : > { %v1807_v47 = vadd.f32 %v1741_v60, %v1615_v44  ;;  %v998_v51 = vadd.f32 %v3268_v37, %v923_v50  ;;  %v2152_v60 = vld [vmem:[%s3555_s10 + $0x31] sm:$0xff] }
 0x256   : > { %v1207_v3 = vpop.permute.xlu1 %1206  ;;  %2040 = vrot.lane.b32.xlu0 %v1978_v53, %s3450_s17  ;;  %v2202_v37 = vld [vmem:[#allocation2 + $0x1b0] sm:$0x7f] }
 0x257   : > { %1839 = vst.msk [vmem:[%s3555_s10 + $0xe8] sm:$0xff] %vm586_vm1, %v1807_v47  ;;  %v1283_v54 = vadd.f32 %v3327_v48, %v1207_v3  ;;  %3298 = vst.msk [vmem:[%s3555_s10 + $0x80] sm:$0xff] %vm586_vm1, %v998_v51  ;;  %v2388_v3 = vld [vmem:[%s3555_s10 + $0x8] sm:$0xff] }
 0x258   : > { %2277 = vrot.lane.b32.xlu1 %v4622_v56, %s3451_s18  ;;  %v1455_v57 = vpop.permute.xlu0 %1454 }
 0x259   : > { %3357 = vst.msk [vmem:[%s3555_s10 + $0x78] sm:$0x7f] %vm774_vm2, %v1283_v54  ;;  %v2387_v54 = vld [vmem:[%s3555_s10] sm:$0xff] }
 0x25a   : > { %v1239_v63 = vpop.permute.xlu1 %1238  ;;  %2509 = vrot.lane.b32.xlu0 %v4557_v0, %s3452_s19  ;;  %v1855_v51 = vld [vmem:[%s3555_s10 + $0x68] sm:$0x7f] }
 0x25b   : > { %v1299_v2 = vadd.f32 %v3343_v62, %v1239_v63  ;;  %v2203_v63 = vld [vmem:[#allocation2 + $0x1c0] sm:$0xff] }
 0x25c   : > { %2038 = vrot.lane.b32.xlu1 %v1979_v17, %s3450_s17  ;;  %v1487_v9 = vpop.permute.xlu0 %1486  ;;  %v1854_v17 = vld [vmem:[%s3555_s10 + $0x60] sm:$0xff] }
 0x25d   : > { %3373 = vst.msk [vmem:[%s3555_s10 + $0xf8] sm:$0x7f] %vm774_vm2, %v1299_v2  ;;  %v2658_v2 = vld [vmem:[#allocation2 + $0x38] sm:$0xff] }
 0x25e   : > { %v925_v61 = vpop.permute.xlu1 %924  ;;  %2511 = vrot.lane.b32.xlu0 %v4482_v59, %s3452_s19  ;;  %v1980_v59 = vrot.slane %v1902_v6, 1  ;;  %v3328_v27 = vld [vmem:[%s3555_s10 + $0x80] sm:$0xff] }
 0x25f   : > { %v999_v11 = vadd.f32 %v3269_v8, %v925_v61  ;;  %v2389_v8 = vld [vmem:[%s3555_s10 + $0x10] sm:$0xff] }
 0x260   : > { %v1344_v40 = vld [vmem:[%s3555_s10 + $0x71] sm:$0xff]  ;;  %2279 = vrot.lane.b32.xlu1 %v2198_v12, %s3451_s18  ;;  %v1345_v15 = vld [vmem:[%s3555_s10 + $0x79] sm:$0x7f]  ;;  %v1711_v18 = vpop.permute.xlu0 %1710  ;;  %v1982_v24 = vsel %vm1134_vm3, %v1980_v59, %v1981_v20  ;;  %v2659_v59 = vld [vmem:[#allocation2 + $0x48] sm:$0xfe] }
 0x261   : > { %v1536_v0 = vadd.f32 %v1455_v57, %v1344_v40  ;;  %3299 = vst.msk [vmem:[%s3555_s10 + $0x88] sm:$0xff] %vm586_vm1, %v999_v11  ;;  %v2718_v11 = vrot.slane %v2658_v2, 1  ;;  %v2204_v40 = vld [vmem:[#allocation2 + $0x1d0] sm:$0x7f] }
 0x262   : > { %v1457_v16 = vpop.permute.xlu1 %1456  ;;  %2044 = vrot.lane.b32.xlu0 %v1981_v20, %s3450_s17 }
 0x263   : > { %1568 = vst.msk [vmem:[%s3555_s10 + $0x71] sm:$0xff] %vm586_vm1, %v1536_v0  ;;  %v1537_v33 = vadd.f32 %v1457_v16, %v1345_v15 }
 0x264   : > { %v1360_v10 = vld [vmem:[%s3555_s10 + $0xf1] sm:$0xff]  ;;  %2281 = vrot.lane.b32.xlu1 %v4651_v21, %s3451_s18  ;;  %v1361_v4 = vld [vmem:[%s3555_s10 + $0xf9] sm:$0x7f]  ;;  %v1743_v49 = vpop.permute.xlu0 %1742 }
 0x265   : > { %v1552_v41 = vadd.f32 %v1487_v9, %v1360_v10  ;;  %1569 = vst.msk [vmem:[%s3555_s10 + $0x79] sm:$0x7f] %vm774_vm2, %v1537_v33  ;;  %v2660_v10 = vld [vmem:[#allocation2 + $0x58] sm:$0xff] }
 0x266   : > { %v1489_v22 = vpop.permute.xlu1 %1488  ;;  %2513 = vrot.lane.b32.xlu0 %v4588_v7, %s3452_s19 }
 0x267   : > { %1584 = vst.msk [vmem:[%s3555_s10 + $0xf1] sm:$0xff] %vm586_vm1, %v1552_v41  ;;  %v1553_v23 = vadd.f32 %v1489_v22, %v1361_v4  ;;  %v2153_v41 = vld [vmem:[%s3555_s10 + $0x39] sm:$0x7f] }
 0x268   : > { %2042 = vrot.lane.b32.xlu1 %v1982_v24, %s3450_s17  ;;  %v1209_v55 = vpop.permute.xlu0 %1208  ;;  %v3329_v47 = vld [vmem:[%s3555_s10 + $0x88] sm:$0x7f]  ;;  %v2390_v22 = vld [vmem:[%s3555_s10 + $0x18] sm:$0xff] }
 0x269   : > { %1585 = vst.msk [vmem:[%s3555_s10 + $0xf9] sm:$0x7f] %vm774_vm2, %v1553_v23  ;;  %v1284_v32 = vadd.f32 %v3328_v27, %v1209_v55  ;;  %v2154_v55 = vld [vmem:[%s3555_s10 + $0x41] sm:$0xff] }
 0x26a   : > { %v1600_v58 = vld [vmem:[%s3555_s10 + $0x70] sm:$0xff]  ;;  %v1713_v25 = vpop.permute.xlu1 %1712  ;;  %2515 = vrot.lane.b32.xlu0 %v4510_v46, %s3452_s19 }
 0x26b   : > { %v1792_v35 = vadd.f32 %v1711_v18, %v1600_v58  ;;  %3358 = vst.msk [vmem:[%s3555_s10 + $0x80] sm:$0xff] %vm586_vm1, %v1284_v32  ;;  %v2720_v58 = vrot.slane %v2659_v59, 1 }
 0x26c   : > { %v1601_v5 = vld [vmem:[%s3555_s10 + $0x78] sm:$0xff]  ;;  %2283 = vrot.lane.b32.xlu1 %v2200_v29, %s3451_s18  ;;  %v2250_v38 = vpop.permute.xlu0 %2249 }
 0x26d   : > { %1824 = vst.msk [vmem:[%s3555_s10 + $0x70] sm:$0xff] %vm586_vm1, %v1792_v35  ;;  %v1793_v7 = vadd.f32 %v1713_v25, %v1601_v5  ;;  %v2333_v43 = vadd.f32 %v2250_v38, %v2152_v60  ;;  %v2721_v25 = vrot.slane %v2660_v10, 1 }
 0x26e   : > { %v1616_v34 = vld [vmem:[%s3555_s10 + $0xf0] sm:$0xff]  ;;  %v1745_v36 = vpop.permute.xlu1 %1744  ;;  %2517 = vrot.lane.b32.xlu0 %v4622_v56, %s3452_s19 }
 0x26f   : > { %v1808_v39 = vadd.f32 %v1743_v49, %v1616_v34  ;;  %1825 = vst.msk [vmem:[%s3555_s10 + $0x78] sm:$0xff] %vm586_vm1, %v1793_v7  ;;  %2363 = vst.msk [vmem:[%s3555_s10 + $0x31] sm:$0xff] %vm586_vm1, %v2333_v43  ;;  %v2206_v7 = vld [vmem:[#allocation2 + $0x1f0] sm:$0x7f] }
 0x270   : > { %v1617_v46 = vld [vmem:[%s3555_s10 + $0xf8] sm:$0xff]  ;;  %2285 = vrot.lane.b32.xlu1 %v4682_v30, %s3451_s18  ;;  %v2480_v48 = vpop.permute.xlu0 %2479 }
 0x271   : > { %1840 = vst.msk [vmem:[%s3555_s10 + $0xf0] sm:$0xff] %vm586_vm1, %v1808_v39  ;;  %v1809_v44 = vadd.f32 %v1745_v36, %v1617_v46  ;;  %v2568_v53 = vadd.f32 %v2480_v48, %v2388_v3  ;;  %v2722_v36 = vsel %vm1134_vm3, %v2720_v58, %v2721_v25  ;;  %v1904_v39 = vld [vmem:[#allocation2 + $0x1e0] sm:$0xfe] }
 0x272   : > { %v1211_v28 = vpop.permute.xlu1 %1210  ;;  %2519 = vrot.lane.b32.xlu0 %v4546_v31, %s3452_s19  ;;  %v2657_v31 = vld [vmem:[#allocation2 + $0x28] sm:$0xfe] }
 0x273   : > { %1841 = vst.msk [vmem:[%s3555_s10 + $0xf8] sm:$0xff] %vm586_vm1, %v1809_v44  ;;  %v1285_v50 = vadd.f32 %v3329_v47, %v1211_v28  ;;  %2598 = vst.msk [vmem:[%s3555_s10 + $0x8] sm:$0xff] %vm586_vm1, %v2568_v53  ;;  %v2717_v18 = vrot.slane %v2657_v31, 1 }
 0x274   : > { %2287 = vrot.lane.b32.xlu1 %v2202_v37, %s3451_s18  ;;  %v2013_v26 = vpop.permute.xlu0 %2012  ;;  %v1856_v46 = vld [vmem:[%s3555_s10 + $0x70] sm:$0xff] }
 0x275   : > { %3359 = vst.msk [vmem:[%s3555_s10 + $0x88] sm:$0x7f] %vm774_vm2, %v1285_v50  ;;  %v2095_v57 = vadd.f32 %v2013_v26, %v1855_v51  ;;  %v2391_v50 = vld [vmem:[%s3555_s10 + $0x20] sm:$0xff]  ;;  %v2661_v26 = vld [vmem:[#allocation2 + $0x68] sm:$0xfe] }
 0x276   : > { %v2478_v56 = vpop.permute.xlu1 %2477  ;;  %2521 = vrot.lane.b32.xlu0 %v4651_v21, %s3452_s19  ;;  %v1857_v32 = vld [vmem:[%s3555_s10 + $0x78] sm:$0x7f] }
 0x277   : > { %v2567_v62 = vadd.f32 %v2478_v56, %v2387_v54  ;;  %2127 = vst.msk [vmem:[%s3555_s10 + $0x68] sm:$0x7f] %vm774_vm2, %v2095_v57  ;;  %v1983_v54 = vrot.slane %v1904_v39, 1  ;;  %v2392_v57 = vld [vmem:[%s3555_s10 + $0x28] sm:$0xff] }
 0x278   : > { %2289 = vrot.lane.b32.xlu1 %v2203_v63, %s3451_s18  ;;  %v2482_v9 = vpop.permute.xlu0 %2481 }
 0x279   : > { %2597 = vst.msk [vmem:[%s3555_s10] sm:$0xff] %vm586_vm1, %v2567_v62  ;;  %v2569_v6 = vadd.f32 %v2482_v9, %v2389_v8  ;;  %v2662_v62 = vld [vmem:[#allocation2 + $0x78] sm:$0xff] }
 0x27a   : > { %v2011_v61 = vpop.permute.xlu1 %2010  ;;  %v2628_v16 = vld [vmem:[%s3555_s10 + $0x8] sm:$0x7f]  ;;  %2523 = vrot.lane.b32.xlu0 %v4577_v19, %s3452_s19  ;;  %v2719_v19 = vsel %vm1134_vm3, %v2717_v18, %v2718_v11  ;;  %v2724_v8 = vrot.slane %v2662_v62, 1  ;;  %v2156_v9 = vld [vmem:[%s3555_s10 + $0x51] sm:$0xff] }
 0x27b   : > { %v2094_v12 = vadd.f32 %v2011_v61, %v1854_v17  ;;  %v2793_v21 = vadd.f32 %v2718_v11, %v2628_v16  ;;  %2599 = vst.msk [vmem:[%s3555_s10 + $0x10] sm:$0xff] %vm586_vm1, %v2569_v6  ;;  %v2723_v61 = vrot.slane %v2661_v26, 1 }
 0x27c   : > { %v1346_v0 = vld [vmem:[%s3555_s10 + $0x81] sm:$0xff]  ;;  %v1347_v15 = vld [vmem:[%s3555_s10 + $0x89] sm:$0x7f]  ;;  %2291 = vrot.lane.b32.xlu1 %v2204_v40, %s3451_s18  ;;  %v2484_v49 = vpop.permute.xlu0 %2483 }
 0x27d   : > { %v1538_v20 = vadd.f32 %v3978_v42, %v1346_v0  ;;  %v1539_v33 = vadd.f32 %v3986_v52, %v1347_v15  ;;  %2126 = vst.msk [vmem:[%s3555_s10 + $0x60] sm:$0xff] %vm586_vm1, %v2094_v12  ;;  %v2205_v52 = vld [vmem:[#allocation2 + $0x1e0] sm:$0xff]  ;;  %v2570_v23 = vadd.f32 %v2484_v49, %v2390_v22  ;;  %v2725_v6 = vsel %vm1134_vm3, %v2723_v61, %v2724_v8  ;;  %v2663_v22 = vld [vmem:[#allocation2 + $0x88] sm:$0xfe]  ;;  %v2664_v49 = vld [vmem:[#allocation2 + $0x98] sm:$0xff] }
 0x27e   : > { %v2252_v4 = vpop.permute.xlu1 %2251  ;;  %2823 = vst.msk [vmem:[%s3555_s10 + $0x8] sm:$0x7f] %vm774_vm2, %v2793_v21  ;;  %2525 = vrot.lane.b32.xlu0 %v4682_v30, %s3452_s19  ;;  %v1905_v30 = vld [vmem:[#allocation2 + $0x1f0] sm:$0xff] }
 0x27f   : > { %1570 = vst.msk [vmem:[%s3555_s10 + $0x81] sm:$0xff] %vm586_vm1, %v1538_v20  ;;  %v2334_v42 = vadd.f32 %v2252_v4, %v2153_v41  ;;  %2600 = vst.msk [vmem:[%s3555_s10 + $0x18] sm:$0xff] %vm586_vm1, %v2570_v23  ;;  %v1984_v56 = vrot.slane %v1905_v30, 1 }
 0x280   : > { %1571 = vst.msk [vmem:[%s3555_s10 + $0x89] sm:$0x7f] %vm774_vm2, %v1539_v33  ;;  %v2627_v24 = vld [vmem:[%s3555_s10] sm:$0xff]  ;;  %2293 = vrot.lane.b32.xlu1 %v2205_v52, %s3451_s18  ;;  %v2017_v29 = vpop.permute.xlu0 %2016  ;;  %v2393_v33 = vld [vmem:[%s3555_s10 + $0x30] sm:$0xff] }
 0x281   : > { %v2792_v27 = vadd.f32 %v2719_v19, %v2627_v24  ;;  %2364 = vst.msk [vmem:[%s3555_s10 + $0x39] sm:$0x7f] %vm774_vm2, %v2334_v42  ;;  %v2097_v34 = vadd.f32 %v2017_v29, %v1857_v32  ;;  %v1985_v17 = vsel %vm1134_vm3, %v1983_v54, %v1984_v56  ;;  %v2157_v42 = vld [vmem:[%s3555_s10 + $0x59] sm:$0x7f] }
 0x282   : > { %v2254_v35 = vpop.permute.xlu1 %2253  ;;  %v2629_v60 = vld [vmem:[%s3555_s10 + $0x10] sm:$0xff]  ;;  %2529 = vrot.lane.b32.xlu0 %v2203_v63, %s3452_s19  ;;  %v1861_v29 = vld [vmem:[%s3555_s10 + $0x98] sm:$0x7f] }
 0x283   : > { %2822 = vst.msk [vmem:[%s3555_s10] sm:$0xff] %vm586_vm1, %v2792_v27  ;;  %v2335_v5 = vadd.f32 %v2254_v35, %v2154_v55  ;;  %v2794_v38 = vadd.f32 %v2722_v36, %v2629_v60  ;;  %v2727_v27 = vrot.slane %v2664_v49, 1 }
 0x284   : > { %2295 = vrot.lane.b32.xlu1 %v2206_v7, %s3451_s18  ;;  %2129 = vst.msk [vmem:[%s3555_s10 + $0x78] sm:$0x7f] %vm774_vm2, %v2097_v34  ;;  %v2486_v28 = vpop.permute.xlu0 %2485  ;;  %v2158_v55 = vld [vmem:[%s3555_s10 + $0x61] sm:$0xff] }
 0x285   : > { %2365 = vst.msk [vmem:[%s3555_s10 + $0x41] sm:$0xff] %vm586_vm1, %v2335_v5  ;;  %2824 = vst.msk [vmem:[%s3555_s10 + $0x10] sm:$0xff] %vm586_vm1, %v2794_v38  ;;  %v2571_v53 = vadd.f32 %v2486_v28, %v2391_v50  ;;  %v1860_v38 = vld [vmem:[%s3555_s10 + $0x90] sm:$0xff]  ;;  %v2159_v50 = vld [vmem:[%s3555_s10 + $0x69] sm:$0x7f] }
 0x286   : > { %v2015_v44 = vpop.permute.xlu1 %2014  ;;  %v1602_v47 = vld [vmem:[%s3555_s10 + $0x80] sm:$0xff]  ;;  %v2630_v37 = vld [vmem:[%s3555_s10 + $0x18] sm:$0x7f]  ;;  %2533 = vrot.lane.b32.xlu0 %v2205_v52, %s3452_s19 }
 0x287   : > { %v1603_v43 = vld [vmem:[%s3555_s10 + $0x88] sm:$0xff]  ;;  %v2096_v48 = vadd.f32 %v2015_v44, %v1856_v46  ;;  %v1794_v51 = vadd.f32 %v3999_v1, %v1602_v47  ;;  %2601 = vst.msk [vmem:[%s3555_s10 + $0x20] sm:$0xff] %vm586_vm1, %v2571_v53 }
 0x288   : > { %v1795_v3 = vadd.f32 %v4019_v13, %v1603_v43  ;;  %2527 = vrot.lane.b32.xlu1 %v4609_v45, %s3452_s19  ;;  %v2795_v13 = vadd.f32 %v2721_v25, %v2630_v37  ;;  %v2155_v45 = vld [vmem:[%s3555_s10 + $0x49] sm:$0x7f]  ;;  %v2488_v2 = vpop.permute.xlu0 %2487  ;;  %v2394_v19 = vld [vmem:[%s3555_s10 + $0x38] sm:$0xff]  ;;  %v2726_v25 = vrot.slane %v2663_v22, 1 }
 0x289   : > { %2128 = vst.msk [vmem:[%s3555_s10 + $0x70] sm:$0xff] %vm586_vm1, %v2096_v48  ;;  %1826 = vst.msk [vmem:[%s3555_s10 + $0x80] sm:$0xff] %vm586_vm1, %v1794_v51  ;;  %v2572_v31 = vadd.f32 %v2488_v2, %v2392_v57  ;;  %v2666_v48 = vld [vmem:[#allocation2 + $0xb8] sm:$0xff] }
 0x28a   : > { %1827 = vst.msk [vmem:[%s3555_s10 + $0x88] sm:$0xff] %vm586_vm1, %v1795_v3  ;;  %v2256_v63 = vpop.permute.xlu1 %2255  ;;  %2046 = vrot.lane.b32.xlu0 %v1985_v17, %s3450_s17  ;;  %v2728_v34 = vsel %vm1134_vm3, %v2726_v25, %v2727_v27  ;;  %v2665_v3 = vld [vmem:[#allocation2 + $0xa8] sm:$0xfe]  ;;  %v2730_v26 = vrot.slane %v2666_v48, 1 }
 0x28b   : > { %2825 = vst.msk [vmem:[%s3555_s10 + $0x18] sm:$0x7f] %vm774_vm2, %v2795_v13  ;;  %v2336_v1 = vadd.f32 %v2256_v63, %v2155_v45  ;;  %v2729_v13 = vrot.slane %v2665_v3, 1  ;;  %v1863_v63 = vld [vmem:[%s3555_s10 + $0xa8] sm:$0x7f] }
 0x28c   : > { %2531 = vrot.lane.b32.xlu1 %v4639_v14, %s3452_s19  ;;  %2602 = vst.msk [vmem:[%s3555_s10 + $0x28] sm:$0xff] %vm586_vm1, %v2572_v31  ;;  %v2021_v12 = vpop.permute.xlu0 %2020  ;;  %v2395_v46 = vld [vmem:[%s3555_s10 + $0x40] sm:$0xff] }
 0x28d   : > { %2366 = vst.msk [vmem:[%s3555_s10 + $0x49] sm:$0x7f] %vm774_vm2, %v2336_v1  ;;  %v2731_v31 = vsel %vm1134_vm3, %v2729_v13, %v2730_v26 }
 0x28e   : > { %v2258_v11 = vpop.permute.xlu1 %2257  ;;  %v2631_v0 = vld [vmem:[%s3555_s10 + $0x20] sm:$0xff] }
 0x28f   : > { %v2337_v40 = vadd.f32 %v2258_v11, %v2156_v9  ;;  %v2796_v16 = vadd.f32 %v2725_v6, %v2631_v0 }
 0x290   : > { %2535 = vrot.lane.b32.xlu1 %v1905_v30, %s3452_s19  ;;  %v1858_v20 = vld [vmem:[%s3555_s10 + $0x80] sm:$0xff]  ;;  %v2490_v21 = vpop.permute.xlu0 %2489  ;;  %v2160_v62 = vld [vmem:[%s3555_s10 + $0x71] sm:$0xff] }
 0x291   : > { %v1859_v14 = vld [vmem:[%s3555_s10 + $0x88] sm:$0x7f]  ;;  %2367 = vst.msk [vmem:[%s3555_s10 + $0x51] sm:$0xff] %vm586_vm1, %v2337_v40  ;;  %v2573_v10 = vadd.f32 %v2490_v21, %v2393_v33  ;;  %2826 = vst.msk [vmem:[%s3555_s10 + $0x20] sm:$0xff] %vm586_vm1, %v2796_v16  ;;  %v2668_v16 = vld [vmem:[#allocation2 + $0xd8] sm:$0xff] }
 0x292   : > { %v2099_v15 = vadd.f32 %v2021_v12, %v1859_v14  ;;  %v2019_v18 = vpop.permute.xlu1 %2018 }
 0x293   : > { %v2098_v59 = vadd.f32 %v2019_v18, %v1858_v20  ;;  %v2632_v41 = vld [vmem:[%s3555_s10 + $0x28] sm:$0x7f]  ;;  %2603 = vst.msk [vmem:[%s3555_s10 + $0x30] sm:$0xff] %vm586_vm1, %v2573_v10  ;;  %v2161_v18 = vld [vmem:[%s3555_s10 + $0x79] sm:$0x7f] }
 0x294   : > { %2131 = vst.msk [vmem:[%s3555_s10 + $0x88] sm:$0x7f] %vm774_vm2, %v2099_v15  ;;  %2048 = vrot.lane.b32.xlu1 %v1984_v56, %s3450_s17  ;;  %v2797_v4 = vadd.f32 %v2724_v8, %v2632_v41  ;;  %v2492_v23 = vpop.permute.xlu0 %2491  ;;  %v2396_v54 = vld [vmem:[%s3555_s10 + $0x48] sm:$0xff]  ;;  %v1862_v8 = vld [vmem:[%s3555_s10 + $0xa0] sm:$0xff] }
 0x295   : > { %2130 = vst.msk [vmem:[%s3555_s10 + $0x80] sm:$0xff] %vm586_vm1, %v2098_v59  ;;  %v2574_v58 = vadd.f32 %v2492_v23, %v2394_v19  ;;  %v2667_v15 = vld [vmem:[#allocation2 + $0xc8] sm:$0xfe] }
 0x296   : > { %v2260_v52 = vpop.permute.xlu1 %2259  ;;  %2827 = vst.msk [vmem:[%s3555_s10 + $0x28] sm:$0x7f] %vm774_vm2, %v2797_v4  ;;  %v2732_v41 = vrot.slane %v2667_v15, 1  ;;  %v2733_v4 = vrot.slane %v2668_v16, 1 }
 0x297   : > { %v2338_v24 = vadd.f32 %v2260_v52, %v2157_v42  ;;  %2604 = vst.msk [vmem:[%s3555_s10 + $0x38] sm:$0xff] %vm586_vm1, %v2574_v58  ;;  %v1865_v42 = vld [vmem:[%s3555_s10 + $0xb8] sm:$0x7f] }
 0x298   : > { %v2025_v32 = vpop.permute.xlu0 %2024  ;;  %v2397_v12 = vld [vmem:[%s3555_s10 + $0x50] sm:$0xff] }
 0x299   : > { %2368 = vst.msk [vmem:[%s3555_s10 + $0x59] sm:$0x7f] %vm774_vm2, %v2338_v24  ;;  %v2101_v7 = vadd.f32 %v2025_v32, %v1861_v29  ;;  %v2734_v24 = vsel %vm1134_vm3, %v2732_v41, %v2733_v4 }
 0x29a   : > { %v2262_v35 = vpop.permute.xlu1 %2261  ;;  %v2633_v36 = vld [vmem:[%s3555_s10 + $0x30] sm:$0xff] }
 0x29b   : > { %v2339_v5 = vadd.f32 %v2262_v35, %v2158_v55  ;;  %v2798_v60 = vadd.f32 %v2728_v34, %v2633_v36  ;;  %2133 = vst.msk [vmem:[%s3555_s10 + $0x98] sm:$0x7f] %vm774_vm2, %v2101_v7  ;;  %v2669_v36 = vld [vmem:[#allocation2 + $0xe8] sm:$0xfe] }
 0x29c   : > { %v2494_v30 = vpop.permute.xlu0 %2493  ;;  %v2162_v49 = vld [vmem:[%s3555_s10 + $0x81] sm:$0xff] }
 0x29d   : > { %2369 = vst.msk [vmem:[%s3555_s10 + $0x61] sm:$0xff] %vm586_vm1, %v2339_v5  ;;  %2828 = vst.msk [vmem:[%s3555_s10 + $0x30] sm:$0xff] %vm586_vm1, %v2798_v60  ;;  %v2575_v28 = vadd.f32 %v2494_v30, %v2395_v46  ;;  %v2670_v60 = vld [vmem:[#allocation2 + $0xf8] sm:$0xff] }
 0x29e   : > { %v2023_v39 = vpop.permute.xlu1 %2022  ;;  %v2634_v44 = vld [vmem:[%s3555_s10 + $0x38] sm:$0x7f] }
 0x29f   : > { %v2100_v43 = vadd.f32 %v2023_v39, %v1860_v38  ;;  %v2799_v47 = vadd.f32 %v2727_v27, %v2634_v44  ;;  %2605 = vst.msk [vmem:[%s3555_s10 + $0x40] sm:$0xff] %vm586_vm1, %v2575_v28  ;;  %v1864_v27 = vld [vmem:[%s3555_s10 + $0xb0] sm:$0xff]  ;;  %v2163_v39 = vld [vmem:[%s3555_s10 + $0x89] sm:$0x7f]  ;;  %v2735_v28 = vrot.slane %v2669_v36, 1 }
 0x2a0   : > { %v2496_v53 = vpop.permute.xlu0 %2495  ;;  %v2398_v21 = vld [vmem:[%s3555_s10 + $0x58] sm:$0xff] }
 0x2a1   : > { %2132 = vst.msk [vmem:[%s3555_s10 + $0x90] sm:$0xff] %vm586_vm1, %v2100_v43  ;;  %v2576_v51 = vadd.f32 %v2496_v53, %v2396_v54 }
 0x2a2   : > { %v2264_v37 = vpop.permute.xlu1 %2263  ;;  %2829 = vst.msk [vmem:[%s3555_s10 + $0x38] sm:$0x7f] %vm774_vm2, %v2799_v47  ;;  %v2736_v47 = vrot.slane %v2670_v60, 1 }
 0x2a3   : > { %v2340_v56 = vadd.f32 %v2264_v37, %v2159_v50  ;;  %2606 = vst.msk [vmem:[%s3555_s10 + $0x48] sm:$0xff] %vm586_vm1, %v2576_v51  ;;  %v1867_v50 = vld [vmem:[%s3555_s10 + $0xc8] sm:$0x7f] }
 0x2a4   : > { %v2029_v57 = vpop.permute.xlu0 %2028  ;;  %v2399_v32 = vld [vmem:[%s3555_s10 + $0x60] sm:$0xff]  ;;  %v2737_v51 = vsel %vm1134_vm3, %v2735_v28, %v2736_v47 }
 0x2a5   : > { %2370 = vst.msk [vmem:[%s3555_s10 + $0x69] sm:$0x7f] %vm774_vm2, %v2340_v56  ;;  %v2103_v1 = vadd.f32 %v2029_v57, %v1863_v63 }
 0x2a6   : > { %v2266_v45 = vpop.permute.xlu1 %2265  ;;  %v2635_v17 = vld [vmem:[%s3555_s10 + $0x40] sm:$0xff] }
 0x2a7   : > { %v2341_v2 = vadd.f32 %v2266_v45, %v2160_v62  ;;  %2135 = vst.msk [vmem:[%s3555_s10 + $0xa8] sm:$0x7f] %vm774_vm2, %v2103_v1  ;;  %v2800_v61 = vadd.f32 %v2731_v31, %v2635_v17  ;;  %v2672_v17 = vld [vmem:[#allocation2 + $0x118] sm:$0xff] }
 0x2a8   : > { %v2498_v11 = vpop.permute.xlu0 %2497  ;;  %v2164_v3 = vld [vmem:[%s3555_s10 + $0x91] sm:$0xff] }
 0x2a9   : > { %2371 = vst.msk [vmem:[%s3555_s10 + $0x71] sm:$0xff] %vm586_vm1, %v2341_v2  ;;  %v2577_v14 = vadd.f32 %v2498_v11, %v2397_v12  ;;  %2830 = vst.msk [vmem:[%s3555_s10 + $0x40] sm:$0xff] %vm586_vm1, %v2800_v61  ;;  %v2165_v61 = vld [vmem:[%s3555_s10 + $0x99] sm:$0x7f]  ;;  %v2671_v12 = vld [vmem:[#allocation2 + $0x108] sm:$0xfe] }
 0x2aa   : > { %v2027_v9 = vpop.permute.xlu1 %2026  ;;  %v2636_v6 = vld [vmem:[%s3555_s10 + $0x48] sm:$0x7f] }
 0x2ab   : > { %v2102_v40 = vadd.f32 %v2027_v9, %v1862_v8  ;;  %v2801_v0 = vadd.f32 %v2730_v26, %v2636_v6  ;;  %2607 = vst.msk [vmem:[%s3555_s10 + $0x50] sm:$0xff] %vm586_vm1, %v2577_v14  ;;  %v1866_v26 = vld [vmem:[%s3555_s10 + $0xc0] sm:$0xff]  ;;  %v2739_v6 = vrot.slane %v2672_v17, 1 }
 0x2ac   : > { %v2500_v33 = vpop.permute.xlu0 %2499  ;;  %v2400_v43 = vld [vmem:[%s3555_s10 + $0x68] sm:$0xff] }
 0x2ad   : > { %2134 = vst.msk [vmem:[%s3555_s10 + $0xa0] sm:$0xff] %vm586_vm1, %v2102_v40  ;;  %v2578_v10 = vadd.f32 %v2500_v33, %v2398_v21 }
 0x2ae   : > { %v2268_v20 = vpop.permute.xlu1 %2267  ;;  %2831 = vst.msk [vmem:[%s3555_s10 + $0x48] sm:$0x7f] %vm774_vm2, %v2801_v0  ;;  %v2738_v0 = vrot.slane %v2671_v12, 1 }
 0x2af   : > { %v2342_v59 = vadd.f32 %v2268_v20, %v2161_v18  ;;  %2608 = vst.msk [vmem:[%s3555_s10 + $0x58] sm:$0xff] %vm586_vm1, %v2578_v10  ;;  %v1869_v18 = vld [vmem:[%s3555_s10 + $0xd8] sm:$0x7f] }
 0x2b0   : > { %v2033_v52 = vpop.permute.xlu0 %2032  ;;  %v2401_v63 = vld [vmem:[%s3555_s10 + $0x70] sm:$0xff] }
 0x2b1   : > { %2372 = vst.msk [vmem:[%s3555_s10 + $0x79] sm:$0x7f] %vm774_vm2, %v2342_v59  ;;  %v2105_v19 = vadd.f32 %v2033_v52, %v1865_v42  ;;  %v2740_v59 = vsel %vm1134_vm3, %v2738_v0, %v2739_v6 }
 0x2b2   : > { %v2270_v22 = vpop.permute.xlu1 %2269  ;;  %v2637_v58 = vld [vmem:[%s3555_s10 + $0x50] sm:$0xff] }
 0x2b3   : > { %v2343_v23 = vadd.f32 %v2270_v22, %v2162_v49  ;;  %v2802_v25 = vadd.f32 %v2734_v24, %v2637_v58  ;;  %2137 = vst.msk [vmem:[%s3555_s10 + $0xb8] sm:$0x7f] %vm774_vm2, %v2105_v19  ;;  %v2673_v58 = vld [vmem:[#allocation2 + $0x128] sm:$0xfe] }
 0x2b4   : > { %v2502_v35 = vpop.permute.xlu0 %2501  ;;  %v2166_v15 = vld [vmem:[%s3555_s10 + $0xa1] sm:$0xff] }
 0x2b5   : > { %2373 = vst.msk [vmem:[%s3555_s10 + $0x81] sm:$0xff] %vm586_vm1, %v2343_v23  ;;  %2832 = vst.msk [vmem:[%s3555_s10 + $0x50] sm:$0xff] %vm586_vm1, %v2802_v25  ;;  %v2579_v7 = vadd.f32 %v2502_v35, %v2399_v32  ;;  %v2674_v25 = vld [vmem:[#allocation2 + $0x138] sm:$0xff] }
 0x2b6   : > { %v2031_v55 = vpop.permute.xlu1 %2030  ;;  %v2638_v5 = vld [vmem:[%s3555_s10 + $0x58] sm:$0x7f] }
 0x2b7   : > { %v2104_v29 = vadd.f32 %v2031_v55, %v1864_v27  ;;  %v2803_v34 = vadd.f32 %v2733_v4, %v2638_v5  ;;  %2609 = vst.msk [vmem:[%s3555_s10 + $0x60] sm:$0xff] %vm586_vm1, %v2579_v7  ;;  %v1868_v4 = vld [vmem:[%s3555_s10 + $0xd0] sm:$0xff]  ;;  %v2167_v27 = vld [vmem:[%s3555_s10 + $0xa9] sm:$0x7f]  ;;  %v2741_v7 = vrot.slane %v2673_v58, 1 }
 0x2b8   : > { %v2504_v30 = vpop.permute.xlu0 %2503  ;;  %v2402_v11 = vld [vmem:[%s3555_s10 + $0x78] sm:$0xff] }
 0x2b9   : > { %2136 = vst.msk [vmem:[%s3555_s10 + $0xb0] sm:$0xff] %vm586_vm1, %v2104_v29  ;;  %v2580_v44 = vadd.f32 %v2504_v30, %v2400_v43 }
 0x2ba   : > { %v2272_v38 = vpop.permute.xlu1 %2271  ;;  %2833 = vst.msk [vmem:[%s3555_s10 + $0x58] sm:$0x7f] %vm774_vm2, %v2803_v34  ;;  %v2742_v34 = vrot.slane %v2674_v25, 1 }
 0x2bb   : > { %v2344_v46 = vadd.f32 %v2272_v38, %v2163_v39  ;;  %2610 = vst.msk [vmem:[%s3555_s10 + $0x68] sm:$0xff] %vm586_vm1, %v2580_v44  ;;  %v1871_v38 = vld [vmem:[%s3555_s10 + $0xe8] sm:$0x7f] }
 0x2bc   : > { %v2037_v37 = vpop.permute.xlu0 %2036  ;;  %v2403_v52 = vld [vmem:[%s3555_s10 + $0x80] sm:$0xff]  ;;  %v2743_v44 = vsel %vm1134_vm3, %v2741_v7, %v2742_v34 }
 0x2bd   : > { %2374 = vst.msk [vmem:[%s3555_s10 + $0x89] sm:$0x7f] %vm774_vm2, %v2344_v46  ;;  %v2107_v54 = vadd.f32 %v2037_v37, %v1867_v50  ;;  %v2852_v46 = vld [vmem:[%s3555_s10] sm:$0xff] }
 0x2be   : > { %v2274_v48 = vpop.permute.xlu1 %2273  ;;  %v2639_v56 = vld [vmem:[%s3555_s10 + $0x60] sm:$0xff] }
 0x2bf   : > { %v2345_v53 = vadd.f32 %v2274_v48, %v2164_v3  ;;  %2139 = vst.msk [vmem:[%s3555_s10 + $0xc8] sm:$0x7f] %vm774_vm2, %v2107_v54  ;;  %v2804_v13 = vadd.f32 %v2737_v51, %v2639_v56  ;;  %v2853_v3 = vld [vmem:[%s3555_s10 + $0x8] sm:$0xff]  ;;  %v2854_v48 = vld [vmem:[%s3555_s10 + $0x10] sm:$0xff]  ;;  %v2953_v56 = vmul.f32 %v2852_v46, %v2852_v46  ;;  %v2855_v51 = vld [vmem:[%s3555_s10 + $0x18] sm:$0xff] }
 0x2c0   : > { %v2506_v45 = vpop.permute.xlu0 %2505  ;;  %v2168_v36 = vld [vmem:[%s3555_s10 + $0xb1] sm:$0xff]  ;;  %v2885_v17 = vsel %vm586_vm1, %v2853_v3, 0.0 }
 0x2c1   : > { %2375 = vst.msk [vmem:[%s3555_s10 + $0x91] sm:$0xff] %vm586_vm1, %v2345_v53  ;;  %v2581_v2 = vadd.f32 %v2506_v45, %v2401_v63  ;;  %2834 = vst.msk [vmem:[%s3555_s10 + $0x60] sm:$0xff] %vm586_vm1, %v2804_v13  ;;  %v2954_v45 = vmul.f32 %v2853_v3, %v2853_v3  ;;  %v2884_v63 = vsel %vm586_vm1, %v2852_v46, 0.0 }
 0x2c2   : > { %v2035_v62 = vpop.permute.xlu1 %2034  ;;  %v2640_v1 = vld [vmem:[%s3555_s10 + $0x68] sm:$0x7f] }
 0x2c3   : > { %v2106_v57 = vadd.f32 %v2035_v62, %v1866_v26  ;;  %v2805_v31 = vadd.f32 %v2736_v47, %v2640_v1  ;;  %2611 = vst.msk [vmem:[%s3555_s10 + $0x70] sm:$0xff] %vm586_vm1, %v2581_v2  ;;  %v1870_v47 = vld [vmem:[%s3555_s10 + $0xe0] sm:$0xff]  ;;  %v2675_v1 = vld [vmem:[#allocation2 + $0x148] sm:$0xfe] }
 0x2c4   : > { %v2508_v9 = vpop.permute.xlu0 %2507  ;;  %v2404_v29 = vld [vmem:[%s3555_s10 + $0x88] sm:$0xff] }
 0x2c5   : > { %2138 = vst.msk [vmem:[%s3555_s10 + $0xc0] sm:$0xff] %vm586_vm1, %v2106_v57  ;;  %v2582_v14 = vadd.f32 %v2508_v9, %v2402_v11  ;;  %v2955_v57 = vmul.f32 %v2854_v48, %v2854_v48  ;;  %v2169_v9 = vld [vmem:[%s3555_s10 + $0xb9] sm:$0x7f] }
 0x2c6   : > { %v2276_v8 = vpop.permute.xlu1 %2275  ;;  %2835 = vst.msk [vmem:[%s3555_s10 + $0x68] sm:$0x7f] %vm774_vm2, %v2805_v31  ;;  %v4960_v31 = vld [vmem:[#allocation2 + $0x158] sm:$0xff] }
 0x2c7   : > { %v2346_v40 = vadd.f32 %v2276_v8, %v2165_v61  ;;  %2612 = vst.msk [vmem:[%s3555_s10 + $0x78] sm:$0xff] %vm586_vm1, %v2582_v14  ;;  %v2956_v61 = vmul.f32 %v2855_v51, %v2855_v51  ;;  %v2856_v8 = vld [vmem:[%s3555_s10 + $0x20] sm:$0xff]  ;;  %v2985_v14 = vsel %vm586_vm1, %v2953_v56, 0.0 }
 0x2c8   : > { %v2041_v20 = vpop.permute.xlu0 %2040  ;;  %v2405_v54 = vld [vmem:[%s3555_s10 + $0x90] sm:$0xff]  ;;  %v2891_v58 = vsel %vm586_vm1, %v2856_v8, 0.0 }
 0x2c9   : > { %2376 = vst.msk [vmem:[%s3555_s10 + $0x99] sm:$0x7f] %vm774_vm2, %v2346_v40  ;;  %v2109_v21 = vadd.f32 %v2041_v20, %v1869_v18  ;;  %v2857_v18 = vld [vmem:[%s3555_s10 + $0x28] sm:$0xff]  ;;  %v2744_v20 = vrot.slane %v2675_v1, 1 }
 0x2ca   : > { %v2278_v16 = vpop.permute.xlu1 %2277  ;;  %v2641_v10 = vld [vmem:[%s3555_s10 + $0x70] sm:$0xff]  ;;  %v2958_v25 = vmul.f32 %v2857_v18, %v2857_v18 }
 0x2cb   : > { %v2347_v33 = vadd.f32 %v2278_v16, %v2166_v15  ;;  %v2806_v41 = vadd.f32 %v2740_v59, %v2641_v10  ;;  %2141 = vst.msk [vmem:[%s3555_s10 + $0xd8] sm:$0x7f] %vm774_vm2, %v2109_v21  ;;  %v2886_v16 = vadd.f32 %v2885_v17, %v2884_v63  ;;  %v2986_v21 = vsel %vm586_vm1, %v2954_v45, 0.0 }
 0x2cc   : > { %v2510_v49 = vpop.permute.xlu0 %2509  ;;  %v2988_v59 = vsel %vm586_vm1, %v2955_v57, 0.0  ;;  %v2889_v10 = vsel %vm586_vm1, %v2855_v51, 0.0 }
 0x2cd   : > { %2377 = vst.msk [vmem:[%s3555_s10 + $0xa1] sm:$0xff] %vm586_vm1, %v2347_v33  ;;  %2836 = vst.msk [vmem:[%s3555_s10 + $0x70] sm:$0xff] %vm586_vm1, %v2806_v41  ;;  %v2583_v19 = vadd.f32 %v2510_v49, %v2403_v52  ;;  %v2745_v33 = vrot.slane %v4960_v31, 1  ;;  %v2957_v41 = vmul.f32 %v2856_v8, %v2856_v8  ;;  %v2990_v49 = vsel %vm586_vm1, %v2956_v61, 0.0  ;;  %v2170_v52 = vld [vmem:[%s3555_s10 + $0xc1] sm:$0xff] }
 0x2ce   : > { %v2039_v22 = vpop.permute.xlu1 %2038  ;;  %v2642_v23 = vld [vmem:[%s3555_s10 + $0x78] sm:$0x7f] }
 0x2cf   : > { %v2108_v42 = vadd.f32 %v2039_v22, %v1868_v4  ;;  %v2807_v24 = vadd.f32 %v2739_v6, %v2642_v23  ;;  %2613 = vst.msk [vmem:[%s3555_s10 + $0x80] sm:$0xff] %vm586_vm1, %v2583_v19  ;;  %v2887_v6 = vsel %vm586_vm1, %v2854_v48, 0.0  ;;  %v2987_v4 = vadd.f32 %v2986_v21, %v2985_v14  ;;  %v2863_v21 = vld [vmem:[%s3555_s10 + $0x58] sm:$0xff] }
 0x2d0   : > { %v2512_v35 = vpop.permute.xlu0 %2511  ;;  %v2406_v40 = vld [vmem:[%s3555_s10 + $0x98] sm:$0xff]  ;;  %v2888_v22 = vadd.f32 %v2887_v6, %v2886_v16 }
 0x2d1   : > { %2140 = vst.msk [vmem:[%s3555_s10 + $0xd0] sm:$0xff] %vm586_vm1, %v2108_v42  ;;  %v2584_v5 = vadd.f32 %v2512_v35, %v2404_v29  ;;  %v2858_v42 = vld [vmem:[%s3555_s10 + $0x30] sm:$0xff]  ;;  %v2989_v29 = vadd.f32 %v2988_v59, %v2987_v4  ;;  %v5020_v16 = vld [vmem:[#allocation2 + $0x198] sm:$0xff] }
 0x2d2   : > { %v2280_v55 = vpop.permute.xlu1 %2279  ;;  %2837 = vst.msk [vmem:[%s3555_s10 + $0x78] sm:$0x7f] %vm774_vm2, %v2807_v24 }
 0x2d3   : > { %v2348_v32 = vadd.f32 %v2280_v55, %v2167_v27  ;;  %2614 = vst.msk [vmem:[%s3555_s10 + $0x88] sm:$0xff] %vm586_vm1, %v2584_v5  ;;  %v2859_v27 = vld [vmem:[%s3555_s10 + $0x38] sm:$0xff]  ;;  %v2746_v5 = vsel %vm1134_vm3, %v2744_v20, %v2745_v33  ;;  %v2991_v46 = vadd.f32 %v2990_v49, %v2989_v29 }
 0x2d4   : > { %v2045_v39 = vpop.permute.xlu0 %2044  ;;  %v2407_v24 = vld [vmem:[%s3555_s10 + $0xa0] sm:$0xff] }
 0x2d5   : > { %2378 = vst.msk [vmem:[%s3555_s10 + $0xa9] sm:$0x7f] %vm774_vm2, %v2348_v32  ;;  %v2111_v43 = vadd.f32 %v2045_v39, %v1871_v38  ;;  %v2890_v32 = vadd.f32 %v2889_v10, %v2888_v22  ;;  %v2959_v38 = vmul.f32 %v2858_v42, %v2858_v42 }
 0x2d6   : > { %v2282_v60 = vpop.permute.xlu1 %2281  ;;  %v2643_v28 = vld [vmem:[%s3555_s10 + $0x80] sm:$0xff] }
 0x2d7   : > { %v2349_v30 = vadd.f32 %v2282_v60, %v2168_v36  ;;  %2143 = vst.msk [vmem:[%s3555_s10 + $0xe8] sm:$0x7f] %vm774_vm2, %v2111_v43  ;;  %v2808_v50 = vadd.f32 %v2743_v44, %v2643_v28  ;;  %v2992_v36 = vsel %vm586_vm1, %v2957_v41, 0.0  ;;  %v2893_v60 = vsel %vm586_vm1, %v2857_v18, 0.0  ;;  %v2860_v44 = vld [vmem:[%s3555_s10 + $0x40] sm:$0xff] }
 0x2d8   : > { %v2514_v53 = vpop.permute.xlu0 %2513  ;;  %v2892_v43 = vadd.f32 %v2891_v58, %v2890_v32  ;;  %v2960_v28 = vmul.f32 %v2859_v27, %v2859_v27  ;;  %v2993_v51 = vadd.f32 %v2992_v36, %v2991_v46  ;;  %v2996_v57 = vsel %vm586_vm1, %v2959_v38, 0.0  ;;  %v2173_v58 = vld [vmem:[%s3555_s10 + $0xd9] sm:$0x7f]  ;;  %v2865_v36 = vld [vmem:[%s3555_s10 + $0x68] sm:$0xff] }
 0x2d9   : > { %2379 = vst.msk [vmem:[%s3555_s10 + $0xb1] sm:$0xff] %vm586_vm1, %v2349_v30  ;;  %v2585_v26 = vadd.f32 %v2514_v53, %v2405_v54  ;;  %2838 = vst.msk [vmem:[%s3555_s10 + $0x80] sm:$0xff] %vm586_vm1, %v2808_v50  ;;  %v4993_v30 = vld [vmem:[#allocation2 + $0x178] sm:$0xff]  ;;  %v2994_v50 = vsel %vm586_vm1, %v2958_v25, 0.0  ;;  %v2961_v1 = vmul.f32 %v2860_v44, %v2860_v44  ;;  %v2899_v6 = vsel %vm586_vm1, %v2860_v44, 0.0 }
 0x2da   : > { %v2043_v37 = vpop.permute.xlu1 %2042  ;;  %v2644_v62 = vld [vmem:[%s3555_s10 + $0x88] sm:$0x7f]  ;;  %v2748_v45 = vrot.slane %v4993_v30, 1  ;;  %v2995_v61 = vadd.f32 %v2994_v50, %v2993_v51  ;;  %v2998_v8 = vsel %vm586_vm1, %v2960_v28, 0.0  ;;  %v2905_v30 = vsel %vm586_vm1, %v2863_v21, 0.0 }
 0x2db   : > { %v2110_v13 = vadd.f32 %v2043_v37, %v1870_v47  ;;  %v2809_v2 = vadd.f32 %v2742_v34, %v2644_v62  ;;  %2615 = vst.msk [vmem:[%s3555_s10 + $0x90] sm:$0xff] %vm586_vm1, %v2585_v26  ;;  %v2677_v34 = vld [vmem:[#allocation2 + $0x168] sm:$0xfe]  ;;  %v2895_v37 = vsel %vm586_vm1, %v2858_v42, 0.0  ;;  %v3000_v41 = vsel %vm586_vm1, %v2961_v1, 0.0 }
 0x2dc   : > { %v2516_v12 = vpop.permute.xlu0 %2515  ;;  %v2171_v47 = vld [vmem:[%s3555_s10 + $0xc9] sm:$0x7f]  ;;  %v2747_v53 = vrot.slane %v2677_v34, 1  ;;  %v2997_v20 = vadd.f32 %v2996_v57, %v2995_v61 }
 0x2dd   : > { %2142 = vst.msk [vmem:[%s3555_s10 + $0xe0] sm:$0xff] %vm586_vm1, %v2110_v13  ;;  %v2586_v15 = vadd.f32 %v2516_v12, %v2406_v40  ;;  %v2408_v56 = vld [vmem:[%s3555_s10 + $0xa8] sm:$0xff]  ;;  %v2894_v13 = vadd.f32 %v2893_v60, %v2892_v43 }
 0x2de   : > { %v2284_v11 = vpop.permute.xlu1 %2283  ;;  %2839 = vst.msk [vmem:[%s3555_s10 + $0x88] sm:$0x7f] %vm774_vm2, %v2809_v2  ;;  %v2861_v26 = vld [vmem:[%s3555_s10 + $0x48] sm:$0xff]  ;;  %v2897_v2 = vsel %vm586_vm1, %v2859_v27, 0.0  ;;  %v2749_v59 = vsel %vm1134_vm3, %v2747_v53, %v2748_v45 }
 0x2df   : > { %v2350_v0 = vadd.f32 %v2284_v11, %v2169_v9  ;;  %2616 = vst.msk [vmem:[%s3555_s10 + $0x98] sm:$0xff] %vm586_vm1, %v2586_v15  ;;  %v2896_v17 = vadd.f32 %v2895_v37, %v2894_v13  ;;  %v2862_v9 = vld [vmem:[%s3555_s10 + $0x50] sm:$0xff]  ;;  %v2901_v4 = vsel %vm586_vm1, %v2861_v26, 0.0  ;;  %v2679_v42 = vld [vmem:[#allocation2 + $0x188] sm:$0xfe] }
 0x2e0   : > { %v2518_v19 = vpop.permute.xlu0 %2517  ;;  %v2172_v11 = vld [vmem:[%s3555_s10 + $0xd1] sm:$0xff]  ;;  %v2963_v22 = vmul.f32 %v2862_v9, %v2862_v9  ;;  %v2903_v27 = vsel %vm586_vm1, %v2862_v9, 0.0  ;;  %v2750_v60 = vrot.slane %v2679_v42, 1  ;;  %v2681_v51 = vld [vmem:[#allocation2 + $0x1a8] sm:$0xfe] }
 0x2e1   : > { %2380 = vst.msk [vmem:[%s3555_s10 + $0xb9] sm:$0x7f] %vm774_vm2, %v2350_v0  ;;  %v2587_v35 = vadd.f32 %v2518_v19, %v2407_v24  ;;  %v2409_v14 = vld [vmem:[%s3555_s10 + $0xb0] sm:$0xff]  ;;  %v2962_v0 = vmul.f32 %v2861_v26, %v2861_v26  ;;  %v2864_v19 = vld [vmem:[%s3555_s10 + $0x60] sm:$0xff]  ;;  %v2751_v24 = vrot.slane %v5020_v16, 1  ;;  %v5063_v9 = vld [vmem:[#allocation2 + $0x1b8] sm:$0xff] }
 0x2e2   : > { %v2286_v23 = vpop.permute.xlu1 %2285  ;;  %v2645_v7 = vld [vmem:[%s3555_s10 + $0x90] sm:$0xff]  ;;  %v2965_v43 = vmul.f32 %v2864_v19, %v2864_v19  ;;  %v2907_v37 = vsel %vm586_vm1, %v2864_v19, 0.0  ;;  %v2754_v42 = vrot.slane %v5063_v9, 1 }
 0x2e3   : > { %v2351_v55 = vadd.f32 %v2286_v23, %v2170_v52  ;;  %v2810_v39 = vadd.f32 %v2746_v5, %v2645_v7  ;;  %2617 = vst.msk [vmem:[%s3555_s10 + $0xa0] sm:$0xff] %vm586_vm1, %v2587_v35  ;;  %v2999_v23 = vadd.f32 %v2998_v8, %v2997_v20  ;;  %v2964_v35 = vmul.f32 %v2863_v21, %v2863_v21 }
 0x2e4   : > { %v2520_v48 = vpop.permute.xlu0 %2519  ;;  %v2752_v57 = vsel %vm1134_vm3, %v2750_v60, %v2751_v24 }
 0x2e5   : > { %2381 = vst.msk [vmem:[%s3555_s10 + $0xc1] sm:$0xff] %vm586_vm1, %v2351_v55  ;;  %2840 = vst.msk [vmem:[%s3555_s10 + $0x90] sm:$0xff] %vm586_vm1, %v2810_v39  ;;  %v2588_v63 = vadd.f32 %v2520_v48, %v2408_v56  ;;  %v3002_v55 = vsel %vm586_vm1, %v2962_v0, 0.0  ;;  %v3001_v7 = vadd.f32 %v3000_v41, %v2999_v23  ;;  %v3004_v39 = vsel %vm586_vm1, %v2963_v22, 0.0  ;;  %v2174_v48 = vld [vmem:[%s3555_s10 + $0xe1] sm:$0xff] }
 0x2e6   : > { %v2288_v3 = vpop.permute.xlu1 %2287  ;;  %v2646_v62 = vld [vmem:[%s3555_s10 + $0x98] sm:$0x7f]  ;;  %v3006_v53 = vsel %vm586_vm1, %v2964_v35, 0.0 }
 0x2e7   : > { %v2352_v54 = vadd.f32 %v2288_v3, %v2171_v47  ;;  %v2811_v31 = vadd.f32 %v2745_v33, %v2646_v62  ;;  %2618 = vst.msk [vmem:[%s3555_s10 + $0xa8] sm:$0xff] %vm586_vm1, %v2588_v63  ;;  %v2898_v33 = vadd.f32 %v2897_v2, %v2896_v17  ;;  %v3003_v28 = vadd.f32 %v3002_v55, %v3001_v7  ;;  %v2866_v47 = vld [vmem:[%s3555_s10 + $0x70] sm:$0xff] }
 0x2e8   : > { %v2522_v40 = vpop.permute.xlu0 %2521  ;;  %v2410_v5 = vld [vmem:[%s3555_s10 + $0xb8] sm:$0xff]  ;;  %v2909_v17 = vsel %vm586_vm1, %v2865_v36, 0.0  ;;  %v2967_v61 = vmul.f32 %v2866_v47, %v2866_v47 }
 0x2e9   : > { %2382 = vst.msk [vmem:[%s3555_s10 + $0xc9] sm:$0x7f] %vm774_vm2, %v2352_v54  ;;  %2841 = vst.msk [vmem:[%s3555_s10 + $0x98] sm:$0x7f] %vm774_vm2, %v2811_v31  ;;  %v2589_v18 = vadd.f32 %v2522_v40, %v2409_v14  ;;  %v2900_v52 = vadd.f32 %v2899_v6, %v2898_v33  ;;  %v2966_v54 = vmul.f32 %v2865_v36, %v2865_v36  ;;  %v3008_v31 = vsel %vm586_vm1, %v2965_v43, 0.0  ;;  %v2868_v40 = vld [vmem:[%s3555_s10 + $0x80] sm:$0xff] }
 0x2ea   : > { %v2290_v12 = vpop.permute.xlu1 %2289  ;;  %v2647_v10 = vld [vmem:[%s3555_s10 + $0xa0] sm:$0xff]  ;;  %v3005_v62 = vadd.f32 %v3004_v39, %v3003_v28  ;;  %v2753_v14 = vrot.slane %v2681_v51, 1  ;;  %v2175_v6 = vld [vmem:[%s3555_s10 + $0xe9] sm:$0x7f]  ;;  %v3012_v23 = vsel %vm586_vm1, %v2967_v61, 0.0  ;;  %v2915_v36 = vsel %vm586_vm1, %v2868_v40, 0.0 }
 0x2eb   : > { %v2353_v15 = vadd.f32 %v2290_v12, %v2172_v11  ;;  %v2812_v49 = vadd.f32 %v2749_v59, %v2647_v10  ;;  %2619 = vst.msk [vmem:[%s3555_s10 + $0xb0] sm:$0xff] %vm586_vm1, %v2589_v18  ;;  %v2902_v34 = vadd.f32 %v2901_v4, %v2900_v52  ;;  %v2911_v18 = vsel %vm586_vm1, %v2866_v47, 0.0  ;;  %v5073_v59 = vld [vmem:[#allocation2 + $0x1d8] sm:$0xff] }
 0x2ec   : > { %v2524_v32 = vpop.permute.xlu0 %2523  ;;  %v2411_v26 = vld [vmem:[%s3555_s10 + $0xc0] sm:$0xff]  ;;  %v3007_v12 = vadd.f32 %v3006_v53, %v3005_v62  ;;  %v3010_v20 = vsel %vm586_vm1, %v2966_v54, 0.0 }
 0x2ed   : > { %2383 = vst.msk [vmem:[%s3555_s10 + $0xd1] sm:$0xff] %vm586_vm1, %v2353_v15  ;;  %2842 = vst.msk [vmem:[%s3555_s10 + $0xa0] sm:$0xff] %vm586_vm1, %v2812_v49  ;;  %v2590_v38 = vadd.f32 %v2524_v32, %v2410_v5  ;;  %v2904_v44 = vadd.f32 %v2903_v27, %v2902_v34  ;;  %v2683_v15 = vld [vmem:[#allocation2 + $0x1c8] sm:$0xfe]  ;;  %v2757_v5 = vrot.slane %v5073_v59, 1 }
 0x2ee   : > { %v2292_v25 = vpop.permute.xlu1 %2291  ;;  %v2648_v46 = vld [vmem:[%s3555_s10 + $0xa8] sm:$0x7f]  ;;  %v3009_v4 = vadd.f32 %v3008_v31, %v3007_v12  ;;  %v2756_v27 = vrot.slane %v2683_v15, 1 }
 0x2ef   : > { %v2354_v29 = vadd.f32 %v2292_v25, %v2173_v58  ;;  %v2813_v3 = vadd.f32 %v2748_v45, %v2648_v46  ;;  %2620 = vst.msk [vmem:[%s3555_s10 + $0xb8] sm:$0xff] %vm586_vm1, %v2590_v38  ;;  %v2906_v63 = vadd.f32 %v2905_v30, %v2904_v44  ;;  %v2867_v45 = vld [vmem:[%s3555_s10 + $0x78] sm:$0xff]  ;;  %v2869_v49 = vld [vmem:[%s3555_s10 + $0x88] sm:$0xff]  ;;  %v2969_v58 = vmul.f32 %v2868_v40, %v2868_v40 }
 0x2f0   : > { %v2526_v13 = vpop.permute.xlu0 %2525  ;;  %v2968_v33 = vmul.f32 %v2867_v45, %v2867_v45  ;;  %v2913_v19 = vsel %vm586_vm1, %v2867_v45, 0.0  ;;  %v3011_v35 = vadd.f32 %v3010_v20, %v3009_v4  ;;  %v2412_v7 = vld [vmem:[%s3555_s10 + $0xc8] sm:$0xff]  ;;  %v2970_v38 = vmul.f32 %v2869_v49, %v2869_v49  ;;  %v2871_v46 = vld [vmem:[%s3555_s10 + $0x98] sm:$0xff] }
 0x2f1   : > { %2384 = vst.msk [vmem:[%s3555_s10 + $0xd9] sm:$0x7f] %vm774_vm2, %v2354_v29  ;;  %2843 = vst.msk [vmem:[%s3555_s10 + $0xa8] sm:$0x7f] %vm774_vm2, %v2813_v3  ;;  %v2591_v1 = vadd.f32 %v2526_v13, %v2411_v26  ;;  %v2908_v11 = vadd.f32 %v2907_v37, %v2906_v63  ;;  %v2870_v29 = vld [vmem:[%s3555_s10 + $0x90] sm:$0xff]  ;;  %v3016_v28 = vsel %vm586_vm1, %v2969_v58, 0.0  ;;  %v2758_v13 = vsel %vm1134_vm3, %v2756_v27, %v2757_v5 }
 0x2f2   : > { %v2294_v50 = vpop.permute.xlu1 %2293  ;;  %v2649_v2 = vld [vmem:[%s3555_s10 + $0xb0] sm:$0xff]  ;;  %v3014_v60 = vsel %vm586_vm1, %v2968_v33, 0.0  ;;  %v3013_v43 = vadd.f32 %v3012_v23, %v3011_v35  ;;  %v2917_v47 = vsel %vm586_vm1, %v2869_v49, 0.0  ;;  %v2971_v3 = vmul.f32 %v2870_v29, %v2870_v29  ;;  %v5108_v26 = vld [vmem:[#allocation2 + $0x1f8] sm:$0xff] }
 0x2f3   : > { %v2355_v56 = vadd.f32 %v2294_v50, %v2174_v48  ;;  %v2814_v8 = vadd.f32 %v2752_v57, %v2649_v2  ;;  %2621 = vst.msk [vmem:[%s3555_s10 + $0xc0] sm:$0xff] %vm586_vm1, %v2591_v1  ;;  %v2910_v22 = vadd.f32 %v2909_v17, %v2908_v11  ;;  %v2685_v50 = vld [vmem:[#allocation2 + $0x1e8] sm:$0xfe]  ;;  %v2919_v45 = vsel %vm586_vm1, %v2870_v29, 0.0  ;;  %v1872_v17 = vld [vmem:[%s3555_s10 + $0xf0] sm:$0xff] }
 0x2f4   : > { %v2530_v10 = vpop.permute.xlu0 %2529  ;;  %v2413_v41 = vld [vmem:[%s3555_s10 + $0xd0] sm:$0xff]  ;;  %v3015_v54 = vadd.f32 %v3014_v60, %v3013_v43  ;;  %v3018_v57 = vsel %vm586_vm1, %v2970_v38, 0.0  ;;  %v2972_v2 = vmul.f32 %v2871_v46, %v2871_v46  ;;  %v2759_v12 = vrot.slane %v2685_v50, 1 }
 0x2f5   : > { %2385 = vst.msk [vmem:[%s3555_s10 + $0xe1] sm:$0xff] %vm586_vm1, %v2355_v56  ;;  %2844 = vst.msk [vmem:[%s3555_s10 + $0xb0] sm:$0xff] %vm586_vm1, %v2814_v8  ;;  %v2593_v52 = vadd.f32 %v2530_v10, %v2413_v41  ;;  %v2912_v55 = vadd.f32 %v2911_v18, %v2910_v22  ;;  %v2872_v56 = vld [vmem:[%s3555_s10 + $0xa0] sm:$0xff]  ;;  %v2760_v18 = vrot.slane %v5108_v26, 1 }
 0x2f6   : > { %v2296_v0 = vpop.permute.xlu1 %2295  ;;  %v2650_v25 = vld [vmem:[%s3555_s10 + $0xb8] sm:$0x7f]  ;;  %v3017_v8 = vadd.f32 %v3016_v28, %v3015_v54  ;;  %v2923_v49 = vsel %vm586_vm1, %v2872_v56, 0.0 }
 0x2f7   : > { %v2356_v21 = vadd.f32 %v2296_v0, %v2175_v6  ;;  %v2815_v32 = vadd.f32 %v2751_v24, %v2650_v25  ;;  %2623 = vst.msk [vmem:[%s3555_s10 + $0xd0] sm:$0xff] %vm586_vm1, %v2593_v52  ;;  %v2914_v16 = vadd.f32 %v2913_v19, %v2912_v55  ;;  %v2755_v24 = vsel %vm1134_vm3, %v2753_v14, %v2754_v42 }
 0x2f8   : > { %v2534_v30 = vpop.permute.xlu0 %2533  ;;  %v2414_v62 = vld [vmem:[%s3555_s10 + $0xd8] sm:$0xff]  ;;  %v2873_v1 = vld [vmem:[%s3555_s10 + $0xa8] sm:$0xff]  ;;  %v3020_v14 = vsel %vm586_vm1, %v2971_v3, 0.0  ;;  %v2921_v6 = vsel %vm586_vm1, %v2871_v46, 0.0  ;;  %v2973_v0 = vmul.f32 %v2872_v56, %v2872_v56  ;;  %v3019_v33 = vadd.f32 %v3018_v57, %v3017_v8 }
 0x2f9   : > { %2386 = vst.msk [vmem:[%s3555_s10 + $0xe9] sm:$0x7f] %vm774_vm2, %v2356_v21  ;;  %2845 = vst.msk [vmem:[%s3555_s10 + $0xb8] sm:$0x7f] %vm774_vm2, %v2815_v32  ;;  %v2916_v53 = vadd.f32 %v2915_v36, %v2914_v16  ;;  %v2974_v10 = vmul.f32 %v2873_v1, %v2873_v1  ;;  %v3022_v52 = vsel %vm586_vm1, %v2972_v2, 0.0  ;;  %v2925_v35 = vsel %vm586_vm1, %v2873_v1, 0.0 }
 0x2fa   : > { %v2528_v34 = vpop.permute.xlu1 %2527  ;;  %v2651_v48 = vld [vmem:[%s3555_s10 + $0xc0] sm:$0xff]  ;;  %v3021_v19 = vadd.f32 %v3020_v14, %v3019_v33  ;;  %v3024_v55 = vsel %vm586_vm1, %v2973_v0, 0.0  ;;  %v2761_v60 = vsel %vm1134_vm3, %v2759_v12, %v2760_v18 }
 0x2fb   : > { %v2592_v39 = vadd.f32 %v2528_v34, %v2412_v7  ;;  %v2816_v51 = vadd.f32 %v2755_v24, %v2651_v48  ;;  %v2918_v11 = vadd.f32 %v2917_v47, %v2916_v53  ;;  %v3026_v36 = vsel %vm586_vm1, %v2974_v10, 0.0 }
 0x2fc   : > { %v2415_v44 = vld [vmem:[%s3555_s10 + $0xe0] sm:$0xff]  ;;  %v2047_v61 = vpop.permute.xlu0 %2046  ;;  %v2874_v21 = vld [vmem:[%s3555_s10 + $0xb0] sm:$0xff]  ;;  %v3023_v34 = vadd.f32 %v3022_v52, %v3021_v19 }
 0x2fd   : > { %2622 = vst.msk [vmem:[%s3555_s10 + $0xc8] sm:$0xff] %vm586_vm1, %v2592_v39  ;;  %v2595_v37 = vadd.f32 %v2534_v30, %v2415_v44  ;;  %2846 = vst.msk [vmem:[%s3555_s10 + $0xc0] sm:$0xff] %vm586_vm1, %v2816_v51  ;;  %v2112_v40 = vadd.f32 %v2047_v61, %v1872_v17  ;;  %v2920_v20 = vadd.f32 %v2919_v45, %v2918_v11  ;;  %v1873_v39 = vld [vmem:[%s3555_s10 + $0xf8] sm:$0x7f]  ;;  %v2927_v43 = vsel %vm586_vm1, %v2874_v21, 0.0 }
 0x2fe   : > { %v2532_v63 = vpop.permute.xlu1 %2531  ;;  %v2653_v15 = vld [vmem:[%s3555_s10 + $0xd0] sm:$0xff]  ;;  %v2975_v29 = vmul.f32 %v2874_v21, %v2874_v21  ;;  %v3025_v24 = vadd.f32 %v3024_v55, %v3023_v34 }
 0x2ff   : > { %2625 = vst.msk [vmem:[%s3555_s10 + $0xe0] sm:$0xff] %vm586_vm1, %v2595_v37  ;;  %v2594_v31 = vadd.f32 %v2532_v63, %v2414_v62  ;;  %v2818_v41 = vadd.f32 %v2758_v13, %v2653_v15  ;;  %2144 = vst.msk [vmem:[%s3555_s10 + $0xf0] sm:$0xff] %vm586_vm1, %v2112_v40  ;;  %v2922_v58 = vadd.f32 %v2921_v6, %v2920_v20 }
 0x300   : > { %v2416_v4 = vld [vmem:[%s3555_s10 + $0xe8] sm:$0xff]  ;;  %v2875_v25 = vld [vmem:[%s3555_s10 + $0xb8] sm:$0xff]  ;;  %v3028_v47 = vsel %vm586_vm1, %v2975_v29, 0.0  ;;  %v3027_v53 = vadd.f32 %v3026_v36, %v3025_v24 }
 0x301   : > { %2624 = vst.msk [vmem:[%s3555_s10 + $0xd8] sm:$0xff] %vm586_vm1, %v2594_v31  ;;  %2848 = vst.msk [vmem:[%s3555_s10 + $0xd0] sm:$0xff] %vm586_vm1, %v2818_v41  ;;  %v2924_v7 = vadd.f32 %v2923_v49, %v2922_v58  ;;  %v2976_v46 = vmul.f32 %v2875_v25, %v2875_v25  ;;  %v2929_v3 = vsel %vm586_vm1, %v2875_v25, 0.0 }
 0x302   : > { %v2536_v22 = vpop.permute.xlu1 %2535  ;;  %v3029_v51 = vadd.f32 %v3028_v47, %v3027_v53 }
 0x303   : > { %v2596_v23 = vadd.f32 %v2536_v22, %v2416_v4  ;;  %v2926_v44 = vadd.f32 %v2925_v35, %v2924_v7  ;;  %v3030_v56 = vsel %vm586_vm1, %v2976_v46, 0.0 }
 0x304   : > { %v2652_v27 = vld [vmem:[%s3555_s10 + $0xc8] sm:$0x7f]  ;;  %v2876_v16 = vld [vmem:[%s3555_s10 + $0xc0] sm:$0xff]  ;;  %v3031_v45 = vadd.f32 %v3030_v56, %v3029_v51 }
 0x305   : > { %v2817_v32 = vadd.f32 %v2754_v42, %v2652_v27  ;;  %2626 = vst.msk [vmem:[%s3555_s10 + $0xe8] sm:$0xff] %vm586_vm1, %v2596_v23  ;;  %v2977_v48 = vmul.f32 %v2876_v16, %v2876_v16  ;;  %v2928_v37 = vadd.f32 %v2927_v43, %v2926_v44  ;;  %v2931_v54 = vsel %vm586_vm1, %v2876_v16, 0.0 }
 0x306   : > { %v2655_v38 = vld [vmem:[%s3555_s10 + $0xe0] sm:$0xff]  ;;  %v2049_v30 = vpop.permute.xlu1 %2048  ;;  %v2882_v33 = vld [vmem:[%s3555_s10 + $0xf0] sm:$0xff] }
 0x307   : > { %2847 = vst.msk [vmem:[%s3555_s10 + $0xc8] sm:$0x7f] %vm774_vm2, %v2817_v32  ;;  %v2820_v9 = vadd.f32 %v2761_v60, %v2655_v38  ;;  %v2113_v42 = vadd.f32 %v2049_v30, %v1873_v39  ;;  %v2930_v13 = vadd.f32 %v2929_v3, %v2928_v37  ;;  %v3032_v59 = vsel %vm586_vm1, %v2977_v48, 0.0 }
 0x308   : > { %v2654_v28 = vld [vmem:[%s3555_s10 + $0xd8] sm:$0x7f]  ;;  %v2878_v26 = vld [vmem:[%s3555_s10 + $0xd0] sm:$0xff]  ;;  %v3033_v17 = vadd.f32 %v3032_v59, %v3031_v45  ;;  %v2983_v58 = vmul.f32 %v2882_v33, %v2882_v33  ;;  %v2943_v29 = vsel %vm586_vm1, %v2882_v33, 0.0 }
 0x309   : > { %2850 = vst.msk [vmem:[%s3555_s10 + $0xe0] sm:$0xff] %vm586_vm1, %v2820_v9  ;;  %v2819_v50 = vadd.f32 %v2757_v5, %v2654_v28  ;;  %v2932_v63 = vadd.f32 %v2931_v54, %v2930_v13  ;;  %v2979_v2 = vmul.f32 %v2878_v26, %v2878_v26  ;;  %v2935_v11 = vsel %vm586_vm1, %v2878_v26, 0.0 }
 0x30a   : > { %2145 = vst.msk [vmem:[%s3555_s10 + $0xf8] sm:$0x7f] %vm774_vm2, %v2113_v42  ;;  %v3044_v60 = vsel %vm586_vm1, %v2983_v58, 0.0 }
 0x30b   : > { %2849 = vst.msk [vmem:[%s3555_s10 + $0xd8] sm:$0x7f] %vm774_vm2, %v2819_v50  ;;  %v3036_v0 = vsel %vm586_vm1, %v2979_v2, 0.0 }
 0x30c   : > { %v2656_v62 = vld [vmem:[%s3555_s10 + $0xe8] sm:$0x7f] }
 0x30d   : > { %v2821_v5 = vadd.f32 %v2760_v18, %v2656_v62 }
 0x30e   : > { %v2877_v57 = vld [vmem:[%s3555_s10 + $0xc8] sm:$0xff] }
 0x30f   : > { %v2933_v1 = vsel %vm586_vm1, %v2877_v57, 0.0  ;;  %v2978_v31 = vmul.f32 %v2877_v57, %v2877_v57  ;;  %2851 = vst.msk [vmem:[%s3555_s10 + $0xe8] sm:$0x7f] %vm774_vm2, %v2821_v5 }
 0x310   : > { %v2880_v61 = vld [vmem:[%s3555_s10 + $0xe0] sm:$0xff]  ;;  %v2934_v8 = vadd.f32 %v2933_v1, %v2932_v63 }
 0x311   : > { %v3034_v12 = vsel %vm586_vm1, %v2978_v31, 0.0  ;;  %v2981_v15 = vmul.f32 %v2880_v61, %v2880_v61  ;;  %v2939_v41 = vsel %vm586_vm1, %v2880_v61, 0.0  ;;  %v2883_v49 = vld [vmem:[%s3555_s10 + $0xf8] sm:$0xff] }
 0x312   : > { %v2879_v40 = vld [vmem:[%s3555_s10 + $0xd8] sm:$0xff]  ;;  %v2936_v14 = vadd.f32 %v2935_v11, %v2934_v8  ;;  %v3035_v6 = vadd.f32 %v3034_v12, %v3033_v17  ;;  %v2984_v7 = vmul.f32 %v2883_v49, %v2883_v49  ;;  %v2945_v38 = vsel %vm586_vm1, %v2883_v49, 0.0 }
 0x313   : > { %v2937_v18 = vsel %vm586_vm1, %v2879_v40, 0.0  ;;  %v2980_v20 = vmul.f32 %v2879_v40, %v2879_v40  ;;  %v3040_v19 = vsel %vm586_vm1, %v2981_v15, 0.0 }
 0x314   : > { %v2938_v21 = vadd.f32 %v2937_v18, %v2936_v14  ;;  %v3037_v10 = vadd.f32 %v3036_v0, %v3035_v6  ;;  %v3046_v43 = vsel %vm586_vm1, %v2984_v7, 0.0 }
 0x315   : > { %v3038_v4 = vsel %vm586_vm1, %v2980_v20, 0.0 }
 0x316   : > { %v2881_v22 = vld [vmem:[%s3555_s10 + $0xe8] sm:$0xff]  ;;  %v2940_v52 = vadd.f32 %v2939_v41, %v2938_v21  ;;  %v3039_v23 = vadd.f32 %v3038_v4, %v3037_v10 }
 0x317   : > { %v2941_v25 = vsel %vm586_vm1, %v2881_v22, 0.0  ;;  %v2982_v27 = vmul.f32 %v2881_v22, %v2881_v22 }
 0x318   : > { %v2942_v55 = vadd.f32 %v2941_v25, %v2940_v52  ;;  %v3041_v35 = vadd.f32 %v3040_v19, %v3039_v23 }
 0x319   : > { %v3042_v32 = vsel %vm586_vm1, %v2982_v27, 0.0 }
 0x31a   : > { %v2944_v34 = vadd.f32 %v2943_v29, %v2942_v55  ;;  %v3043_v36 = vadd.f32 %v3042_v32, %v3041_v35 }
 0x31c   : > { %v2946_v39 = vadd.f32 %v2945_v38, %v2944_v34  ;;  %v3045_v30 = vadd.f32 %v3044_v60, %v3043_v36 }
 0x31e   : > { %v2947_v16 = vrot.slane %v2946_v39, 4  ;;  %v3047_v46 = vadd.f32 %v3046_v43, %v3045_v30 }
 0x320   : > { %v2948_v9 = vadd.f32 %v2947_v16, %v2946_v39  ;;  %v3048_v42 = vrot.slane %v3047_v46, 4 }
 0x322   : > { %v2949_v24 = vrot.slane %v2948_v9, 2  ;;  %v3049_v44 = vadd.f32 %v3048_v42, %v3047_v46 }
 0x324   : > { %v2950_v28 = vadd.f32 %v2949_v24, %v2948_v9  ;;  %v3050_v47 = vrot.slane %v3049_v44, 2 }
 0x326   : > { %v2951_v3 = vrot.slane %v2950_v28, 1  ;;  %v3051_v48 = vadd.f32 %v3050_v47, %v3049_v44 }
 0x328   : > { %v3052_v50 = vrot.slane %v3051_v48, 1  ;;  %v2952_v37 = vadd.f32 %v2951_v3, %v2950_v28 }
 0x32a   : > { %v3053_v53 = vadd.f32 %v3052_v50, %v3051_v48 }
 0x32c   : > { %v3055_v54 = vsel %vm3054_vm4, %v2952_v37, %v3053_v53 }
 0x32d   : > { %3057 = vst.msk [vmem:[%s181_s23] sm:$0x3] %vm3056_vm5, %v3055_v54 }
 0x32e PF: > { %s14_s12 = sadd.s32 1, %s3442_s12  }
 0x32f   : > { %p11_p4 = scmp.ge.s32.totalorder %s14_s12, 4  }
 0x331   :  { %13 = sbr.rel (!%p11_p4) target bundleno = 1 (0x1), region = 72 }

</bundles_post_ra>
